<compile_context>
chip_gen: v5e
topology: v5e:2x2
jax: 0.10.0
libtpu: 0.0.40
codegen_flags: <defaults>
</compile_context>

<pallas_src>
import math
import functools

import numpy as np
import jax
import jax.numpy as jnp
from jax import lax
from jax.experimental import pallas as pl
from jax.experimental.pallas import tpu as pltpu


def _pos_embed_sine_kernel(not_mask_ref, cum_l_ref, cum_u_ref, const_ref, out_ref,
                           *, num_pos_feats, normalize, scale):
    """One batch element per grid step."""
    nm = not_mask_ref[0]                                   # (H, W) float32
    F = num_pos_feats
    F2 = 2 * F

    # cumsum along H: y_embed = L @ nm ; cumsum along W: x_embed = nm @ U
    y_embed = jnp.dot(cum_l_ref[...], nm, preferred_element_type=jnp.float32)
    x_embed = jnp.dot(nm, cum_u_ref[...], preferred_element_type=jnp.float32)

    if normalize:
        eps = 1e-6
        # Only (W + H) exact divisions; scale folded into the factor.
        y_embed = y_embed * (scale / (y_embed[-1:, :] + eps))
        x_embed = x_embed * (scale / (x_embed[:, -1:] + eps))

    inv_dim_t = const_ref[0:1, :].reshape(1, 1, F2)        # (1, 1, 2F)
    phase = const_ref[1:2, :].reshape(1, 1, F2)            # (1, 1, 2F)

    # Channels [0, F) carry pos_y, channels [F, 2F) carry pos_x (lane-dense 2F=128).
    c = lax.broadcasted_iota(jnp.int32, (1, 1, F2), 2)
    embed = jnp.where(c < F, y_embed[:, :, None], x_embed[:, :, None])   # (H, W, 2F)

    # Interleaved sin/cos via a single sin: cos(a) == sin(a + pi/2). Matches the
    # PyTorch stack/flatten interleave because dim_t[2p] == dim_t[2p+1].
    out_ref[0] = jnp.sin(embed * inv_dim_t + phase)        # (H, W, 2F) full-tile store


def position_embedding_sine(x, mask=None, *, num_pos_feats=64, temperature=10000,
                            normalize=False, scale=None):
    """JAX/Pallas equivalent of PositionEmbeddingSine.forward.

    x    : (B, H, W, C)  (only the leading-dim shapes are used)
    mask : optional (B, H, W) bool padding mask
    returns (B, H*W, 2*num_pos_feats) float32
    """
    if scale is not None and normalize is False:
        raise ValueError("normalize should be True if scale is passed")
    if scale is None:
        scale = 2 * math.pi
    if num_pos_feats % 2 != 0:
        raise ValueError("num_pos_feats must be even (same constraint as PyTorch interleave)")

    B, H, W = x.shape[:-1]
    if mask is None:
        mask = jnp.zeros((B, H, W), dtype=bool)
    not_mask = (~mask).astype(jnp.float32)

    F = num_pos_feats
    F2 = 2 * F

    # Host-precomputed, loop-invariant constants.
    k = np.arange(F, dtype=np.float64)
    dim_t = np.asarray(float(temperature), dtype=np.float64) ** (2.0 * np.floor(k / 2.0) / F)
    inv_dim_t = (1.0 / dim_t).astype(np.float32)
    phase = ((k % 2) * (np.pi / 2.0)).astype(np.float32)
    consts = jnp.asarray(np.stack([np.concatenate([inv_dim_t, inv_dim_t]),
                                   np.concatenate([phase, phase])]))       # (2, 2F)

    # Triangular matrices for the cumulative sums (MXU matmuls).
    cum_l = jnp.asarray(np.tril(np.ones((H, H), dtype=np.float32)))   # L @ nm  = cumsum over H
    cum_u = jnp.asarray(np.triu(np.ones((W, W), dtype=np.float32)))   # nm @ U  = cumsum over W

    kern = functools.partial(
        _pos_embed_sine_kernel,
        num_pos_feats=F,
        normalize=bool(normalize),
        scale=float(scale),
    )

    pos4 = pl.pallas_call(
        kern,
        out_shape=jax.ShapeDtypeStruct((B, H, W, F2), jnp.float32),
        grid_spec=pltpu.PrefetchScalarGridSpec(
            num_scalar_prefetch=0,
            grid=(B,),
            in_specs=[
                pl.BlockSpec((1, H, W), lambda b: (b, 0, 0)),
                pl.BlockSpec((H, H), lambda b: (0, 0)),      # resident across grid
                pl.BlockSpec((W, W), lambda b: (0, 0)),      # resident across grid
                pl.BlockSpec((2, F2), lambda b: (0, 0)),     # resident across grid
            ],
            out_specs=pl.BlockSpec((1, H, W, F2), lambda b: (b, 0, 0, 0)),
        ),
        compiler_params=pltpu.CompilerParams(dimension_semantics=("parallel",)),
    )(not_mask, cum_l, cum_u, consts)

    return pos4.reshape(B, H * W, F2)


def _reference(x, mask=None, num_pos_feats=64, temperature=10000,
               normalize=False, scale=None):
    """Pure-JAX transcription of the PyTorch forward (for verification)."""
    if scale is None:
        scale = 2 * math.pi
    B, H, W = x.shape[:-1]
    if mask is None:
        mask = jnp.zeros((B, H, W), dtype=bool)
    not_mask = (~mask).astype(jnp.float32)
    y_embed = jnp.cumsum(not_mask, axis=1)
    x_embed = jnp.cumsum(not_mask, axis=2)
    if normalize:
        eps = 1e-6
        y_embed = y_embed / (y_embed[:, -1:, :] + eps) * scale
        x_embed = x_embed / (x_embed[:, :, -1:] + eps) * scale
    dim_t = jnp.arange(num_pos_feats, dtype=jnp.float32)
    dim_t = temperature ** (2 * jnp.floor(dim_t / 2) / num_pos_feats)
    pos_x = x_embed[..., None] / dim_t
    pos_y = y_embed[..., None] / dim_t
    pos_x = jnp.stack((jnp.sin(pos_x[..., 0::2]), jnp.cos(pos_x[..., 1::2])),
                      axis=4).reshape(B, H, W, -1)
    pos_y = jnp.stack((jnp.sin(pos_y[..., 0::2]), jnp.cos(pos_y[..., 1::2])),
                      axis=4).reshape(B, H, W, -1)
    pos = jnp.concatenate((pos_y, pos_x), axis=3)
    return pos.reshape(B, H * W, -1)


if __name__ == "__main__":
    key = jax.random.PRNGKey(0)
    B, H, W, C = 2, 16, 16, 4
    F = 64

    x = jax.random.normal(key, (B, H, W, C), dtype=jnp.float32)

    # Case 1: default (mask=None, normalize=False)
    out1 = position_embedding_sine(x, num_pos_feats=F)
    out1 = jax.block_until_ready(out1)
    ref1 = _reference(x, num_pos_feats=F)
    assert out1.shape == (B, H * W, 2 * F)
    assert jnp.allclose(out1, ref1, rtol=1e-5, atol=1e-4), "mismatch (default case)"

    # Case 2: explicit padding mask + normalize=True
    col = jnp.arange(W)[None, None, :] >= jnp.array([W, W - 3])[:, None, None]
    row = jnp.arange(H)[None, :, None] >= jnp.array([H, H - 2])[:, None, None]
    mask = col | row                                    # (B, H, W) bool padding mask
    out2 = position_embedding_sine(x, mask, num_pos_feats=F, normalize=True)
    out2 = jax.block_until_ready(out2)
    ref2 = _reference(x, mask, num_pos_feats=F, normalize=True)
    assert jnp.allclose(out2, ref2, rtol=1e-5, atol=1e-4), "mismatch (masked/normalized)"

    print("KERNEL_OK")
</pallas_src>

<mosaic_0001>
module attributes {stable_mosaic.version = 11 : i64} {
  func.func @_pos_embed_sine_kernel(%arg0: i32, %arg1: memref<1x16x16xf32, #tpu.memory_space<vmem>>, %arg2: memref<16x16xf32, #tpu.memory_space<vmem>>, %arg3: memref<16x16xf32, #tpu.memory_space<vmem>>, %arg4: memref<2x128xf32, #tpu.memory_space<vmem>>, %arg5: memref<1x16x16x128xf32, #tpu.memory_space<vmem>>) attributes {dimension_semantics = [#tpu.dimension_semantics<parallel>], iteration_bounds = array<i64: 2>, scalar_prefetch = 0 : i64, scratch_operands = 0 : i64, tpu.core_type = #tpu.core_type<tc>, window_params = [{transform_indices = @transform_0, window_bounds = array<i64: 1, 16, 16>}, {pipeline_mode = #tpu.pipeline_mode<synchronous>, transform_indices = @transform_1, window_bounds = array<i64: 16, 16>}, {pipeline_mode = #tpu.pipeline_mode<synchronous>, transform_indices = @transform_2, window_bounds = array<i64: 16, 16>}, {pipeline_mode = #tpu.pipeline_mode<synchronous>, transform_indices = @transform_3, window_bounds = array<i64: 2, 128>}, {transform_indices = @transform_4, window_bounds = array<i64: 1, 16, 16, 128>}]} {
    %c0 = arith.constant 0 : index
    %c0_0 = arith.constant 0 : index
    %c0_1 = arith.constant 0 : index
    %0 = vector.load %arg1[%c0, %c0_0, %c0_1] : memref<1x16x16xf32, #tpu.memory_space<vmem>>, vector<1x16x16xf32>
    %1 = vector.shape_cast %0 : vector<1x16x16xf32> to vector<16x16xf32>
    %c0_2 = arith.constant 0 : index
    %c0_3 = arith.constant 0 : index
    %2 = vector.load %arg2[%c0_2, %c0_3] : memref<16x16xf32, #tpu.memory_space<vmem>>, vector<16x16xf32>
    %cst = arith.constant dense<0.000000e+00> : vector<16x16xf32>
    %3 = tpu.matmul %2, %1, %cst {dimension_numbers = #tpu.dot_dimension_numbers<[1], [0], [0], [1], [0, 0, 1, 1], [], []>} : vector<16x16xf32>, vector<16x16xf32>, vector<16x16xf32> -> vector<16x16xf32>
    %c0_4 = arith.constant 0 : index
    %c0_5 = arith.constant 0 : index
    %4 = vector.load %arg3[%c0_4, %c0_5] : memref<16x16xf32, #tpu.memory_space<vmem>>, vector<16x16xf32>
    %cst_6 = arith.constant dense<0.000000e+00> : vector<16x16xf32>
    %5 = tpu.matmul %1, %4, %cst_6 {dimension_numbers = #tpu.dot_dimension_numbers<[1], [0], [0], [1], [0, 0, 1, 1], [], []>} : vector<16x16xf32>, vector<16x16xf32>, vector<16x16xf32> -> vector<16x16xf32>
    %c0_7 = arith.constant 0 : index
    %c0_8 = arith.constant 0 : index
    %6 = vector.load %arg4[%c0_7, %c0_8] : memref<2x128xf32, #tpu.memory_space<vmem>>, vector<1x128xf32>
    %7 = vector.shape_cast %6 : vector<1x128xf32> to vector<1x1x128xf32>
    %c1 = arith.constant 1 : index
    %c0_9 = arith.constant 0 : index
    %8 = vector.load %arg4[%c1, %c0_9] : memref<2x128xf32, #tpu.memory_space<vmem>>, vector<1x128xf32>
    %9 = vector.shape_cast %8 : vector<1x128xf32> to vector<1x1x128xf32>
    %10 = tpu.iota {dimensions = array<i32: 2>} : vector<1x1x128xi32>
    %c64_i32 = arith.constant 64 : i32
    %11 = vector.broadcast %c64_i32 : i32 to vector<1x1x128xi32>
    %12 = arith.cmpi slt, %10, %11 : vector<1x1x128xi32>
    %13 = vector.shape_cast %3 : vector<16x16xf32> to vector<16x16x1xf32>
    %14 = vector.shape_cast %5 : vector<16x16xf32> to vector<16x16x1xf32>
    %15 = vector.shape_cast %12 : vector<1x1x128xi1> to vector<1x1x128xi1>
    %16 = vector.broadcast %15 : vector<1x1x128xi1> to vector<16x16x128xi1>
    %17 = vector.shape_cast %13 : vector<16x16x1xf32> to vector<16x16x1xf32>
    %18 = vector.broadcast %17 : vector<16x16x1xf32> to vector<16x16x128xf32>
    %19 = vector.shape_cast %14 : vector<16x16x1xf32> to vector<16x16x1xf32>
    %20 = vector.broadcast %19 : vector<16x16x1xf32> to vector<16x16x128xf32>
    %21 = arith.select %16, %18, %20 : vector<16x16x128xi1>, vector<16x16x128xf32>
    %22 = vector.broadcast %7 : vector<1x1x128xf32> to vector<16x16x128xf32>
    %23 = arith.mulf %21, %22 : vector<16x16x128xf32>
    %24 = vector.broadcast %9 : vector<1x1x128xf32> to vector<16x16x128xf32>
    %25 = arith.addf %23, %24 : vector<16x16x128xf32>
    %26 = math.sin %25 : vector<16x16x128xf32>
    %c0_10 = arith.constant 0 : index
    %c0_11 = arith.constant 0 : index
    %c0_12 = arith.constant 0 : index
    %c0_13 = arith.constant 0 : index
    %27 = vector.load %arg5[%c0_10, %c0_11, %c0_12, %c0_13] : memref<1x16x16x128xf32, #tpu.memory_space<vmem>>, vector<1x16x16x128xf32>
    %28 = vector.shape_cast %27 : vector<1x16x16x128xf32> to vector<16x16x128xf32>
    %29 = vector.shape_cast %26 : vector<16x16x128xf32> to vector<1x16x16x128xf32>
    tpu.vector_store %arg5[%c0_10, %c0_11, %c0_12, %c0_13], %29 {strides = array<i32>} : memref<1x16x16x128xf32, #tpu.memory_space<vmem>>, vector<1x16x16x128xf32>,
    return
  }
  func.func @transform_0(%arg0: i32) -> (i32, i32, i32) {
    %c0_i32 = arith.constant 0 : i32
    %c0_i32_0 = arith.constant 0 : i32
    %c0_i32_1 = arith.constant 0 : i32
    return %arg0, %c0_i32, %c0_i32_0 : i32, i32, i32
  }
  func.func @transform_1(%arg0: i32) -> (i32, i32) {
    %c0_i32 = arith.constant 0 : i32
    %c0_i32_0 = arith.constant 0 : i32
    %c0_i32_1 = arith.constant 0 : i32
    return %c0_i32, %c0_i32_0 : i32, i32
  }
  func.func @transform_2(%arg0: i32) -> (i32, i32) {
    %c0_i32 = arith.constant 0 : i32
    %c0_i32_0 = arith.constant 0 : i32
    %c0_i32_1 = arith.constant 0 : i32
    return %c0_i32, %c0_i32_0 : i32, i32
  }
  func.func @transform_3(%arg0: i32) -> (i32, i32) {
    %c0_i32 = arith.constant 0 : i32
    %c0_i32_0 = arith.constant 0 : i32
    %c0_i32_1 = arith.constant 0 : i32
    return %c0_i32, %c0_i32_0 : i32, i32
  }
  func.func @transform_4(%arg0: i32) -> (i32, i32, i32, i32) {
    %c0_i32 = arith.constant 0 : i32
    %c0_i32_0 = arith.constant 0 : i32
    %c0_i32_1 = arith.constant 0 : i32
    %c0_i32_2 = arith.constant 0 : i32
    return %arg0, %c0_i32, %c0_i32_0, %c0_i32_1 : i32, i32, i32, i32
  }
}

</mosaic_0001>

<bundles_post_ra>
// kernel: tpu_custom_call.1
= control target key start
LH: loop header
LB: loop body
LE: loop exit
PB: predicated region body
PF: predicated region fallthrough
CT: control target
= control target key end

     0   :  { %9 = vsyncpa [#allocation3], 0  ;;  %s10361_s0 = inlined_call_operand.hbm [shape: f32[2,16,16], index: 0, kind: input, shape index: {}]   ;;  %s10362_s1 = inlined_call_operand.hbm [shape: f32[16,16], index: 1, kind: input, shape index: {}]   ;;  %s10363_s2 = inlined_call_operand.hbm [shape: f32[16,16], index: 2, kind: input, shape index: {}]   ;;  %s10364_s3 = inlined_call_operand.vmem [shape: f32[2,128], index: 3, kind: input, shape index: {}]   ;;  %s10365_s4 = inlined_call_operand.hbm [shape: f32[2,16,16,128], index: 4, kind: output, shape index: {}]  }
   0x1   :  { %11 = vsyncpa [#allocation3 + $0x1], 0 }
   0x2   :  { %12 = vsyncpa [#allocation6], 0 }
   0x3   :  { %13 = vsyncpa [#allocation4], 0 }
   0x4   :  { %15 = vsyncpa [#allocation4 + $0x1], 0  ;;  %s6388_s15 = smov 0   ;;  %s6390_s16 = smov 0  }
   0x5   :  { %s6392_s17 = smov 0   ;;  %s6394_s18 = smov 0  }
   0x6 LB: > { %s6409_s19 = sadd.s32 4294967295, %s6348_s18   ;;  %s5937_s20 = sadd.s32 4294967294, %s6348_s18   ;;  %s6348_s18 = sphi %s6394_s18, %s10475_s18   ;;  %s6344_s17 = sphi %s6392_s17, %s10474_s17   ;;  %s6340_s16 = sphi %s6390_s16, %s10473_s16   ;;  %s6336_s15 = sphi %s6388_s15, %s10472_s15  }
   0x7   : > { %p41_p0 = scmp.ne.s32.totalorder %s6340_s16, %s6336_s15  ;;  %p42_p1 = scmp.eq.s32.totalorder %s6409_s19, 0 }
   0x8   : > { %p128_p2 = scmp.eq.s32.totalorder %s6409_s19, 1  ;;  %p134_p3 = scmp.eq.s32.totalorder %s5937_s20, 1 }
   0x9   : > { %p6418_p4 = por %p42_p1, %p41_p0  ;;  %p5938_p5 = scmp.ge.s32.totalorder %s6348_s18, 1 }
   0xa   : > { %p6423_p6 = por %p134_p3, %p41_p0  ;;  %p141_p7 = scmp.lt.s32.totalorder %s6348_s18, 3 }
   0xb   : > { %s152_s25 = sshll.u32 %s10362_s1, 4  ;;  %s6350_s27 = smov [#allocation5]   ;;  %s153_s25 = int_to_ptr.hbm [resolvable:$true] %s152_s25 }
   0xc   : > { %p6431_p8 = pnand %p5938_p5, %p141_p7  ;;  %s154_s28 = sshll.u32 %s6350_s27, 4  ;;  %s155_s28 = int_to_ptr.vmem [resolvable:$true] %s154_s28 }
   0xd   : > { %s166_s5 = sshll.u32 %s10363_s2, 4  ;;  %s6351_s6 = smov 128   ;;  %s167_s5 = int_to_ptr.hbm [resolvable:$true] %s166_s5 }
   0xe   : > { %p6073_p9 = pneg %p6431_p8  ;;  %s6352_s7 = smov 8  }
   0xf   : > { %s6353_s8 = smov [#allocation7]   ;;  %s6450_s10 = sadd.s32 1, %s6348_s18  }
  0x10   : > { %p6074_p10 = pnand %p6073_p9, %p42_p1  ;;  %s168_s9 = sshll.u32 %s6353_s8, 4  ;;  %s169_s9 = int_to_ptr.vmem [resolvable:$true] %s168_s9 }
  0x11   : > { %s28_s11 = sadd.s32 1, %s6344_s17  ;;  %s25_s12 = ssub.s32 %s6348_s18, %s6450_s10 }
  0x12   : > { %6076 = dma.hbm_to_vmem [thread:$0]  (!%p6074_p10), %s153_s25, 256, %s155_s28, [#allocation6], %s6351_s6, %s6351_s6, %s6352_s7  }
  0x13   : > { %6079 = dma.hbm_to_vmem [thread:$0]  (!%p6074_p10), %s167_s5, 256, %s169_s9, [#allocation6], %s6351_s6, %s6351_s6, %s6352_s7  }
  0x14   : > { %p35_p12 = scmp.ne.s32.totalorder %s6344_s17, %s6340_s16  ;;  %p26_p13 = scmp.eq.s32.totalorder %s25_s12, 0 }
  0x15   : > { %p36_p0 = scmp.eq.s32.totalorder %s6348_s18, 0  ;;  %p6090_p5 = scmp.lt.s32.totalorder %s6348_s18, 2 }
  0x16   : > { %p6460_p3 = por %p128_p2, %p35_p12  ;;  %s185_s20 = sand.u32 1, %s6344_s17  }
  0x17   : > { %s6466_s14 = scalar_select %p26_p13, %s6344_s17, %s28_s11  }
  0x18   : > { %p37_p7 = por %p36_p0, %p35_p12  ;;  %s5942_s23 = sshll.u32 %s185_s20, 4 }
  0x19   : > { %s6055_s24 = sshll.u32 %s6348_s18, 4  ;;  %s189_s29 = scalar_lea.vmem [#allocation2], %s5942_s23 }
  0x1a   : > { %s194_s28 = scalar_lea.hbm %s10361_s0, %s6055_s24  ;;  %s197_s30 = sshll.u32 %s189_s29, 4  ;;  %s198_s30 = int_to_ptr.vmem [resolvable:$true] %s197_s30 }
  0x1b   : > { %s195_s5 = sshll.u32 %s194_s28, 4  ;;  %p6473_p2 = pnand %p6090_p5, %p37_p7  ;;  %s196_s5 = int_to_ptr.hbm [resolvable:$true] %s195_s5 }
  0x1c   : > { %s186_s9 = scalar_lea.sflag [#allocation3], %s185_s20  ;;  %s6248_s11 = sshra.s32 %s196_s5, 4  ;;  %s6249_s11 = int_to_ptr.hbm [resolvable:$true] %s6248_s11 }
  0x1d   : > { %s6250_s12 = scalar_lea.hbm %s6249_s11, 16  ;;  %p6252_p10 = pneg %p6473_p2 }
  0x1e   : > { %p6251_p9 = scmp.ne.s32.totalorder %s6249_s11, %s6250_s12  ;;  %s6255_s25 = scalar_lea.hbm %s10361_s0, 32 }
  0x1f   : > { %p6256_p0 = scmp.lt.s32.totalorder %s6249_s11, %s10361_s0  ;;  %p6257_p5 = scmp.lt.s32.totalorder %s6255_s25, %s6250_s12 }
  0x20   : > { %p6253_p12 = pnand %p6252_p10, %p6251_p9 }
  0x21   : > { %p6258_p7 = por %p6257_p5, %p6256_p0 }
  0x22   : > { %p6254_p13 = pneg %p6253_p12 }
  0x24   : > { %p6259_p11 = pnand %p6258_p7, %p6254_p13 }
  0x26   : > { %6262 = shalt.err (!%p6259_p11)
}
  0x27   : > { %6083 = dma.hbm_to_vmem [thread:$0]  (!%p6473_p2), %s196_s5, 256, %s198_s30, %s186_s9, %s6351_s6, %s6351_s6, %s6352_s7  }
  0x28   : > { %209 = sbr.rel (%p6431_p8) target bundleno = 1619 (0x653), region = 36  ;;  %s6493_s20 = sand.u32 (!%p6431_p8), 1, %s6340_s16  }
  0x29   : > { %s5946_s29 = sshll.u32 (!%p6431_p8), %s6493_s20, 4  ;;  %s212_s11 = scalar_lea.sflag (!%p6431_p8), [#allocation3], %s6493_s20 }
  0x2a   : > { %s215_s12 = scalar_lea.vmem (!%p6431_p8), [#allocation2], %s5946_s29 }
  0x2d   : > { %6323 = dma.done.wait (%p6418_p4), %s212_s11, 256  }
  0x2e   : > { %6325 = vsyncadd (%p6418_p4), %s212_s11, 4294967040 }
  0x2f   : > { %6327 = dma.done.wait (%p42_p1), [#allocation6], 512  }
  0x30   : > { %6329 = vsyncadd (%p42_p1), [#allocation6], 4294966784  ;;  %v318_v0 = vlaneseq  ;;  %v252_v2 = vld [vmem:[%s215_s12 + $0x8] sm:$0xff]  ;;  %v251_v3 = vld [vmem:[%s215_s12] sm:$0xff]  ;;  %vm255_vm0 = vcmask 130048   ;;  %s5949_s30 = sshll.u32 %s6493_s20, 8 }
  0x31   : > { %276 = vmatpush.msra.mxu0 %v252_v2  ;;  %v253_v4 = vld [vmem:[#allocation5] sm:$0xff]  ;;  %v286_v5 = vld [vmem:[#allocation7 + $0x8] sm:$0xff]  ;;  %6057 = vmatpush.msra.mxu2 %v252_v2  ;;  %v285_v6 = vld [vmem:[#allocation7] sm:$0xff]  ;;  %s6906_s5 = scalar_lea.vmem [#allocation8], %s5949_s30  ;;  %s6056_s7 = sshll.u32 %s6409_s19, 8 }
  0x32   : > { %v6506_v1 = vshrl.u32 %v318_v0, 7  ;;  %307 = vmatpush.msra.mxu1 %v286_v5  ;;  %v254_v7 = vld [vmem:[#allocation5 + $0x8] sm:$0xff]  ;;  %6059 = vmatpush.msra.mxu3 %v286_v5  ;;  %v6575_v46 = vand.u32 127, %v318_v0  ;;  %v6583_v48 = vld [vmem:[%s10364_s3] ss:$0 sm:$0xff]  ;;  %s5841_s9 = scalar_lea.hbm %s10365_s4, %s6056_s7  ;;  %s5842_s24 = sshll.u32 %s6906_s5, 4  ;;  %s5843_s24 = int_to_ptr.vmem [resolvable:$true] %s5842_s24 }
  0x33   : > { %277 = vmatpush.msra.mxu0 %v251_v3  ;;  %6058 = vmatpush.msra.mxu2 %v251_v3  ;;  %v6588_v49 = vld [vmem:[%s10364_s3 + $0x1] ss:$0 sm:$0xff]  ;;  %s5844_s23 = sshll.u32 %s5841_s9, 4  ;;  %s5830_s19 = scalar_lea.sflag [#allocation4], %s6493_s20  ;;  %s5845_s23 = int_to_ptr.hbm [resolvable:$true] %s5844_s23 }
  0x34   : > { %6143 = vset.pattern.permute.xlu2 %v6506_v1  ;;  %6141 = vset.pattern.permute.xlu1 %v6506_v1  ;;  %v6512_v12 = vadd.s32 8, %v6506_v1  ;;  %vm320_vm1 = vcmp.lt.s32.totalorder %v6575_v46, 64  ;;  %s6292_s25 = sshra.s32 %s5845_s23, 4  ;;  %s6298_s11 = scalar_lea.hbm %s10365_s4, 512  ;;  %s6293_s25 = int_to_ptr.hbm [resolvable:$true] %s6292_s25 }
  0x35   : > { %6139 = vset.pattern.permute.xlu0 %v6506_v1  ;;  %5950 = vmatmul.msk.f32.vlgmr.msra.gmra.mxu0 %vm255_vm0, %v253_v4  ;;  %s6294_s27 = scalar_lea.hbm %s6293_s25, 256  ;;  %p6299_p11 = scmp.lt.s32.totalorder %s6293_s25, %s10365_s4 }
  0x36   : > { %308 = vmatpush.msra.mxu1 %v285_v6  ;;  %5951 = vmatmul.msk.f32.vlgmr.msra.gmra.mxu2 %vm255_vm0, %v254_v7  ;;  %p6295_p1 = scmp.ne.s32.totalorder %s6293_s25, %s6294_s27  ;;  %p6300_p2 = scmp.lt.s32.totalorder %s6298_s11, %s6294_s27 }
  0x37   : > { %5952 = vmatmul.msk.f32.vlgmr.msra.gmra.mxu1 %vm255_vm0, %v251_v3  ;;  %6060 = vmatpush.msra.mxu3 %v285_v6 }
  0x38   : > { %5953 = vmatmul.msk.f32.vlgmr.msra.gmra.mxu3 %vm255_vm0, %v252_v2  ;;  %p6296_p4 = pnand %p6295_p1, %p6460_p3  ;;  %p6301_p9 = por %p6300_p2, %p6299_p11 }
  0x3a   : > { %p6297_p8 = pneg %p6296_p4 }
  0x3c   : > { %p6302_p10 = pnand %p6301_p9, %p6297_p8 }
  0xb2   : > { %v279_v8 = vpop.f32.mrf.mxu0 }
  0xb3   : > { %v347_v9 = vperm.slane %v279_v8, 2  ;;  %v334_v10 = vperm.slane %v279_v8, 1  ;;  %v321_v11 = vperm.slane %v279_v8, 0  ;;  %v360_v13 = vperm.slane %v279_v8, 3 }
  0xb4   : > { %v373_v14 = vperm.slane %v279_v8, 4  ;;  %v386_v15 = vperm.slane %v279_v8, 5  ;;  %v399_v16 = vperm.slane %v279_v8, 6  ;;  %v310_v17 = vpop.f32.mrf.mxu1  ;;  %v412_v19 = vperm.slane %v279_v8, 7 }
  0xb5   : > { %352 = vperm.xlu2 %6143, %v347_v9   ;;  %339 = vperm.xlu1 %6141, %v334_v10   ;;  %v568_v18 = vperm.slane %v310_v17, 3  ;;  %v529_v22 = vperm.slane %v310_v17, 0  ;;  %v542_v23 = vperm.slane %v310_v17, 1  ;;  %v555_v25 = vperm.slane %v310_v17, 2 }
  0xb6   : > { %326 = vperm.xlu0 %6139, %v321_v11   ;;  %v581_v29 = vperm.slane %v310_v17, 4  ;;  %v594_v33 = vperm.slane %v310_v17, 5  ;;  %v607_v34 = vperm.slane %v310_v17, 6  ;;  %v620_v35 = vperm.slane %v310_v17, 7 }
  0xb9   : > { %v6525_v20 = vpop.f32.mrf.mxu2 }
  0xba   : > { %v438_v21 = vperm.slane %v6525_v20, 1  ;;  %v464_v24 = vperm.slane %v6525_v20, 3  ;;  %v503_v26 = vperm.slane %v6525_v20, 6  ;;  %v425_v37 = vperm.slane %v6525_v20, 0 }
  0xbb   : > { %v6539_v27 = vpop.f32.mrf.mxu3  ;;  %v451_v47 = vperm.slane %v6525_v20, 2  ;;  %v477_v4 = vperm.slane %v6525_v20, 4 }
  0xbc   : > { %v10368_v28 = vperm.slane %v6539_v27, 0  ;;  %v10366_v30 = vperm.slane %v6539_v27, 5  ;;  %v10367_v40 = vperm.slane %v6539_v27, 2 }
  0xbd   : > { %6144 = vset.pattern.permute.xlu2 %v6512_v12  ;;  %6142 = vset.pattern.permute.xlu1 %v6512_v12 }
  0xbe   : > { %6140 = vset.pattern.permute.xlu0 %v6512_v12 }
  0xc5   : > { %358 = vperm.xlu2 %6144, %v347_v9   ;;  %345 = vperm.xlu1 %6142, %v334_v10  }
  0xc6   : > { %332 = vperm.xlu0 %6140, %v321_v11   ;;  %v490_v11 = vperm.slane %v6525_v20, 5 }
  0xcd   : > { %371 = vperm.xlu2 %6144, %v360_v13   ;;  %6145 = vset.pattern.permute.xlu1 %v6506_v1 }
  0xce   : > { %6146 = vset.pattern.permute.xlu0 %v6506_v1 }
  0xd5   : > { %6148 = vset.pattern.permute.xlu2 %v6506_v1  ;;  %365 = vperm.xlu1 %6145, %v360_v13  }
  0xd6   : > { %378 = vperm.xlu0 %6146, %v373_v14  }
  0xdd   : > { %391 = vperm.xlu2 %6148, %v386_v15   ;;  %6147 = vset.pattern.permute.xlu1 %v6512_v12 }
  0xde   : > { %6149 = vset.pattern.permute.xlu0 %v6512_v12 }
  0xe5   : > { %404 = vperm.xlu2 %6148, %v399_v16   ;;  %384 = vperm.xlu1 %6147, %v373_v14  }
  0xe6   : > { %410 = vperm.xlu0 %6149, %v399_v16  }
  0xed   : > { %6151 = vset.pattern.permute.xlu2 %v6512_v12  ;;  %397 = vperm.xlu1 %6147, %v386_v15  }
  0xee   : > { %6154 = vset.pattern.permute.xlu0 %v6506_v1 }
  0xf5   : > { %423 = vperm.xlu2 %6151, %v412_v19   ;;  %6150 = vset.pattern.permute.xlu1 %v6506_v1 }
  0xf6   : > { %573 = vperm.xlu0 %6154, %v568_v18  }
  0xfd   : > { %6152 = vset.pattern.permute.xlu2 %v6506_v1  ;;  %417 = vperm.xlu1 %6150, %v412_v19  }
  0xfe   : > { %443 = vperm.xlu0 %6154, %v438_v21  }
 0x105   : > { %534 = vperm.xlu2 %6152, %v529_v22   ;;  %547 = vperm.xlu1 %6150, %v542_v23  }
 0x106   : > { %6161 = vset.pattern.permute.xlu0 %v6512_v12 }
 0x10d   : > { %6153 = vset.pattern.permute.xlu2 %v6512_v12  ;;  %560 = vperm.xlu1 %6150, %v555_v25  }
 0x10e   : > { %475 = vperm.xlu0 %6161, %v464_v24  }
 0x10f   : > { %v6546_v31 = vpop.permute.xlu2 %352 }
 0x115   : > { %553 = vperm.xlu2 %6153, %v542_v23   ;;  %6155 = vset.pattern.permute.xlu1 %v6512_v12 }
 0x116   : > { %6164 = vset.pattern.permute.xlu0 %v6506_v1 }
 0x11d   : > { %566 = vperm.xlu2 %6153, %v555_v25   ;;  %579 = vperm.xlu1 %6155, %v568_v18   ;;  %v10386_v18 = vmov 683565275   ;;  %v10375_v25 = vmov 2131351028  }
 0x11e   : > { %508 = vperm.xlu0 %6164, %v503_v26  }
 0x11f   : > { %v6551_v32 = vpop.permute.xlu2 %358 }
 0x125   : > { %6156 = vset.pattern.permute.xlu2 %v6506_v1  ;;  %592 = vperm.xlu1 %6155, %v581_v29  }
 0x126   : > { %638 = vperm.xlu0 %6164, %v10368_v28  }
 0x127   : > { %v6554_v36 = vpop.permute.xlu2 %371  ;;  %v6570_v44 = vpop.permute.xlu1 %339 }
 0x128   : > { %v327_v39 = vpop.permute.xlu0 %326 }
 0x12d   : > { %586 = vperm.xlu2 %6156, %v581_v29   ;;  %6157 = vset.pattern.permute.xlu1 %v6506_v1 }
 0x12e   : > { %703 = vperm.xlu0 %6164, %v10366_v30  }
 0x135   : > { %599 = vperm.xlu2 %6156, %v594_v33   ;;  %612 = vperm.xlu1 %6157, %v607_v34  }
 0x136   : > { %6169 = vset.pattern.permute.xlu0 %v6512_v12 }
 0x137   : > { %v6558_v38 = vpop.permute.xlu2 %391  ;;  %v6590_v51 = vpop.permute.xlu1 %345 }
 0x138   : > { %v6566_v42 = vpop.permute.xlu0 %332 }
 0x13d   : > { %6158 = vset.pattern.permute.xlu2 %v6512_v12  ;;  %625 = vperm.xlu1 %6157, %v620_v35  }
 0x13e   : > { %540 = vperm.xlu0 %6169, %v529_v22  }
 0x13f   : > { %v6564_v41 = vpop.permute.xlu2 %404 }
 0x145   : > { %618 = vperm.xlu2 %6158, %v607_v34   ;;  %430 = vperm.xlu1 %6157, %v425_v37   ;;  %v10377_v34 = vmov 2102212464  }
 0x146   : > { %605 = vperm.xlu0 %6169, %v594_v33  }
 0x147   : > { %v366_v60 = vpop.permute.xlu1 %365 }
 0x148   : > { %v6572_v45 = vpop.permute.xlu0 %378 }
 0x14d   : > { %631 = vperm.xlu2 %6158, %v620_v35   ;;  %6159 = vset.pattern.permute.xlu1 %v6512_v12 }
 0x14e   : > { %670 = vperm.xlu0 %6169, %v10367_v40  }
 0x14f   : > { %v6568_v43 = vpop.permute.xlu2 %423 }
 0x155   : > { %436 = vperm.xlu2 %6158, %v425_v37   ;;  %449 = vperm.xlu1 %6159, %v438_v21   ;;  %v10380_v21 = vmov 2475754826  }
 0x158   : > { %v6592_v52 = vpop.permute.xlu0 %410 }
 0x15d   : > { %6160 = vset.pattern.permute.xlu2 %v6506_v1  ;;  %462 = vperm.xlu1 %6159, %v451_v47  }
 0x15f   : > { %v535_v50 = vpop.permute.xlu2 %534 }
 0x160   : > { %v739_v53 = vsel %vm320_vm1, %v327_v39, %v535_v50  ;;  %v10373_v39 = vmov 920167782  }
 0x161   : > { %v772_v54 = vmul.f32 %v6583_v48, %v739_v53  ;;  %v10371_v53 = vmov 1326507024  }
 0x163   : > { %v6598_v55 = vadd.f32 %v6588_v49, %v772_v54 }
 0x165   : > { %v837_v56 = vand.u32 2147483647, %v6598_v55  ;;  %v840_v57 = vand.u32 2139095040, %v6598_v55  ;;  %456 = vperm.xlu2 %6160, %v451_v47   ;;  %6162 = vset.pattern.permute.xlu1 %v6506_v1 }
 0x167   : > { %v841_v58 = vshrl.u32 %v840_v57, 23  ;;  %v844_v59 = vand.u32 8388607, %v837_v56 }
 0x168   : > { %v574_v61 = vpop.permute.xlu0 %573 }
 0x169   : > { %v5954_v62 = vadd.s32 4294967169, %v841_v58  ;;  %v845_v63 = vor.u32 8388608, %v844_v59  ;;  %v745_v0 = vsel %vm320_vm1, %v366_v60, %v574_v61 }
 0x16a   : > { %v778_v2 = vmul.f32 %v6583_v48, %v745_v0 }
 0x16b   : > { %v847_v3 = vadd.s32 1, %v5954_v62  ;;  %v6612_v6 = vshll.u32 %v845_v63, 8 }
 0x16c   : > { %v6610_v5 = vadd.f32 %v6588_v49, %v778_v2 }
 0x16d   : > { %vm848_vm2 = vcmp.gt.s32.totalorder %v847_v3, 0  ;;  %469 = vperm.xlu2 %6160, %v464_v24   ;;  %482 = vperm.xlu1 %6162, %v477_v4   ;;  %v6622_v14 = vand.u32 65535, %v6612_v6  ;;  %v6625_v15 = vshrl.u32 %v6612_v6, 16 }
 0x16e   : > { %v849_v7 = vsel %vm848_vm2, %v847_v3, 0  ;;  %v10369_v8 = vand.u32 2147483647, %v6610_v5  ;;  %v1770_v9 = vand.u32 2139095040, %v6610_v5 }
 0x16f   : > { %v851_v10 = vand.u32 31, %v849_v7  ;;  %v850_v17 = vshrl.u32 %v849_v7, 5 }
 0x170   : > { %v1771_v16 = vshrl.u32 %v1770_v9, 23  ;;  %v6631_v23 = vand.u32 8388607, %v10369_v8 }
 0x171   : > { %v852_v13 = vsub.s32 32, %v851_v10  ;;  %v854_v19 = vshll.u32 %v10386_v18, %v851_v10  ;;  %v857_v22 = vshll.u32 %v10380_v21, %v851_v10  ;;  %v860_v33 = vshll.u32 %v10375_v25, %v851_v10 }
 0x172   : > { %v863_v37 = vshll.u32 %v10377_v34, %v851_v10  ;;  %v866_v50 = vshll.u32 %v10373_v39, %v851_v10  ;;  %v5972_v60 = vadd.s32 4294967169, %v1771_v16  ;;  %vm869_vm3 = vcmp.lt.s32.totalorder %v850_v17, 1 }
 0x173   : > { %v855_v24 = vshrl.u32 %v10380_v21, %v852_v13  ;;  %v858_v29 = vshrl.u32 %v10375_v25, %v852_v13  ;;  %v861_v35 = vshrl.u32 %v10377_v34, %v852_v13  ;;  %v864_v47 = vshrl.u32 %v10373_v39, %v852_v13 }
 0x174   : > { %v867_v54 = vshrl.u32 %v10371_v53, %v852_v13  ;;  %vm872_vm4 = vcmp.lt.s32.totalorder %v850_v17, 4  ;;  %v853_v63 = vshrl.u32 %v10386_v18, %v852_v13  ;;  %vm871_vm5 = vcmp.lt.s32.totalorder %v850_v17, 3 }
 0x175   : > { %v856_v57 = vor.u32 %v855_v24, %v854_v19  ;;  %v859_v58 = vor.u32 %v858_v29, %v857_v22  ;;  %v862_v59 = vor.u32 %v861_v35, %v860_v33  ;;  %6163 = vset.pattern.permute.xlu2 %v6512_v12  ;;  %495 = vperm.xlu1 %6162, %v490_v11   ;;  %v1777_v10 = vadd.s32 1, %v5972_v60  ;;  %v554_v24 = vpop.permute.xlu2 %553 }
 0x176   : > { %v865_v61 = vor.u32 %v864_v47, %v863_v37  ;;  %v868_v62 = vor.u32 %v867_v54, %v866_v50  ;;  %vm870_vm6 = vcmp.lt.s32.totalorder %v850_v17, 2  ;;  %v1775_v54 = vor.u32 8388608, %v6631_v23 }
 0x177   : > { %v874_v0 = vsel %vm872_vm4, %v862_v59, 2102212464  ;;  %v877_v2 = vsel %vm869_vm3, %v856_v57, %v859_v58  ;;  %v881_v3 = vsel %vm869_vm3, %v859_v58, %v862_v59  ;;  %v873_v16 = vsel %vm869_vm3, %v853_v63, %v856_v57 }
 0x178   : > { %v878_v7 = vsel %vm872_vm4, %v865_v61, 920167782  ;;  %v882_v9 = vsel %vm872_vm4, %v868_v62, 1326507024  ;;  %v875_v29 = vsel %vm871_vm5, %v859_v58, %v874_v0  ;;  %vm1778_vm7 = vcmp.gt.s32.totalorder %v1777_v10, 0 }
 0x179   : > { %v879_v19 = vsel %vm871_vm5, %v862_v59, %v878_v7  ;;  %v883_v22 = vsel %vm871_vm5, %v865_v61, %v882_v9  ;;  %v742_v62 = vsel %vm320_vm1, %v6590_v51, %v554_v24  ;;  %v6649_v60 = vsel %vm870_vm6, %v873_v16, %v875_v29 }
 0x17a   : > { %v880_v33 = vsel %vm870_vm6, %v877_v2, %v879_v19  ;;  %v884_v35 = vsel %vm870_vm6, %v881_v3, %v883_v22  ;;  %v1779_v58 = vsel %vm1778_vm7, %v1777_v10, 0  ;;  %v6360_v29 = vmov 0  }
 0x17b   : > { %v888_v37 = vand.u32 65535, %v884_v35  ;;  %v889_v47 = vshrl.u32 %v884_v35, 16  ;;  %v910_v50 = vand.u32 65535, %v880_v33  ;;  %v911_v13 = vshrl.u32 %v880_v33, 16 }
 0x17c   : > { %v1781_v24 = vand.u32 31, %v1779_v58  ;;  %vm839_vm6 = vcmp.lt.s32.totalorder %v6598_v55, 0 }
 0x17d   : > { %v891_v17 = vmul.u32 %v889_v47, %v6622_v14  ;;  %v892_v57 = vmul.u32 %v888_v37, %v6625_v15  ;;  %488 = vperm.xlu2 %6163, %v477_v4   ;;  %v890_v59 = vmul.u32 %v888_v37, %v6622_v14  ;;  %v893_v61 = vmul.u32 %v889_v47, %v6625_v15 }
 0x17e   : > { %v913_v63 = vmul.u32 %v911_v13, %v6622_v14  ;;  %v914_v0 = vmul.u32 %v910_v50, %v6625_v15  ;;  %6165 = vset.pattern.permute.xlu1 %v6512_v12  ;;  %v912_v3 = vmul.u32 %v910_v50, %v6622_v14  ;;  %v915_v7 = vmul.u32 %v911_v13, %v6625_v15 }
 0x17f   : > { %v894_v51 = vshll.u32 %v891_v17, 16  ;;  %v895_v2 = vshrl.u32 %v891_v17, 16  ;;  %v896_v9 = vshll.u32 %v892_v57, 16  ;;  %v897_v10 = vshrl.u32 %v892_v57, 16 }
 0x180   : > { %v916_v16 = vshll.u32 %v913_v63, 16  ;;  %v917_v4 = vshrl.u32 %v913_v63, 16  ;;  %v918_v22 = vshll.u32 %v914_v0, 16  ;;  %v919_v35 = vshrl.u32 %v914_v0, 16 }
 0x181   : > { %vm898_vm8 = vc.u32 %v890_v59, %v894_v51  ;;  %v900_v19 = vadd.s32 %v894_v51, %v890_v59  ;;  %v6664_v50 = vsub.s32 32, %v1781_v24  ;;  %v6667_v17 = vshrl.u32 %v1779_v58, 5 }
 0x182   : > { %v899_v33 = vsel %vm898_vm8, 1, %v6360_v29  ;;  %vm920_vm9 = vc.u32 %v912_v3, %v916_v16  ;;  %v922_v37 = vadd.s32 %v916_v16, %v912_v3  ;;  %v1784_v0 = vshll.u32 %v10386_v18, %v1781_v24 }
 0x183   : > { %v901_v47 = vadd.s32 %v899_v33, %v893_v61  ;;  %vm902_vm10 = vc.u32 %v900_v19, %v896_v9  ;;  %v921_v14 = vsel %vm920_vm9, 1, %v6360_v29  ;;  %v1785_v51 = vshrl.u32 %v10380_v21, %v6664_v50 }
 0x184   : > { %v903_v15 = vsel %vm902_vm10, 1, %v6360_v29  ;;  %v923_v13 = vadd.s32 %v921_v14, %v915_v7  ;;  %vm924_vm11 = vc.u32 %v922_v37, %v918_v22  ;;  %v6670_v63 = vadd.s32 %v922_v37, %v918_v22 }
 0x185   : > { %v905_v57 = vadd.s32 %v903_v15, %v901_v47  ;;  %v925_v59 = vsel %vm924_vm11, 1, %v6360_v29  ;;  %501 = vperm.xlu2 %6163, %v490_v11   ;;  %v1787_v3 = vshll.u32 %v10380_v21, %v1781_v24  ;;  %v1788_v58 = vshrl.u32 %v10375_v25, %v6664_v50 }
 0x186   : > { %v927_v61 = vadd.s32 %v925_v59, %v923_v13  ;;  %514 = vperm.xlu1 %6165, %v503_v26   ;;  %v1790_v9 = vshll.u32 %v10375_v25, %v1781_v24  ;;  %v1791_v16 = vshrl.u32 %v10377_v34, %v6664_v50  ;;  %v1793_v11 = vshll.u32 %v10377_v34, %v1781_v24 }
 0x187   : > { %v906_v7 = vadd.s32 %v905_v57, %v895_v2  ;;  %v6686_v22 = vor.u32 %v1785_v51, %v1784_v0  ;;  %v6688_v33 = vor.u32 %v1788_v58, %v1787_v3  ;;  %v1794_v37 = vshrl.u32 %v10373_v39, %v6664_v50 }
 0x188   : > { %v928_v19 = vadd.s32 %v927_v61, %v917_v4  ;;  %v1792_v14 = vor.u32 %v1791_v16, %v1790_v9  ;;  %v1796_v26 = vshll.u32 %v10373_v39, %v1781_v24  ;;  %v1797_v2 = vshrl.u32 %v10371_v53, %v6664_v50 }
 0x189   : > { %v6692_v47 = vadd.s32 %v906_v7, %v897_v10  ;;  %v1795_v13 = vor.u32 %v1794_v37, %v1793_v11  ;;  %v775_v57 = vmul.f32 %v6583_v48, %v742_v62  ;;  %vm1799_vm13 = vcmp.lt.s32.totalorder %v6667_v17, 1 }
 0x18a   : > { %v929_v15 = vadd.s32 %v928_v19, %v919_v35  ;;  %v1798_v4 = vor.u32 %v1797_v2, %v1796_v26  ;;  %v6703_v10 = vshll.u32 %v1775_v54, 8  ;;  %v930_v24 = vmul.u32 %v6612_v6, %v6649_v60 }
 0x18b   : > { %vm932_vm12 = vc.u32 %v6692_v47, %v6670_v63  ;;  %vm1802_vm14 = vcmp.lt.s32.totalorder %v6667_v17, 4  ;;  %v1807_v62 = vsel %vm1799_vm13, %v6686_v22, %v6688_v33  ;;  %vm1801_vm15 = vcmp.lt.s32.totalorder %v6667_v17, 3 }
 0x18c   : > { %v933_v59 = vadd.s32 1, %v929_v15  ;;  %v1808_v35 = vsel %vm1802_vm14, %v1795_v13, 920167782  ;;  %v1811_v23 = vsel %vm1799_vm13, %v6688_v33, %v1792_v14  ;;  %v1812_v6 = vsel %vm1802_vm14, %v1798_v4, 1326507024 }
 0x18d   : > { %6166 = vset.pattern.permute.xlu2 %v6506_v1  ;;  %vm1800_vm0 = vcmp.lt.s32.totalorder %v6667_v17, 2  ;;  %v1809_v60 = vsel %vm1801_vm15, %v1792_v14, %v1808_v35  ;;  %v1813_v0 = vsel %vm1801_vm15, %v1795_v13, %v1812_v6  ;;  %v1816_v58 = vand.u32 65535, %v6703_v10 }
 0x18e   : > { %v934_v54 = vsel %vm932_vm12, %v933_v59, %v929_v15  ;;  %v1810_v51 = vsel %vm1800_vm0, %v1807_v62, %v1809_v60  ;;  %v1814_v3 = vsel %vm1800_vm0, %v1811_v23, %v1813_v0  ;;  %v1817_v7 = vshrl.u32 %v6703_v10, 16 }
 0x18f   : > { %v935_v61 = vadd.s32 %v934_v54, %v930_v24  ;;  %v1818_v9 = vand.u32 65535, %v1814_v3  ;;  %v1819_v16 = vshrl.u32 %v1814_v3, 16  ;;  %v1841_v11 = vshrl.u32 %v1810_v51, 16 }
 0x190   : > { %v1840_v37 = vand.u32 65535, %v1810_v51  ;;  %v6733_v59 = vadd.f32 %v6588_v49, %v775_v57  ;;  %v1804_v51 = vsel %vm1802_vm14, %v1792_v14, 2102212464  ;;  %vm6753_vm8 = vcmp.le.f32.partialorder %v837_v56, 0.7853982 }
 0x191   : > { %v936_v19 = vadd.s32 536870912, %v935_v61  ;;  %v1821_v26 = vmul.u32 %v1819_v16, %v1816_v58  ;;  %v1822_v2 = vmul.u32 %v1818_v9, %v1817_v7  ;;  %v1843_v13 = vmul.u32 %v1841_v11, %v1816_v58 }
 0x192   : > { %v1820_v4 = vmul.u32 %v1818_v9, %v1816_v58  ;;  %v1823_v35 = vmul.u32 %v1819_v16, %v1817_v7  ;;  %v1844_v23 = vmul.u32 %v1840_v37, %v1817_v7  ;;  %v1842_v0 = vmul.u32 %v1840_v37, %v1816_v58 }
 0x193   : > { %v937_v15 = vshrl.u32 %v936_v19, 30  ;;  %v1824_v24 = vshll.u32 %v1821_v26, 16  ;;  %v1846_v6 = vshll.u32 %v1843_v13, 16  ;;  %v1826_v54 = vshll.u32 %v1822_v2, 16 }
 0x194   : > { %v1825_v30 = vshrl.u32 %v1821_v26, 16  ;;  %v1845_v40 = vmul.u32 %v1841_v11, %v1817_v7  ;;  %v1848_v28 = vshll.u32 %v1844_v23, 16  ;;  %v1783_v26 = vshrl.u32 %v10386_v18, %v6664_v50 }
 0x195   : > { %v938_v62 = vshll.u32 %v937_v15, 30  ;;  %vm1828_vm2 = vc.u32 %v1820_v4, %v1824_v24  ;;  %v1830_v60 = vadd.s32 %v1824_v24, %v1820_v4  ;;  %vm1850_vm4 = vc.u32 %v1842_v0, %v1846_v6 }
 0x196   : > { %v1829_v19 = vsel %vm1828_vm2, 1, %v6360_v29  ;;  %v1851_v4 = vsel %vm1850_vm4, 1, %v6360_v29  ;;  %v1852_v58 = vadd.s32 %v1846_v6, %v1842_v0  ;;  %v961_v14 = vsub.s32 4, %v937_v15 }
 0x197   : > { %v939_v3 = vsub.s32 %v935_v61, %v938_v62  ;;  %v1831_v9 = vadd.s32 %v1829_v19, %v1823_v35  ;;  %vm1832_vm3 = vc.u32 %v1830_v60, %v1826_v54  ;;  %v1305_v61 = vand.u32 2139095040, %v6733_v59 }
 0x198   : > { %v1833_v16 = vsel %vm1832_vm3, 1, %v6360_v29  ;;  %v1853_v24 = vadd.s32 %v1851_v4, %v1845_v40  ;;  %vm1854_vm7 = vc.u32 %v1852_v58, %v1848_v28  ;;  %v1803_v62 = vsel %vm1799_vm13, %v1783_v26, %v6686_v22 }
 0x199   : > { %vm940_vm5 = vcmp.lt.s32.totalorder %v939_v3, 0  ;;  %v941_v57 = vsub.s32 0, %v939_v3  ;;  %v1835_v8 = vadd.s32 %v1833_v16, %v1831_v9  ;;  %v1805_v35 = vsel %vm1801_vm15, %v6688_v33, %v1804_v51 }
 0x19a   : > { %v1827_v6 = vshrl.u32 %v1822_v2, 16  ;;  %v1855_v54 = vsel %vm1854_vm7, 1, %v6360_v29  ;;  %v1847_v0 = vshrl.u32 %v1843_v13, 16  ;;  %v1306_v40 = vshrl.u32 %v1305_v61, 23 }
 0x19b   : > { %v942_v37 = vsel %vm940_vm5, %v941_v57, %v939_v3  ;;  %v1836_v11 = vadd.s32 %v1835_v8, %v1825_v30  ;;  %v1857_v50 = vadd.s32 %v1855_v54, %v1853_v24  ;;  %v962_v8 = vsel %vm839_vm6, %v961_v14, %v937_v15 }
 0x19c   : > { %v943_v7 = vclz %v942_v37  ;;  %v10370_v19 = vand.u32 2147483647, %v6733_v59  ;;  %v931_v33 = vadd.s32 %v6670_v63, %v6692_v47  ;;  %v1849_v2 = vshrl.u32 %v1844_v23, 16  ;;  %v567_v37 = vpop.permute.xlu2 %566 }
 0x19d   : > { %v1837_v22 = vadd.s32 %v1836_v11, %v1827_v6  ;;  %v1858_v13 = vadd.s32 %v1857_v50, %v1847_v0  ;;  %v1806_v9 = vsel %vm1800_vm0, %v1803_v62, %v1805_v35  ;;  %v1856_v56 = vadd.s32 %v1852_v58, %v1848_v28 }
 0x19e   : > { %v5955_v60 = vadd.s32 4294967294, %v943_v7  ;;  %v5963_v57 = vadd.s32 4294967169, %v1306_v40  ;;  %v964_v15 = vsel %vm6753_vm8, 0, %v962_v8  ;;  %v1309_v63 = vand.u32 8388607, %v10370_v19 }
 0x19f   : > { %v1859_v61 = vadd.s32 %v1858_v13, %v1849_v2  ;;  %vm1862_vm10 = vc.u32 %v1837_v22, %v1856_v56  ;;  %v981_v17 = vadd.s32 3, %v964_v15  ;;  %v1860_v28 = vmul.u32 %v6703_v10, %v1806_v9 }
 0x1a0   : > { %vm5956_vm9 = vcmp.lt.s32.totalorder %v5955_v60, 0  ;;  %v1312_v47 = vadd.s32 1, %v5963_v57  ;;  %v744_v58 = vsel %vm320_vm1, %v6551_v32, %v567_v37  ;;  %v1310_v54 = vor.u32 8388608, %v1309_v63 }
 0x1a1   : > { %v946_v51 = vsel %vm5956_vm9, 0, %v5955_v60  ;;  %v1863_v24 = vadd.s32 1, %v1859_v61  ;;  %v6777_v2 = vadd.s32 %v1856_v56, %v1837_v22  ;;  %vm1769_vm12 = vcmp.lt.s32.totalorder %v6610_v5, 0 }
 0x1a2   : > { %v947_v16 = vsub.s32 32, %v946_v51  ;;  %v951_v4 = vsub.s32 4294967266, %v946_v51  ;;  %v948_v23 = vshll.u32 %v939_v3, %v946_v51  ;;  %vm1313_vm11 = vcmp.gt.s32.totalorder %v1312_v47, 0 }
 0x1a3   : > { %v1864_v62 = vsel %vm1862_vm10, %v1863_v24, %v1859_v61  ;;  %v1314_v35 = vsel %vm1313_vm11, %v1312_v47, 0  ;;  %v777_v3 = vmul.f32 %v6583_v48, %v744_v58  ;;  %v6783_v9 = vshll.u32 %v1310_v54, 8 }
 0x1a4   : > { %v949_v14 = vshrl.u32 %v931_v33, %v947_v16  ;;  %v952_v26 = vadd.s32 127, %v951_v4  ;;  %v1865_v6 = vadd.s32 %v1864_v62, %v1860_v28  ;;  %v1316_v60 = vand.u32 31, %v1314_v35 }
 0x1a5   : > { %v6775_v33 = vand.u32 3, %v981_v17  ;;  %v6789_v15 = vadd.f32 %v6588_v49, %v777_v3  ;;  %v6795_v47 = vshrl.u32 %v1314_v35, 5  ;;  %v6814_v62 = vshrl.u32 %v6783_v9, 16 }
 0x1a6   : > { %v950_v7 = vor.u32 %v949_v14, %v948_v23  ;;  %v953_v11 = vshll.u32 %v952_v26, 23  ;;  %v1866_v50 = vadd.s32 536870912, %v1865_v6  ;;  %v6773_v40 = vsub.s32 32, %v1316_v60 }
 0x1a7   : > { %v1319_v16 = vshll.u32 %v10386_v18, %v1316_v60  ;;  %v1322_v56 = vshll.u32 %v10380_v21, %v1316_v60  ;;  %v1328_v37 = vshll.u32 %v10377_v34, %v1316_v60  ;;  %v1325_v23 = vshll.u32 %v10375_v25, %v1316_v60 }
 0x1a8   : > { %v954_v0 = vor.u32 4788187, %v953_v11  ;;  %v957_v10 = vcvt.s32.f32 %v950_v7  ;;  %v1867_v32 = vshrl.u32 %v1866_v50, 30  ;;  %v1320_v13 = vshrl.u32 %v10380_v21, %v6773_v40 }
 0x1a9   : > { %v1323_v51 = vshrl.u32 %v10375_v25, %v6773_v40  ;;  %v1329_v4 = vshrl.u32 %v10373_v39, %v6773_v40  ;;  %v1326_v61 = vshrl.u32 %v10377_v34, %v6773_v40  ;;  %v1332_v14 = vshrl.u32 %v10371_v53, %v6773_v40 }
 0x1aa   : > { %v955_v8 = vand.u32 2147483647, %v954_v0  ;;  %v1868_v22 = vshll.u32 %v1867_v32, 30  ;;  %v6802_v24 = vor.u32 %v1320_v13, %v1319_v16  ;;  %v1331_v7 = vshll.u32 %v10373_v39, %v1316_v60 }
 0x1ab   : > { %v6804_v17 = vor.u32 %v1323_v51, %v1322_v56  ;;  %v1330_v28 = vor.u32 %v1329_v4, %v1328_v37  ;;  %v6811_v11 = vand.u32 65535, %v6783_v9  ;;  %v1327_v54 = vor.u32 %v1326_v61, %v1325_v23 }
 0x1ac   : > { %v958_v57 = vmul.f32 %v957_v10, %v955_v8  ;;  %v6800_v26 = vsub.s32 %v1865_v6, %v1868_v22  ;;  %vm1334_vm14 = vcmp.lt.s32.totalorder %v6795_v47, 1  ;;  %vm1337_vm15 = vcmp.lt.s32.totalorder %v6795_v47, 4 }
 0x1ad   : > { %v1615_v60 = vand.u32 2139095040, %v6789_v15  ;;  %v1333_v50 = vor.u32 %v1332_v14, %v1331_v7  ;;  %v1342_v30 = vsel %vm1334_vm14, %v6802_v24, %v6804_v17  ;;  %v1343_v8 = vsel %vm1337_vm15, %v1330_v28, 920167782 }
 0x1ae   : > { %v959_v63 = vxor.u32 2147483648, %v958_v57  ;;  %vm1870_vm13 = vcmp.lt.s32.totalorder %v6800_v26, 0  ;;  %v1871_v6 = vsub.s32 0, %v6800_v26  ;;  %vm1336_vm0 = vcmp.lt.s32.totalorder %v6795_v47, 3 }
 0x1af   : > { %vm1335_vm2 = vcmp.lt.s32.totalorder %v6795_v47, 2  ;;  %v1344_v16 = vsel %vm1336_vm0, %v1327_v54, %v1343_v8  ;;  %v1612_v4 = vand.u32 2147483647, %v6789_v15  ;;  %v1346_v23 = vsel %vm1334_vm14, %v6804_v17, %v1327_v54 }
 0x1b0   : > { %v960_v58 = vsel %vm839_vm6, %v959_v63, %v958_v57  ;;  %v1872_v3 = vsel %vm1870_vm13, %v1871_v6, %v6800_v26  ;;  %v1891_v57 = vsub.s32 4, %v1867_v32  ;;  %v1345_v37 = vsel %vm1335_vm2, %v1342_v30, %v1344_v16  ;;  %v6842_v63 = vpop.permute.xlu1 %384 }
 0x1b1   : > { %v6819_v35 = vsel %vm6753_vm8, %v6598_v55, %v960_v58  ;;  %v1873_v51 = vclz %v1872_v3  ;;  %v1347_v14 = vsel %vm1337_vm15, %v1333_v50, 1326507024  ;;  %v1376_v58 = vshrl.u32 %v1345_v37, 16 }
 0x1b2   : > { %v965_v0 = vmul.f32 %v6819_v35, %v6819_v35  ;;  %v6849_v7 = vshrl.u32 %v1615_v60, 23  ;;  %v1348_v8 = vsel %vm1336_vm0, %v1330_v28, %v1347_v14  ;;  %v6855_v30 = vsel %vm1769_vm12, %v1891_v57, %v1867_v32 }
 0x1b3   : > { %v5973_v61 = vadd.s32 4294967294, %v1873_v51  ;;  %v1349_v50 = vsel %vm1335_vm2, %v1346_v23, %v1348_v8  ;;  %vm984_vm4 = vcmp.eq.s32.totalorder %v6775_v33, 0  ;;  %vm987_vm5 = vcmp.eq.s32.totalorder %v6775_v33, 2 }
 0x1b4   : > { %v966_v10 = vmul.f32 -0.001358992, %v965_v0  ;;  %v973_v13 = vmul.f32 -0.00019511016, %v965_v0  ;;  %v1339_v32 = vsel %vm1337_vm15, %v1327_v54, 2102212464  ;;  %v6870_v14 = vmul.u32 %v1376_v58, %v6811_v11 }
 0x1b5   : > { %vm5974_vm3 = vcmp.lt.s32.totalorder %v5973_v61, 0  ;;  %v1353_v57 = vand.u32 65535, %v1349_v50  ;;  %vm983_vm6 = vcmp.lt.s32.totalorder %v6775_v33, 2  ;;  %vm980_vm7 = vweird.f32 %v6598_v55 }
 0x1b6   : > { %v967_v22 = vadd.f32 0.041655596, %v966_v10  ;;  %v974_v56 = vadd.f32 0.008332121, %v973_v13  ;;  %v1876_v10 = vsel %vm5974_vm3, 0, %v5973_v61  ;;  %v6859_v13 = vshrl.u32 %v10386_v18, %v6773_v40 }
 0x1b7   : > { %v1877_v16 = vsub.s32 32, %v1876_v10  ;;  %v1881_v28 = vsub.s32 4294967266, %v1876_v10  ;;  %v1357_v54 = vmul.u32 %v1353_v57, %v6814_v62 }
 0x1b8   : > { %v968_v6 = vmul.f32 %v967_v22, %v965_v0  ;;  %v975_v3 = vmul.f32 %v974_v56, %v965_v0  ;;  %v1375_v22 = vand.u32 65535, %v1345_v37  ;;  %v1354_v56 = vshrl.u32 %v1349_v50, 16 }
 0x1b9   : > { %v1879_v23 = vshrl.u32 %v6777_v2, %v1877_v16  ;;  %v1878_v37 = vshll.u32 %v6800_v26, %v1876_v10  ;;  %v1355_v16 = vmul.u32 %v1353_v57, %v6811_v11  ;;  %v1361_v53 = vshll.u32 %v1357_v54, 16 }
 0x1ba   : > { %v969_v60 = vadd.f32 -0.4999988, %v968_v6  ;;  %v976_v51 = vadd.f32 -0.16666654, %v975_v3  ;;  %v1882_v6 = vadd.s32 127, %v1881_v28  ;;  %v1356_v3 = vmul.u32 %v1354_v56, %v6811_v11 }
 0x1bb   : > { %v1377_v2 = vmul.u32 %v1375_v22, %v6811_v11  ;;  %v1880_v26 = vor.u32 %v1879_v23, %v1878_v37  ;;  %v1380_v11 = vmul.u32 %v1376_v58, %v6814_v62  ;;  %v1338_v55 = vsel %vm1334_vm14, %v6859_v13, %v6802_v24 }
 0x1bc   : > { %v970_v61 = vmul.f32 %v969_v60, %v965_v0  ;;  %v977_v40 = vmul.f32 %v976_v51, %v965_v0  ;;  %v10396_v0 = vand.u32 2147483647, %v6610_v5  ;;  %v6884_v51 = vmul.u32 %v1375_v22, %v6814_v62 }
 0x1bd   : > { %v1883_v10 = vshll.u32 %v1882_v6, 23  ;;  %v1359_v28 = vshll.u32 %v1356_v3, 16  ;;  %v1381_v22 = vshll.u32 %v6870_v14, 16  ;;  %v1360_v23 = vshrl.u32 %v1356_v3, 16 }
 0x1be   : > { %v971_v8 = vadd.f32 1.0, %v970_v61  ;;  %v978_v50 = vadd.f32 1.0, %v977_v40  ;;  %vm6878_vm8 = vcmp.le.f32.partialorder %v10396_v0, 0.7853982  ;;  %v1358_v40 = vmul.u32 %v1354_v56, %v6814_v62  ;;  %v6890_v0 = vpop.permute.xlu1 %397 }
 0x1bf   : > { %v1884_v39 = vor.u32 4788187, %v1883_v10  ;;  %vm1363_vm9 = vc.u32 %v1355_v16, %v1359_v28  ;;  %v1365_v25 = vadd.s32 %v1359_v28, %v1355_v16  ;;  %vm1385_vm11 = vc.u32 %v1377_v2, %v1381_v22 }
 0x1c0   : > { %v979_v19 = vmul.f32 %v978_v50, %v6819_v35  ;;  %v988_v61 = vxor.u32 2147483648, %v971_v8  ;;  %v1364_v37 = vsel %vm1363_vm9, 1, %v6360_v29  ;;  %v1887_v35 = vcvt.s32.f32 %v1880_v26 }
 0x1c1   : > { %v1885_v57 = vand.u32 2147483647, %v1884_v39  ;;  %v1366_v6 = vadd.s32 %v1364_v37, %v1358_v40  ;;  %vm1367_vm10 = vc.u32 %v1365_v25, %v1361_v53  ;;  %v1386_v62 = vsel %vm1385_vm11, 1, %v6360_v29 }
 0x1c2   : > { %v985_v34 = vxor.u32 2147483648, %v979_v19  ;;  %v989_v50 = vsel %vm987_vm5, %v988_v61, %v979_v19  ;;  %v1368_v10 = vsel %vm1367_vm10, 1, %v6360_v29  ;;  %v1383_v25 = vshll.u32 %v6884_v51, 16 }
 0x1c3   : > { %v1888_v16 = vmul.f32 %v1887_v35, %v1885_v57  ;;  %v1370_v28 = vadd.s32 %v1368_v10, %v1366_v6  ;;  %v1387_v53 = vadd.s32 %v1381_v22, %v1377_v2  ;;  %v1894_v33 = vsel %vm6878_vm8, 0, %v6855_v30 }
 0x1c4   : > { %v986_v56 = vsel %vm984_vm4, %v971_v8, %v985_v34  ;;  %v1388_v34 = vadd.s32 %v1386_v62, %v1380_v11  ;;  %v5969_v8 = vadd.s32 4294967169, %v6849_v7  ;;  %v1340_v2 = vsel %vm1336_vm0, %v6804_v17, %v1339_v32 }
 0x1c5   : > { %v990_v3 = vsel %vm983_vm6, %v986_v56, %v989_v50  ;;  %v1889_v19 = vxor.u32 2147483648, %v1888_v16  ;;  %v1371_v58 = vadd.s32 %v1370_v28, %v1360_v23  ;;  %vm1389_vm13 = vc.u32 %v1387_v53, %v1383_v25 }
 0x1c6   : > { %v991_v39 = vsel %vm980_vm7, nan, %v990_v3  ;;  %v6922_v26 = vand.u32 8388607, %v1612_v4  ;;  %v1362_v61 = vshrl.u32 %v1357_v54, 16  ;;  %v1390_v7 = vsel %vm1389_vm13, 1, %v6360_v29  ;;  %v6927_v40 = vpop.permute.xlu1 %417 }
 0x1c7   : > { %5797 = vst [vmem:[%s6906_s5] sm:$0xff] %v991_v39  ;;  %v1890_v30 = vsel %vm1769_vm12, %v1889_v19, %v1888_v16  ;;  %v1622_v22 = vadd.s32 1, %v5969_v8  ;;  %v1911_v13 = vadd.s32 3, %v1894_v33  ;;  %v1382_v17 = vshrl.u32 %v6870_v14, 16 }
 0x1c8   : > { %v1893_v24 = vsel %vm6878_vm8, %v6610_v5, %v1890_v30  ;;  %v1392_v32 = vadd.s32 %v1390_v7, %v1388_v34  ;;  %v1341_v37 = vsel %vm1335_vm2, %v1338_v55, %v1340_v2  ;;  %v6935_v11 = vadd.s32 %v1371_v58, %v1362_v61 }
 0x1c9   : > { %v1895_v23 = vmul.f32 %v1893_v24, %v1893_v24  ;;  %vm1623_vm12 = vcmp.gt.s32.totalorder %v1622_v22, 0  ;;  %v1384_v54 = vshrl.u32 %v6884_v51, 16  ;;  %v6938_v50 = vadd.s32 %v1387_v53, %v1383_v25 }
 0x1ca   : > { %v1393_v57 = vadd.s32 %v1392_v32, %v1382_v17  ;;  %v1624_v35 = vsel %vm1623_vm12, %v1622_v22, 0  ;;  %v6940_v10 = vand.u32 3, %v1911_v13  ;;  %v1395_v3 = vmul.u32 %v6783_v9, %v1341_v37 }
 0x1cb   : > { %v1896_v6 = vmul.f32 -0.001358992, %v1895_v23  ;;  %v1903_v56 = vmul.f32 -0.00019511016, %v1895_v23  ;;  %v1626_v60 = vand.u32 31, %v1624_v35  ;;  %v1620_v47 = vor.u32 8388608, %v6922_v26 }
 0x1cc   : > { %v1394_v14 = vadd.s32 %v1393_v57, %v1384_v54  ;;  %vm1397_vm14 = vc.u32 %v6935_v11, %v6938_v50  ;;  %v6946_v39 = vshrl.u32 %v1624_v35, 5  ;;  %v10399_v9 = vmov 2102212464  }
 0x1cd   : > { %v1897_v16 = vadd.f32 0.041655596, %v1896_v6  ;;  %v1904_v28 = vadd.f32 0.008332121, %v1903_v56  ;;  %v1627_v51 = vsub.s32 32, %v1626_v60  ;;  %v1629_v25 = vshll.u32 %v10386_v18, %v1626_v60 }
 0x1ce   : > { %v1398_v62 = vadd.s32 1, %v1394_v14  ;;  %v1632_v53 = vshll.u32 %v10380_v21, %v1626_v60  ;;  %v1638_v58 = vshll.u32 %v10399_v9, %v1626_v60  ;;  %v10400_v55 = vmov 2131351028   ;;  %v548_v32 = vpop.permute.xlu1 %547 }
 0x1cf   : > { %v1898_v34 = vmul.f32 %v1897_v16, %v1895_v23  ;;  %v1905_v19 = vmul.f32 %v1904_v28, %v1895_v23  ;;  %v1630_v33 = vshrl.u32 %v10380_v21, %v1627_v51  ;;  %v1633_v2 = vshrl.u32 %v10400_v55, %v1627_v51 }
 0x1d0   : > { %v1399_v8 = vsel %vm1397_vm14, %v1398_v62, %v1394_v14  ;;  %v1636_v26 = vshrl.u32 %v10399_v9, %v1627_v51  ;;  %v10401_v30 = vmov 920167782   ;;  %v1635_v17 = vshll.u32 %v10400_v55, %v1626_v60 }
 0x1d1   : > { %v1639_v61 = vshrl.u32 %v10401_v30, %v1627_v51  ;;  %v1899_v7 = vadd.f32 -0.4999988, %v1898_v34  ;;  %v1906_v22 = vadd.f32 -0.16666654, %v1905_v19  ;;  %v1400_v13 = vadd.s32 %v1399_v8, %v1395_v3 }
 0x1d2   : > { %v1631_v37 = vor.u32 %v1630_v33, %v1629_v25  ;;  %v6956_v54 = vor.u32 %v1633_v2, %v1632_v53  ;;  %v1641_v35 = vshll.u32 %v10401_v30, %v1626_v60  ;;  %vm1913_vm15 = vcmp.lt.s32.totalorder %v6940_v10, 2 }
 0x1d3   : > { %v1640_v57 = vor.u32 %v1639_v61, %v1638_v58  ;;  %v1900_v6 = vmul.f32 %v1899_v7, %v1895_v23  ;;  %v1907_v56 = vmul.f32 %v1906_v22, %v1895_v23  ;;  %v1401_v14 = vadd.s32 536870912, %v1400_v13 }
 0x1d4   : > { %v10402_v16 = vmov 1326507024   ;;  %vm1910_vm0 = vweird.f32 %v6610_v5  ;;  %vm1914_vm2 = vcmp.eq.s32.totalorder %v6940_v10, 0  ;;  %v1637_v3 = vor.u32 %v1636_v26, %v1635_v17 }
 0x1d5   : > { %v1642_v28 = vshrl.u32 %v10402_v16, %v1627_v51  ;;  %vm1647_vm3 = vcmp.lt.s32.totalorder %v6946_v39, 4  ;;  %v741_v62 = vsel %vm320_vm1, %v6570_v44, %v548_v32  ;;  %v1901_v25 = vadd.f32 1.0, %v1900_v6 }
 0x1d6   : > { %v1908_v60 = vadd.f32 1.0, %v1907_v56  ;;  %v6967_v53 = vshrl.u32 %v1401_v14, 30  ;;  %vm1644_vm4 = vcmp.lt.s32.totalorder %v6946_v39, 1  ;;  %vm1646_vm5 = vcmp.lt.s32.totalorder %v6946_v39, 3 }
 0x1d7   : > { %v1643_v23 = vor.u32 %v1642_v28, %v1641_v35  ;;  %v1653_v34 = vsel %vm1647_vm3, %v1640_v57, 920167782  ;;  %v6973_v19 = vshll.u32 %v1620_v47, 8  ;;  %v1918_v58 = vxor.u32 2147483648, %v1901_v25 }
 0x1d8   : > { %v1909_v33 = vmul.f32 %v1908_v60, %v1893_v24  ;;  %v1403_v8 = vshll.u32 %v6967_v53, 30  ;;  %v1652_v44 = vsel %vm1644_vm4, %v1631_v37, %v6956_v54  ;;  %vm1917_vm6 = vcmp.eq.s32.totalorder %v6940_v10, 2 }
 0x1d9   : > { %v1654_v2 = vsel %vm1646_vm5, %v1637_v3, %v1653_v34  ;;  %v1657_v26 = vsel %vm1647_vm3, %v1643_v23, 1326507024  ;;  %v774_v61 = vmul.f32 %v6583_v48, %v741_v62  ;;  %vm1645_vm7 = vcmp.lt.s32.totalorder %v6946_v39, 2 }
 0x1da   : > { %v1915_v47 = vxor.u32 2147483648, %v1909_v33  ;;  %v1404_v7 = vsub.s32 %v1400_v13, %v1403_v8  ;;  %v1656_v24 = vsel %vm1644_vm4, %v6956_v54, %v1637_v3  ;;  %v1655_v22 = vsel %vm1645_vm7, %v1652_v44, %v1654_v2 }
 0x1db   : > { %v1658_v17 = vsel %vm1646_vm5, %v1640_v57, %v1657_v26  ;;  %v1661_v32 = vand.u32 65535, %v6973_v19  ;;  %v1662_v35 = vshrl.u32 %v6973_v19, 16  ;;  %v1919_v13 = vsel %vm1917_vm6, %v1918_v58, %v1909_v33 }
 0x1dc   : > { %v1916_v48 = vsel %vm1914_vm2, %v1901_v25, %v1915_v47  ;;  %vm1405_vm8 = vcmp.lt.s32.totalorder %v1404_v7, 0  ;;  %v1406_v6 = vsub.s32 0, %v1404_v7  ;;  %v1628_v14 = vshrl.u32 %v10386_v18, %v1627_v51 }
 0x1dd   : > { %v1920_v56 = vsel %vm1913_vm15, %v1916_v48, %v1919_v13  ;;  %v1659_v28 = vsel %vm1645_vm7, %v1656_v24, %v1658_v17  ;;  %v1686_v62 = vshrl.u32 %v1655_v22, 16  ;;  %v1685_v34 = vand.u32 65535, %v1655_v22 }
 0x1de   : > { %v1921_v57 = vsel %vm1910_vm0, nan, %v1920_v56  ;;  %v1407_v60 = vsel %vm1405_vm8, %v1406_v6, %v1404_v7  ;;  %v1663_v23 = vand.u32 65535, %v1659_v28  ;;  %v1649_v33 = vsel %vm1647_vm3, %v1637_v3, 2102212464 }
 0x1df   : > { %5803 = vst [vmem:[%s6906_s5 + $0x30] sm:$0xff] %v1921_v57  ;;  %v1408_v25 = vclz %v1407_v60  ;;  %v1664_v58 = vshrl.u32 %v1659_v28, 16  ;;  %v1688_v10 = vmul.u32 %v1686_v62, %v1661_v32  ;;  %v1396_v51 = vadd.s32 %v6938_v50, %v6935_v11 }
 0x1e0   : > { %v1648_v8 = vsel %vm1644_vm4, %v1628_v14, %v1631_v37  ;;  %v7012_v44 = vadd.f32 %v6588_v49, %v774_v61  ;;  %v1426_v2 = vsub.s32 4, %v6967_v53  ;;  %v1667_v47 = vmul.u32 %v1663_v23, %v1662_v35 }
 0x1e1   : > { %v5964_v5 = vadd.s32 4294967294, %v1408_v25  ;;  %v1666_v26 = vmul.u32 %v1664_v58, %v1661_v32  ;;  %vm1304_vm9 = vcmp.lt.s32.totalorder %v6733_v59, 0  ;;  %v1650_v3 = vsel %vm1646_vm5, %v6956_v54, %v1649_v33 }
 0x1e2   : > { %v1687_v24 = vmul.u32 %v1685_v34, %v1661_v32  ;;  %v1689_v22 = vmul.u32 %v1685_v34, %v1662_v35  ;;  %v1691_v11 = vshll.u32 %v1688_v10, 16  ;;  %v1665_v50 = vmul.u32 %v1663_v23, %v1661_v32 }
 0x1e3   : > { %vm5965_vm10 = vcmp.lt.s32.totalorder %v5964_v5, 0  ;;  %v1668_v37 = vmul.u32 %v1664_v58, %v1662_v35  ;;  %v1669_v17 = vshll.u32 %v1666_v26, 16  ;;  %v1671_v61 = vshll.u32 %v1667_v47, 16 }
 0x1e4   : > { %v1411_v49 = vsel %vm5965_vm10, 0, %v5964_v5  ;;  %v1690_v48 = vmul.u32 %v1686_v62, %v1662_v35  ;;  %v1693_v13 = vshll.u32 %v1689_v22, 16  ;;  %vm1695_vm13 = vc.u32 %v1687_v24, %v1691_v11 }
 0x1e5   : > { %v1412_v6 = vsub.s32 32, %v1411_v49  ;;  %v1413_v56 = vshll.u32 %v1404_v7, %v1411_v49  ;;  %v1416_v14 = vsub.s32 4294967266, %v1411_v49  ;;  %vm1673_vm11 = vc.u32 %v1665_v50, %v1669_v17 }
 0x1e6   : > { %v1674_v28 = vsel %vm1673_vm11, 1, %v6360_v29  ;;  %v1675_v57 = vadd.s32 %v1669_v17, %v1665_v50  ;;  %v1697_v54 = vadd.s32 %v1691_v11, %v1687_v24  ;;  %v1696_v32 = vsel %vm1695_vm13, 1, %v6360_v29 }
 0x1e7   : > { %v1414_v60 = vshrl.u32 %v1396_v51, %v1412_v6  ;;  %v1417_v34 = vadd.s32 127, %v1416_v14  ;;  %v1676_v25 = vadd.s32 %v1674_v28, %v1668_v37  ;;  %v1692_v23 = vshrl.u32 %v1688_v10, 16  ;;  %v561_v6 = vpop.permute.xlu1 %560 }
 0x1e8   : > { %vm1677_vm12 = vc.u32 %v1675_v57, %v1671_v61  ;;  %v1698_v33 = vadd.s32 %v1696_v32, %v1690_v48  ;;  %vm1699_vm14 = vc.u32 %v1697_v54, %v1693_v13  ;;  %v1670_v5 = vshrl.u32 %v1666_v26, 16 }
 0x1e9   : > { %v1415_v35 = vor.u32 %v1414_v60, %v1413_v56  ;;  %v1418_v62 = vshll.u32 %v1417_v34, 23  ;;  %v1678_v7 = vsel %vm1677_vm12, 1, %v6360_v29  ;;  %v1700_v58 = vsel %vm1699_vm14, 1, %v6360_v29 }
 0x1ea   : > { %v1680_v49 = vadd.s32 %v1678_v7, %v1676_v25  ;;  %v1702_v50 = vadd.s32 %v1700_v58, %v1698_v33  ;;  %v10379_v24 = vand.u32 2147483647, %v7012_v44  ;;  %v1427_v11 = vsel %vm1304_vm9, %v1426_v2, %v6967_v53 }
 0x1eb   : > { %v1419_v51 = vor.u32 4788187, %v1418_v62  ;;  %v1150_v10 = vand.u32 2139095040, %v7012_v44  ;;  %v1672_v37 = vshrl.u32 %v1667_v47, 16  ;;  %v1694_v61 = vshrl.u32 %v1689_v22, 16 }
 0x1ec   : > { %v1681_v17 = vadd.s32 %v1680_v49, %v1670_v5  ;;  %v1703_v48 = vadd.s32 %v1702_v50, %v1692_v23  ;;  %v1422_v14 = vcvt.s32.f32 %v1415_v35  ;;  %v1651_v26 = vsel %vm1645_vm7, %v1648_v8, %v1650_v3 }
 0x1ed   : > { %v1420_v56 = vand.u32 2147483647, %v1419_v51  ;;  %v1151_v28 = vshrl.u32 %v1150_v10, 23  ;;  %v1701_v60 = vadd.s32 %v1697_v54, %v1693_v13  ;;  %v1154_v25 = vand.u32 8388607, %v10379_v24 }
 0x1ee   : > { %v1682_v57 = vadd.s32 %v1681_v17, %v1672_v37  ;;  %v1704_v34 = vadd.s32 %v1703_v48, %v1694_v61  ;;  %v743_v47 = vsel %vm320_vm1, %v6546_v31, %v561_v6  ;;  %v516_v22 = vperm.slane %v6525_v20, 7  ;;  %v7048_v20 = vld [vmem:[%s10364_s3] ss:$0 sm:$0xff]  ;;  %v7061_v10 = vld [vmem:[%s10364_s3 + $0x1] ss:$0 sm:$0xff] }
 0x1ef   : > { %v1423_v53 = vmul.f32 %v1422_v14, %v1420_v56  ;;  %v5960_v2 = vadd.s32 4294967169, %v1151_v28  ;;  %v10403_v39 = vand.u32 2147483647, %v6733_v59  ;;  %v1705_v13 = vmul.u32 %v6973_v19, %v1651_v26 }
 0x1f0   : > { %vm1707_vm15 = vc.u32 %v1682_v57, %v1701_v60  ;;  %v1708_v32 = vadd.s32 1, %v1704_v34  ;;  %527 = vperm.xlu1 %6165, %v516_v22   ;;  %521 = vperm.xlu2 %6166, %v516_v22   ;;  %v1155_v33 = vor.u32 8388608, %v1154_v25  ;;  %v776_v35 = vmul.f32 %v7048_v20, %v743_v47 }
 0x1f1   : > { %vm7038_vm0 = vcmp.le.f32.partialorder %v10403_v39, 0.7853982  ;;  %v1424_v3 = vxor.u32 2147483648, %v1423_v53  ;;  %v1157_v54 = vadd.s32 1, %v5960_v2  ;;  %vm1614_vm3 = vcmp.lt.s32.totalorder %v6789_v15, 0 }
 0x1f2   : > { %v1429_v23 = vsel %vm7038_vm0, 0, %v1427_v11  ;;  %v1709_v31 = vsel %vm1707_vm15, %v1708_v32, %v1704_v34  ;;  %v7056_v11 = vshll.u32 %v1155_v33, 8  ;;  %v7064_v37 = vadd.f32 %v7061_v10, %v776_v35 }
 0x1f3   : > { %v1425_v62 = vsel %vm1304_vm9, %v1424_v3, %v1423_v53  ;;  %v1710_v7 = vadd.s32 %v1709_v31, %v1705_v13  ;;  %vm1158_vm2 = vcmp.gt.s32.totalorder %v1157_v54, 0  ;;  %v1446_v49 = vadd.s32 3, %v1429_v23 }
 0x1f4   : > { %v1428_v19 = vsel %vm7038_vm0, %v6733_v59, %v1425_v62  ;;  %v1159_v58 = vsel %vm1158_vm2, %v1157_v54, 0  ;;  %v10406_v34 = vperm.slane %v6539_v27, 0  ;;  %v7073_v25 = vadd.s32 %v1701_v60, %v1682_v57 }
 0x1f5   : > { %v1430_v5 = vmul.f32 %v1428_v19, %v1428_v19  ;;  %v1711_v50 = vadd.s32 536870912, %v1710_v7  ;;  %v1161_v51 = vand.u32 31, %v1159_v58  ;;  %v7068_v26 = vand.u32 3, %v1446_v49 }
 0x1f6   : > { %v7076_v53 = vand.u32 65535, %v7056_v11  ;;  %v7079_v2 = vshrl.u32 %v7056_v11, 16  ;;  %v1457_v47 = vand.u32 2147483647, %v7064_v37  ;;  %v7084_v8 = vshrl.u32 %v1159_v58, 5 }
 0x1f7   : > { %v1431_v17 = vmul.f32 -0.001358992, %v1430_v5  ;;  %v1438_v61 = vmul.f32 -0.00019511016, %v1430_v5  ;;  %v1712_v48 = vshrl.u32 %v1711_v50, 30  ;;  %v7066_v6 = vsub.s32 32, %v1161_v51 }
 0x1f8   : > { %644 = vperm.xlu1 %6165, %v10406_v34   ;;  %v1164_v3 = vshll.u32 %v10386_v18, %v1161_v51  ;;  %v1167_v60 = vshll.u32 %v10380_v21, %v1161_v51  ;;  %vm1452_vm4 = vcmp.eq.s32.totalorder %v7068_v26, 2  ;;  %vm1449_vm6 = vcmp.eq.s32.totalorder %v7068_v26, 0 }
 0x1f9   : > { %v1432_v56 = vadd.f32 0.041655596, %v1431_v17  ;;  %v1439_v14 = vadd.f32 0.008332121, %v1438_v61  ;;  %v1713_v28 = vshll.u32 %v1712_v48, 30  ;;  %v1165_v57 = vshrl.u32 %v10380_v21, %v7066_v6 }
 0x1fa   : > { %v1168_v13 = vshrl.u32 %v10400_v55, %v7066_v6  ;;  %v1736_v33 = vsub.s32 4, %v1712_v48  ;;  %v1171_v35 = vshrl.u32 %v10399_v9, %v7066_v6  ;;  %v1173_v62 = vshll.u32 %v10399_v9, %v1161_v51 }
 0x1fb   : > { %v1433_v22 = vmul.f32 %v1432_v56, %v1430_v5  ;;  %v1440_v32 = vmul.f32 %v1439_v14, %v1430_v5  ;;  %v7082_v39 = vsub.s32 %v1710_v7, %v1713_v28  ;;  %v1174_v7 = vshrl.u32 %v10401_v30, %v7066_v6 }
 0x1fc   : > { %vm1448_vm7 = vcmp.lt.s32.totalorder %v7068_v26, 2  ;;  %v1177_v17 = vshrl.u32 %v10402_v16, %v7066_v6  ;;  %vm1445_vm8 = vweird.f32 %v6733_v59  ;;  %v1166_v56 = vor.u32 %v1165_v57, %v1164_v3 }
 0x1fd   : > { %v1434_v54 = vadd.f32 -0.4999988, %v1433_v22  ;;  %v1441_v23 = vadd.f32 -0.16666654, %v1440_v32  ;;  %vm1715_vm5 = vcmp.lt.s32.totalorder %v7082_v39, 0  ;;  %v1716_v31 = vsub.s32 0, %v7082_v39 }
 0x1fe   : > { %v1170_v14 = vshll.u32 %v10400_v55, %v1161_v51  ;;  %v1175_v28 = vor.u32 %v1174_v7, %v1173_v62  ;;  %v7107_v32 = vor.u32 %v1168_v13, %v1167_v60  ;;  %v1460_v24 = vand.u32 2139095040, %v7064_v37 }
 0x1ff   : > { %v1435_v58 = vmul.f32 %v1434_v54, %v1430_v5  ;;  %v1442_v49 = vmul.f32 %v1441_v23, %v1430_v5  ;;  %v1717_v50 = vsel %vm1715_vm5, %v1716_v31, %v7082_v39  ;;  %v1176_v5 = vshll.u32 %v10401_v30, %v1161_v51 }
 0x200   : > { %v1718_v61 = vclz %v1717_v50  ;;  %v7112_v23 = vsel %vm1614_vm3, %v1736_v33, %v1712_v48  ;;  %v1172_v31 = vor.u32 %v1171_v35, %v1170_v14  ;;  %vm7117_vm9 = vcmp.le.f32.partialorder %v1612_v4, 0.7853982 }
 0x201   : > { %v1436_v34 = vadd.f32 1.0, %v1435_v58  ;;  %v1443_v22 = vadd.f32 1.0, %v1442_v49  ;;  %v1178_v57 = vor.u32 %v1177_v17, %v1176_v5  ;;  %vm1182_vm10 = vcmp.lt.s32.totalorder %v7084_v8, 4 }
 0x202   : > { %v5970_v54 = vadd.s32 4294967294, %v1718_v61  ;;  %vm1179_vm13 = vcmp.lt.s32.totalorder %v7084_v8, 1  ;;  %vm1180_vm12 = vcmp.lt.s32.totalorder %v7084_v8, 2  ;;  %v1188_v51 = vsel %vm1182_vm10, %v1175_v28, 920167782 }
 0x203   : > { %v1444_v21 = vmul.f32 %v1443_v22, %v1428_v19  ;;  %v1453_v50 = vxor.u32 2147483648, %v1436_v34  ;;  %vm1181_vm14 = vcmp.lt.s32.totalorder %v7084_v8, 3  ;;  %v1187_v4 = vsel %vm1179_vm13, %v1166_v56, %v7107_v32 }
 0x204   : > { %vm5971_vm11 = vcmp.lt.s32.totalorder %v5970_v54, 0  ;;  %v1189_v7 = vsel %vm1181_vm14, %v1172_v31, %v1188_v51  ;;  %v1191_v58 = vsel %vm1179_vm13, %v7107_v32, %v1172_v31  ;;  %v1192_v49 = vsel %vm1182_vm10, %v1178_v57, 1326507024 }
 0x205   : > { %v1450_v48 = vxor.u32 2147483648, %v1444_v21  ;;  %v1721_v19 = vsel %vm5971_vm11, 0, %v5970_v54  ;;  %v1454_v60 = vsel %vm1452_vm4, %v1453_v50, %v1444_v21  ;;  %v1190_v61 = vsel %vm1180_vm12, %v1187_v4, %v1189_v7 }
 0x206   : > { %v1722_v13 = vsub.s32 32, %v1721_v19  ;;  %v1723_v33 = vshll.u32 %v7082_v39, %v1721_v19  ;;  %v1726_v35 = vsub.s32 4294967266, %v1721_v19  ;;  %v1220_v22 = vand.u32 65535, %v1190_v61 }
 0x207   : > { %v1451_v62 = vsel %vm1449_vm6, %v1436_v34, %v1450_v48  ;;  %v1193_v34 = vsel %vm1181_vm14, %v1175_v28, %v1192_v49  ;;  %v1221_v5 = vshrl.u32 %v1190_v61, 16  ;;  %v1163_v26 = vshrl.u32 %v10386_v18, %v7066_v6 }
 0x208   : > { %v1455_v21 = vsel %vm1448_vm7, %v1451_v62, %v1454_v60  ;;  %v1724_v17 = vshrl.u32 %v7073_v25, %v1722_v13  ;;  %v1727_v39 = vadd.s32 127, %v1726_v35  ;;  %v1194_v25 = vsel %vm1180_vm12, %v1191_v58, %v1193_v34 }
 0x209   : > { %v1456_v14 = vsel %vm1445_vm8, nan, %v1455_v21  ;;  %v1198_v57 = vand.u32 65535, %v1194_v25  ;;  %v1199_v51 = vshrl.u32 %v1194_v25, 16  ;;  %v1223_v48 = vmul.u32 %v1221_v5, %v7076_v53 }
 0x20a   : > { %5800 = vst [vmem:[%s6906_s5 + $0x18] sm:$0xff] %v1456_v14  ;;  %v1725_v54 = vor.u32 %v1724_v17, %v1723_v33  ;;  %v1728_v50 = vshll.u32 %v1727_v39, 23  ;;  %v1461_v59 = vshrl.u32 %v1460_v24, 23  ;;  %v1739_v28 = vsel %vm7117_vm9, 0, %v7112_v23 }
 0x20b   : > { %v1183_v4 = vsel %vm1179_vm13, %v1163_v26, %v1166_v56  ;;  %v1224_v60 = vmul.u32 %v1220_v22, %v7079_v2  ;;  %v1184_v6 = vsel %vm1182_vm10, %v1172_v31, 2102212464  ;;  %v1201_v13 = vmul.u32 %v1199_v51, %v7076_v53 }
 0x20c   : > { %v1729_v19 = vor.u32 4788187, %v1728_v50  ;;  %v1202_v33 = vmul.u32 %v1198_v57, %v7079_v2  ;;  %v1222_v35 = vmul.u32 %v1220_v22, %v7076_v53  ;;  %v1732_v62 = vcvt.s32.f32 %v1725_v54 }
 0x20d   : > { %v1225_v7 = vmul.u32 %v1221_v5, %v7079_v2  ;;  %v1226_v58 = vshll.u32 %v1223_v48, 16  ;;  %v1200_v23 = vmul.u32 %v1198_v57, %v7076_v53  ;;  %v1203_v56 = vmul.u32 %v1199_v51, %v7079_v2 }
 0x20e   : > { %v1730_v24 = vand.u32 2147483647, %v1729_v19  ;;  %v1204_v49 = vshll.u32 %v1201_v13, 16  ;;  %v1228_v21 = vshll.u32 %v1224_v60, 16  ;;  %v1206_v39 = vshll.u32 %v1202_v33, 16 }
 0x20f   : > { %vm1230_vm15 = vc.u32 %v1222_v35, %v1226_v58  ;;  %v1232_v31 = vadd.s32 %v1226_v58, %v1222_v35  ;;  %v5966_v34 = vadd.s32 4294967169, %v1461_v59  ;;  %v1185_v53 = vsel %vm1181_vm14, %v7107_v32, %v1184_v6 }
 0x210   : > { %v1733_v17 = vmul.f32 %v1732_v62, %v1730_v24  ;;  %vm1208_vm0 = vc.u32 %v1200_v23, %v1204_v49  ;;  %v1210_v61 = vadd.s32 %v1204_v49, %v1200_v23  ;;  %v1231_v14 = vsel %vm1230_vm15, 1, %v6360_v29 }
 0x211   : > { %v1209_v54 = vsel %vm1208_vm0, 1, %v6360_v29  ;;  %v1233_v5 = vadd.s32 %v1231_v14, %v1225_v7  ;;  %vm1234_vm2 = vc.u32 %v1232_v31, %v1228_v21  ;;  %v1227_v57 = vshrl.u32 %v1223_v48, 16 }
 0x212   : > { %v1734_v22 = vxor.u32 2147483648, %v1733_v17  ;;  %v1211_v2 = vadd.s32 %v1209_v54, %v1203_v56  ;;  %vm1212_vm4 = vc.u32 %v1210_v61, %v1206_v39  ;;  %v1235_v50 = vsel %vm1234_vm2, 1, %v6360_v29 }
 0x213   : > { %v1213_v25 = vsel %vm1212_vm4, 1, %v6360_v29  ;;  %v1237_v51 = vadd.s32 %v1235_v50, %v1233_v5  ;;  %v1205_v19 = vshrl.u32 %v1201_v13, 16  ;;  %v1467_v24 = vadd.s32 1, %v5966_v34 }
 0x214   : > { %v1735_v26 = vsel %vm1614_vm3, %v1734_v22, %v1733_v17  ;;  %v1215_v35 = vadd.s32 %v1213_v25, %v1211_v2  ;;  %v1756_v32 = vadd.s32 3, %v1739_v28  ;;  %v1229_v6 = vshrl.u32 %v1224_v60, 16 }
 0x215   : > { %v1738_v59 = vsel %vm7117_vm9, %v6789_v15, %v1735_v26  ;;  %v1238_v7 = vadd.s32 %v1237_v51, %v1227_v57  ;;  %v1186_v58 = vsel %vm1180_vm12, %v1183_v4, %v1185_v53  ;;  %v1207_v23 = vshrl.u32 %v1202_v33, 16 }
 0x216   : > { %v1740_v62 = vmul.f32 %v1738_v59, %v1738_v59  ;;  %v1216_v56 = vadd.s32 %v1215_v35, %v1205_v19  ;;  %vm1468_vm3 = vcmp.gt.s32.totalorder %v1467_v24, 0  ;;  %v7187_v3 = vadd.s32 %v1232_v31, %v1228_v21 }
 0x217   : > { %v1239_v17 = vadd.s32 %v1238_v7, %v1229_v6  ;;  %v1469_v39 = vsel %vm1468_vm3, %v1467_v24, 0  ;;  %v1464_v13 = vand.u32 8388607, %v1457_v47  ;;  %v1757_v8 = vand.u32 3, %v1756_v32 }
 0x218   : > { %v1741_v49 = vmul.f32 -0.001358992, %v1740_v62  ;;  %v1748_v48 = vmul.f32 -0.00019511016, %v1740_v62  ;;  %v7185_v61 = vadd.s32 %v1216_v56, %v1207_v23  ;;  %v1471_v28 = vand.u32 31, %v1469_v39 }
 0x219   : > { %v1243_v34 = vadd.s32 1, %v1239_v17  ;;  %v1240_v4 = vmul.u32 %v7056_v11, %v1186_v58  ;;  %v1465_v2 = vor.u32 8388608, %v1464_v13  ;;  %v7196_v50 = vshrl.u32 %v1469_v39, 5 }
 0x21a   : > { %v1742_v60 = vadd.f32 0.041655596, %v1741_v49  ;;  %v1749_v14 = vadd.f32 0.008332121, %v1748_v48  ;;  %vm1242_vm5 = vc.u32 %v7185_v61, %v7187_v3  ;;  %v7194_v33 = vsub.s32 32, %v1471_v28 }
 0x21b   : > { %v1244_v5 = vsel %vm1242_vm5, %v1243_v34, %v1239_v17  ;;  %vm1759_vm6 = vcmp.eq.s32.totalorder %v1757_v8, 0  ;;  %v10409_v25 = vmov 2475754826   ;;  %vm1758_vm7 = vcmp.lt.s32.totalorder %v1757_v8, 2  ;;  %v587_v17 = vpop.permute.xlu2 %586 }
 0x21c   : > { %v1743_v22 = vmul.f32 %v1742_v60, %v1740_v62  ;;  %v1750_v54 = vmul.f32 %v1749_v14, %v1740_v62  ;;  %v1245_v21 = vadd.s32 %v1244_v5, %v1240_v4  ;;  %v1475_v57 = vshrl.u32 %v10409_v25, %v7194_v33 }
 0x21d   : > { %v1478_v11 = vshrl.u32 %v10400_v55, %v7194_v33  ;;  %v1481_v51 = vshrl.u32 %v10399_v9, %v7194_v33  ;;  %v1474_v24 = vshll.u32 %v10386_v18, %v1471_v28  ;;  %v1484_v32 = vshrl.u32 %v10401_v30, %v7194_v33 }
 0x21e   : > { %v1744_v31 = vadd.f32 -0.4999988, %v1743_v22  ;;  %v1751_v53 = vadd.f32 -0.16666654, %v1750_v54  ;;  %v1246_v26 = vadd.s32 536870912, %v1245_v21  ;;  %vm1755_vm8 = vweird.f32 %v6789_v15 }
 0x21f   : > { %v1477_v7 = vshll.u32 %v10409_v25, %v1471_v28  ;;  %v1480_v58 = vshll.u32 %v10400_v55, %v1471_v28  ;;  %v1487_v23 = vshrl.u32 %v10402_v16, %v7194_v33  ;;  %v1486_v48 = vshll.u32 %v10401_v30, %v1471_v28 }
 0x220   : > { %v1745_v19 = vmul.f32 %v1744_v31, %v1740_v62  ;;  %v1752_v35 = vmul.f32 %v1751_v53, %v1740_v62  ;;  %v7208_v6 = vshrl.u32 %v1246_v26, 30  ;;  %v1483_v62 = vshll.u32 %v10399_v9, %v1471_v28 }
 0x221   : > { %v7217_v13 = vor.u32 %v1475_v57, %v1474_v24  ;;  %v7219_v60 = vor.u32 %v1478_v11, %v1477_v7  ;;  %v7221_v14 = vor.u32 %v1481_v51, %v1480_v58  ;;  %v1488_v54 = vor.u32 %v1487_v23, %v1486_v48 }
 0x222   : > { %v1746_v56 = vadd.f32 1.0, %v1745_v19  ;;  %v1753_v49 = vadd.f32 1.0, %v1752_v35  ;;  %v1248_v39 = vshll.u32 %v7208_v6, 30  ;;  %v1485_v22 = vor.u32 %v1484_v32, %v1483_v62 }
 0x223   : > { %vm1762_vm9 = vcmp.eq.s32.totalorder %v1757_v8, 2  ;;  %v7223_v31 = vshll.u32 %v1465_v2, 8  ;;  %v747_v28 = vsel %vm320_vm1, %v6572_v45, %v587_v17  ;;  %vm1489_vm10 = vcmp.lt.s32.totalorder %v7196_v50, 1 }
 0x224   : > { %v1754_v34 = vmul.f32 %v1753_v49, %v1738_v59  ;;  %v1763_v4 = vxor.u32 2147483648, %v1746_v56  ;;  %v1249_v5 = vsub.s32 %v1245_v21, %v1248_v39  ;;  %vm1491_vm11 = vcmp.lt.s32.totalorder %v7196_v50, 3 }
 0x225   : > { %vm1492_vm13 = vcmp.lt.s32.totalorder %v7196_v50, 4  ;;  %v1497_v21 = vsel %vm1489_vm10, %v7217_v13, %v7219_v60  ;;  %v1501_v57 = vsel %vm1489_vm10, %v7219_v60, %v7221_v14  ;;  %vm1490_vm14 = vcmp.lt.s32.totalorder %v7196_v50, 2 }
 0x226   : > { %v1760_v53 = vxor.u32 2147483648, %v1754_v34  ;;  %v1764_v26 = vsel %vm1762_vm9, %v1763_v4, %v1754_v34  ;;  %vm1250_vm12 = vcmp.lt.s32.totalorder %v1249_v5, 0  ;;  %v1251_v59 = vsub.s32 0, %v1249_v5 }
 0x227   : > { %v1498_v45 = vsel %vm1492_vm13, %v1485_v22, 920167782  ;;  %v1502_v11 = vsel %vm1492_vm13, %v1488_v54, 1326507024  ;;  %v1506_v23 = vand.u32 65535, %v7223_v31  ;;  %v1507_v49 = vshrl.u32 %v7223_v31, 16 }
 0x228   : > { %v1761_v2 = vsel %vm1759_vm6, %v1746_v56, %v1760_v53  ;;  %v1252_v19 = vsel %vm1250_vm12, %v1251_v59, %v1249_v5  ;;  %v1499_v35 = vsel %vm1491_vm11, %v7221_v14, %v1498_v45  ;;  %v1503_v58 = vsel %vm1491_vm11, %v1485_v22, %v1502_v11 }
 0x229   : > { %v1765_v51 = vsel %vm1758_vm7, %v1761_v2, %v1764_v26  ;;  %v1253_v32 = vclz %v1252_v19  ;;  %v1500_v7 = vsel %vm1490_vm14, %v1497_v21, %v1499_v35  ;;  %v1504_v8 = vsel %vm1490_vm14, %v1501_v57, %v1503_v58 }
 0x22a   : > { %v1766_v24 = vsel %vm1755_vm8, nan, %v1765_v51  ;;  %v1508_v62 = vand.u32 65535, %v1504_v8  ;;  %v1509_v48 = vshrl.u32 %v1504_v8, 16  ;;  %v1531_v15 = vshrl.u32 %v1500_v7, 16 }
 0x22b   : > { %5802 = vst [vmem:[%s6906_s5 + $0x28] sm:$0xff] %v1766_v24  ;;  %v5961_v56 = vadd.s32 4294967294, %v1253_v32  ;;  %v780_v17 = vmul.f32 %v7048_v20, %v747_v28  ;;  %v10382_v39 = vperm.slane %v6539_v27, 7  ;;  %v1241_v22 = vadd.s32 %v7187_v3, %v7185_v61 }
 0x22c   : > { %v1511_v34 = vmul.u32 %v1509_v48, %v1506_v23  ;;  %v1512_v4 = vmul.u32 %v1508_v62, %v1507_v49  ;;  %v1530_v53 = vand.u32 65535, %v1500_v7  ;;  %v1533_v26 = vmul.u32 %v1531_v15, %v1506_v23 }
 0x22d   : > { %vm5962_vm15 = vcmp.lt.s32.totalorder %v5961_v56, 0  ;;  %735 = vperm.xlu0 %6169, %v10382_v39   ;;  %v1510_v2 = vmul.u32 %v1508_v62, %v1506_v23  ;;  %v1513_v28 = vmul.u32 %v1509_v48, %v1507_v49  ;;  %v7267_v51 = vadd.f32 %v7061_v10, %v780_v17 }
 0x22e   : > { %v1256_v54 = vsel %vm5962_vm15, 0, %v5961_v56  ;;  %v1514_v45 = vshll.u32 %v1511_v34, 16  ;;  %v1516_v11 = vshll.u32 %v1512_v4, 16  ;;  %v1532_v24 = vmul.u32 %v1530_v53, %v1506_v23 }
 0x22f   : > { %v1257_v59 = vsub.s32 32, %v1256_v54  ;;  %v1261_v21 = vsub.s32 4294967266, %v1256_v54  ;;  %v1258_v57 = vshll.u32 %v1249_v5, %v1256_v54  ;;  %v1534_v32 = vmul.u32 %v1530_v53, %v1507_v49 }
 0x230   : > { %vm1518_vm0 = vc.u32 %v1510_v2, %v1514_v45  ;;  %v1520_v61 = vadd.s32 %v1514_v45, %v1510_v2  ;;  %v1536_v7 = vshll.u32 %v1533_v26, 16  ;;  %v1535_v62 = vmul.u32 %v1531_v15, %v1507_v49 }
 0x231   : > { %v1259_v19 = vshrl.u32 %v1241_v22, %v1257_v59  ;;  %v1262_v35 = vadd.s32 127, %v1261_v21  ;;  %v1519_v3 = vsel %vm1518_vm0, 1, %v6360_v29  ;;  %v1515_v17 = vshrl.u32 %v1511_v34, 16 }
 0x232   : > { %v1521_v56 = vadd.s32 %v1519_v3, %v1513_v28  ;;  %vm1522_vm2 = vc.u32 %v1520_v61, %v1516_v11  ;;  %vm1540_vm4 = vc.u32 %v1532_v24, %v1536_v7  ;;  %v1271_v59 = vsub.s32 4, %v7208_v6 }
 0x233   : > { %v1260_v58 = vor.u32 %v1259_v19, %v1258_v57  ;;  %v1263_v8 = vshll.u32 %v1262_v35, 23  ;;  %v1523_v5 = vsel %vm1522_vm2, 1, %v6360_v29  ;;  %v1541_v22 = vsel %vm1540_vm4, 1, %v6360_v29 }
 0x234   : > { %v1525_v54 = vadd.s32 %v1523_v5, %v1521_v56  ;;  %v1538_v21 = vshll.u32 %v1534_v32, 16  ;;  %v1542_v2 = vadd.s32 %v1536_v7, %v1532_v24  ;;  %v1543_v23 = vadd.s32 %v1541_v22, %v1535_v62 }
 0x235   : > { %v1264_v48 = vor.u32 4788187, %v1263_v8  ;;  %v1267_v45 = vcvt.s32.f32 %v1260_v58  ;;  %v2080_v28 = vand.u32 2139095040, %v7267_v51  ;;  %vm1149_vm3 = vcmp.lt.s32.totalorder %v7012_v44, 0 }
 0x236   : > { %v1526_v57 = vadd.s32 %v1525_v54, %v1515_v17  ;;  %v1473_v49 = vshrl.u32 %v10386_v18, %v7194_v33  ;;  %v1494_v15 = vsel %vm1492_vm13, %v7221_v14, 2102212464  ;;  %vm1544_vm5 = vc.u32 %v1542_v2, %v1538_v21 }
 0x237   : > { %v1265_v53 = vand.u32 2147483647, %v1264_v48  ;;  %v1517_v11 = vshrl.u32 %v1512_v4, 16  ;;  %v1545_v19 = vsel %vm1544_vm5, 1, %v6360_v29  ;;  %v2081_v35 = vshrl.u32 %v2080_v28, 23 }
 0x238   : > { %v1272_v61 = vsel %vm1149_vm3, %v1271_v59, %v7208_v6  ;;  %v1493_v3 = vsel %vm1489_vm10, %v1473_v49, %v7217_v13  ;;  %v1537_v24 = vshrl.u32 %v1533_v26, 16  ;;  %v1547_v33 = vadd.s32 %v1545_v19, %v1543_v23 }
 0x239   : > { %v1268_v34 = vmul.f32 %v1267_v45, %v1265_v53  ;;  %v1495_v14 = vsel %vm1491_vm11, %v7219_v60, %v1494_v15  ;;  %v7290_v58 = vadd.s32 %v1526_v57, %v1517_v11  ;;  %v5978_v4 = vadd.s32 4294967169, %v2081_v35 }
 0x23a   : > { %v10410_v8 = vand.u32 2147483647, %v7012_v44  ;;  %v1539_v56 = vshrl.u32 %v1534_v32, 16  ;;  %v1548_v5 = vadd.s32 %v1547_v33, %v1537_v24  ;;  %v2077_v6 = vand.u32 2147483647, %v7267_v51 }
 0x23b   : > { %v1269_v7 = vxor.u32 2147483648, %v1268_v34  ;;  %v7297_v62 = vadd.s32 %v1542_v2, %v1538_v21  ;;  %v2087_v48 = vadd.s32 1, %v5978_v4  ;;  %v1496_v60 = vsel %vm1490_vm14, %v1493_v3, %v1495_v14 }
 0x23c   : > { %vm1148_vm6 = vcmp.le.f32.partialorder %v10410_v8, 0.7853982  ;;  %v1549_v54 = vadd.s32 %v1548_v5, %v1539_v56  ;;  %v2084_v23 = vand.u32 8388607, %v2077_v6  ;;  %v1550_v45 = vmul.u32 %v7223_v31, %v1496_v60  ;;  %v600_v60 = vpop.permute.xlu2 %599 }
 0x23d   : > { %v1270_v13 = vsel %vm1149_vm3, %v1269_v7, %v1268_v34  ;;  %v1274_v26 = vsel %vm1148_vm6, 0, %v1272_v61  ;;  %vm1552_vm7 = vc.u32 %v7290_v58, %v7297_v62  ;;  %vm2088_vm8 = vcmp.gt.s32.totalorder %v2087_v48, 0 }
 0x23e   : > { %v1273_v17 = vsel %vm1148_vm6, %v7012_v44, %v1270_v13  ;;  %v1291_v32 = vadd.s32 3, %v1274_v26  ;;  %v1553_v59 = vadd.s32 1, %v1549_v54  ;;  %v2089_v53 = vsel %vm2088_vm8, %v2087_v48, 0 }
 0x23f   : > { %v1275_v22 = vmul.f32 %v1273_v17, %v1273_v17  ;;  %v2091_v57 = vand.u32 31, %v2089_v53  ;;  %v2085_v3 = vor.u32 8388608, %v2084_v23  ;;  %v7309_v24 = vshrl.u32 %v2089_v53, 5 }
 0x240   : > { %v1554_v28 = vsel %vm1552_vm7, %v1553_v59, %v1549_v54  ;;  %v1292_v11 = vand.u32 3, %v1291_v32  ;;  %vm1290_vm2 = vweird.f32 %v7012_v44  ;;  %vm1459_vm3 = vcmp.lt.s32.totalorder %v7064_v37, 0 }
 0x241   : > { %v1276_v21 = vmul.f32 -0.001358992, %v1275_v22  ;;  %v1283_v2 = vmul.f32 -0.00019511016, %v1275_v22  ;;  %v1555_v15 = vadd.s32 %v1554_v28, %v1550_v45  ;;  %v7307_v34 = vsub.s32 32, %v2091_v57 }
 0x242   : > { %v2094_v56 = vshll.u32 %v10386_v18, %v2091_v57  ;;  %vm1294_vm9 = vcmp.eq.s32.totalorder %v1292_v11, 0  ;;  %v2097_v5 = vshll.u32 %v10409_v25, %v2091_v57  ;;  %v2100_v13 = vshll.u32 %v10400_v55, %v2091_v57 }
 0x243   : > { %v1277_v50 = vadd.f32 0.041655596, %v1276_v21  ;;  %v1284_v49 = vadd.f32 0.008332121, %v1283_v2  ;;  %v1556_v61 = vadd.s32 536870912, %v1555_v15  ;;  %v2095_v33 = vshrl.u32 %v10409_v25, %v7307_v34 }
 0x244   : > { %v2098_v31 = vshrl.u32 %v10400_v55, %v7307_v34  ;;  %v2104_v7 = vshrl.u32 %v10401_v30, %v7307_v34  ;;  %v2101_v26 = vshrl.u32 %v10399_v9, %v7307_v34  ;;  %v2103_v48 = vshll.u32 %v10399_v9, %v2091_v57 }
 0x245   : > { %v1278_v19 = vmul.f32 %v1277_v50, %v1275_v22  ;;  %v1285_v35 = vmul.f32 %v1284_v49, %v1275_v22  ;;  %v7317_v8 = vshrl.u32 %v1556_v61, 30  ;;  %vm1293_vm10 = vcmp.lt.s32.totalorder %v1292_v11, 2 }
 0x246   : > { %v2106_v23 = vshll.u32 %v10401_v30, %v2091_v57  ;;  %v7327_v53 = vor.u32 %v2095_v33, %v2094_v56  ;;  %v7329_v21 = vor.u32 %v2098_v31, %v2097_v5  ;;  %v2105_v2 = vor.u32 %v2104_v7, %v2103_v48 }
 0x247   : > { %v1279_v14 = vadd.f32 -0.4999988, %v1278_v19  ;;  %v1286_v4 = vadd.f32 -0.16666654, %v1285_v35  ;;  %v1558_v59 = vshll.u32 %v7317_v8, 30  ;;  %v2107_v45 = vshrl.u32 %v10402_v16, %v7307_v34 }
 0x248   : > { %v2102_v19 = vor.u32 %v2101_v26, %v2100_v13  ;;  %vm2109_vm11 = vcmp.lt.s32.totalorder %v7309_v24, 1  ;;  %vm2112_vm13 = vcmp.lt.s32.totalorder %v7309_v24, 4  ;;  %vm1297_vm14 = vcmp.eq.s32.totalorder %v1292_v11, 2 }
 0x249   : > { %v1280_v54 = vmul.f32 %v1279_v14, %v1275_v22  ;;  %v1287_v32 = vmul.f32 %v1286_v4, %v1275_v22  ;;  %v1559_v49 = vsub.s32 %v1555_v15, %v1558_v59  ;;  %v749_v22 = vsel %vm320_vm1, %v6558_v38, %v600_v60 }
 0x24a   : > { %v2108_v35 = vor.u32 %v2107_v45, %v2106_v23  ;;  %v2117_v15 = vsel %vm2109_vm11, %v7327_v53, %v7329_v21  ;;  %v2118_v31 = vsel %vm2112_vm13, %v2105_v2, 920167782  ;;  %v782_v38 = vmul.f32 %v7048_v20, %v749_v22 }
 0x24b   : > { %v1281_v28 = vadd.f32 1.0, %v1280_v54  ;;  %v1288_v50 = vadd.f32 1.0, %v1287_v32  ;;  %vm1560_vm12 = vcmp.lt.s32.totalorder %v1559_v49, 0  ;;  %v1561_v33 = vsub.s32 0, %v1559_v49 }
 0x24c   : > { %vm2111_vm15 = vcmp.lt.s32.totalorder %v7309_v24, 3  ;;  %v7346_v4 = vshll.u32 %v2085_v3, 8  ;;  %vm2110_vm0 = vcmp.lt.s32.totalorder %v7309_v24, 2  ;;  %v2121_v48 = vsel %vm2109_vm11, %v7329_v21, %v2102_v19 }
 0x24d   : > { %v1289_v57 = vmul.f32 %v1288_v50, %v1273_v17  ;;  %v1298_v61 = vxor.u32 2147483648, %v1281_v28  ;;  %v1562_v14 = vsel %vm1560_vm12, %v1561_v33, %v1559_v49  ;;  %v2119_v5 = vsel %vm2111_vm15, %v2102_v19, %v2118_v31 }
 0x24e   : > { %v1563_v56 = vclz %v1562_v14  ;;  %v2120_v26 = vsel %vm2110_vm0, %v2117_v15, %v2119_v5  ;;  %v2122_v3 = vsel %vm2112_vm13, %v2108_v35, 1326507024  ;;  %v7362_v32 = vadd.f32 %v7061_v10, %v782_v38 }
 0x24f   : > { %v1295_v7 = vxor.u32 2147483648, %v1289_v57  ;;  %v1299_v17 = vsel %vm1297_vm14, %v1298_v61, %v1289_v57  ;;  %v1551_v23 = vadd.s32 %v7297_v62, %v7290_v58  ;;  %v2123_v45 = vsel %vm2111_vm15, %v2105_v2, %v2122_v3 }
 0x250   : > { %v5967_v54 = vadd.s32 4294967294, %v1563_v56  ;;  %v2124_v44 = vsel %vm2110_vm0, %v2121_v48, %v2123_v45  ;;  %v2150_v11 = vand.u32 65535, %v2120_v26  ;;  %v2151_v50 = vshrl.u32 %v2120_v26, 16 }
 0x251   : > { %v1296_v13 = vsel %vm1294_vm9, %v1281_v28, %v1295_v7  ;;  %v2126_v28 = vand.u32 65535, %v7346_v4  ;;  %v2127_v35 = vshrl.u32 %v7346_v4, 16  ;;  %v2128_v57 = vand.u32 65535, %v2124_v44 }
 0x252   : > { %v1300_v60 = vsel %vm1293_vm10, %v1296_v13, %v1299_v17  ;;  %vm5968_vm4 = vcmp.lt.s32.totalorder %v5967_v54, 0  ;;  %v2129_v61 = vshrl.u32 %v2124_v44, 16  ;;  %v2390_v62 = vand.u32 2139095040, %v7362_v32 }
 0x253   : > { %v1301_v59 = vsel %vm1290_vm2, nan, %v1300_v60  ;;  %v1566_v22 = vsel %vm5968_vm4, 0, %v5967_v54  ;;  %v2153_v58 = vmul.u32 %v2151_v50, %v2126_v28  ;;  %v1581_v2 = vsub.s32 4, %v7317_v8 }
 0x254   : > { %5799 = vst [vmem:[%s6906_s5 + $0x10] sm:$0xff] %v1301_v59  ;;  %v1567_v33 = vsub.s32 32, %v1566_v22  ;;  %v1571_v15 = vsub.s32 4294967266, %v1566_v22  ;;  %v2093_v31 = vshrl.u32 %v10386_v18, %v7307_v34  ;;  %v2131_v38 = vmul.u32 %v2129_v61, %v2126_v28 }
 0x255   : > { %v2132_v7 = vmul.u32 %v2128_v57, %v2127_v35  ;;  %v1568_v14 = vshll.u32 %v1559_v49, %v1566_v22  ;;  %v2154_v5 = vmul.u32 %v2150_v11, %v2127_v35  ;;  %v2114_v13 = vsel %vm2112_vm13, %v2102_v19, 2102212464 }
 0x256   : > { %v1569_v17 = vshrl.u32 %v1551_v23, %v1567_v33  ;;  %v1572_v56 = vadd.s32 127, %v1571_v15  ;;  %v2130_v26 = vmul.u32 %v2128_v57, %v2126_v28  ;;  %v2134_v48 = vshll.u32 %v2131_v38, 16 }
 0x257   : > { %v2152_v3 = vmul.u32 %v2150_v11, %v2126_v28  ;;  %v2133_v59 = vmul.u32 %v2129_v61, %v2127_v35  ;;  %v2156_v45 = vshll.u32 %v2153_v58, 16  ;;  %vm7382_vm5 = vcmp.le.f32.partialorder %v1457_v47, 0.7853982 }
 0x258   : > { %v1570_v60 = vor.u32 %v1569_v17, %v1568_v14  ;;  %v1573_v54 = vshll.u32 %v1572_v56, 23  ;;  %v2136_v49 = vshll.u32 %v2132_v7, 16  ;;  %vm2138_vm6 = vc.u32 %v2130_v26, %v2134_v48 }
 0x259   : > { %v2140_v23 = vadd.s32 %v2134_v48, %v2130_v26  ;;  %v2155_v44 = vmul.u32 %v2151_v50, %v2127_v35  ;;  %v2139_v19 = vsel %vm2138_vm6, 1, %v6360_v29  ;;  %v2158_v57 = vshll.u32 %v2154_v5, 16 }
 0x25a   : > { %v1574_v22 = vor.u32 4788187, %v1573_v54  ;;  %vm2160_vm7 = vc.u32 %v2152_v3, %v2156_v45  ;;  %v2141_v28 = vadd.s32 %v2139_v19, %v2133_v59  ;;  %v2162_v61 = vadd.s32 %v2156_v45, %v2152_v3 }
 0x25b   : > { %vm2142_vm8 = vc.u32 %v2140_v23, %v2136_v49  ;;  %v2161_v11 = vsel %vm2160_vm7, 1, %v6360_v29  ;;  %v1577_v15 = vcvt.s32.f32 %v1570_v60  ;;  %v2135_v17 = vshrl.u32 %v2131_v38, 16 }
 0x25c   : > { %v1575_v33 = vand.u32 2147483647, %v1574_v22  ;;  %v2143_v47 = vsel %vm2142_vm8, 1, %v6360_v29  ;;  %v2163_v14 = vadd.s32 %v2161_v11, %v2155_v44  ;;  %vm2164_vm9 = vc.u32 %v2162_v61, %v2158_v57 }
 0x25d   : > { %v2145_v56 = vadd.s32 %v2143_v47, %v2141_v28  ;;  %v2391_v26 = vshrl.u32 %v2390_v62, 23  ;;  %v1582_v35 = vsel %vm1459_vm3, %v1581_v2, %v7317_v8  ;;  %v2137_v48 = vshrl.u32 %v2132_v7, 16  ;;  %v580_v47 = vpop.permute.xlu1 %579 }
 0x25e   : > { %v1578_v50 = vmul.f32 %v1577_v15, %v1575_v33  ;;  %v2165_v54 = vsel %vm2164_vm9, 1, %v6360_v29  ;;  %v2157_v49 = vshrl.u32 %v2153_v58, 16  ;;  %v2113_v38 = vsel %vm2109_vm11, %v2093_v31, %v7327_v53 }
 0x25f   : > { %v2146_v59 = vadd.s32 %v2145_v56, %v2135_v17  ;;  %v2167_v3 = vadd.s32 %v2165_v54, %v2163_v14  ;;  %v5984_v45 = vadd.s32 4294967169, %v2391_v26  ;;  %v2115_v62 = vsel %vm2111_vm15, %v7329_v21, %v2114_v13 }
 0x260   : > { %v1579_v60 = vxor.u32 2147483648, %v1578_v50  ;;  %v2387_v23 = vand.u32 2147483647, %v7362_v32  ;;  %v2159_v8 = vshrl.u32 %v2154_v5, 16  ;;  %v1584_v22 = vsel %vm7382_vm5, 0, %v1582_v35 }
 0x261   : > { %v7400_v44 = vadd.s32 %v2146_v59, %v2137_v48  ;;  %v2168_v2 = vadd.s32 %v2167_v3, %v2157_v49  ;;  %v2397_v7 = vadd.s32 1, %v5984_v45  ;;  %v7406_v19 = vadd.s32 %v2162_v61, %v2158_v57 }
 0x262   : > { %v1580_v58 = vsel %vm1459_vm3, %v1579_v60, %v1578_v50  ;;  %v2116_v21 = vsel %vm2110_vm0, %v2113_v38, %v2115_v62  ;;  %v1601_v5 = vadd.s32 3, %v1584_v22  ;;  %v2394_v11 = vand.u32 8388607, %v2387_v23 }
 0x263   : > { %v1583_v53 = vsel %vm7382_vm5, %v7064_v37, %v1580_v58  ;;  %v2169_v31 = vadd.s32 %v2168_v2, %v2159_v8  ;;  %vm2172_vm10 = vc.u32 %v7400_v44, %v7406_v19  ;;  %vm2398_vm11 = vcmp.gt.s32.totalorder %v2397_v7, 0 }
 0x264   : > { %v1585_v13 = vmul.f32 %v1583_v53, %v1583_v53  ;;  %v2399_v57 = vsel %vm2398_vm11, %v2397_v7, 0  ;;  %v2170_v34 = vmul.u32 %v7346_v4, %v2116_v21  ;;  %v1602_v50 = vand.u32 3, %v1601_v5 }
 0x265   : > { %v2173_v28 = vadd.s32 1, %v2169_v31  ;;  %v2401_v15 = vand.u32 31, %v2399_v57  ;;  %v746_v35 = vsel %vm320_vm1, %v6554_v36, %v580_v47  ;;  %v2395_v49 = vor.u32 8388608, %v2394_v11 }
 0x266   : > { %v1586_v61 = vmul.f32 -0.001358992, %v1585_v13  ;;  %v1593_v33 = vmul.f32 -0.00019511016, %v1585_v13  ;;  %v7423_v3 = vshrl.u32 %v2399_v57, 5  ;;  %vm1604_vm13 = vcmp.eq.s32.totalorder %v1602_v50, 0 }
 0x267   : > { %v2174_v24 = vsel %vm2172_vm10, %v2173_v28, %v2169_v31  ;;  %v7418_v26 = vsub.s32 32, %v2401_v15  ;;  %v2404_v36 = vshll.u32 %v10386_v18, %v2401_v15  ;;  %v2407_v2 = vshll.u32 %v10409_v25, %v2401_v15 }
 0x268   : > { %v1587_v14 = vadd.f32 0.041655596, %v1586_v61  ;;  %v1594_v17 = vadd.f32 0.008332121, %v1593_v33  ;;  %v2175_v56 = vadd.s32 %v2174_v24, %v2170_v34  ;;  %v2410_v7 = vshll.u32 %v10400_v55, %v2401_v15 }
 0x269   : > { %v2405_v4 = vshrl.u32 %v10409_v25, %v7418_v26  ;;  %v2408_v45 = vshrl.u32 %v10400_v55, %v7418_v26  ;;  %v2414_v60 = vshrl.u32 %v10401_v30, %v7418_v26  ;;  %v2411_v58 = vshrl.u32 %v10399_v9, %v7418_v26 }
 0x26a   : > { %v1588_v48 = vmul.f32 %v1587_v14, %v1585_v13  ;;  %v1595_v54 = vmul.f32 %v1594_v17, %v1585_v13  ;;  %v2176_v59 = vadd.s32 536870912, %v2175_v56  ;;  %v2413_v22 = vshll.u32 %v10399_v9, %v2401_v15 }
 0x26b   : > { %vm1603_vm12 = vcmp.lt.s32.totalorder %v1602_v50, 2  ;;  %v2416_v28 = vshll.u32 %v10401_v30, %v2401_v15  ;;  %vm1600_vm14 = vweird.f32 %v7064_v37  ;;  %v7442_v11 = vor.u32 %v2405_v4, %v2404_v36 }
 0x26c   : > { %v1589_v38 = vadd.f32 -0.4999988, %v1588_v48  ;;  %v1596_v62 = vadd.f32 -0.16666654, %v1595_v54  ;;  %v7431_v8 = vshrl.u32 %v2176_v59, 30  ;;  %v7444_v57 = vor.u32 %v2408_v45, %v2407_v2 }
 0x26d   : > { %v2415_v61 = vor.u32 %v2414_v60, %v2413_v22  ;;  %v2417_v33 = vshrl.u32 %v10402_v16, %v7418_v26  ;;  %v7449_v14 = vor.u32 %v2411_v58, %v2410_v7  ;;  %vm2419_vm15 = vcmp.lt.s32.totalorder %v7423_v3, 1 }
 0x26e   : > { %v1590_v21 = vmul.f32 %v1589_v38, %v1585_v13  ;;  %v1597_v31 = vmul.f32 %v1596_v62, %v1585_v13  ;;  %v2178_v5 = vshll.u32 %v7431_v8, 30  ;;  %v779_v13 = vmul.f32 %v7048_v20, %v746_v35 }
 0x26f   : > { %v2418_v17 = vor.u32 %v2417_v33, %v2416_v28  ;;  %vm2422_vm0 = vcmp.lt.s32.totalorder %v7423_v3, 4  ;;  %vm1607_vm4 = vcmp.eq.s32.totalorder %v1602_v50, 2  ;;  %vm2079_vm3 = vcmp.lt.s32.totalorder %v7267_v51, 0 }
 0x270   : > { %v1591_v34 = vadd.f32 1.0, %v1590_v21  ;;  %v1598_v47 = vadd.f32 1.0, %v1597_v31  ;;  %v2179_v24 = vsub.s32 %v2175_v56, %v2178_v5  ;;  %v2427_v56 = vsel %vm2419_vm15, %v7442_v11, %v7444_v57 }
 0x271   : > { %v2428_v20 = vsel %vm2422_vm0, %v2415_v61, 920167782  ;;  %v7460_v35 = vshll.u32 %v2395_v49, 8  ;;  %vm2421_vm5 = vcmp.lt.s32.totalorder %v7423_v3, 3  ;;  %vm2420_vm6 = vcmp.lt.s32.totalorder %v7423_v3, 2 }
 0x272   : > { %v1599_v15 = vmul.f32 %v1598_v47, %v1583_v53  ;;  %v1608_v48 = vxor.u32 2147483648, %v1591_v34  ;;  %vm2180_vm2 = vcmp.lt.s32.totalorder %v2179_v24, 0  ;;  %v2181_v54 = vsub.s32 0, %v2179_v24 }
 0x273   : > { %v7464_v53 = vadd.f32 %v7061_v10, %v779_v13  ;;  %v2429_v38 = vsel %vm2421_vm5, %v7449_v14, %v2428_v20  ;;  %v2431_v10 = vsel %vm2419_vm15, %v7444_v57, %v7449_v14  ;;  %v2432_v36 = vsel %vm2422_vm0, %v2418_v17, 1326507024 }
 0x274   : > { %v1605_v59 = vxor.u32 2147483648, %v1599_v15  ;;  %v2182_v4 = vsel %vm2180_vm2, %v2181_v54, %v2179_v24  ;;  %v1609_v45 = vsel %vm1607_vm4, %v1608_v48, %v1599_v15  ;;  %v2430_v49 = vsel %vm2420_vm6, %v2427_v56, %v2429_v38 }
 0x275   : > { %v2183_v60 = vclz %v2182_v4  ;;  %v2171_v7 = vadd.s32 %v7406_v19, %v7400_v44  ;;  %v2436_v22 = vand.u32 65535, %v7460_v35  ;;  %v2201_v31 = vsub.s32 4, %v7431_v8 }
 0x276   : > { %v1606_v62 = vsel %vm1604_vm13, %v1591_v34, %v1605_v59  ;;  %v2433_v5 = vsel %vm2421_vm5, %v2415_v61, %v2432_v36  ;;  %v2437_v28 = vshrl.u32 %v7460_v35, 16  ;;  %v2460_v33 = vand.u32 65535, %v2430_v49 }
 0x277   : > { %v1610_v2 = vsel %vm1603_vm12, %v1606_v62, %v1609_v45  ;;  %v5979_v58 = vadd.s32 4294967294, %v2183_v60  ;;  %v2434_v50 = vsel %vm2420_vm6, %v2431_v10, %v2433_v5  ;;  %v2461_v44 = vshrl.u32 %v2430_v49, 16 }
 0x278   : > { %v1611_v21 = vsel %vm1600_vm14, nan, %v1610_v2  ;;  %v2438_v34 = vand.u32 65535, %v2434_v50  ;;  %v2439_v47 = vshrl.u32 %v2434_v50, 16  ;;  %v10383_v37 = vand.u32 2147483647, %v7464_v53 }
 0x279   : > { %5801 = vst [vmem:[%s6906_s5 + $0x20] sm:$0xff] %v1611_v21  ;;  %vm5980_vm7 = vcmp.lt.s32.totalorder %v5979_v58, 0  ;;  %v2463_v15 = vmul.u32 %v2461_v44, %v2436_v22  ;;  %v1925_v48 = vand.u32 2139095040, %v7464_v53  ;;  %vm7496_vm8 = vcmp.le.f32.partialorder %v2077_v6, 0.7853982 }
 0x27a   : > { %v2186_v19 = vsel %vm5980_vm7, 0, %v5979_v58  ;;  %v2202_v54 = vsel %vm2079_vm3, %v2201_v31, %v7431_v8  ;;  %v2403_v56 = vshrl.u32 %v10386_v18, %v7418_v26  ;;  %v2441_v20 = vmul.u32 %v2439_v47, %v2436_v22 }
 0x27b   : > { %v2187_v13 = vsub.s32 32, %v2186_v19  ;;  %v2191_v17 = vsub.s32 4294967266, %v2186_v19  ;;  %v2442_v59 = vmul.u32 %v2438_v34, %v2437_v28  ;;  %v2188_v4 = vshll.u32 %v2179_v24, %v2186_v19 }
 0x27c   : > { %v2464_v38 = vmul.u32 %v2460_v33, %v2437_v28  ;;  %v2440_v62 = vmul.u32 %v2438_v34, %v2436_v22  ;;  %v2443_v49 = vmul.u32 %v2439_v47, %v2437_v28  ;;  %v2444_v10 = vshll.u32 %v2441_v20, 16 }
 0x27d   : > { %v2189_v45 = vshrl.u32 %v2171_v7, %v2187_v13  ;;  %v2192_v60 = vadd.s32 127, %v2191_v17  ;;  %v2462_v6 = vmul.u32 %v2460_v33, %v2436_v22  ;;  %v2465_v58 = vmul.u32 %v2461_v44, %v2437_v28 }
 0x27e   : > { %v2466_v21 = vshll.u32 %v2463_v15, 16  ;;  %v2446_v5 = vshll.u32 %v2442_v59, 16  ;;  %vm2448_vm9 = vc.u32 %v2440_v62, %v2444_v10  ;;  %v2450_v8 = vadd.s32 %v2444_v10, %v2440_v62 }
 0x27f   : > { %v2190_v36 = vor.u32 %v2189_v45, %v2188_v4  ;;  %v2193_v2 = vshll.u32 %v2192_v60, 23  ;;  %v2468_v31 = vshll.u32 %v2464_v38, 16  ;;  %v2449_v39 = vsel %vm2448_vm9, 1, %v6360_v29 }
 0x280   : > { %vm2470_vm10 = vc.u32 %v2462_v6, %v2466_v21  ;;  %v2451_v24 = vadd.s32 %v2449_v39, %v2443_v49  ;;  %vm2452_vm11 = vc.u32 %v2450_v8, %v2446_v5  ;;  %v2472_v19 = vadd.s32 %v2466_v21, %v2462_v6 }
 0x281   : > { %v2194_v50 = vor.u32 4788187, %v2193_v2  ;;  %v2197_v26 = vcvt.s32.f32 %v2190_v36  ;;  %v2471_v7 = vsel %vm2470_vm10, 1, %v6360_v29  ;;  %v2453_v22 = vsel %vm2452_vm11, 1, %v6360_v29 }
 0x282   : > { %v2473_v33 = vadd.s32 %v2471_v7, %v2465_v58  ;;  %v1926_v28 = vshrl.u32 %v1925_v48, 23  ;;  %v2424_v44 = vsel %vm2422_vm0, %v7449_v14, 2102212464  ;;  %v2445_v47 = vshrl.u32 %v2441_v20, 16 }
 0x283   : > { %v2195_v34 = vand.u32 2147483647, %v2194_v50  ;;  %v2455_v13 = vadd.s32 %v2453_v22, %v2451_v24  ;;  %vm2474_vm13 = vc.u32 %v2472_v19, %v2468_v31  ;;  %v2204_v39 = vsel %vm7496_vm8, 0, %v2202_v54  ;;  %v593_v24 = vpop.permute.xlu1 %592 }
 0x284   : > { %v2475_v4 = vsel %vm2474_vm13, 1, %v6360_v29  ;;  %v5975_v45 = vadd.s32 4294967169, %v1926_v28  ;;  %v2447_v60 = vshrl.u32 %v2442_v59, 16  ;;  %v2467_v49 = vshrl.u32 %v2463_v15, 16 }
 0x285   : > { %v2198_v17 = vmul.f32 %v2197_v26, %v2195_v34  ;;  %v2456_v62 = vadd.s32 %v2455_v13, %v2445_v47  ;;  %v2477_v10 = vadd.s32 %v2475_v4, %v2473_v33  ;;  %v2423_v48 = vsel %vm2419_vm15, %v2403_v56, %v7442_v11 }
 0x286   : > { %v2425_v14 = vsel %vm2421_vm5, %v7444_v57, %v2424_v44  ;;  %v1932_v20 = vadd.s32 1, %v5975_v45  ;;  %v2469_v54 = vshrl.u32 %v2464_v38, 16  ;;  %v7524_v58 = vadd.s32 %v2472_v19, %v2468_v31 }
 0x287   : > { %v2199_v6 = vxor.u32 2147483648, %v2198_v17  ;;  %v7520_v36 = vadd.s32 %v2456_v62, %v2447_v60  ;;  %v2478_v2 = vadd.s32 %v2477_v10, %v2467_v49  ;;  %v2221_v11 = vadd.s32 3, %v2204_v39 }
 0x288   : > { %vm1933_vm12 = vcmp.gt.s32.totalorder %v1932_v20, 0  ;;  %v2426_v56 = vsel %vm2420_vm6, %v2423_v48, %v2425_v14  ;;  %v1929_v38 = vand.u32 8388607, %v10383_v37  ;;  %vm2220_vm2 = vweird.f32 %v7267_v51 }
 0x289   : > { %v2200_v59 = vsel %vm2079_vm3, %v2199_v6, %v2198_v17  ;;  %v2479_v57 = vadd.s32 %v2478_v2, %v2469_v54  ;;  %vm2482_vm14 = vc.u32 %v7520_v36, %v7524_v58  ;;  %v1934_v5 = vsel %vm1933_vm12, %v1932_v20, 0 }
 0x28a   : > { %v2203_v15 = vsel %vm7496_vm8, %v7267_v51, %v2200_v59  ;;  %v1936_v31 = vand.u32 31, %v1934_v5  ;;  %v2480_v61 = vmul.u32 %v7460_v35, %v2426_v56  ;;  %v7536_v7 = vand.u32 3, %v2221_v11 }
 0x28b   : > { %v2205_v21 = vmul.f32 %v2203_v15, %v2203_v15  ;;  %v2483_v8 = vadd.s32 1, %v2479_v57  ;;  %v1930_v28 = vor.u32 8388608, %v1929_v38  ;;  %v7540_v44 = vshrl.u32 %v1934_v5, 5 }
 0x28c   : > { %v7538_v19 = vsub.s32 32, %v1936_v31  ;;  %v748_v35 = vsel %vm320_vm1, %v6842_v63, %v593_v24  ;;  %v1939_v45 = vshll.u32 %v10386_v18, %v1936_v31  ;;  %v1942_v60 = vshll.u32 %v10409_v25, %v1936_v31 }
 0x28d   : > { %v2206_v50 = vmul.f32 -0.001358992, %v2205_v21  ;;  %v2213_v26 = vmul.f32 -0.00019511016, %v2205_v21  ;;  %v2484_v3 = vsel %vm2482_vm14, %v2483_v8, %v2479_v57  ;;  %v1948_v49 = vshll.u32 %v10399_v9, %v1936_v31 }
 0x28e   : > { %v2485_v33 = vadd.s32 %v2484_v3, %v2480_v61  ;;  %v1940_v47 = vshrl.u32 %v10409_v25, %v7538_v19  ;;  %v1943_v13 = vshrl.u32 %v10400_v55, %v7538_v19  ;;  %v1946_v62 = vshrl.u32 %v10399_v9, %v7538_v19 }
 0x28f   : > { %v2207_v34 = vadd.f32 0.041655596, %v2206_v50  ;;  %v2214_v22 = vadd.f32 0.008332121, %v2213_v26  ;;  %v1949_v10 = vshrl.u32 %v10401_v30, %v7538_v19  ;;  %v1945_v63 = vshll.u32 %v10400_v55, %v1936_v31  ;;  %v7576_v50 = vld [vmem:[%s10364_s3] ss:$0 sm:$0xff] }
 0x290   : > { %v2486_v4 = vadd.s32 536870912, %v2485_v33  ;;  %vm2224_vm15 = vcmp.eq.s32.totalorder %v7536_v7, 0  ;;  %v7560_v20 = vor.u32 %v1940_v47, %v1939_v45  ;;  %v7562_v54 = vor.u32 %v1943_v13, %v1942_v60 }
 0x291   : > { %v2208_v17 = vmul.f32 %v2207_v34, %v2205_v21  ;;  %v2215_v39 = vmul.f32 %v2214_v22, %v2205_v21  ;;  %v1950_v2 = vor.u32 %v1949_v10, %v1948_v49  ;;  %v1952_v59 = vshrl.u32 %v10402_v16, %v7538_v19 }
 0x292   : > { %v7556_v14 = vshrl.u32 %v2486_v4, 30  ;;  %vm2223_vm0 = vcmp.lt.s32.totalorder %v7536_v7, 2  ;;  %v7568_v38 = vshll.u32 %v1930_v28, 8  ;;  %v1947_v5 = vor.u32 %v1946_v62, %v1945_v63 }
 0x293   : > { %v2209_v6 = vadd.f32 -0.4999988, %v2208_v17  ;;  %v2216_v48 = vadd.f32 -0.16666654, %v2215_v39  ;;  %v1951_v8 = vshll.u32 %v10401_v30, %v1936_v31  ;;  %vm1954_vm4 = vcmp.lt.s32.totalorder %v7540_v44, 1 }
 0x294   : > { %v2488_v57 = vshll.u32 %v7556_v14, 30  ;;  %vm1957_vm3 = vcmp.lt.s32.totalorder %v7540_v44, 4  ;;  %vm1956_vm5 = vcmp.lt.s32.totalorder %v7540_v44, 3  ;;  %v1962_v31 = vsel %vm1954_vm4, %v7560_v20, %v7562_v54 }
 0x295   : > { %v2210_v11 = vmul.f32 %v2209_v6, %v2205_v21  ;;  %v2217_v56 = vmul.f32 %v2216_v48, %v2205_v21  ;;  %v781_v21 = vmul.f32 %v7576_v50, %v748_v35  ;;  %v1953_v3 = vor.u32 %v1952_v59, %v1951_v8  ;;  %v7594_v35 = vld [vmem:[%s10364_s3 + $0x1] ss:$0 sm:$0xff] }
 0x296   : > { %v2489_v24 = vsub.s32 %v2485_v33, %v2488_v57  ;;  %v1963_v34 = vsel %vm1957_vm3, %v1950_v2, 920167782  ;;  %vm2227_vm7 = vcmp.eq.s32.totalorder %v7536_v7, 2  ;;  %v1971_v13 = vand.u32 65535, %v7568_v38 }
 0x297   : > { %v2211_v26 = vadd.f32 1.0, %v2210_v11  ;;  %v2218_v61 = vadd.f32 1.0, %v2217_v56  ;;  %v1964_v33 = vsel %vm1956_vm5, %v1947_v5, %v1963_v34  ;;  %v7597_v17 = vadd.f32 %v7594_v35, %v781_v21 }
 0x298   : > { %vm2490_vm6 = vcmp.lt.s32.totalorder %v2489_v24, 0  ;;  %v2491_v47 = vsub.s32 0, %v2489_v24  ;;  %vm1955_vm8 = vcmp.lt.s32.totalorder %v7540_v44, 2  ;;  %v1966_v4 = vsel %vm1954_vm4, %v7562_v54, %v1947_v5 }
 0x299   : > { %v2219_v22 = vmul.f32 %v2218_v61, %v2203_v15  ;;  %v2228_v28 = vxor.u32 2147483648, %v2211_v26  ;;  %v1965_v62 = vsel %vm1955_vm8, %v1962_v31, %v1964_v33  ;;  %v1967_v49 = vsel %vm1957_vm3, %v1953_v3, 1326507024 }
 0x29a   : > { %v2492_v15 = vsel %vm2490_vm6, %v2491_v47, %v2489_v24  ;;  %v1968_v6 = vsel %vm1956_vm5, %v1950_v2, %v1967_v49  ;;  %v1995_v48 = vand.u32 65535, %v1965_v62  ;;  %v1996_v63 = vshrl.u32 %v1965_v62, 16 }
 0x29b   : > { %v2225_v39 = vxor.u32 2147483648, %v2219_v22  ;;  %v2229_v45 = vsel %vm2227_vm7, %v2228_v28, %v2219_v22  ;;  %v2493_v60 = vclz %v2492_v15  ;;  %v2481_v11 = vadd.s32 %v7524_v58, %v7520_v36 }
 0x29c   : > { %v1972_v57 = vshrl.u32 %v7568_v38, 16  ;;  %v1938_v21 = vshrl.u32 %v10386_v18, %v7538_v19  ;;  %v1969_v2 = vsel %vm1955_vm8, %v1966_v4, %v1968_v6  ;;  %v1998_v3 = vmul.u32 %v1996_v63, %v1971_v13 }
 0x29d   : > { %v2226_v10 = vsel %vm2224_vm15, %v2211_v26, %v2225_v39  ;;  %v5985_v56 = vadd.s32 4294967294, %v2493_v60  ;;  %v2232_v26 = vand.u32 2147483647, %v7597_v17  ;;  %v1973_v7 = vand.u32 65535, %v1969_v2 }
 0x29e   : > { %v2230_v59 = vsel %vm2223_vm0, %v2226_v10, %v2229_v45  ;;  %v1974_v61 = vshrl.u32 %v1969_v2, 16  ;;  %v2511_v58 = vsub.s32 4, %v7556_v14  ;;  %v1999_v31 = vmul.u32 %v1995_v48, %v1972_v57 }
 0x29f   : > { %v2231_v8 = vsel %vm2220_vm2, nan, %v2230_v59  ;;  %vm5986_vm9 = vcmp.lt.s32.totalorder %v5985_v56, 0  ;;  %v2235_v51 = vand.u32 2139095040, %v7597_v17  ;;  %v1958_v19 = vsel %vm1954_vm4, %v1938_v21, %v7560_v20 }
 0x2a0   : > { %5805 = vst [vmem:[%s6906_s5 + $0x40] sm:$0xff] %v2231_v8  ;;  %v2496_v36 = vsel %vm5986_vm9, 0, %v5985_v56  ;;  %v1959_v28 = vsel %vm1957_vm3, %v1947_v5, 2102212464  ;;  %vm2389_vm10 = vcmp.lt.s32.totalorder %v7362_v32, 0  ;;  %v1976_v47 = vmul.u32 %v1974_v61, %v1971_v13 }
 0x2a1   : > { %v2497_v34 = vsub.s32 32, %v2496_v36  ;;  %v2501_v22 = vsub.s32 4294967266, %v2496_v36  ;;  %v1977_v33 = vmul.u32 %v1973_v7, %v1972_v57  ;;  %v1997_v39 = vmul.u32 %v1995_v48, %v1971_v13 }
 0x2a2   : > { %v2001_v15 = vshll.u32 %v1998_v3, 16  ;;  %v2498_v4 = vshll.u32 %v2489_v24, %v2496_v36  ;;  %v2000_v62 = vmul.u32 %v1996_v63, %v1972_v57  ;;  %v1975_v49 = vmul.u32 %v1973_v7, %v1971_v13 }
 0x2a3   : > { %v2499_v45 = vshrl.u32 %v2481_v11, %v2497_v34  ;;  %v2502_v60 = vadd.s32 127, %v2501_v22  ;;  %v1978_v10 = vmul.u32 %v1974_v61, %v1972_v57  ;;  %v1979_v6 = vshll.u32 %v1976_v47, 16 }
 0x2a4   : > { %v2003_v59 = vshll.u32 %v1999_v31, 16  ;;  %v1981_v20 = vshll.u32 %v1977_v33, 16  ;;  %vm2005_vm11 = vc.u32 %v1997_v39, %v2001_v15  ;;  %v2007_v2 = vadd.s32 %v2001_v15, %v1997_v39 }
 0x2a5   : > { %v2500_v56 = vor.u32 %v2499_v45, %v2498_v4  ;;  %v2503_v8 = vshll.u32 %v2502_v60, 23  ;;  %vm1983_vm13 = vc.u32 %v1975_v49, %v1979_v6  ;;  %v1985_v5 = vadd.s32 %v1979_v6, %v1975_v49 }
 0x2a6   : > { %v2006_v21 = vsel %vm2005_vm11, 1, %v6360_v29  ;;  %v1960_v24 = vsel %vm1956_vm5, %v7562_v54, %v1959_v28  ;;  %v1984_v48 = vsel %vm1983_vm13, 1, %v6360_v29  ;;  %vm2009_vm14 = vc.u32 %v2007_v2, %v2003_v59 }
 0x2a7   : > { %v2504_v37 = vor.u32 4788187, %v2503_v8  ;;  %v2008_v13 = vadd.s32 %v2006_v21, %v2000_v62  ;;  %v2507_v63 = vcvt.s32.f32 %v2500_v56  ;;  %v1986_v11 = vadd.s32 %v1984_v48, %v1978_v10 }
 0x2a8   : > { %vm1987_vm12 = vc.u32 %v1985_v5, %v1981_v20  ;;  %v2010_v61 = vsel %vm2009_vm14, 1, %v6360_v29  ;;  %v2236_v36 = vshrl.u32 %v2235_v51, 23  ;;  %v1980_v34 = vshrl.u32 %v1976_v47, 16 }
 0x2a9   : > { %v2505_v57 = vand.u32 2147483647, %v2504_v37  ;;  %v1988_v7 = vsel %vm1987_vm12, 1, %v6360_v29  ;;  %v2002_v39 = vshrl.u32 %v1998_v3, 16  ;;  %v2012_v15 = vadd.s32 %v2010_v61, %v2008_v13 }
 0x2aa   : > { %v1990_v22 = vadd.s32 %v1988_v7, %v1986_v11  ;;  %v2512_v54 = vsel %vm2389_vm10, %v2511_v58, %v7556_v14  ;;  %v5981_v28 = vadd.s32 4294967169, %v2236_v36  ;;  %v646_v45 = vperm.slane %v6539_v27, 1 }
 0x2ab   : > { %v2508_v4 = vmul.f32 %v2507_v63, %v2505_v57  ;;  %v1982_v60 = vshrl.u32 %v1977_v33, 16  ;;  %v2004_v37 = vshrl.u32 %v1999_v31, 16  ;;  %v2013_v49 = vadd.s32 %v2012_v15, %v2002_v39 }
 0x2ac   : > { %v1991_v62 = vadd.s32 %v1990_v22, %v1980_v34  ;;  %vm7645_vm15 = vcmp.le.f32.partialorder %v2387_v23, 0.7853982  ;;  %v1961_v47 = vsel %vm1955_vm8, %v1958_v19, %v1960_v24  ;;  %v2242_v10 = vadd.s32 1, %v5981_v28  ;;  %651 = vperm.xlu2 %6166, %v646_v45   ;;  %657 = vperm.xlu1 %6165, %v646_v45  }
 0x2ad   : > { %v2509_v3 = vxor.u32 2147483648, %v2508_v4  ;;  %v7653_v58 = vadd.s32 %v2007_v2, %v2003_v59  ;;  %v2014_v33 = vadd.s32 %v2013_v49, %v2004_v37  ;;  %v2239_v31 = vand.u32 8388607, %v2232_v26  ;;  %v619_v59 = vpop.permute.xlu2 %618 }
 0x2ae   : > { %v7651_v14 = vadd.s32 %v1991_v62, %v1982_v60  ;;  %v2514_v6 = vsel %vm7645_vm15, 0, %v2512_v54  ;;  %vm2243_vm0 = vcmp.gt.s32.totalorder %v2242_v10, 0  ;;  %v2015_v8 = vmul.u32 %v7568_v38, %v1961_v47 }
 0x2af   : > { %v2510_v23 = vsel %vm2389_vm10, %v2509_v3, %v2508_v4  ;;  %v2018_v19 = vadd.s32 1, %v2014_v33  ;;  %v2244_v20 = vsel %vm2243_vm0, %v2242_v10, 0  ;;  %v2531_v5 = vadd.s32 3, %v2514_v6 }
 0x2b0   : > { %v2513_v44 = vsel %vm7645_vm15, %v7362_v32, %v2510_v23  ;;  %vm2017_vm2 = vc.u32 %v7651_v14, %v7653_v58  ;;  %v2240_v2 = vor.u32 8388608, %v2239_v31  ;;  %v2246_v24 = vand.u32 31, %v2244_v20 }
 0x2b1   : > { %v2515_v56 = vmul.f32 %v2513_v44, %v2513_v44  ;;  %v2019_v21 = vsel %vm2017_vm2, %v2018_v19, %v2014_v33  ;;  %v752_v11 = vsel %vm320_vm1, %v6592_v52, %v619_v59  ;;  %v10417_v34 = vperm.slane %v6539_v27, 2 }
 0x2b2   : > { %v2020_v63 = vadd.s32 %v2019_v21, %v2015_v8  ;;  %v7670_v57 = vsub.s32 32, %v2246_v24  ;;  %v2532_v38 = vand.u32 3, %v2531_v5  ;;  %v7675_v22 = vshll.u32 %v2240_v2, 8 }
 0x2b3   : > { %v2516_v48 = vmul.f32 -0.001358992, %v2515_v56  ;;  %v2523_v13 = vmul.f32 -0.00019511016, %v2515_v56  ;;  %v785_v39 = vmul.f32 %v7576_v50, %v752_v11  ;;  %v7682_v28 = vshrl.u32 %v2244_v20, 5 }
 0x2b4   : > { %v2021_v36 = vadd.s32 536870912, %v2020_v63  ;;  %664 = vperm.xlu2 %6166, %v10417_v34   ;;  %6167 = vset.pattern.permute.xlu1 %v6506_v1  ;;  %v2250_v52 = vshrl.u32 %v10409_v25, %v7670_v57  ;;  %v2253_v45 = vshrl.u32 %v10400_v55, %v7670_v57  ;;  %v2256_v60 = vshrl.u32 %v10399_v9, %v7670_v57 }
 0x2b5   : > { %v2517_v7 = vadd.f32 0.041655596, %v2516_v48  ;;  %v2524_v61 = vadd.f32 0.008332121, %v2523_v13  ;;  %v2259_v62 = vshrl.u32 %v10401_v30, %v7670_v57  ;;  %v2249_v3 = vshll.u32 %v10386_v18, %v2246_v24 }
 0x2b6   : > { %v7678_v54 = vshrl.u32 %v2021_v36, 30  ;;  %vm2534_vm4 = vcmp.eq.s32.totalorder %v2532_v38, 0  ;;  %v2252_v47 = vshll.u32 %v10409_v25, %v2246_v24  ;;  %v2255_v10 = vshll.u32 %v10400_v55, %v2246_v24 }
 0x2b7   : > { %v2518_v15 = vmul.f32 %v2517_v7, %v2515_v56  ;;  %v2525_v4 = vmul.f32 %v2524_v61, %v2515_v56  ;;  %v2258_v33 = vshll.u32 %v10399_v9, %v2246_v24  ;;  %v2262_v31 = vshrl.u32 %v10402_v16, %v7670_v57 }
 0x2b8   : > { %v2023_v51 = vshll.u32 %v7678_v54, 30  ;;  %vm2533_vm3 = vcmp.lt.s32.totalorder %v2532_v38, 2  ;;  %v2251_v59 = vor.u32 %v2250_v52, %v2249_v3  ;;  %vm2530_vm5 = vweird.f32 %v7362_v32 }
 0x2b9   : > { %v2519_v37 = vadd.f32 -0.4999988, %v2518_v15  ;;  %v2526_v49 = vadd.f32 -0.16666654, %v2525_v4  ;;  %v7700_v8 = vor.u32 %v2253_v45, %v2252_v47  ;;  %v2257_v20 = vor.u32 %v2256_v60, %v2255_v10 }
 0x2ba   : > { %v7697_v19 = vsub.s32 %v2020_v63, %v2023_v51  ;;  %v2260_v5 = vor.u32 %v2259_v62, %v2258_v33  ;;  %v2261_v21 = vshll.u32 %v10401_v30, %v2246_v24  ;;  %vm2537_vm7 = vcmp.eq.s32.totalorder %v2532_v38, 2 }
 0x2bb   : > { %v2520_v23 = vmul.f32 %v2519_v37, %v2515_v56  ;;  %v2527_v6 = vmul.f32 %v2526_v49, %v2515_v56  ;;  %vm2264_vm8 = vcmp.lt.s32.totalorder %v7682_v28, 1  ;;  %v7708_v63 = vadd.f32 %v7594_v35, %v785_v39 }
 0x2bc   : > { %vm2025_vm6 = vcmp.lt.s32.totalorder %v7697_v19, 0  ;;  %v2026_v13 = vsub.s32 0, %v7697_v19  ;;  %6168 = vset.pattern.permute.xlu2 %v6512_v12  ;;  %v2263_v56 = vor.u32 %v2262_v31, %v2261_v21  ;;  %vm2267_vm9 = vcmp.lt.s32.totalorder %v7682_v28, 4 }
 0x2bd   : > { %v2521_v2 = vadd.f32 1.0, %v2520_v23  ;;  %v2528_v48 = vadd.f32 1.0, %v2527_v6  ;;  %vm1924_vm10 = vcmp.lt.s32.totalorder %v7464_v53, 0  ;;  %vm2266_vm11 = vcmp.lt.s32.totalorder %v7682_v28, 3 }
 0x2be   : > { %v2027_v61 = vsel %vm2025_vm6, %v2026_v13, %v7697_v19  ;;  %v2272_v36 = vsel %vm2264_vm8, %v2251_v59, %v7700_v8  ;;  %v2273_v34 = vsel %vm2267_vm9, %v2260_v5, 920167782  ;;  %v2281_v4 = vand.u32 65535, %v7675_v22 }
 0x2bf   : > { %v2529_v11 = vmul.f32 %v2528_v48, %v2513_v44  ;;  %v2538_v7 = vxor.u32 2147483648, %v2521_v2  ;;  %v2028_v24 = vclz %v2027_v61  ;;  %v2016_v44 = vadd.s32 %v7653_v58, %v7651_v14 }
 0x2c0   : > { %v2274_v15 = vsel %vm2266_vm11, %v2257_v20, %v2273_v34  ;;  %v2046_v45 = vsub.s32 4, %v7678_v54  ;;  %vm2265_vm13 = vcmp.lt.s32.totalorder %v7682_v28, 2  ;;  %v2276_v60 = vsel %vm2264_vm8, %v7700_v8, %v2257_v20 }
 0x2c1   : > { %v2535_v39 = vxor.u32 2147483648, %v2529_v11  ;;  %v5976_v52 = vadd.s32 4294967294, %v2028_v24  ;;  %v2539_v37 = vsel %vm2537_vm7, %v2538_v7, %v2529_v11  ;;  %v2275_v14 = vsel %vm2265_vm13, %v2272_v36, %v2274_v15 }
 0x2c2   : > { %v2277_v58 = vsel %vm2267_vm9, %v2263_v56, 1326507024  ;;  %v2305_v3 = vand.u32 65535, %v2275_v14  ;;  %v2306_v31 = vshrl.u32 %v2275_v14, 16  ;;  %v2282_v21 = vshrl.u32 %v7675_v22, 16 }
 0x2c3   : > { %v2536_v62 = vsel %vm2534_vm4, %v2521_v2, %v2535_v39  ;;  %vm5977_vm12 = vcmp.lt.s32.totalorder %v5976_v52, 0  ;;  %v2278_v51 = vsel %vm2266_vm11, %v2260_v5, %v2277_v58  ;;  %v2248_v5 = vshrl.u32 %v10386_v18, %v7670_v57 }
 0x2c4   : > { %v2540_v49 = vsel %vm2533_vm3, %v2536_v62, %v2539_v37  ;;  %v2031_v10 = vsel %vm5977_vm12, 0, %v5976_v52  ;;  %v2279_v33 = vsel %vm2265_vm13, %v2276_v60, %v2278_v51  ;;  %v2308_v13 = vmul.u32 %v2306_v31, %v2281_v4 }
 0x2c5   : > { %v2541_v47 = vsel %vm2530_vm5, nan, %v2540_v49  ;;  %v2032_v23 = vsub.s32 32, %v2031_v10  ;;  %v2036_v6 = vsub.s32 4294967266, %v2031_v10  ;;  %v2283_v38 = vand.u32 65535, %v2279_v33 }
 0x2c6   : > { %5807 = vst [vmem:[%s6906_s5 + $0x50] sm:$0xff] %v2541_v47  ;;  %v2033_v2 = vshll.u32 %v7697_v19, %v2031_v10  ;;  %v2284_v48 = vshrl.u32 %v2279_v33, 16  ;;  %v2309_v7 = vmul.u32 %v2305_v3, %v2282_v21  ;;  %v2047_v61 = vsel %vm1924_vm10, %v2046_v45, %v7678_v54 }
 0x2c7   : > { %v2034_v32 = vshrl.u32 %v2016_v44, %v2032_v23  ;;  %v2037_v56 = vadd.s32 127, %v2036_v6  ;;  %v2287_v11 = vmul.u32 %v2283_v38, %v2282_v21  ;;  %v2268_v24 = vsel %vm2264_vm8, %v2248_v5, %v2251_v59 }
 0x2c8   : > { %v2286_v36 = vmul.u32 %v2284_v48, %v2281_v4  ;;  %v2311_v34 = vshll.u32 %v2308_v13, 16  ;;  %v2269_v57 = vsel %vm2267_vm9, %v2257_v20, 2102212464  ;;  %v2307_v15 = vmul.u32 %v2305_v3, %v2281_v4 }
 0x2c9   : > { %v2035_v39 = vor.u32 %v2034_v32, %v2033_v2  ;;  %v2038_v19 = vshll.u32 %v2037_v56, 23  ;;  %v2285_v52 = vmul.u32 %v2283_v38, %v2281_v4  ;;  %v2288_v44 = vmul.u32 %v2284_v48, %v2282_v21 }
 0x2ca   : > { %v2289_v60 = vshll.u32 %v2286_v36, 16  ;;  %v2310_v62 = vmul.u32 %v2306_v31, %v2282_v21  ;;  %v2291_v14 = vshll.u32 %v2287_v11, 16  ;;  %v2313_v58 = vshll.u32 %v2309_v7, 16 }
 0x2cb   : > { %v2039_v37 = vor.u32 4788187, %v2038_v19  ;;  %vm2315_vm14 = vc.u32 %v2307_v15, %v2311_v34  ;;  %v2317_v45 = vadd.s32 %v2311_v34, %v2307_v15  ;;  %v2042_v51 = vcvt.s32.f32 %v2035_v39 }
 0x2cc   : > { %vm2293_vm15 = vc.u32 %v2285_v52, %v2289_v60  ;;  %v2295_v54 = vadd.s32 %v2289_v60, %v2285_v52  ;;  %v2316_v59 = vsel %vm2315_vm14, 1, %v6360_v29  ;;  %v2270_v20 = vsel %vm2266_vm11, %v7700_v8, %v2269_v57 }
 0x2cd   : > { %v2040_v49 = vand.u32 2147483647, %v2039_v37  ;;  %v2294_v47 = vsel %vm2293_vm15, 1, %v6360_v29  ;;  %v2318_v10 = vadd.s32 %v2316_v59, %v2310_v62  ;;  %vm2319_vm2 = vc.u32 %v2317_v45, %v2313_v58 }
 0x2ce   : > { %v2296_v4 = vadd.s32 %v2294_v47, %v2288_v44  ;;  %vm2297_vm0 = vc.u32 %v2295_v54, %v2291_v14  ;;  %v2320_v31 = vsel %vm2319_vm2, 1, %v6360_v29  ;;  %v2855_v23 = vand.u32 2139095040, %v7708_v63 }
 0x2cf   : > { %v2043_v3 = vmul.f32 %v2042_v51, %v2040_v49  ;;  %v2298_v33 = vsel %vm2297_vm0, 1, %v6360_v29  ;;  %v2290_v6 = vshrl.u32 %v2286_v36, 16  ;;  %v2312_v38 = vshrl.u32 %v2308_v13, 16 }
 0x2d0   : > { %v2300_v21 = vadd.s32 %v2298_v33, %v2296_v4  ;;  %v2322_v2 = vadd.s32 %v2320_v31, %v2318_v10  ;;  %v10418_v5 = vand.u32 2147483647, %v7464_v53  ;;  %v2852_v32 = vand.u32 2147483647, %v7708_v63 }
 0x2d1   : > { %v2044_v8 = vxor.u32 2147483648, %v2043_v3  ;;  %v2856_v56 = vshrl.u32 %v2855_v23, 23  ;;  %v2292_v34 = vshrl.u32 %v2287_v11, 16  ;;  %v2314_v19 = vshrl.u32 %v2309_v7, 16 }
 0x2d2   : > { %vm7764_vm4 = vcmp.le.f32.partialorder %v10418_v5, 0.7853982  ;;  %v2301_v39 = vadd.s32 %v2300_v21, %v2290_v6  ;;  %v2323_v57 = vadd.s32 %v2322_v2, %v2312_v38  ;;  %v2271_v15 = vsel %vm2265_vm13, %v2268_v24, %v2270_v20  ;;  %v632_v24 = vpop.permute.xlu2 %631 }
 0x2d3   : > { %v2045_v36 = vsel %vm1924_vm10, %v2044_v8, %v2043_v3  ;;  %v2049_v13 = vsel %vm7764_vm4, 0, %v2047_v61  ;;  %v5993_v52 = vadd.s32 4294967169, %v2856_v56  ;;  %v2321_v62 = vadd.s32 %v2317_v45, %v2313_v58 }
 0x2d4   : > { %v2048_v44 = vsel %vm7764_vm4, %v7464_v53, %v2045_v36  ;;  %v2302_v60 = vadd.s32 %v2301_v39, %v2292_v34  ;;  %v2324_v11 = vadd.s32 %v2323_v57, %v2314_v19  ;;  %v2066_v14 = vadd.s32 3, %v2049_v13 }
 0x2d5   : > { %v2050_v37 = vmul.f32 %v2048_v44, %v2048_v44  ;;  %v2862_v7 = vadd.s32 1, %v5993_v52  ;;  %v2859_v59 = vand.u32 8388607, %v2852_v32  ;;  %v2325_v28 = vmul.u32 %v7675_v22, %v2271_v15 }
 0x2d6   : > { %vm2327_vm3 = vc.u32 %v2302_v60, %v2321_v62  ;;  %v2328_v54 = vadd.s32 1, %v2324_v11  ;;  %v2067_v45 = vand.u32 3, %v2066_v14  ;;  %v754_v33 = vsel %vm320_vm1, %v6568_v43, %v632_v24 }
 0x2d7   : > { %v2051_v61 = vmul.f32 -0.001358992, %v2050_v37  ;;  %v2058_v49 = vmul.f32 -0.00019511016, %v2050_v37  ;;  %vm2863_vm5 = vcmp.gt.s32.totalorder %v2862_v7, 0  ;;  %v2860_v4 = vor.u32 8388608, %v2859_v59 }
 0x2d8   : > { %v2329_v51 = vsel %vm2327_vm3, %v2328_v54, %v2324_v11  ;;  %v2864_v47 = vsel %vm2863_vm5, %v2862_v7, 0  ;;  %v787_v5 = vmul.f32 %v7576_v50, %v754_v33  ;;  %vm2069_vm6 = vcmp.eq.s32.totalorder %v2067_v45, 0 }
 0x2d9   : > { %v2052_v10 = vadd.f32 0.041655596, %v2051_v61  ;;  %v2059_v20 = vadd.f32 0.008332121, %v2058_v49  ;;  %v2330_v58 = vadd.s32 %v2329_v51, %v2325_v28  ;;  %v2866_v3 = vand.u32 31, %v2864_v47 }
 0x2da   : > { %vm2072_vm7 = vcmp.eq.s32.totalorder %v2067_v45, 2  ;;  %v7789_v48 = vshrl.u32 %v2864_v47, 5  ;;  %v7795_v56 = vshll.u32 %v2860_v4, 8  ;;  %vm2068_vm8 = vcmp.lt.s32.totalorder %v2067_v45, 2 }
 0x2db   : > { %v2053_v31 = vmul.f32 %v2052_v10, %v2050_v37  ;;  %v2060_v23 = vmul.f32 %v2059_v20, %v2050_v37  ;;  %v2331_v6 = vadd.s32 536870912, %v2330_v58  ;;  %v7784_v21 = vsub.s32 32, %v2866_v3 }
 0x2dc   : > { %v2869_v57 = vshll.u32 %v10386_v18, %v2866_v3  ;;  %vm2065_vm9 = vweird.f32 %v7464_v53  ;;  %v2872_v36 = vshll.u32 %v10409_v25, %v2866_v3  ;;  %v2875_v13 = vshll.u32 %v10400_v55, %v2866_v3 }
 0x2dd   : > { %v2054_v22 = vadd.f32 -0.4999988, %v2053_v31  ;;  %v2061_v38 = vadd.f32 -0.16666654, %v2060_v23  ;;  %v7786_v2 = vshrl.u32 %v2331_v6, 30  ;;  %v2870_v8 = vshrl.u32 %v10409_v25, %v7784_v21 }
 0x2de   : > { %v2873_v43 = vshrl.u32 %v10400_v55, %v7784_v21  ;;  %v2878_v15 = vshll.u32 %v10399_v9, %v2866_v3  ;;  %v2879_v52 = vshrl.u32 %v10401_v30, %v7784_v21  ;;  %v2882_v49 = vshrl.u32 %v10402_v16, %v7784_v21 }
 0x2df   : > { %v2055_v34 = vmul.f32 %v2054_v22, %v2050_v37  ;;  %v2062_v39 = vmul.f32 %v2061_v38, %v2050_v37  ;;  %v2333_v19 = vshll.u32 %v7786_v2, 30  ;;  %v2876_v37 = vshrl.u32 %v10399_v9, %v7784_v21 }
 0x2e0   : > { %v2871_v54 = vor.u32 %v2870_v8, %v2869_v57  ;;  %v2874_v59 = vor.u32 %v2873_v43, %v2872_v36  ;;  %v2880_v61 = vor.u32 %v2879_v52, %v2878_v15  ;;  %v2326_v47 = vadd.s32 %v2321_v62, %v2302_v60 }
 0x2e1   : > { %v2056_v11 = vadd.f32 1.0, %v2055_v34  ;;  %v2063_v7 = vadd.f32 1.0, %v2062_v39  ;;  %v2334_v14 = vsub.s32 %v2330_v58, %v2333_v19  ;;  %v2881_v10 = vshll.u32 %v10401_v30, %v2866_v3 }
 0x2e2   : > { %v2901_v20 = vand.u32 65535, %v7795_v56  ;;  %v7812_v58 = vadd.f32 %v7594_v35, %v787_v5  ;;  %v2877_v31 = vor.u32 %v2876_v37, %v2875_v13  ;;  %v2902_v23 = vshrl.u32 %v7795_v56, 16 }
 0x2e3   : > { %v2064_v28 = vmul.f32 %v2063_v7, %v2048_v44  ;;  %v2073_v24 = vxor.u32 2147483648, %v2056_v11  ;;  %vm2335_vm10 = vcmp.lt.s32.totalorder %v2334_v14, 0  ;;  %v2336_v51 = vsub.s32 0, %v2334_v14 }
 0x2e4   : > { %vm2234_vm11 = vcmp.lt.s32.totalorder %v7597_v17, 0  ;;  %v2883_v44 = vor.u32 %v2882_v49, %v2881_v10  ;;  %vm2884_vm13 = vcmp.lt.s32.totalorder %v7789_v48, 1  ;;  %vm2887_vm12 = vcmp.lt.s32.totalorder %v7789_v48, 4 }
 0x2e5   : > { %v2070_v4 = vxor.u32 2147483648, %v2064_v28  ;;  %v2337_v33 = vsel %vm2335_vm10, %v2336_v51, %v2334_v14  ;;  %v2074_v62 = vsel %vm2072_vm7, %v2073_v24, %v2064_v28  ;;  %v2892_v3 = vsel %vm2884_vm13, %v2871_v54, %v2874_v59 }
 0x2e6   : > { %v2338_v6 = vclz %v2337_v33  ;;  %v2893_v22 = vsel %vm2887_vm12, %v2880_v61, 920167782  ;;  %vm2886_vm14 = vcmp.lt.s32.totalorder %v7789_v48, 3  ;;  %v3165_v8 = vand.u32 2139095040, %v7812_v58 }
 0x2e7   : > { %v2071_v60 = vsel %vm2069_vm6, %v2056_v11, %v2070_v4  ;;  %v2356_v34 = vsub.s32 4, %v7786_v2  ;;  %vm2885_vm15 = vcmp.lt.s32.totalorder %v7789_v48, 2  ;;  %v2894_v39 = vsel %vm2886_vm14, %v2877_v31, %v2893_v22 }
 0x2e8   : > { %v2075_v38 = vsel %vm2068_vm8, %v2071_v60, %v2074_v62  ;;  %v5982_v5 = vadd.s32 4294967294, %v2338_v6  ;;  %v2895_v45 = vsel %vm2885_vm15, %v2892_v3, %v2894_v39  ;;  %v2896_v19 = vsel %vm2884_vm13, %v2874_v59, %v2877_v31 }
 0x2e9   : > { %v2076_v43 = vsel %vm2065_vm9, nan, %v2075_v38  ;;  %v2897_v57 = vsel %vm2887_vm12, %v2883_v44, 1326507024  ;;  %v2925_v13 = vand.u32 65535, %v2895_v45  ;;  %v2926_v15 = vshrl.u32 %v2895_v45, 16 }
 0x2ea   : > { %5804 = vst [vmem:[%s6906_s5 + $0x38] sm:$0xff] %v2076_v43  ;;  %vm5983_vm0 = vcmp.lt.s32.totalorder %v5982_v5, 0  ;;  %v2898_v36 = vsel %vm2886_vm14, %v2880_v61, %v2897_v57  ;;  %v2868_v7 = vshrl.u32 %v10386_v18, %v7784_v21  ;;  %v2889_v49 = vsel %vm2887_vm12, %v2877_v31, 2102212464 }
 0x2eb   : > { %v2341_v53 = vsel %vm5983_vm0, 0, %v5982_v5  ;;  %v2899_v37 = vsel %vm2885_vm15, %v2896_v19, %v2898_v36  ;;  %v2928_v51 = vmul.u32 %v2926_v15, %v2901_v20  ;;  %v2929_v61 = vmul.u32 %v2925_v13, %v2902_v23 }
 0x2ec   : > { %v2342_v52 = vsub.s32 32, %v2341_v53  ;;  %v2346_v11 = vsub.s32 4294967266, %v2341_v53  ;;  %v2903_v28 = vand.u32 65535, %v2899_v37  ;;  %v2904_v24 = vshrl.u32 %v2899_v37, 16 }
 0x2ed   : > { %v2343_v10 = vshll.u32 %v2334_v14, %v2341_v53  ;;  %v2357_v6 = vsel %vm2234_vm11, %v2356_v34, %v7786_v2  ;;  %v2888_v21 = vsel %vm2884_vm13, %v2868_v7, %v2871_v54  ;;  %v2890_v31 = vsel %vm2886_vm14, %v2874_v59, %v2889_v49 }
 0x2ee   : > { %v2344_v4 = vshrl.u32 %v2326_v47, %v2342_v52  ;;  %v2347_v33 = vadd.s32 127, %v2346_v11  ;;  %v2906_v44 = vmul.u32 %v2904_v24, %v2901_v20  ;;  %v2907_v60 = vmul.u32 %v2903_v28, %v2902_v23 }
 0x2ef   : > { %v2931_v22 = vshll.u32 %v2928_v51, 16  ;;  %vm7857_vm2 = vcmp.le.f32.partialorder %v2232_v26, 0.7853982  ;;  %v2905_v47 = vmul.u32 %v2903_v28, %v2901_v20  ;;  %v2927_v2 = vmul.u32 %v2925_v13, %v2901_v20 }
 0x2f0   : > { %v2345_v62 = vor.u32 %v2344_v4, %v2343_v10  ;;  %v2348_v3 = vshll.u32 %v2347_v33, 23  ;;  %v2909_v38 = vshll.u32 %v2906_v44, 16  ;;  %v2930_v5 = vmul.u32 %v2926_v15, %v2902_v23 }
 0x2f1   : > { %v2908_v54 = vmul.u32 %v2904_v24, %v2902_v23  ;;  %v2911_v34 = vshll.u32 %v2907_v60, 16  ;;  %v2933_v39 = vshll.u32 %v2929_v61, 16  ;;  %vm2935_vm3 = vc.u32 %v2927_v2, %v2931_v22 }
 0x2f2   : > { %v2349_v43 = vor.u32 4788187, %v2348_v3  ;;  %vm2913_vm4 = vc.u32 %v2905_v47, %v2909_v38  ;;  %v2915_v45 = vadd.s32 %v2909_v38, %v2905_v47  ;;  %v2937_v19 = vadd.s32 %v2931_v22, %v2927_v2 }
 0x2f3   : > { %v2352_v57 = vcvt.s32.f32 %v2345_v62  ;;  %v2914_v53 = vsel %vm2913_vm4, 1, %v6360_v29  ;;  %v2936_v26 = vsel %vm2935_vm3, 1, %v6360_v29  ;;  %v2932_v23 = vshrl.u32 %v2928_v51, 16 }
 0x2f4   : > { %v2350_v59 = vand.u32 2147483647, %v2349_v43  ;;  %v2916_v36 = vadd.s32 %v2914_v53, %v2908_v54  ;;  %vm2917_vm5 = vc.u32 %v2915_v45, %v2911_v34  ;;  %v2938_v52 = vadd.s32 %v2936_v26, %v2930_v5 }
 0x2f5   : > { %vm2939_vm6 = vc.u32 %v2937_v19, %v2933_v39  ;;  %v2918_v13 = vsel %vm2917_vm5, 1, %v6360_v29  ;;  %v2910_v11 = vshrl.u32 %v2906_v44, 16  ;;  %v3166_v49 = vshrl.u32 %v3165_v8, 23 }
 0x2f6   : > { %v2353_v20 = vmul.f32 %v2352_v57, %v2350_v59  ;;  %v2940_v15 = vsel %vm2939_vm6, 1, %v6360_v29  ;;  %v2920_v7 = vadd.s32 %v2918_v13, %v2916_v36  ;;  %v2912_v24 = vshrl.u32 %v2907_v60, 16  ;;  %v613_v57 = vpop.permute.xlu1 %612 }
 0x2f7   : > { %v2942_v37 = vadd.s32 %v2940_v15, %v2938_v52  ;;  %v3162_v10 = vand.u32 2147483647, %v7812_v58  ;;  %v672_v4 = vperm.slane %v6539_v27, 3  ;;  %v2934_v62 = vshrl.u32 %v2929_v61, 16 }
 0x2f8   : > { %v2354_v28 = vxor.u32 2147483648, %v2353_v20  ;;  %v2921_v33 = vadd.s32 %v2920_v7, %v2910_v11  ;;  %v5999_v22 = vadd.s32 4294967169, %v3166_v49  ;;  %v2359_v51 = vsel %vm7857_vm2, 0, %v2357_v6 }
 0x2f9   : > { %v2943_v3 = vadd.s32 %v2942_v37, %v2932_v23  ;;  %v2891_v44 = vsel %vm2885_vm15, %v2888_v21, %v2890_v31  ;;  %v7873_v8 = vadd.s32 %v2937_v19, %v2933_v39  ;;  %677 = vperm.xlu1 %6167, %v672_v4   ;;  %683 = vperm.xlu2 %6168, %v672_v4   ;;  %v2376_v43 = vadd.s32 3, %v2359_v51 }
 0x2fa   : > { %v2355_v47 = vsel %vm2234_vm11, %v2354_v28, %v2353_v20  ;;  %v7878_v61 = vadd.s32 %v2921_v33, %v2912_v24  ;;  %v3172_v2 = vadd.s32 1, %v5999_v22  ;;  %v2945_v31 = vmul.u32 %v7795_v56, %v2891_v44 }
 0x2fb   : > { %v2358_v60 = vsel %vm7857_vm2, %v7597_v17, %v2355_v47  ;;  %v2944_v38 = vadd.s32 %v2943_v3, %v2934_v62  ;;  %v3169_v14 = vand.u32 8388607, %v3162_v10  ;;  %v2377_v53 = vand.u32 3, %v2376_v43 }
 0x2fc   : > { %v2360_v5 = vmul.f32 %v2358_v60, %v2358_v60  ;;  %vm2947_vm7 = vc.u32 %v7878_v61, %v7873_v8  ;;  %vm3173_vm8 = vcmp.gt.s32.totalorder %v3172_v2, 0  ;;  %v751_v56 = vsel %vm320_vm1, %v6564_v41, %v613_v57 }
 0x2fd   : > { %v2948_v6 = vadd.s32 1, %v2944_v38  ;;  %v3174_v54 = vsel %vm3173_vm8, %v3172_v2, 0  ;;  %v3170_v13 = vor.u32 8388608, %v3169_v14  ;;  %vm2379_vm9 = vcmp.eq.s32.totalorder %v2377_v53, 0 }
 0x2fe   : > { %v2361_v48 = vmul.f32 -0.001358992, %v2360_v5  ;;  %v2368_v21 = vmul.f32 -0.00019511016, %v2360_v5  ;;  %v3176_v39 = vand.u32 31, %v3174_v54  ;;  %v7887_v23 = vshrl.u32 %v3174_v54, 5 }
 0x2ff   : > { %v2949_v34 = vsel %vm2947_vm7, %v2948_v6, %v2944_v38  ;;  %vm2378_vm10 = vcmp.lt.s32.totalorder %v2377_v53, 2  ;;  %vm2375_vm11 = vweird.f32 %v7597_v17  ;;  %vm2382_vm12 = vcmp.eq.s32.totalorder %v2377_v53, 2 }
 0x300   : > { %v2362_v45 = vadd.f32 0.041655596, %v2361_v48  ;;  %v2369_v19 = vadd.f32 0.008332121, %v2368_v21  ;;  %v2950_v59 = vadd.s32 %v2949_v34, %v2945_v31  ;;  %v7885_v26 = vsub.s32 32, %v3176_v39 }
 0x301   : > { %v3179_v49 = vshll.u32 %v10386_v18, %v3176_v39  ;;  %v3182_v3 = vshll.u32 %v10409_v25, %v3176_v39  ;;  %v3185_v22 = vshll.u32 %v10400_v55, %v3176_v39  ;;  %v3188_v47 = vshll.u32 %v10399_v9, %v3176_v39 }
 0x302   : > { %v2363_v36 = vmul.f32 %v2362_v45, %v2360_v5  ;;  %v2370_v52 = vmul.f32 %v2369_v19, %v2360_v5  ;;  %v2951_v20 = vadd.s32 536870912, %v2950_v59  ;;  %v3180_v37 = vshrl.u32 %v10409_v25, %v7885_v26 }
 0x303   : > { %v3183_v28 = vshrl.u32 %v10400_v55, %v7885_v26  ;;  %v3186_v24 = vshrl.u32 %v10399_v9, %v7885_v26  ;;  %v3189_v4 = vshrl.u32 %v10401_v30, %v7885_v26  ;;  %v3191_v51 = vshll.u32 %v10401_v30, %v3176_v39 }
 0x304   : > { %v2364_v15 = vadd.f32 -0.4999988, %v2363_v36  ;;  %v2371_v11 = vadd.f32 -0.16666654, %v2370_v52  ;;  %v7892_v7 = vshrl.u32 %v2951_v20, 30  ;;  %v3192_v44 = vshrl.u32 %v10402_v16, %v7885_v26 }
 0x305   : > { %v7913_v6 = vor.u32 %v3183_v28, %v3182_v3  ;;  %v3187_v48 = vor.u32 %v3186_v24, %v3185_v22  ;;  %v3190_v21 = vor.u32 %v3189_v4, %v3188_v47  ;;  %vm3194_vm14 = vcmp.lt.s32.totalorder %v7887_v23, 1 }
 0x306   : > { %v2365_v41 = vmul.f32 %v2364_v15, %v2360_v5  ;;  %v2372_v33 = vmul.f32 %v2371_v11, %v2360_v5  ;;  %v2953_v62 = vshll.u32 %v7892_v7, 30  ;;  %v7911_v5 = vor.u32 %v3180_v37, %v3179_v49 }
 0x307   : > { %v3193_v31 = vor.u32 %v3192_v44, %v3191_v51  ;;  %v7916_v39 = vshll.u32 %v3170_v13, 8  ;;  %v784_v45 = vmul.f32 %v7576_v50, %v751_v56  ;;  %vm3196_vm15 = vcmp.lt.s32.totalorder %v7887_v23, 3 }
 0x308   : > { %v2366_v38 = vadd.f32 1.0, %v2365_v41  ;;  %v2373_v2 = vadd.f32 1.0, %v2372_v33  ;;  %v2954_v43 = vsub.s32 %v2950_v59, %v2953_v62  ;;  %vm3197_vm0 = vcmp.lt.s32.totalorder %v7887_v23, 4 }
 0x309   : > { %v3203_v52 = vsel %vm3197_vm0, %v3190_v21, 920167782  ;;  %v3206_v13 = vsel %vm3194_vm14, %v7913_v6, %v3187_v48  ;;  %v3207_v56 = vsel %vm3197_vm0, %v3193_v31, 1326507024  ;;  %vm3195_vm2 = vcmp.lt.s32.totalorder %v7887_v23, 2 }
 0x30a   : > { %v2374_v54 = vmul.f32 %v2373_v2, %v2358_v60  ;;  %v2383_v34 = vxor.u32 2147483648, %v2366_v38  ;;  %vm2955_vm13 = vcmp.lt.s32.totalorder %v2954_v43, 0  ;;  %v2956_v14 = vsub.s32 0, %v2954_v43 }
 0x30b   : > { %v3202_v60 = vsel %vm3194_vm14, %v7911_v5, %v7913_v6  ;;  %v3204_v50 = vsel %vm3196_vm15, %v3187_v48, %v3203_v52  ;;  %v7938_v37 = vadd.f32 %v7594_v35, %v784_v45  ;;  %v3208_v24 = vsel %vm3196_vm15, %v3190_v21, %v3207_v56 }
 0x30c   : > { %v2380_v19 = vxor.u32 2147483648, %v2374_v54  ;;  %v2957_v59 = vsel %vm2955_vm13, %v2956_v14, %v2954_v43  ;;  %v2384_v57 = vsel %vm2382_vm12, %v2383_v34, %v2374_v54  ;;  %v3205_v28 = vsel %vm3195_vm2, %v3202_v60, %v3204_v50 }
 0x30d   : > { %v2958_v36 = vclz %v2957_v59  ;;  %v3211_v4 = vand.u32 65535, %v7916_v39  ;;  %v3209_v53 = vsel %vm3195_vm2, %v3206_v13, %v3208_v24  ;;  %v3235_v41 = vand.u32 65535, %v3205_v28 }
 0x30e   : > { %v2381_v20 = vsel %vm2379_vm9, %v2366_v38, %v2380_v19  ;;  %v3236_v33 = vshrl.u32 %v3205_v28, 16  ;;  %v3212_v62 = vshrl.u32 %v7916_v39, 16  ;;  %v3213_v17 = vand.u32 65535, %v3209_v53 }
 0x30f   : > { %v2385_v15 = vsel %vm2378_vm10, %v2381_v20, %v2384_v57  ;;  %v5994_v11 = vadd.s32 4294967294, %v2958_v36  ;;  %v3214_v3 = vshrl.u32 %v3209_v53, 16  ;;  %v2946_v22 = vadd.s32 %v7873_v8, %v7878_v61 }
 0x310   : > { %v2386_v49 = vsel %vm2375_vm11, nan, %v2385_v15  ;;  %v2700_v44 = vand.u32 2139095040, %v7938_v37  ;;  %vm2854_vm3 = vcmp.lt.s32.totalorder %v7708_v63, 0  ;;  %v3178_v2 = vshrl.u32 %v10386_v18, %v7885_v26 }
 0x311   : > { %5806 = vst [vmem:[%s6906_s5 + $0x48] sm:$0xff] %v2386_v49  ;;  %vm5995_vm4 = vcmp.lt.s32.totalorder %v5994_v11, 0  ;;  %v3216_v21 = vmul.u32 %v3214_v3, %v3211_v4  ;;  %v3217_v31 = vmul.u32 %v3213_v17, %v3212_v62  ;;  %v3238_v14 = vmul.u32 %v3236_v33, %v3211_v4 }
 0x312   : > { %v2961_v35 = vsel %vm5995_vm4, 0, %v5994_v11  ;;  %v3239_v45 = vmul.u32 %v3235_v41, %v3212_v62  ;;  %v2976_v19 = vsub.s32 4, %v7892_v7  ;;  %v3199_v8 = vsel %vm3197_vm0, %v3187_v48, 2102212464  ;;  %v7967_v11 = vpop.permute.xlu0 %443 }
 0x313   : > { %v2962_v47 = vsub.s32 32, %v2961_v35  ;;  %v2966_v51 = vsub.s32 4294967266, %v2961_v35  ;;  %v2963_v38 = vshll.u32 %v2954_v43, %v2961_v35  ;;  %v3215_v61 = vmul.u32 %v3213_v17, %v3211_v4 }
 0x314   : > { %v3219_v59 = vshll.u32 %v3216_v21, 16  ;;  %v3237_v60 = vmul.u32 %v3235_v41, %v3211_v4  ;;  %v3241_v43 = vshll.u32 %v3238_v14, 16  ;;  %vm7962_vm5 = vcmp.le.f32.partialorder %v2852_v32, 0.7853982 }
 0x315   : > { %v2964_v54 = vshrl.u32 %v2946_v22, %v2962_v47  ;;  %v2967_v34 = vadd.s32 127, %v2966_v51  ;;  %v3218_v52 = vmul.u32 %v3214_v3, %v3212_v62  ;;  %v3221_v20 = vshll.u32 %v3217_v31, 16 }
 0x316   : > { %vm3223_vm6 = vc.u32 %v3215_v61, %v3219_v59  ;;  %v3225_v50 = vadd.s32 %v3219_v59, %v3215_v61  ;;  %v3240_v48 = vmul.u32 %v3236_v33, %v3212_v62  ;;  %v3243_v15 = vshll.u32 %v3239_v45, 16 }
 0x317   : > { %v2965_v57 = vor.u32 %v2964_v54, %v2963_v38  ;;  %v2968_v36 = vshll.u32 %v2967_v34, 23  ;;  %v3224_v56 = vsel %vm3223_vm6, 1, %v6360_v29  ;;  %vm3245_vm8 = vc.u32 %v3237_v60, %v3241_v43 }
 0x318   : > { %v3226_v49 = vadd.s32 %v3224_v56, %v3218_v52  ;;  %vm3227_vm7 = vc.u32 %v3225_v50, %v3221_v20  ;;  %v3247_v28 = vadd.s32 %v3241_v43, %v3237_v60  ;;  %v3246_v53 = vsel %vm3245_vm8, 1, %v6360_v29  ;;  %v626_v60 = vpop.permute.xlu1 %625 }
 0x319   : > { %v2969_v13 = vor.u32 4788187, %v2968_v36  ;;  %v2972_v32 = vcvt.s32.f32 %v2965_v57  ;;  %v3228_v4 = vsel %vm3227_vm7, 1, %v6360_v29  ;;  %v3220_v41 = vshrl.u32 %v3216_v21, 16 }
 0x31a   : > { %v3230_v35 = vadd.s32 %v3228_v4, %v3226_v49  ;;  %v3248_v17 = vadd.s32 %v3246_v53, %v3240_v48  ;;  %vm3249_vm9 = vc.u32 %v3247_v28, %v3243_v15  ;;  %v2977_v33 = vsel %vm2854_vm3, %v2976_v19, %v7892_v7  ;;  %v7997_v43 = vpop.permute.xlu0 %475 }
 0x31b   : > { %v2970_v24 = vand.u32 2147483647, %v2969_v13  ;;  %v3250_v62 = vsel %vm3249_vm9, 1, %v6360_v29  ;;  %v2701_v22 = vshrl.u32 %v2700_v44, 23  ;;  %v3222_v47 = vshrl.u32 %v3217_v31, 16 }
 0x31c   : > { %v3231_v51 = vadd.s32 %v3230_v35, %v3220_v41  ;;  %v3242_v38 = vshrl.u32 %v3238_v14, 16  ;;  %v3252_v54 = vadd.s32 %v3250_v62, %v3248_v17  ;;  %v3198_v21 = vsel %vm3194_vm14, %v3178_v2, %v7911_v5 }
 0x31d   : > { %v2973_v3 = vmul.f32 %v2972_v32, %v2970_v24  ;;  %v3200_v61 = vsel %vm3196_vm15, %v7913_v6, %v3199_v8  ;;  %v5990_v59 = vadd.s32 4294967169, %v2701_v22  ;;  %v3244_v7 = vshrl.u32 %v3239_v45, 16 }
 0x31e   : > { %v7981_v57 = vadd.s32 %v3231_v51, %v3222_v47  ;;  %v3253_v19 = vadd.s32 %v3252_v54, %v3242_v38  ;;  %v10384_v44 = vand.u32 2147483647, %v7938_v37  ;;  %v2979_v14 = vsel %vm7962_vm5, 0, %v2977_v33 }
 0x31f   : > { %v2974_v34 = vxor.u32 2147483648, %v2973_v3  ;;  %v7988_v36 = vadd.s32 %v3247_v28, %v3243_v15  ;;  %v2707_v5 = vadd.s32 1, %v5990_v59  ;;  %v3201_v2 = vsel %vm3195_vm2, %v3198_v21, %v3200_v61 }
 0x320   : > { %v3254_v45 = vadd.s32 %v3253_v19, %v3244_v7  ;;  %v2996_v52 = vadd.s32 3, %v2979_v14  ;;  %v2704_v50 = vand.u32 8388607, %v10384_v44  ;;  %v3255_v23 = vmul.u32 %v7916_v39, %v3201_v2  ;;  %v8012_v39 = vld [vmem:[%s10364_s3] ss:$0 sm:$0xff] }
 0x321   : > { %v2975_v31 = vsel %vm2854_vm3, %v2974_v34, %v2973_v3  ;;  %vm3257_vm10 = vc.u32 %v7981_v57, %v7988_v36  ;;  %vm2708_vm11 = vcmp.gt.s32.totalorder %v2707_v5, 0  ;;  %v753_v49 = vsel %vm320_vm1, %v6927_v40, %v626_v60 }
 0x322   : > { %v2978_v6 = vsel %vm7962_vm5, %v7708_v63, %v2975_v31  ;;  %v3258_v20 = vadd.s32 1, %v3254_v45  ;;  %v2709_v13 = vsel %vm2708_vm11, %v2707_v5, 0  ;;  %v8007_v53 = vand.u32 3, %v2996_v52  ;;  %v8032_v2 = vpop.permute.xlu0 %508 }
 0x323   : > { %v2980_v8 = vmul.f32 %v2978_v6, %v2978_v6  ;;  %v2711_v48 = vand.u32 31, %v2709_v13  ;;  %v2705_v41 = vor.u32 8388608, %v2704_v50  ;;  %v786_v33 = vmul.f32 %v8012_v39, %v753_v49 }
 0x324   : > { %v3259_v15 = vsel %vm3257_vm10, %v3258_v20, %v3254_v45  ;;  %v8015_v62 = vshrl.u32 %v2709_v13, 5  ;;  %vm2999_vm13 = vcmp.eq.s32.totalorder %v8007_v53, 0  ;;  %vm2998_vm12 = vcmp.lt.s32.totalorder %v8007_v53, 2 }
 0x325   : > { %v2981_v26 = vmul.f32 -0.001358992, %v2980_v8  ;;  %v2988_v56 = vmul.f32 -0.00019511016, %v2980_v8  ;;  %v3260_v32 = vadd.s32 %v3259_v15, %v3255_v23  ;;  %v8005_v4 = vsub.s32 32, %v2711_v48 }
 0x326   : > { %v2714_v34 = vshll.u32 %v10386_v18, %v2711_v48  ;;  %v2717_v21 = vshll.u32 %v10409_v25, %v2711_v48  ;;  %v2720_v61 = vshll.u32 %v10400_v55, %v2711_v48  ;;  %v2723_v7 = vshll.u32 %v10399_v9, %v2711_v48 }
 0x327   : > { %v2982_v28 = vadd.f32 0.041655596, %v2981_v26  ;;  %v2989_v24 = vadd.f32 0.008332121, %v2988_v56  ;;  %v3261_v3 = vadd.s32 536870912, %v3260_v32  ;;  %v2715_v40 = vshrl.u32 %v10409_v25, %v8005_v4 }
 0x328   : > { %v2718_v22 = vshrl.u32 %v10400_v55, %v8005_v4  ;;  %v2724_v47 = vshrl.u32 %v10401_v30, %v8005_v4  ;;  %v2721_v59 = vshrl.u32 %v10399_v9, %v8005_v4  ;;  %v2726_v5 = vshll.u32 %v10401_v30, %v2711_v48 }
 0x329   : > { %v2983_v35 = vmul.f32 %v2982_v28, %v2980_v8  ;;  %v2990_v17 = vmul.f32 %v2989_v24, %v2980_v8  ;;  %v3262_v54 = vshrl.u32 %v3261_v3, 30  ;;  %vm2995_vm14 = vweird.f32 %v7708_v63 }
 0x32a   : > { %vm3164_vm15 = vcmp.lt.s32.totalorder %v7812_v58, 0  ;;  %v8036_v45 = vor.u32 %v2715_v40, %v2714_v34  ;;  %v8038_v60 = vor.u32 %v2718_v22, %v2717_v21  ;;  %v2725_v52 = vor.u32 %v2724_v47, %v2723_v7 }
 0x32b   : > { %v2984_v51 = vadd.f32 -0.4999988, %v2983_v35  ;;  %v2991_v38 = vadd.f32 -0.16666654, %v2990_v17  ;;  %v3263_v14 = vshll.u32 %v3262_v54, 30  ;;  %v2727_v20 = vshrl.u32 %v10402_v16, %v8005_v4 }
 0x32c   : > { %vm3002_vm0 = vcmp.eq.s32.totalorder %v8007_v53, 2  ;;  %v8043_v26 = vor.u32 %v2721_v59, %v2720_v61  ;;  %vm2729_vm2 = vcmp.lt.s32.totalorder %v8015_v62, 1  ;;  %vm2732_vm4 = vcmp.lt.s32.totalorder %v8015_v62, 4  ;;  %v8101_v53 = vpop.permute.xlu0 %638 }
 0x32d   : > { %v2985_v19 = vmul.f32 %v2984_v51, %v2980_v8  ;;  %v2992_v31 = vmul.f32 %v2991_v38, %v2980_v8  ;;  %v3264_v13 = vsub.s32 %v3260_v32, %v3263_v14  ;;  %v2728_v56 = vor.u32 %v2727_v20, %v2726_v5 }
 0x32e   : > { %vm8049_vm5 = vcmp.le.f32.partialorder %v3162_v10, 0.7853982  ;;  %v2737_v28 = vsel %vm2729_vm2, %v8036_v45, %v8038_v60  ;;  %v2738_v24 = vsel %vm2732_vm4, %v2725_v52, 920167782  ;;  %v8059_v32 = vshll.u32 %v2705_v41, 8 }
 0x32f   : > { %v2986_v8 = vadd.f32 1.0, %v2985_v19  ;;  %v2993_v50 = vadd.f32 1.0, %v2992_v31  ;;  %vm3265_vm3 = vcmp.lt.s32.totalorder %v3264_v13, 0  ;;  %v3266_v15 = vsub.s32 0, %v3264_v13 }
 0x330   : > { %v3286_v3 = vsub.s32 4, %v3262_v54  ;;  %vm2731_vm6 = vcmp.lt.s32.totalorder %v8015_v62, 3  ;;  %vm2730_vm7 = vcmp.lt.s32.totalorder %v8015_v62, 2  ;;  %v2741_v51 = vsel %vm2729_vm2, %v8038_v60, %v8043_v26 }
 0x331   : > { %v2994_v23 = vmul.f32 %v2993_v50, %v2978_v6  ;;  %v3003_v48 = vxor.u32 2147483648, %v2986_v8  ;;  %v8064_v6 = vld [vmem:[%s10364_s3 + $0x1] ss:$0 sm:$0xff]  ;;  %v3267_v17 = vsel %vm3265_vm3, %v3266_v15, %v3264_v13  ;;  %v2739_v41 = vsel %vm2731_vm6, %v8043_v26, %v2738_v24 }
 0x332   : > { %v8067_v10 = vadd.f32 %v8064_v6, %v786_v33  ;;  %v3268_v22 = vclz %v3267_v17  ;;  %v2740_v47 = vsel %vm2730_vm7, %v2737_v28, %v2739_v41  ;;  %v2742_v38 = vsel %vm2732_vm4, %v2728_v56, 1326507024 }
 0x333   : > { %v3000_v35 = vxor.u32 2147483648, %v2994_v23  ;;  %v3004_v40 = vsel %vm3002_vm0, %v3003_v48, %v2994_v23  ;;  %v3256_v21 = vadd.s32 %v7988_v36, %v7981_v57  ;;  %v2746_v59 = vand.u32 65535, %v8059_v32 }
 0x334   : > { %v6000_v61 = vadd.s32 4294967294, %v3268_v22  ;;  %v8095_v19 = vsel %vm3164_vm15, %v3286_v3, %v3262_v54  ;;  %v2743_v31 = vsel %vm2731_vm6, %v2725_v52, %v2742_v38  ;;  %v2747_v14 = vshrl.u32 %v8059_v32, 16 }
 0x335   : > { %v3001_v33 = vsel %vm2999_vm13, %v2986_v8, %v3000_v35  ;;  %v2744_v57 = vsel %vm2730_vm7, %v2741_v51, %v2743_v31  ;;  %v2770_v36 = vand.u32 65535, %v2740_v47  ;;  %v2771_v5 = vshrl.u32 %v2740_v47, 16 }
 0x336   : > { %v3005_v34 = vsel %vm2998_vm12, %v3001_v33, %v3004_v40  ;;  %vm6001_vm8 = vcmp.lt.s32.totalorder %v6000_v61, 0  ;;  %v2748_v20 = vand.u32 65535, %v2744_v57  ;;  %v2749_v8 = vshrl.u32 %v2744_v57, 16 }
 0x337   : > { %v3006_v7 = vsel %vm2995_vm14, nan, %v3005_v34  ;;  %v3271_v63 = vsel %vm6001_vm8, 0, %v6000_v61  ;;  %v3007_v54 = vand.u32 2147483647, %v8067_v10  ;;  %v2773_v23 = vmul.u32 %v2771_v5, %v2746_v59 }
 0x338   : > { %5810 = vst [vmem:[%s6906_s5 + $0x68] sm:$0xff] %v3006_v7  ;;  %v3272_v50 = vsub.s32 32, %v3271_v63  ;;  %v3276_v56 = vsub.s32 4294967266, %v3271_v63  ;;  %v3010_v52 = vand.u32 2139095040, %v8067_v10  ;;  %v3289_v48 = vsel %vm8049_vm5, 0, %v8095_v19 }
 0x339   : > { %v2713_v15 = vshrl.u32 %v10386_v18, %v8005_v4  ;;  %v2751_v28 = vmul.u32 %v2749_v8, %v2746_v59  ;;  %v2752_v24 = vmul.u32 %v2748_v20, %v2747_v14  ;;  %v3273_v35 = vshll.u32 %v3264_v13, %v3271_v63 }
 0x33a   : > { %v3274_v17 = vshrl.u32 %v3256_v21, %v3272_v50  ;;  %v3277_v3 = vadd.s32 127, %v3276_v56  ;;  %v2774_v40 = vmul.u32 %v2770_v36, %v2747_v14  ;;  %v2750_v22 = vmul.u32 %v2748_v20, %v2746_v59 }
 0x33b   : > { %v2753_v41 = vmul.u32 %v2749_v8, %v2747_v14  ;;  %v2754_v33 = vshll.u32 %v2751_v28, 16  ;;  %v2772_v47 = vmul.u32 %v2770_v36, %v2746_v59  ;;  %v2775_v34 = vmul.u32 %v2771_v5, %v2747_v14  ;;  %v8115_v14 = vpop.permute.xlu0 %703 }
 0x33c   : > { %v3275_v51 = vor.u32 %v3274_v17, %v3273_v35  ;;  %v3278_v38 = vshll.u32 %v3277_v3, 23  ;;  %v2776_v61 = vshll.u32 %v2773_v23, 16  ;;  %v2756_v7 = vshll.u32 %v2752_v24, 16 }
 0x33d   : > { %vm2758_vm9 = vc.u32 %v2750_v22, %v2754_v33  ;;  %v2760_v19 = vadd.s32 %v2754_v33, %v2750_v22  ;;  %v2778_v31 = vshll.u32 %v2774_v40, 16  ;;  %v3011_v5 = vshrl.u32 %v3010_v52, 23 }
 0x33e   : > { %v3279_v57 = vor.u32 4788187, %v3278_v38  ;;  %v3282_v4 = vcvt.s32.f32 %v3275_v51  ;;  %v2759_v44 = vsel %vm2758_vm9, 1, %v6360_v29  ;;  %vm2780_vm10 = vc.u32 %v2772_v47, %v2776_v61 }
 0x33f   : > { %v2761_v13 = vadd.s32 %v2759_v44, %v2753_v41  ;;  %vm2762_vm11 = vc.u32 %v2760_v19, %v2756_v7  ;;  %v2781_v21 = vsel %vm2780_vm10, 1, %v6360_v29  ;;  %v2782_v63 = vadd.s32 %v2776_v61, %v2772_v47 }
 0x340   : > { %v3280_v20 = vand.u32 2147483647, %v3279_v57  ;;  %v2763_v59 = vsel %vm2762_vm11, 1, %v6360_v29  ;;  %v2783_v36 = vadd.s32 %v2781_v21, %v2775_v34  ;;  %v2734_v8 = vsel %vm2732_vm4, %v8043_v26, 2102212464 }
 0x341   : > { %v2755_v50 = vshrl.u32 %v2751_v28, 16  ;;  %v2765_v56 = vadd.s32 %v2763_v59, %v2761_v13  ;;  %vm2784_vm13 = vc.u32 %v2782_v63, %v2778_v31  ;;  %v2733_v44 = vsel %vm2729_vm2, %v2713_v15, %v8036_v45 }
 0x342   : > { %v3283_v35 = vmul.f32 %v3282_v4, %v3280_v20  ;;  %v2785_v17 = vsel %vm2784_vm13, 1, %v6360_v29  ;;  %v5996_v3 = vadd.s32 4294967169, %v3011_v5  ;;  %v2757_v22 = vshrl.u32 %v2752_v24, 16 }
 0x343   : > { %v2766_v41 = vadd.s32 %v2765_v56, %v2755_v50  ;;  %v2777_v33 = vshrl.u32 %v2773_v23, 16  ;;  %v2787_v47 = vadd.s32 %v2785_v17, %v2783_v36  ;;  %v2735_v26 = vsel %vm2731_vm6, %v8038_v60, %v2734_v8 }
 0x344   : > { %v3284_v52 = vxor.u32 2147483648, %v3283_v35  ;;  %v3017_v28 = vadd.s32 1, %v5996_v3  ;;  %v685_v51 = vperm.slane %v6539_v27, 4  ;;  %v2779_v34 = vshrl.u32 %v2774_v40, 16 }
 0x345   : > { %v8128_v38 = vadd.s32 %v2766_v41, %v2757_v22  ;;  %v2788_v61 = vadd.s32 %v2787_v47, %v2777_v33  ;;  %v8132_v15 = vadd.s32 %v2782_v63, %v2778_v31  ;;  %v3306_v60 = vadd.s32 3, %v3289_v48  ;;  %v541_v63 = vpop.permute.xlu0 %540 }
 0x346   : > { %v3285_v45 = vsel %vm3164_vm15, %v3284_v52, %v3283_v35  ;;  %vm3018_vm12 = vcmp.gt.s32.totalorder %v3017_v28, 0  ;;  %690 = vperm.xlu1 %6167, %v685_v51   ;;  %696 = vperm.xlu2 %6168, %v685_v51   ;;  %v2736_v24 = vsel %vm2730_vm7, %v2733_v44, %v2735_v26  ;;  %v3014_v40 = vand.u32 8388607, %v3007_v54 }
 0x347   : > { %v3288_v23 = vsel %vm8049_vm5, %v7812_v58, %v3285_v45  ;;  %v2789_v7 = vadd.s32 %v2788_v61, %v2779_v34  ;;  %vm2792_vm14 = vc.u32 %v8128_v38, %v8132_v15  ;;  %v3019_v31 = vsel %vm3018_vm12, %v3017_v28, 0 }
 0x348   : > { %v3290_v19 = vmul.f32 %v3288_v23, %v3288_v23  ;;  %v3021_v4 = vand.u32 31, %v3019_v31  ;;  %v2790_v49 = vmul.u32 %v8059_v32, %v2736_v24  ;;  %v8144_v48 = vand.u32 3, %v3306_v60 }
 0x349   : > { %v2793_v57 = vadd.s32 1, %v2789_v7  ;;  %v3015_v8 = vor.u32 8388608, %v3014_v40  ;;  %v8148_v50 = vshrl.u32 %v3019_v31, 5  ;;  %v740_v32 = vsel %vm320_vm1, %v6566_v42, %v541_v63 }
 0x34a   : > { %v3291_v13 = vmul.f32 -0.001358992, %v3290_v19  ;;  %v3298_v21 = vmul.f32 -0.00019511016, %v3290_v19  ;;  %v8146_v20 = vsub.s32 32, %v3021_v4  ;;  %v3024_v22 = vshll.u32 %v10386_v18, %v3021_v4 }
 0x34b   : > { %v2794_v62 = vsel %vm2792_vm14, %v2793_v57, %v2789_v7  ;;  %v3027_v41 = vshll.u32 %v10409_v25, %v3021_v4  ;;  %v3033_v47 = vshll.u32 %v10399_v9, %v3021_v4  ;;  %v3030_v51 = vshll.u32 %v10400_v55, %v3021_v4 }
 0x34c   : > { %v3292_v59 = vadd.f32 0.041655596, %v3291_v13  ;;  %v3299_v36 = vadd.f32 0.008332121, %v3298_v21  ;;  %v2795_v5 = vadd.s32 %v2794_v62, %v2790_v49  ;;  %v3025_v56 = vshrl.u32 %v10409_v25, %v8146_v20 }
 0x34d   : > { %v3028_v35 = vshrl.u32 %v10400_v55, %v8146_v20  ;;  %v3031_v33 = vshrl.u32 %v10399_v9, %v8146_v20  ;;  %v3034_v52 = vshrl.u32 %v10401_v30, %v8146_v20  ;;  %vm3309_vm15 = vcmp.eq.s32.totalorder %v8144_v48, 0 }
 0x34e   : > { %v3293_v44 = vmul.f32 %v3292_v59, %v3290_v19  ;;  %v3300_v17 = vmul.f32 %v3299_v36, %v3290_v19  ;;  %v2796_v3 = vadd.s32 536870912, %v2795_v5  ;;  %6170 = vset.pattern.permute.xlu1 %v6512_v12  ;;  %6171 = vset.pattern.permute.xlu2 %v6506_v1  ;;  %v8170_v12 = vor.u32 %v3025_v56, %v3024_v22 }
 0x34f   : > { %v8172_v1 = vor.u32 %v3028_v35, %v3027_v41  ;;  %v3035_v34 = vor.u32 %v3034_v52, %v3033_v47  ;;  %v3037_v61 = vshrl.u32 %v10402_v16, %v8146_v20  ;;  %vm3308_vm0 = vcmp.lt.s32.totalorder %v8144_v48, 2 }
 0x350   : > { %v3294_v42 = vadd.f32 -0.4999988, %v3293_v44  ;;  %v3301_v26 = vadd.f32 -0.16666654, %v3300_v17  ;;  %v8166_v28 = vshrl.u32 %v2796_v3, 30  ;;  %v8178_v7 = vshll.u32 %v3015_v8, 8 }
 0x351   : > { %vm3305_vm2 = vweird.f32 %v7812_v58  ;;  %v3032_v40 = vor.u32 %v3031_v33, %v3030_v51  ;;  %v3036_v31 = vshll.u32 %v10401_v30, %v3021_v4  ;;  %vm3039_vm4 = vcmp.lt.s32.totalorder %v8148_v50, 1 }
 0x352   : > { %v3295_v45 = vmul.f32 %v3294_v42, %v3290_v19  ;;  %v3302_v60 = vmul.f32 %v3301_v26, %v3290_v19  ;;  %v2798_v24 = vshll.u32 %v8166_v28, 30  ;;  %v773_v57 = vmul.f32 %v8012_v39, %v740_v32 }
 0x353   : > { %vm3042_vm3 = vcmp.lt.s32.totalorder %v8148_v50, 4  ;;  %v3038_v19 = vor.u32 %v3037_v61, %v3036_v31  ;;  %vm3041_vm5 = vcmp.lt.s32.totalorder %v8148_v50, 3  ;;  %v3047_v63 = vsel %vm3039_vm4, %v8170_v12, %v8172_v1 }
 0x354   : > { %v3296_v13 = vadd.f32 1.0, %v3295_v45  ;;  %v3303_v21 = vadd.f32 1.0, %v3302_v60  ;;  %v2799_v49 = vsub.s32 %v2795_v5, %v2798_v24  ;;  %v3048_v4 = vsel %vm3042_vm3, %v3035_v34, 920167782 }
 0x355   : > { %v10427_v8 = vperm.slane %v6539_v27, 5  ;;  %vm3312_vm7 = vcmp.eq.s32.totalorder %v8144_v48, 2  ;;  %v3049_v5 = vsel %vm3041_vm5, %v3032_v40, %v3048_v4  ;;  %v3056_v56 = vand.u32 65535, %v8178_v7 }
 0x356   : > { %v3304_v62 = vmul.f32 %v3303_v21, %v3288_v23  ;;  %v3313_v59 = vxor.u32 2147483648, %v3296_v13  ;;  %vm2800_vm6 = vcmp.lt.s32.totalorder %v2799_v49, 0  ;;  %v2801_v36 = vsub.s32 0, %v2799_v49 }
 0x357   : > { %709 = vperm.xlu1 %6170, %v10427_v8   ;;  %v8199_v35 = vadd.f32 %v8064_v6, %v773_v57  ;;  %vm3040_vm8 = vcmp.lt.s32.totalorder %v8148_v50, 2  ;;  %v3051_v23 = vsel %vm3039_vm4, %v8172_v1, %v3032_v40  ;;  %v3052_v41 = vsel %vm3042_vm3, %v3038_v19, 1326507024 }
 0x358   : > { %v3310_v32 = vxor.u32 2147483648, %v3304_v62  ;;  %v2802_v44 = vsel %vm2800_vm6, %v2801_v36, %v2799_v49  ;;  %v3314_v17 = vsel %vm3312_vm7, %v3313_v59, %v3304_v62  ;;  %v3050_v22 = vsel %vm3040_vm8, %v3047_v63, %v3049_v5 }
 0x359   : > { %v2803_v3 = vclz %v2802_v44  ;;  %v3053_v47 = vsel %vm3041_vm5, %v3035_v34, %v3052_v41  ;;  %v3080_v52 = vand.u32 65535, %v3050_v22  ;;  %v3081_v42 = vshrl.u32 %v3050_v22, 16 }
 0x35a   : > { %v3311_v33 = vsel %vm3309_vm15, %v3296_v13, %v3310_v32  ;;  %v2791_v51 = vadd.s32 %v8132_v15, %v8128_v38  ;;  %v3057_v45 = vshrl.u32 %v8178_v7, 16  ;;  %v3023_v24 = vshrl.u32 %v10386_v18, %v8146_v20 }
 0x35b   : > { %v3315_v26 = vsel %vm3308_vm0, %v3311_v33, %v3314_v17  ;;  %v5991_v61 = vadd.s32 4294967294, %v2803_v3  ;;  %v3054_v34 = vsel %vm3040_vm8, %v3051_v23, %v3053_v47  ;;  %v992_v31 = vand.u32 2147483647, %v8199_v35 }
 0x35c   : > { %v3316_v60 = vsel %vm3305_vm2, nan, %v3315_v26  ;;  %v3058_v48 = vand.u32 65535, %v3054_v34  ;;  %v3059_v57 = vshrl.u32 %v3054_v34, 16  ;;  %v3083_v13 = vmul.u32 %v3081_v42, %v3056_v56 }
 0x35d   : > { %5812 = vst [vmem:[%s6906_s5 + $0x78] sm:$0xff] %v3316_v60  ;;  %vm5992_vm9 = vcmp.lt.s32.totalorder %v5991_v61, 0  ;;  %v2821_v15 = vsub.s32 4, %v8166_v28  ;;  %v3084_v21 = vmul.u32 %v3080_v52, %v3057_v45  ;;  %v995_v58 = vand.u32 2139095040, %v8199_v35 }
 0x35e   : > { %v2806_v38 = vsel %vm5992_vm9, 0, %v5991_v61  ;;  %v3043_v20 = vsel %vm3039_vm4, %v3023_v24, %v8170_v12  ;;  %v3044_v4 = vsel %vm3042_vm3, %v3032_v40, 2102212464  ;;  %vm2699_vm10 = vcmp.lt.s32.totalorder %v7938_v37, 0 }
 0x35f   : > { %v2807_v19 = vsub.s32 32, %v2806_v38  ;;  %v2811_v63 = vsub.s32 4294967266, %v2806_v38  ;;  %v3061_v62 = vmul.u32 %v3059_v57, %v3056_v56  ;;  %v3062_v59 = vmul.u32 %v3058_v48, %v3057_v45 }
 0x360   : > { %v3082_v36 = vmul.u32 %v3080_v52, %v3056_v56  ;;  %v3086_v8 = vshll.u32 %v3083_v13, 16  ;;  %v2808_v5 = vshll.u32 %v2799_v49, %v2806_v38  ;;  %v3085_v23 = vmul.u32 %v3081_v42, %v3057_v45 }
 0x361   : > { %v2809_v32 = vshrl.u32 %v2791_v51, %v2807_v19  ;;  %v2812_v44 = vadd.s32 127, %v2811_v63  ;;  %v3060_v17 = vmul.u32 %v3058_v48, %v3056_v56  ;;  %v3063_v3 = vmul.u32 %v3059_v57, %v3057_v45 }
 0x362   : > { %v3064_v22 = vshll.u32 %v3061_v62, 16  ;;  %v3088_v41 = vshll.u32 %v3084_v21, 16  ;;  %v3066_v12 = vshll.u32 %v3062_v59, 16  ;;  %vm3090_vm11 = vc.u32 %v3082_v36, %v3086_v8 }
 0x363   : > { %v2810_v33 = vor.u32 %v2809_v32, %v2808_v5  ;;  %v2813_v47 = vshll.u32 %v2812_v44, 23  ;;  %v3091_v26 = vsel %vm3090_vm11, 1, %v6360_v29  ;;  %v3092_v61 = vadd.s32 %v3086_v8, %v3082_v36 }
 0x364   : > { %vm3068_vm13 = vc.u32 %v3060_v17, %v3064_v22  ;;  %v3070_v40 = vadd.s32 %v3064_v22, %v3060_v17  ;;  %v3045_v49 = vsel %vm3041_vm5, %v8172_v1, %v3044_v4  ;;  %v3093_v56 = vadd.s32 %v3091_v26, %v3085_v23 }
 0x365   : > { %v2814_v60 = vor.u32 4788187, %v2813_v47  ;;  %v3069_v52 = vsel %vm3068_vm13, 1, %v6360_v29  ;;  %v2817_v42 = vcvt.s32.f32 %v2810_v33  ;;  %vm3094_vm14 = vc.u32 %v3092_v61, %v3088_v41 }
 0x366   : > { %v3071_v51 = vadd.s32 %v3069_v52, %v3063_v3  ;;  %vm3072_vm12 = vc.u32 %v3070_v40, %v3066_v12  ;;  %v3095_v34 = vsel %vm3094_vm14, 1, %v6360_v29  ;;  %v996_v48 = vshrl.u32 %v995_v58, 23 }
 0x367   : > { %v2815_v45 = vand.u32 2147483647, %v2814_v60  ;;  %v3073_v24 = vsel %vm3072_vm12, 1, %v6360_v29  ;;  %v3065_v57 = vshrl.u32 %v3061_v62, 16  ;;  %v3087_v19 = vshrl.u32 %v3083_v13, 16 }
 0x368   : > { %v3075_v38 = vadd.s32 %v3073_v24, %v3071_v51  ;;  %v3097_v63 = vadd.s32 %v3095_v34, %v3093_v56  ;;  %v2822_v1 = vsel %vm2699_vm10, %v2821_v15, %v8166_v28  ;;  %v5957_v4 = vadd.s32 4294967169, %v996_v48 }
 0x369   : > { %v2818_v36 = vmul.f32 %v2817_v42, %v2815_v45  ;;  %v3067_v8 = vshrl.u32 %v3062_v59, 16  ;;  %v3089_v32 = vshrl.u32 %v3084_v21, 16  ;;  %v10428_v23 = vand.u32 2147483647, %v7938_v37 }
 0x36a   : > { %v3076_v5 = vadd.s32 %v3075_v38, %v3065_v57  ;;  %v3098_v44 = vadd.s32 %v3097_v63, %v3087_v19  ;;  %v3046_v13 = vsel %vm3040_vm8, %v3043_v20, %v3045_v49  ;;  %v1002_v62 = vadd.s32 1, %v5957_v4 }
 0x36b   : > { %vm8246_vm15 = vcmp.le.f32.partialorder %v10428_v23, 0.7853982  ;;  %v2819_v58 = vxor.u32 2147483648, %v2818_v36  ;;  %v8254_v22 = vadd.s32 %v3092_v61, %v3088_v41  ;;  %v999_v15 = vand.u32 8388607, %v992_v31  ;;  %v431_v41 = vpop.permute.xlu1 %430 }
 0x36c   : > { %v8252_v3 = vadd.s32 %v3076_v5, %v3067_v8  ;;  %v3099_v28 = vadd.s32 %v3098_v44, %v3089_v32  ;;  %v2824_v59 = vsel %vm8246_vm15, 0, %v2822_v1  ;;  %vm1003_vm0 = vcmp.gt.s32.totalorder %v1002_v62, 0 }
 0x36d   : > { %v2820_v21 = vsel %vm2699_vm10, %v2819_v58, %v2818_v36  ;;  %v3100_v47 = vmul.u32 %v8178_v7, %v3046_v13  ;;  %v1004_v12 = vsel %vm1003_vm0, %v1002_v62, 0  ;;  %v2841_v40 = vadd.s32 3, %v2824_v59 }
 0x36e   : > { %v2823_v50 = vsel %vm8246_vm15, %v7938_v37, %v2820_v21  ;;  %vm3102_vm2 = vc.u32 %v8252_v3, %v8254_v22  ;;  %v3103_v20 = vadd.s32 1, %v3099_v28  ;;  %v1000_v61 = vor.u32 8388608, %v999_v15 }
 0x36f   : > { %v2825_v33 = vmul.f32 %v2823_v50, %v2823_v50  ;;  %v1006_v60 = vand.u32 31, %v1004_v12  ;;  %v755_v42 = vsel %vm320_vm1, %v431_v41, %v8101_v53  ;;  %v2842_v48 = vand.u32 3, %v2841_v40 }
 0x370   : > { %v3104_v26 = vsel %vm3102_vm2, %v3103_v20, %v3099_v28  ;;  %v8273_v57 = vshll.u32 %v1000_v61, 8  ;;  %v788_v7 = vmul.f32 %v8012_v39, %v755_v42  ;;  %v8280_v1 = vshrl.u32 %v1004_v12, 5 }
 0x371   : > { %v2826_v49 = vmul.f32 -0.001358992, %v2825_v33  ;;  %v2833_v52 = vmul.f32 -0.00019511016, %v2825_v33  ;;  %v3105_v56 = vadd.s32 %v3104_v26, %v3100_v47  ;;  %v8271_v51 = vsub.s32 32, %v1006_v60 }
 0x372   : > { %v1009_v23 = vshll.u32 %v10386_v18, %v1006_v60  ;;  %vm2844_vm4 = vcmp.eq.s32.totalorder %v2842_v48, 0  ;;  %v1012_v17 = vshll.u32 %v10409_v25, %v1006_v60  ;;  %v1015_v58 = vshll.u32 %v10400_v55, %v1006_v60 }
 0x373   : > { %v2827_v45 = vadd.f32 0.041655596, %v2826_v49  ;;  %v2834_v24 = vadd.f32 0.008332121, %v2833_v52  ;;  %v3106_v34 = vadd.s32 536870912, %v3105_v56  ;;  %v1010_v36 = vshrl.u32 %v10409_v25, %v8271_v51 }
 0x374   : > { %v1013_v53 = vshrl.u32 %v10400_v55, %v8271_v51  ;;  %v1016_v4 = vshrl.u32 %v10399_v9, %v8271_v51  ;;  %v1019_v8 = vshrl.u32 %v10401_v30, %v8271_v51  ;;  %v1018_v13 = vshll.u32 %v10399_v9, %v1006_v60 }
 0x375   : > { %v2828_v38 = vmul.f32 %v2827_v45, %v2825_v33  ;;  %v2835_v19 = vmul.f32 %v2834_v24, %v2825_v33  ;;  %v8276_v63 = vshrl.u32 %v3106_v34, 30  ;;  %v1022_v62 = vshrl.u32 %v10402_v16, %v8271_v51 }
 0x376   : > { %vm2843_vm3 = vcmp.lt.s32.totalorder %v2842_v48, 2  ;;  %v1011_v59 = vor.u32 %v1010_v36, %v1009_v23  ;;  %vm2840_vm5 = vweird.f32 %v7938_v37  ;;  %v8296_v20 = vor.u32 %v1013_v53, %v1012_v17 }
 0x377   : > { %v2829_v5 = vadd.f32 -0.4999988, %v2828_v38  ;;  %v2836_v32 = vadd.f32 -0.16666654, %v2835_v19  ;;  %v3108_v44 = vshll.u32 %v8276_v63, 30  ;;  %v1017_v41 = vor.u32 %v1016_v4, %v1015_v58 }
 0x378   : > { %v1020_v47 = vor.u32 %v1019_v8, %v1018_v13  ;;  %v1021_v12 = vshll.u32 %v10401_v30, %v1006_v60  ;;  %vm2847_vm7 = vcmp.eq.s32.totalorder %v2842_v48, 2  ;;  %vm1024_vm8 = vcmp.lt.s32.totalorder %v8280_v1, 1 }
 0x379   : > { %v2830_v28 = vmul.f32 %v2829_v5, %v2825_v33  ;;  %v2837_v15 = vmul.f32 %v2836_v32, %v2825_v33  ;;  %v3109_v21 = vsub.s32 %v3105_v56, %v3108_v44  ;;  %v8301_v33 = vadd.f32 %v8064_v6, %v788_v7 }
 0x37a   : > { %v1023_v49 = vor.u32 %v1022_v62, %v1021_v12  ;;  %vm1027_vm9 = vcmp.lt.s32.totalorder %v8280_v1, 4  ;;  %vm3009_vm10 = vcmp.lt.s32.totalorder %v8067_v10, 0  ;;  %vm1026_vm11 = vcmp.lt.s32.totalorder %v8280_v1, 3 }
 0x37b   : > { %v2831_v40 = vadd.f32 1.0, %v2830_v28  ;;  %v2838_v26 = vadd.f32 1.0, %v2837_v15  ;;  %vm3110_vm6 = vcmp.lt.s32.totalorder %v3109_v21, 0  ;;  %v3111_v61 = vsub.s32 0, %v3109_v21 }
 0x37c   : > { %v1032_v60 = vsel %vm1024_vm8, %v1011_v59, %v8296_v20  ;;  %v1033_v24 = vsel %vm1027_vm9, %v1020_v47, 920167782  ;;  %v1041_v38 = vand.u32 65535, %v8273_v57  ;;  %v3131_v36 = vsub.s32 4, %v8276_v63 }
 0x37d   : > { %v2839_v52 = vmul.f32 %v2838_v26, %v2823_v50  ;;  %v2848_v56 = vxor.u32 2147483648, %v2831_v40  ;;  %v3112_v42 = vsel %vm3110_vm6, %v3111_v61, %v3109_v21  ;;  %v3101_v50 = vadd.s32 %v8254_v22, %v8252_v3 }
 0x37e   : > { %v3113_v45 = vclz %v3112_v42  ;;  %v1034_v7 = vsel %vm1026_vm11, %v1017_v41, %v1033_v24  ;;  %vm1025_vm13 = vcmp.lt.s32.totalorder %v8280_v1, 2  ;;  %v1036_v53 = vsel %vm1024_vm8, %v8296_v20, %v1017_v41 }
 0x37f   : > { %v2845_v34 = vxor.u32 2147483648, %v2839_v52  ;;  %v2849_v8 = vsel %vm2847_vm7, %v2848_v56, %v2839_v52  ;;  %v1035_v3 = vsel %vm1025_vm13, %v1032_v60, %v1034_v7  ;;  %v1037_v22 = vsel %vm1027_vm9, %v1023_v49, 1326507024 }
 0x380   : > { %v5997_v19 = vadd.s32 4294967294, %v3113_v45  ;;  %v1038_v32 = vsel %vm1026_vm11, %v1020_v47, %v1037_v22  ;;  %v1065_v44 = vand.u32 65535, %v1035_v3  ;;  %v1066_v13 = vshrl.u32 %v1035_v3, 16 }
 0x381   : > { %v2846_v4 = vsel %vm2844_vm4, %v2831_v40, %v2845_v34  ;;  %v1039_v58 = vsel %vm1025_vm13, %v1036_v53, %v1038_v32  ;;  %v1042_v15 = vshrl.u32 %v8273_v57, 16  ;;  %v1008_v40 = vshrl.u32 %v10386_v18, %v8271_v51 }
 0x382   : > { %v2850_v5 = vsel %vm2843_vm3, %v2846_v4, %v2849_v8  ;;  %vm5998_vm12 = vcmp.lt.s32.totalorder %v5997_v19, 0  ;;  %v1043_v48 = vand.u32 65535, %v1039_v58  ;;  %v1044_v47 = vshrl.u32 %v1039_v58, 16 }
 0x383   : > { %v2851_v23 = vsel %vm2840_vm5, nan, %v2850_v5  ;;  %v3116_v17 = vsel %vm5998_vm12, 0, %v5997_v19  ;;  %v1068_v26 = vmul.u32 %v1066_v13, %v1041_v38  ;;  %v1069_v52 = vmul.u32 %v1065_v44, %v1042_v15 }
 0x384   : > { %5809 = vst [vmem:[%s6906_s5 + $0x60] sm:$0xff] %v2851_v23  ;;  %v3117_v62 = vsub.s32 32, %v3116_v17  ;;  %v3121_v28 = vsub.s32 4294967266, %v3116_v17  ;;  %v3118_v12 = vshll.u32 %v3109_v21, %v3116_v17  ;;  %v1047_v49 = vmul.u32 %v1043_v48, %v1042_v15 }
 0x385   : > { %v3132_v56 = vsel %vm3009_vm10, %v3131_v36, %v8276_v63  ;;  %v1028_v42 = vsel %vm1024_vm8, %v1008_v40, %v1011_v59  ;;  %v1046_v45 = vmul.u32 %v1044_v47, %v1041_v38  ;;  %v1071_v60 = vshll.u32 %v1068_v26, 16 }
 0x386   : > { %v3119_v61 = vshrl.u32 %v3101_v50, %v3117_v62  ;;  %v3122_v37 = vadd.s32 127, %v3121_v28  ;;  %v1029_v51 = vsel %vm1027_vm9, %v1017_v41, 2102212464  ;;  %v1067_v34 = vmul.u32 %v1065_v44, %v1041_v38 }
 0x387   : > { %vm8347_vm14 = vcmp.le.f32.partialorder %v3007_v54, 0.7853982  ;;  %v1045_v7 = vmul.u32 %v1043_v48, %v1041_v38  ;;  %v1048_v19 = vmul.u32 %v1044_v47, %v1042_v15  ;;  %v1049_v63 = vshll.u32 %v1046_v45, 16 }
 0x388   : > { %v3120_v24 = vor.u32 %v3119_v61, %v3118_v12  ;;  %v3123_v21 = vshll.u32 %v3122_v37, 23  ;;  %v1070_v36 = vmul.u32 %v1066_v13, %v1042_v15  ;;  %v1051_v59 = vshll.u32 %v1047_v49, 16 }
 0x389   : > { %v1073_v4 = vshll.u32 %v1069_v52, 16  ;;  %vm1075_vm15 = vc.u32 %v1067_v34, %v1071_v60  ;;  %vm1053_vm0 = vc.u32 %v1045_v7, %v1049_v63  ;;  %v1055_v8 = vadd.s32 %v1049_v63, %v1045_v7 }
 0x38a   : > { %v3124_v53 = vor.u32 4788187, %v3123_v21  ;;  %v1076_v3 = vsel %vm1075_vm15, 1, %v6360_v29  ;;  %v1077_v41 = vadd.s32 %v1071_v60, %v1067_v34  ;;  %v3127_v5 = vcvt.s32.f32 %v3120_v24 }
 0x38b   : > { %v1054_v54 = vsel %vm1053_vm0, 1, %v6360_v29  ;;  %v1078_v32 = vadd.s32 %v1076_v3, %v1070_v36  ;;  %v1030_v38 = vsel %vm1026_vm11, %v8296_v20, %v1029_v51  ;;  %vm1057_vm2 = vc.u32 %v1055_v8, %v1051_v59  ;;  %v606_v8 = vpop.permute.xlu0 %605 }
 0x38c   : > { %v3125_v22 = vand.u32 2147483647, %v3124_v53  ;;  %v1056_v44 = vadd.s32 %v1054_v54, %v1048_v19  ;;  %vm1079_vm4 = vc.u32 %v1077_v41, %v1073_v4  ;;  %v1058_v17 = vsel %vm1057_vm2, 1, %v6360_v29 }
 0x38d   : > { %v1080_v58 = vsel %vm1079_vm4, 1, %v6360_v29  ;;  %v3320_v13 = vand.u32 2139095040, %v8301_v33  ;;  %v1050_v62 = vshrl.u32 %v1046_v45, 16  ;;  %v1072_v15 = vshrl.u32 %v1068_v26, 16 }
 0x38e   : > { %v3128_v23 = vmul.f32 %v3127_v5, %v3125_v22  ;;  %v1060_v28 = vadd.s32 %v1058_v17, %v1056_v44  ;;  %v1082_v48 = vadd.s32 %v1080_v58, %v1078_v32  ;;  %v3317_v40 = vand.u32 2147483647, %v8301_v33 }
 0x38f   : > { %v3321_v47 = vshrl.u32 %v3320_v13, 23  ;;  %v711_v20 = vperm.slane %v6539_v27, 6  ;;  %v1052_v61 = vshrl.u32 %v1047_v49, 16  ;;  %v1074_v60 = vshrl.u32 %v1069_v52, 16 }
 0x390   : > { %v3129_v12 = vxor.u32 2147483648, %v3128_v23  ;;  %v1061_v37 = vadd.s32 %v1060_v28, %v1050_v62  ;;  %v1083_v24 = vadd.s32 %v1082_v48, %v1072_v15  ;;  %v3134_v51 = vsel %vm8347_vm14, 0, %v3132_v56 }
 0x391   : > { %v1031_v26 = vsel %vm1025_vm13, %v1028_v42, %v1030_v38  ;;  %v6002_v45 = vadd.s32 4294967169, %v3321_v47  ;;  %716 = vperm.xlu2 %6171, %v711_v20   ;;  %722 = vperm.xlu1 %6170, %v711_v20   ;;  %v1081_v7 = vadd.s32 %v1077_v41, %v1073_v4  ;;  %v3151_v36 = vadd.s32 3, %v3134_v51 }
 0x392   : > { %v3130_v21 = vsel %vm3009_vm10, %v3129_v12, %v3128_v23  ;;  %v1062_v49 = vadd.s32 %v1061_v37, %v1052_v61  ;;  %v1084_v52 = vadd.s32 %v1083_v24, %v1074_v60  ;;  %v3324_v56 = vand.u32 8388607, %v3317_v40 }
 0x393   : > { %v3133_v34 = vsel %vm8347_vm14, %v8067_v10, %v3130_v21  ;;  %v3327_v63 = vadd.s32 1, %v6002_v45  ;;  %v1085_v59 = vmul.u32 %v8273_v57, %v1031_v26  ;;  %v3152_v41 = vand.u32 3, %v3151_v36 }
 0x394   : > { %v3135_v19 = vmul.f32 %v3133_v34, %v3133_v34  ;;  %vm1087_vm3 = vc.u32 %v1062_v49, %v1081_v7  ;;  %v1088_v53 = vadd.s32 1, %v1084_v52  ;;  %v3325_v54 = vor.u32 8388608, %v3324_v56 }
 0x395   : > { %vm3328_vm5 = vcmp.gt.s32.totalorder %v3327_v63, 0  ;;  %v750_v38 = vsel %vm320_vm1, %v6890_v0, %v606_v8  ;;  %v10433_v58 = vperm.slane %v6539_v27, 7  ;;  %vm3154_vm6 = vcmp.eq.s32.totalorder %v3152_v41, 0 }
 0x396   : > { %v3136_v1 = vmul.f32 -0.001358992, %v3135_v19  ;;  %v3143_v42 = vmul.f32 -0.00019511016, %v3135_v19  ;;  %v1089_v3 = vsel %vm1087_vm3, %v1088_v53, %v1084_v52  ;;  %v3329_v50 = vsel %vm3328_vm5, %v3327_v63, 0 }
 0x397   : > { %v1090_v4 = vadd.s32 %v1089_v3, %v1085_v59  ;;  %v3331_v32 = vand.u32 31, %v3329_v50  ;;  %v783_v15 = vmul.f32 %v8012_v39, %v750_v38  ;;  %vm3157_vm7 = vcmp.eq.s32.totalorder %v3152_v41, 2 }
 0x398   : > { %v3137_v22 = vadd.f32 0.041655596, %v3136_v1  ;;  %v3144_v5 = vadd.f32 0.008332121, %v3143_v42  ;;  %v8383_v48 = vshrl.u32 %v3329_v50, 5  ;;  %v8389_v27 = vshll.u32 %v3325_v54, 8 }
 0x399   : > { %v1091_v17 = vadd.s32 536870912, %v1090_v4  ;;  %729 = vperm.xlu2 %6171, %v10433_v58   ;;  %v8378_v57 = vsub.s32 32, %v3331_v32  ;;  %vm3153_vm8 = vcmp.lt.s32.totalorder %v3152_v41, 2  ;;  %v3334_v37 = vshll.u32 %v10386_v18, %v3331_v32 }
 0x39a   : > { %v3138_v44 = vmul.f32 %v3137_v22, %v3135_v19  ;;  %v3145_v23 = vmul.f32 %v3144_v5, %v3135_v19  ;;  %vm3150_vm9 = vweird.f32 %v8067_v10  ;;  %v3337_v39 = vshll.u32 %v10409_v25, %v3331_v32 }
 0x39b   : > { %v8380_v28 = vshrl.u32 %v1091_v17, 30  ;;  %v3335_v0 = vshrl.u32 %v10409_v25, %v8378_v57  ;;  %v3338_v12 = vshrl.u32 %v10400_v55, %v8378_v57  ;;  %v3340_v60 = vshll.u32 %v10400_v55, %v3331_v32 }
 0x39c   : > { %v3139_v13 = vadd.f32 -0.4999988, %v3138_v44  ;;  %v3146_v62 = vadd.f32 -0.16666654, %v3145_v23  ;;  %v3343_v24 = vshll.u32 %v10399_v9, %v3331_v32  ;;  %v3344_v21 = vshrl.u32 %v10401_v30, %v8378_v57 }
 0x39d   : > { %v1093_v61 = vshll.u32 %v8380_v28, 30  ;;  %v3341_v52 = vshrl.u32 %v10399_v9, %v8378_v57  ;;  %v3339_v63 = vor.u32 %v3338_v12, %v3337_v39  ;;  %v3347_v53 = vshrl.u32 %v10402_v16, %v8378_v57 }
 0x39e   : > { %v3140_v47 = vmul.f32 %v3139_v13, %v3135_v19  ;;  %v3147_v20 = vmul.f32 %v3146_v62, %v3135_v19  ;;  %v3336_v19 = vor.u32 %v3335_v0, %v3334_v37  ;;  %v3345_v36 = vor.u32 %v3344_v21, %v3343_v24 }
 0x39f   : > { %v1094_v45 = vsub.s32 %v1090_v4, %v1093_v61  ;;  %v1086_v59 = vadd.s32 %v1081_v7, %v1062_v49  ;;  %v3346_v8 = vshll.u32 %v10401_v30, %v3331_v32  ;;  %v3366_v3 = vand.u32 65535, %v8389_v27 }
 0x3a0   : > { %v3141_v51 = vadd.f32 1.0, %v3140_v47  ;;  %v3148_v26 = vadd.f32 1.0, %v3147_v20  ;;  %v8406_v50 = vadd.f32 %v8064_v6, %v783_v15  ;;  %v3342_v4 = vor.u32 %v3341_v52, %v3340_v60 }
 0x3a1   : > { %vm1095_vm10 = vcmp.lt.s32.totalorder %v1094_v45, 0  ;;  %v1096_v42 = vsub.s32 0, %v1094_v45  ;;  %v3367_v54 = vshrl.u32 %v8389_v27, 16  ;;  %vm994_vm11 = vcmp.lt.s32.totalorder %v8199_v35, 0 }
 0x3a2   : > { %v3149_v56 = vmul.f32 %v3148_v26, %v3133_v34  ;;  %v3158_v1 = vxor.u32 2147483648, %v3141_v51  ;;  %v3348_v34 = vor.u32 %v3347_v53, %v3346_v8  ;;  %vm3349_vm13 = vcmp.lt.s32.totalorder %v8383_v48, 1 }
 0x3a3   : > { %v1097_v5 = vsel %vm1095_vm10, %v1096_v42, %v1094_v45  ;;  %vm3352_vm12 = vcmp.lt.s32.totalorder %v8383_v48, 4  ;;  %v3357_v6 = vsel %vm3349_vm13, %v3336_v19, %v3339_v63  ;;  %vm3351_vm14 = vcmp.lt.s32.totalorder %v8383_v48, 3 }
 0x3a4   : > { %v3155_v22 = vxor.u32 2147483648, %v3149_v56  ;;  %v1098_v38 = vclz %v1097_v5  ;;  %v3159_v7 = vsel %vm3157_vm7, %v3158_v1, %v3149_v56  ;;  %v3358_v32 = vsel %vm3352_vm12, %v3345_v36, 920167782 }
 0x3a5   : > { %v2545_v17 = vand.u32 2139095040, %v8406_v50  ;;  %v1116_v13 = vsub.s32 4, %v8380_v28  ;;  %vm3350_vm15 = vcmp.lt.s32.totalorder %v8383_v48, 2  ;;  %v3359_v62 = vsel %vm3351_vm14, %v3342_v4, %v3358_v32 }
 0x3a6   : > { %v3156_v49 = vsel %vm3154_vm6, %v3141_v51, %v3155_v22  ;;  %v5958_v23 = vadd.s32 4294967294, %v1098_v38  ;;  %v3360_v41 = vsel %vm3350_vm15, %v3357_v6, %v3359_v62  ;;  %v3361_v15 = vsel %vm3349_vm13, %v3339_v63, %v3342_v4 }
 0x3a7   : > { %v3160_v44 = vsel %vm3153_vm8, %v3156_v49, %v3159_v7  ;;  %v3362_v0 = vsel %vm3352_vm12, %v3348_v34, 1326507024  ;;  %v3390_v47 = vand.u32 65535, %v3360_v41  ;;  %v3391_v20 = vshrl.u32 %v3360_v41, 16 }
 0x3a8   : > { %v3161_v58 = vsel %vm3150_vm9, nan, %v3160_v44  ;;  %vm5959_vm0 = vcmp.lt.s32.totalorder %v5958_v23, 0  ;;  %v3363_v12 = vsel %vm3351_vm14, %v3345_v36, %v3362_v0  ;;  %v3333_v39 = vshrl.u32 %v10386_v18, %v8378_v57 }
 0x3a9   : > { %5811 = vst [vmem:[%s6906_s5 + $0x70] sm:$0xff] %v3161_v58  ;;  %v1101_v10 = vsel %vm5959_vm0, 0, %v5958_v23  ;;  %v3364_v60 = vsel %vm3350_vm15, %v3361_v15, %v3363_v12  ;;  %v3354_v24 = vsel %vm3352_vm12, %v3342_v4, 2102212464  ;;  %v3393_v26 = vmul.u32 %v3391_v20, %v3366_v3 }
 0x3aa   : > { %v1102_v61 = vsub.s32 32, %v1101_v10  ;;  %v1106_v37 = vsub.s32 4294967266, %v1101_v10  ;;  %v3368_v21 = vand.u32 65535, %v3364_v60  ;;  %v3369_v51 = vshrl.u32 %v3364_v60, 16 }
 0x3ab   : > { %v1103_v52 = vshll.u32 %v1094_v45, %v1101_v10  ;;  %v3394_v36 = vmul.u32 %v3390_v47, %v3367_v54  ;;  %v1117_v1 = vsel %vm994_vm11, %v1116_v13, %v8380_v28  ;;  %v3353_v57 = vsel %vm3349_vm13, %v3333_v39, %v3336_v19  ;;  %v8453_v10 = vpop.permute.xlu1 %449 }
 0x3ac   : > { %v1104_v53 = vshrl.u32 %v1086_v59, %v1102_v61  ;;  %v1107_v56 = vadd.s32 127, %v1106_v37  ;;  %v3371_v42 = vmul.u32 %v3369_v51, %v3366_v3  ;;  %v3372_v8 = vmul.u32 %v3368_v21, %v3367_v54 }
 0x3ad   : > { %v3355_v4 = vsel %vm3351_vm14, %v3339_v63, %v3354_v24  ;;  %v3396_v38 = vshll.u32 %v3393_v26, 16  ;;  %v3370_v34 = vmul.u32 %v3368_v21, %v3366_v3  ;;  %v3392_v59 = vmul.u32 %v3390_v47, %v3366_v3 }
 0x3ae   : > { %v1105_v22 = vor.u32 %v1104_v53, %v1103_v52  ;;  %v1108_v5 = vshll.u32 %v1107_v56, 23  ;;  %v3374_v45 = vshll.u32 %v3371_v42, 16  ;;  %v3395_v49 = vmul.u32 %v3391_v20, %v3367_v54 }
 0x3af   : > { %v3373_v6 = vmul.u32 %v3369_v51, %v3367_v54  ;;  %v3376_v32 = vshll.u32 %v3372_v8, 16  ;;  %v3398_v44 = vshll.u32 %v3394_v36, 16  ;;  %vm3400_vm4 = vc.u32 %v3392_v59, %v3396_v38 }
 0x3b0   : > { %v1109_v7 = vor.u32 4788187, %v1108_v5  ;;  %vm3378_vm2 = vc.u32 %v3370_v34, %v3374_v45  ;;  %v3380_v28 = vadd.s32 %v3374_v45, %v3370_v34  ;;  %v3402_v19 = vadd.s32 %v3396_v38, %v3392_v59 }
 0x3b1   : > { %v1112_v58 = vcvt.s32.f32 %v1105_v22  ;;  %v3379_v13 = vsel %vm3378_vm2, 1, %v6360_v29  ;;  %v3401_v62 = vsel %vm3400_vm4, 1, %v6360_v29  ;;  %v3397_v54 = vshrl.u32 %v3393_v26, 16 }
 0x3b2   : > { %v1110_v23 = vand.u32 2147483647, %v1109_v7  ;;  %v3381_v63 = vadd.s32 %v3379_v13, %v3373_v6  ;;  %vm3382_vm3 = vc.u32 %v3380_v28, %v3376_v32  ;;  %v3403_v41 = vadd.s32 %v3401_v62, %v3395_v49  ;;  %v671_v28 = vpop.permute.xlu0 %670 }
 0x3b3   : > { %vm3404_vm5 = vc.u32 %v3402_v19, %v3398_v44  ;;  %v3383_v15 = vsel %vm3382_vm3, 1, %v6360_v29  ;;  %v3375_v12 = vshrl.u32 %v3371_v42, 16  ;;  %v2546_v61 = vshrl.u32 %v2545_v17, 23 }
 0x3b4   : > { %v1113_v3 = vmul.f32 %v1112_v58, %v1110_v23  ;;  %v3405_v0 = vsel %vm3404_vm5, 1, %v6360_v29  ;;  %v3385_v47 = vadd.s32 %v3383_v15, %v3381_v63  ;;  %vm8457_vm6 = vcmp.le.f32.partialorder %v992_v31, 0.7853982 }
 0x3b5   : > { %v3407_v20 = vadd.s32 %v3405_v0, %v3403_v41  ;;  %v3377_v60 = vshrl.u32 %v3372_v8, 16  ;;  %v2542_v24 = vand.u32 2147483647, %v8406_v50  ;;  %v3399_v51 = vshrl.u32 %v3394_v36, 16 }
 0x3b6   : > { %v1114_v39 = vxor.u32 2147483648, %v1113_v3  ;;  %v3386_v21 = vadd.s32 %v3385_v47, %v3375_v12  ;;  %v5987_v52 = vadd.s32 4294967169, %v2546_v61  ;;  %v1119_v17 = vsel %vm8457_vm6, 0, %v1117_v1 }
 0x3b7   : > { %v3408_v26 = vadd.s32 %v3407_v20, %v3397_v54  ;;  %v3356_v31 = vsel %vm3350_vm15, %v3353_v57, %v3355_v4  ;;  %v8468_v56 = vadd.s32 %v3402_v19, %v3398_v44  ;;  %v1136_v38 = vadd.s32 3, %v1119_v17  ;;  %v463_v44 = vpop.permute.xlu1 %462 }
 0x3b8   : > { %v1115_v53 = vsel %vm994_vm11, %v1114_v39, %v1113_v3  ;;  %v8473_v8 = vadd.s32 %v3386_v21, %v3377_v60  ;;  %v2552_v22 = vadd.s32 1, %v5987_v52  ;;  %v3410_v57 = vmul.u32 %v8389_v27, %v3356_v31 }
 0x3b9   : > { %v1118_v42 = vsel %vm8457_vm6, %v8199_v35, %v1115_v53  ;;  %v3409_v36 = vadd.s32 %v3408_v26, %v3399_v51  ;;  %v2549_v59 = vand.u32 8388607, %v2542_v24  ;;  %v1137_v19 = vand.u32 3, %v1136_v38 }
 0x3ba   : > { %v1120_v5 = vmul.f32 %v1118_v42, %v1118_v42  ;;  %vm3412_vm7 = vc.u32 %v8473_v8, %v8468_v56  ;;  %vm2553_vm8 = vcmp.gt.s32.totalorder %v2552_v22, 0  ;;  %v760_v27 = vsel %vm320_vm1, %v463_v44, %v671_v28 }
 0x3bb   : > { %v3413_v34 = vadd.s32 1, %v3409_v36  ;;  %v2554_v4 = vsel %vm2553_vm8, %v2552_v22, 0  ;;  %v2550_v63 = vor.u32 8388608, %v2549_v59  ;;  %vm1139_vm9 = vcmp.eq.s32.totalorder %v1137_v19, 0  ;;  %v8519_v59 = vld [vmem:[%s10364_s3] ss:$0 sm:$0xff] }
 0x3bc   : > { %v1121_v1 = vmul.f32 -0.001358992, %v1120_v5  ;;  %v1128_v48 = vmul.f32 -0.00019511016, %v1120_v5  ;;  %v2556_v49 = vand.u32 31, %v2554_v4  ;;  %v8482_v41 = vshrl.u32 %v2554_v4, 5 }
 0x3bd   : > { %v3414_v45 = vsel %vm3412_vm7, %v3413_v34, %v3409_v36  ;;  %vm1138_vm10 = vcmp.lt.s32.totalorder %v1137_v19, 2  ;;  %vm1135_vm11 = vweird.f32 %v8199_v35  ;;  %vm1142_vm12 = vcmp.eq.s32.totalorder %v1137_v19, 2 }
 0x3be   : > { %v1122_v7 = vadd.f32 0.041655596, %v1121_v1  ;;  %v1129_v6 = vadd.f32 0.008332121, %v1128_v48  ;;  %v3415_v32 = vadd.s32 %v3414_v45, %v3410_v57  ;;  %v8480_v23 = vsub.s32 32, %v2556_v49 }
 0x3bf   : > { %v2559_v12 = vshll.u32 %v10386_v18, %v2556_v49  ;;  %v2562_v21 = vshll.u32 %v10409_v25, %v2556_v49  ;;  %v2565_v51 = vshll.u32 %v10400_v55, %v2556_v49  ;;  %v2568_v26 = vshll.u32 %v10399_v9, %v2556_v49 }
 0x3c0   : > { %v1123_v58 = vmul.f32 %v1122_v7, %v1120_v5  ;;  %v1130_v13 = vmul.f32 %v1129_v6, %v1120_v5  ;;  %v3416_v62 = vadd.s32 536870912, %v3415_v32  ;;  %v2560_v0 = vshrl.u32 %v10409_v25, %v8480_v23 }
 0x3c1   : > { %v2563_v47 = vshrl.u32 %v10400_v55, %v8480_v23  ;;  %v2566_v20 = vshrl.u32 %v10399_v9, %v8480_v23  ;;  %v2569_v61 = vshrl.u32 %v10401_v30, %v8480_v23  ;;  %v2571_v52 = vshll.u32 %v10401_v30, %v2556_v49 }
 0x3c2   : > { %v1124_v3 = vadd.f32 -0.4999988, %v1123_v58  ;;  %v1131_v15 = vadd.f32 -0.16666654, %v1130_v13  ;;  %v8486_v54 = vshrl.u32 %v3416_v62, 30  ;;  %v2572_v53 = vshrl.u32 %v10402_v16, %v8480_v23 }
 0x3c3   : > { %v8507_v22 = vor.u32 %v2560_v0, %v2559_v12  ;;  %v2567_v38 = vor.u32 %v2566_v20, %v2565_v51  ;;  %v2570_v34 = vor.u32 %v2569_v61, %v2568_v26  ;;  %vm2574_vm14 = vcmp.lt.s32.totalorder %v8482_v41, 1 }
 0x3c4   : > { %v1125_v37 = vmul.f32 %v1124_v3, %v1120_v5  ;;  %v1132_v39 = vmul.f32 %v1131_v15, %v1120_v5  ;;  %v3418_v60 = vshll.u32 %v8486_v54, 30  ;;  %v8509_v5 = vor.u32 %v2563_v47, %v2562_v21  ;;  %v8544_v15 = vld [vmem:[%s10364_s3 + $0x1] ss:$0 sm:$0xff] }
 0x3c5   : > { %v2573_v1 = vor.u32 %v2572_v53, %v2571_v52  ;;  %v8514_v45 = vshll.u32 %v2550_v63, 8  ;;  %v793_v49 = vmul.f32 %v8519_v59, %v760_v27  ;;  %vm2576_vm15 = vcmp.lt.s32.totalorder %v8482_v41, 3 }
 0x3c6   : > { %v1126_v17 = vadd.f32 1.0, %v1125_v37  ;;  %v1133_v31 = vadd.f32 1.0, %v1132_v39  ;;  %v8505_v36 = vsub.s32 %v3415_v32, %v3418_v60  ;;  %vm2577_vm0 = vcmp.lt.s32.totalorder %v8482_v41, 4 }
 0x3c7   : > { %v2582_v44 = vsel %vm2574_vm14, %v8507_v22, %v8509_v5  ;;  %v2583_v28 = vsel %vm2577_vm0, %v2570_v34, 920167782  ;;  %v2586_v62 = vsel %vm2574_vm14, %v8509_v5, %v2567_v38  ;;  %v2587_v63 = vsel %vm2577_vm0, %v2573_v1, 1326507024 }
 0x3c8   : > { %v1134_v48 = vmul.f32 %v1133_v31, %v1118_v42  ;;  %v1143_v57 = vxor.u32 2147483648, %v1126_v17  ;;  %vm3420_vm13 = vcmp.lt.s32.totalorder %v8505_v36, 0  ;;  %v3421_v4 = vsub.s32 0, %v8505_v36 }
 0x3c9   : > { %v2584_v13 = vsel %vm2576_vm15, %v2567_v38, %v2583_v28  ;;  %vm2575_vm2 = vcmp.lt.s32.totalorder %v8482_v41, 2  ;;  %v8547_v0 = vadd.f32 %v8544_v15, %v793_v49  ;;  %v2588_v19 = vsel %vm2576_vm15, %v2570_v34, %v2587_v63 }
 0x3ca   : > { %v1140_v7 = vxor.u32 2147483648, %v1134_v48  ;;  %v3422_v42 = vsel %vm3420_vm13, %v3421_v4, %v8505_v36  ;;  %v1144_v6 = vsel %vm1142_vm12, %v1143_v57, %v1134_v48  ;;  %v2585_v47 = vsel %vm2575_vm2, %v2582_v44, %v2584_v13 }
 0x3cb   : > { %v3423_v32 = vclz %v3422_v42  ;;  %v2591_v20 = vand.u32 65535, %v8514_v45  ;;  %v2589_v61 = vsel %vm2575_vm2, %v2586_v62, %v2588_v19  ;;  %v2615_v37 = vand.u32 65535, %v2585_v47  ;;  %v8567_v42 = vpop.permute.xlu2 %436 }
 0x3cc   : > { %v1141_v58 = vsel %vm1139_vm9, %v1126_v17, %v1140_v7  ;;  %v2616_v39 = vshrl.u32 %v2585_v47, 16  ;;  %v2592_v21 = vshrl.u32 %v8514_v45, 16  ;;  %v2593_v35 = vand.u32 65535, %v2589_v61 }
 0x3cd   : > { %v1145_v27 = vsel %vm1138_vm10, %v1141_v58, %v1144_v6  ;;  %v6003_v3 = vadd.s32 4294967294, %v3423_v32  ;;  %v2594_v51 = vshrl.u32 %v2589_v61, 16  ;;  %v3411_v26 = vadd.s32 %v8468_v56, %v8473_v8 }
 0x3ce   : > { %v1146_v12 = vsel %vm1135_vm11, nan, %v1145_v27  ;;  %v4095_v17 = vand.u32 2139095040, %v8547_v0  ;;  %vm3319_vm3 = vcmp.lt.s32.totalorder %v8301_v33, 0  ;;  %v2558_v34 = vshrl.u32 %v10386_v18, %v8480_v23 }
 0x3cf   : > { %5798 = vst [vmem:[%s6906_s5 + $0x8] sm:$0xff] %v1146_v12  ;;  %vm6004_vm4 = vcmp.lt.s32.totalorder %v6003_v3, 0  ;;  %v2596_v1 = vmul.u32 %v2594_v51, %v2591_v20  ;;  %v2597_v48 = vmul.u32 %v2593_v35, %v2592_v21  ;;  %v2618_v49 = vmul.u32 %v2616_v39, %v2591_v20 }
 0x3d0   : > { %v3426_v60 = vsel %vm6004_vm4, 0, %v6003_v3  ;;  %v2619_v7 = vmul.u32 %v2615_v37, %v2592_v21  ;;  %v3441_v56 = vsub.s32 4, %v8486_v54  ;;  %v2579_v8 = vsel %vm2577_vm0, %v2567_v38, 2102212464 }
 0x3d1   : > { %v3427_v52 = vsub.s32 32, %v3426_v60  ;;  %v3431_v53 = vsub.s32 4294967266, %v3426_v60  ;;  %v3428_v31 = vshll.u32 %v8505_v36, %v3426_v60  ;;  %v2595_v6 = vmul.u32 %v2593_v35, %v2591_v20  ;;  %v8581_v60 = vpop.permute.xlu1 %482 }
 0x3d2   : > { %v2599_v32 = vshll.u32 %v2596_v1, 16  ;;  %v2617_v28 = vmul.u32 %v2615_v37, %v2591_v20  ;;  %v2621_v58 = vshll.u32 %v2618_v49, 16  ;;  %vm8574_vm5 = vcmp.le.f32.partialorder %v3317_v40, 0.7853982 }
 0x3d3   : > { %v3429_v57 = vshrl.u32 %v3411_v26, %v3427_v52  ;;  %v3432_v4 = vadd.s32 127, %v3431_v53  ;;  %v2598_v13 = vmul.u32 %v2594_v51, %v2592_v21  ;;  %v2601_v62 = vshll.u32 %v2597_v48, 16 }
 0x3d4   : > { %vm2603_vm6 = vc.u32 %v2595_v6, %v2599_v32  ;;  %v2605_v63 = vadd.s32 %v2599_v32, %v2595_v6  ;;  %v2620_v38 = vmul.u32 %v2616_v39, %v2592_v21  ;;  %v2623_v12 = vshll.u32 %v2619_v7, 16  ;;  %v8587_v32 = vpop.permute.xlu2 %456 }
 0x3d5   : > { %v3430_v44 = vor.u32 %v3429_v57, %v3428_v31  ;;  %v3433_v36 = vshll.u32 %v3432_v4, 23  ;;  %v2604_v3 = vsel %vm2603_vm6, 1, %v6360_v29  ;;  %vm2625_vm8 = vc.u32 %v2617_v28, %v2621_v58 }
 0x3d6   : > { %v2606_v47 = vadd.s32 %v2604_v3, %v2598_v13  ;;  %vm2607_vm7 = vc.u32 %v2605_v63, %v2601_v62  ;;  %v2627_v19 = vadd.s32 %v2621_v58, %v2617_v28  ;;  %v2626_v37 = vsel %vm2625_vm8, 1, %v6360_v29 }
 0x3d7   : > { %v3434_v27 = vor.u32 4788187, %v3433_v36  ;;  %v3437_v61 = vcvt.s32.f32 %v3430_v44  ;;  %v2608_v40 = vsel %vm2607_vm7, 1, %v6360_v29  ;;  %v2600_v35 = vshrl.u32 %v2596_v1, 16 }
 0x3d8   : > { %v2610_v51 = vadd.s32 %v2608_v40, %v2606_v47  ;;  %v2628_v26 = vadd.s32 %v2626_v37, %v2620_v38  ;;  %vm2629_vm9 = vc.u32 %v2627_v19, %v2623_v12  ;;  %v3442_v39 = vsel %vm3319_vm3, %v3441_v56, %v8486_v54 }
 0x3d9   : > { %v3435_v20 = vand.u32 2147483647, %v3434_v27  ;;  %v2630_v21 = vsel %vm2629_vm9, 1, %v6360_v29  ;;  %v4096_v53 = vshrl.u32 %v4095_v17, 23  ;;  %v2602_v31 = vshrl.u32 %v2597_v48, 16 }
 0x3da   : > { %v2611_v57 = vadd.s32 %v2610_v51, %v2600_v35  ;;  %v2622_v4 = vshrl.u32 %v2618_v49, 16  ;;  %v2632_v6 = vadd.s32 %v2630_v21, %v2628_v26  ;;  %v2578_v1 = vsel %vm2574_vm14, %v2558_v34, %v8507_v22 }
 0x3db   : > { %v3438_v52 = vmul.f32 %v3437_v61, %v3435_v20  ;;  %v2580_v36 = vsel %vm2576_vm15, %v8509_v5, %v2579_v8  ;;  %v6017_v28 = vadd.s32 4294967169, %v4096_v53  ;;  %v2624_v56 = vshrl.u32 %v2619_v7, 16 }
 0x3dc   : > { %v8595_v54 = vadd.s32 %v2611_v57, %v2602_v31  ;;  %v2633_v17 = vadd.s32 %v2632_v6, %v2622_v4  ;;  %v10385_v48 = vand.u32 2147483647, %v8547_v0  ;;  %v3444_v58 = vsel %vm8574_vm5, 0, %v3442_v39  ;;  %v8616_v51 = vpop.permute.xlu2 %469 }
 0x3dd   : > { %v3439_v44 = vxor.u32 2147483648, %v3438_v52  ;;  %v8602_v13 = vadd.s32 %v2627_v19, %v2623_v12  ;;  %v4102_v22 = vadd.s32 1, %v6017_v28  ;;  %v2581_v34 = vsel %vm2575_vm2, %v2578_v1, %v2580_v36  ;;  %v496_v19 = vpop.permute.xlu1 %495 }
 0x3de   : > { %v2634_v7 = vadd.s32 %v2633_v17, %v2624_v56  ;;  %v3461_v62 = vadd.s32 3, %v3444_v58  ;;  %v4099_v27 = vand.u32 8388607, %v10385_v48  ;;  %v2635_v23 = vmul.u32 %v8514_v45, %v2581_v34 }
 0x3df   : > { %v3440_v49 = vsel %vm3319_vm3, %v3439_v44, %v3438_v52  ;;  %vm2637_vm10 = vc.u32 %v8595_v54, %v8602_v13  ;;  %vm4103_vm11 = vcmp.gt.s32.totalorder %v4102_v22, 0  ;;  %v765_v26 = vsel %vm320_vm1, %v496_v19, %v8115_v14 }
 0x3e0   : > { %v3443_v5 = vsel %vm8574_vm5, %v8301_v33, %v3440_v49  ;;  %v2638_v63 = vadd.s32 1, %v2634_v7  ;;  %v4104_v3 = vsel %vm4103_vm11, %v4102_v22, 0  ;;  %v3462_v35 = vand.u32 3, %v3461_v62 }
 0x3e1   : > { %v3445_v8 = vmul.f32 %v3443_v5, %v3443_v5  ;;  %v4106_v47 = vand.u32 31, %v4104_v3  ;;  %v4100_v53 = vor.u32 8388608, %v4099_v27  ;;  %v8621_v45 = vshrl.u32 %v4104_v3, 5 }
 0x3e2   : > { %v2639_v41 = vsel %vm2637_vm10, %v2638_v63, %v2634_v7  ;;  %vm3464_vm13 = vcmp.eq.s32.totalorder %v3462_v35, 0  ;;  %vm3463_vm12 = vcmp.lt.s32.totalorder %v3462_v35, 2  ;;  %vm3460_vm14 = vweird.f32 %v8301_v33 }
 0x3e3   : > { %v3446_v38 = vmul.f32 -0.001358992, %v3445_v8  ;;  %v3453_v12 = vmul.f32 -0.00019511016, %v3445_v8  ;;  %v2640_v40 = vadd.s32 %v2639_v41, %v2635_v23  ;;  %v8614_v37 = vsub.s32 32, %v4106_v47 }
 0x3e4   : > { %v4109_v14 = vshll.u32 %v10386_v18, %v4106_v47  ;;  %v4112_v36 = vshll.u32 %v10409_v25, %v4106_v47  ;;  %v4115_v28 = vshll.u32 %v10400_v55, %v4106_v47  ;;  %v4118_v17 = vshll.u32 %v10399_v9, %v4106_v47 }
 0x3e5   : > { %v3447_v20 = vadd.f32 0.041655596, %v3446_v38  ;;  %v3454_v61 = vadd.f32 0.008332121, %v3453_v12  ;;  %v2641_v21 = vadd.s32 536870912, %v2640_v40  ;;  %v4110_v31 = vshrl.u32 %v10409_v25, %v8614_v37 }
 0x3e6   : > { %v4113_v57 = vshrl.u32 %v10400_v55, %v8614_v37  ;;  %v4119_v4 = vshrl.u32 %v10401_v30, %v8614_v37  ;;  %v4116_v56 = vshrl.u32 %v10399_v9, %v8614_v37  ;;  %v4121_v34 = vshll.u32 %v10401_v30, %v4106_v47  ;;  %v8653_v47 = vpop.permute.xlu2 %488 }
 0x3e7   : > { %v3448_v52 = vmul.f32 %v3447_v20, %v3445_v8  ;;  %v3455_v39 = vmul.f32 %v3454_v61, %v3445_v8  ;;  %v8629_v1 = vshrl.u32 %v2641_v21, 30  ;;  %v8640_v7 = vor.u32 %v4110_v31, %v4109_v14 }
 0x3e8   : > { %v8642_v62 = vor.u32 %v4113_v57, %v4112_v36  ;;  %v4120_v63 = vor.u32 %v4119_v4, %v4118_v17  ;;  %v4122_v27 = vshrl.u32 %v10402_v16, %v8614_v37  ;;  %v8649_v23 = vor.u32 %v4116_v56, %v4115_v28 }
 0x3e9   : > { %v3449_v6 = vadd.f32 -0.4999988, %v3448_v52  ;;  %v3456_v44 = vadd.f32 -0.16666654, %v3455_v39  ;;  %v2643_v22 = vshll.u32 %v8629_v1, 30  ;;  %vm4124_vm15 = vcmp.lt.s32.totalorder %v8621_v45, 1 }
 0x3ea   : > { %v4123_v19 = vor.u32 %v4122_v27, %v4121_v34  ;;  %vm4127_vm0 = vcmp.lt.s32.totalorder %v8621_v45, 4  ;;  %vm3467_vm4 = vcmp.eq.s32.totalorder %v3462_v35, 2  ;;  %vm2544_vm3 = vcmp.lt.s32.totalorder %v8406_v50, 0 }
 0x3eb   : > { %v3450_v49 = vmul.f32 %v3449_v6, %v3445_v8  ;;  %v3457_v58 = vmul.f32 %v3456_v44, %v3445_v8  ;;  %v8646_v12 = vsub.s32 %v2640_v40, %v2643_v22  ;;  %v798_v8 = vmul.f32 %v8519_v59, %v765_v26 }
 0x3ec   : > { %v4132_v40 = vsel %vm4124_vm15, %v8640_v7, %v8642_v62  ;;  %v4133_v26 = vsel %vm4127_vm0, %v4120_v63, 920167782  ;;  %v8664_v52 = vshll.u32 %v4100_v53, 8  ;;  %vm4126_vm5 = vcmp.lt.s32.totalorder %v8621_v45, 3 }
 0x3ed   : > { %v3451_v3 = vadd.f32 1.0, %v3450_v49  ;;  %v3458_v38 = vadd.f32 1.0, %v3457_v58  ;;  %vm2645_vm2 = vcmp.lt.s32.totalorder %v8646_v12, 0  ;;  %v2646_v61 = vsub.s32 0, %v8646_v12 }
 0x3ee   : > { %v8669_v21 = vadd.f32 %v8544_v15, %v798_v8  ;;  %vm4125_vm6 = vcmp.lt.s32.totalorder %v8621_v45, 2  ;;  %v4134_v4 = vsel %vm4126_vm5, %v8649_v23, %v4133_v26  ;;  %v4136_v44 = vsel %vm4124_vm15, %v8642_v62, %v8649_v23 }
 0x3ef   : > { %v3459_v41 = vmul.f32 %v3458_v38, %v3443_v5  ;;  %v3468_v20 = vxor.u32 2147483648, %v3451_v3  ;;  %v2647_v5 = vsel %vm2645_vm2, %v2646_v61, %v8646_v12  ;;  %v4135_v6 = vsel %vm4125_vm6, %v4132_v40, %v4134_v4 }
 0x3f0   : > { %v2648_v57 = vclz %v2647_v5  ;;  %v4137_v14 = vsel %vm4127_vm0, %v4123_v19, 1326507024  ;;  %v2636_v28 = vadd.s32 %v8602_v13, %v8595_v54  ;;  %v4141_v17 = vand.u32 65535, %v8664_v52 }
 0x3f1   : > { %v3465_v39 = vxor.u32 2147483648, %v3459_v41  ;;  %v3469_v31 = vsel %vm3467_vm4, %v3468_v20, %v3459_v41  ;;  %v2666_v58 = vsub.s32 4, %v8629_v1  ;;  %v4138_v22 = vsel %vm4126_vm5, %v4120_v63, %v4137_v14  ;;  %v8698_v20 = vpop.permute.xlu2 %501 }
 0x3f2   : > { %v5988_v56 = vadd.s32 4294967294, %v2648_v57  ;;  %v4142_v34 = vshrl.u32 %v8664_v52, 16  ;;  %v4139_v35 = vsel %vm4125_vm6, %v4136_v44, %v4138_v22  ;;  %v4165_v27 = vand.u32 65535, %v4135_v6 }
 0x3f3   : > { %v3466_v53 = vsel %vm3464_vm13, %v3451_v3, %v3465_v39  ;;  %v4166_v54 = vshrl.u32 %v4135_v6, 16  ;;  %v4143_v3 = vand.u32 65535, %v4139_v35  ;;  %v4144_v38 = vshrl.u32 %v4139_v35, 16 }
 0x3f4   : > { %v3470_v36 = vsel %vm3463_vm12, %v3466_v53, %v3469_v31  ;;  %vm5989_vm7 = vcmp.lt.s32.totalorder %v5988_v56, 0  ;;  %v10388_v33 = vand.u32 2147483647, %v8669_v21  ;;  %v4870_v63 = vand.u32 2139095040, %v8669_v21 }
 0x3f5   : > { %v3471_v49 = vsel %vm3460_vm14, nan, %v3470_v36  ;;  %v2651_v13 = vsel %vm5989_vm7, 0, %v5988_v56  ;;  %v4168_v41 = vmul.u32 %v4166_v54, %v4141_v17  ;;  %vm8703_vm8 = vcmp.le.f32.partialorder %v2542_v24, 0.7853982 }
 0x3f6   : > { %5813 = vst [vmem:[%s6906_s5 + $0x80] sm:$0xff] %v3471_v49  ;;  %v2652_v8 = vsub.s32 32, %v2651_v13  ;;  %v2656_v19 = vsub.s32 4294967266, %v2651_v13  ;;  %v2667_v40 = vsel %vm2544_vm3, %v2666_v58, %v8629_v1  ;;  %v4108_v26 = vshrl.u32 %v10386_v18, %v8614_v37 }
 0x3f7   : > { %v4146_v39 = vmul.u32 %v4144_v38, %v4141_v17  ;;  %v4147_v5 = vmul.u32 %v4143_v3, %v4142_v34  ;;  %v2653_v31 = vshll.u32 %v8646_v12, %v2651_v13  ;;  %v4169_v53 = vmul.u32 %v4165_v27, %v4142_v34 }
 0x3f8   : > { %v2654_v57 = vshrl.u32 %v2636_v28, %v2652_v8  ;;  %v2657_v4 = vadd.s32 127, %v2656_v19  ;;  %v4145_v6 = vmul.u32 %v4143_v3, %v4141_v17  ;;  %v4148_v44 = vmul.u32 %v4144_v38, %v4142_v34 }
 0x3f9   : > { %v4149_v24 = vshll.u32 %v4146_v39, 16  ;;  %v4167_v14 = vmul.u32 %v4165_v27, %v4141_v17  ;;  %v4170_v49 = vmul.u32 %v4166_v54, %v4142_v34  ;;  %v4171_v22 = vshll.u32 %v4168_v41, 16  ;;  %v8716_v54 = vpop.permute.xlu2 %521 }
 0x3fa   : > { %v2655_v36 = vor.u32 %v2654_v57, %v2653_v31  ;;  %v2658_v56 = vshll.u32 %v2657_v4, 23  ;;  %v4151_v35 = vshll.u32 %v4147_v5, 16  ;;  %v4173_v58 = vshll.u32 %v4169_v53, 16 }
 0x3fb   : > { %vm4153_vm9 = vc.u32 %v4145_v6, %v4149_v24  ;;  %v4155_v1 = vadd.s32 %v4149_v24, %v4145_v6  ;;  %vm4175_vm10 = vc.u32 %v4167_v14, %v4171_v22  ;;  %v4177_v13 = vadd.s32 %v4171_v22, %v4167_v14 }
 0x3fc   : > { %v2659_v37 = vor.u32 4788187, %v2658_v56  ;;  %v2662_v48 = vcvt.s32.f32 %v2655_v36  ;;  %v4154_v18 = vsel %vm4153_vm9, 1, %v6360_v29  ;;  %v4176_v28 = vsel %vm4175_vm10, 1, %v6360_v29 }
 0x3fd   : > { %v4156_v12 = vadd.s32 %v4154_v18, %v4148_v44  ;;  %vm4157_vm11 = vc.u32 %v4155_v1, %v4151_v35  ;;  %v4178_v27 = vadd.s32 %v4176_v28, %v4170_v49  ;;  %v4871_v34 = vshrl.u32 %v4870_v63, 23 }
 0x3fe   : > { %v2660_v3 = vand.u32 2147483647, %v2659_v37  ;;  %v4158_v17 = vsel %vm4157_vm11, 1, %v6360_v29  ;;  %v4129_v38 = vsel %vm4127_vm0, %v8649_v23, 2102212464  ;;  %v4150_v8 = vshrl.u32 %v4146_v39, 16 }
 0x3ff   : > { %v4160_v19 = vadd.s32 %v4158_v17, %v4156_v12  ;;  %vm4179_vm13 = vc.u32 %v4177_v13, %v4173_v58  ;;  %v2669_v18 = vsel %vm8703_vm8, 0, %v2667_v40  ;;  %v6032_v4 = vadd.s32 4294967169, %v4871_v34 }
 0x400   : > { %v2663_v31 = vmul.f32 %v2662_v48, %v2660_v3  ;;  %v4180_v57 = vsel %vm4179_vm13, 1, %v6360_v29  ;;  %v4152_v6 = vshrl.u32 %v4147_v5, 16  ;;  %v4172_v24 = vshrl.u32 %v4168_v41, 16 }
 0x401   : > { %v4161_v44 = vadd.s32 %v4160_v19, %v4150_v8  ;;  %v4182_v63 = vadd.s32 %v4180_v57, %v4178_v27  ;;  %v4128_v36 = vsel %vm4124_vm15, %v4108_v26, %v8640_v7  ;;  %v4130_v23 = vsel %vm4126_vm5, %v8642_v62, %v4129_v38  ;;  %v652_v28 = vpop.permute.xlu2 %651 }
 0x402   : > { %v2664_v14 = vxor.u32 2147483648, %v2663_v31  ;;  %v4877_v48 = vadd.s32 1, %v6032_v4  ;;  %v4174_v40 = vshrl.u32 %v4169_v53, 16  ;;  %v8734_v49 = vadd.s32 %v4177_v13, %v4173_v58 }
 0x403   : > { %v8730_v39 = vadd.s32 %v4161_v44, %v4152_v6  ;;  %v4183_v56 = vadd.s32 %v4182_v63, %v4172_v24  ;;  %v2686_v7 = vadd.s32 3, %v2669_v18  ;;  %v4131_v26 = vsel %vm4125_vm6, %v4128_v36, %v4130_v23 }
 0x404   : > { %v2665_v5 = vsel %vm2544_vm3, %v2664_v14, %v2663_v31  ;;  %vm4878_vm12 = vcmp.gt.s32.totalorder %v4877_v48, 0  ;;  %v4874_v53 = vand.u32 8388607, %v10388_v33  ;;  %v4185_v61 = vmul.u32 %v8664_v52, %v4131_v26 }
 0x405   : > { %v2668_v41 = vsel %vm8703_vm8, %v8406_v50, %v2665_v5  ;;  %v4184_v62 = vadd.s32 %v4183_v56, %v4174_v40  ;;  %vm4187_vm14 = vc.u32 %v8730_v39, %v8734_v49  ;;  %v4879_v35 = vsel %vm4878_vm12, %v4877_v48, 0 }
 0x406   : > { %v2670_v22 = vmul.f32 %v2668_v41, %v2668_v41  ;;  %v4881_v58 = vand.u32 31, %v4879_v35  ;;  %v8746_v13 = vand.u32 3, %v2686_v7  ;;  %v4875_v38 = vor.u32 8388608, %v4874_v53 }
 0x407   : > { %v4188_v1 = vadd.s32 1, %v4184_v62  ;;  %v8750_v8 = vshrl.u32 %v4879_v35, 5  ;;  %v757_v52 = vsel %vm320_vm1, %v7967_v11, %v652_v28  ;;  %v10440_v6 = vmov 683565275  }
 0x408   : > { %v2671_v37 = vmul.f32 -0.001358992, %v2670_v22  ;;  %v2678_v12 = vmul.f32 -0.00019511016, %v2670_v22  ;;  %v8748_v3 = vsub.s32 32, %v4881_v58  ;;  %v4884_v44 = vshll.u32 %v10440_v6, %v4881_v58 }
 0x409   : > { %v4189_v45 = vsel %vm4187_vm14, %v4188_v1, %v4184_v62  ;;  %v4887_v24 = vshll.u32 %v10409_v25, %v4881_v58  ;;  %v4893_v14 = vshll.u32 %v10399_v9, %v4881_v58  ;;  %v4890_v11 = vshll.u32 %v10400_v55, %v4881_v58 }
 0x40a   : > { %v2672_v17 = vadd.f32 0.041655596, %v2671_v37  ;;  %v2679_v27 = vadd.f32 0.008332121, %v2678_v12  ;;  %v4190_v34 = vadd.s32 %v4189_v45, %v4185_v61  ;;  %v4885_v19 = vshrl.u32 %v10409_v25, %v8748_v3 }
 0x40b   : > { %v4888_v31 = vshrl.u32 %v10400_v55, %v8748_v3  ;;  %v4891_v63 = vshrl.u32 %v10399_v9, %v8748_v3  ;;  %v4894_v36 = vshrl.u32 %v10401_v30, %v8748_v3  ;;  %vm2689_vm15 = vcmp.eq.s32.totalorder %v8746_v13, 0 }
 0x40c   : > { %v2673_v18 = vmul.f32 %v2672_v17, %v2670_v22  ;;  %v2680_v57 = vmul.f32 %v2679_v27, %v2670_v22  ;;  %v4191_v4 = vadd.s32 536870912, %v4190_v34  ;;  %v4886_v56 = vor.u32 %v4885_v19, %v4884_v44 }
 0x40d   : > { %v8770_v5 = vor.u32 %v4888_v31, %v4887_v24  ;;  %v4895_v7 = vor.u32 %v4894_v36, %v4893_v14  ;;  %v4897_v26 = vshrl.u32 %v10402_v16, %v8748_v3  ;;  %vm2688_vm0 = vcmp.lt.s32.totalorder %v8746_v13, 2 }
 0x40e   : > { %v2674_v23 = vadd.f32 -0.4999988, %v2673_v18  ;;  %v2681_v48 = vadd.f32 -0.16666654, %v2680_v57  ;;  %v8766_v40 = vshrl.u32 %v4191_v4, 30  ;;  %v8776_v1 = vshll.u32 %v4875_v38, 8 }
 0x40f   : > { %vm2685_vm2 = vweird.f32 %v8406_v50  ;;  %v4892_v37 = vor.u32 %v4891_v63, %v4890_v11  ;;  %v4896_v12 = vshll.u32 %v10401_v30, %v4881_v58  ;;  %vm4899_vm4 = vcmp.lt.s32.totalorder %v8750_v8, 1 }
 0x410   : > { %v2675_v62 = vmul.f32 %v2674_v23, %v2670_v22  ;;  %v2682_v53 = vmul.f32 %v2681_v48, %v2670_v22  ;;  %v4193_v35 = vshll.u32 %v8766_v40, 30  ;;  %v790_v61 = vmul.f32 %v8519_v59, %v757_v52 }
 0x411   : > { %vm4902_vm3 = vcmp.lt.s32.totalorder %v8750_v8, 4  ;;  %v4898_v22 = vor.u32 %v4897_v26, %v4896_v12  ;;  %vm4901_vm5 = vcmp.lt.s32.totalorder %v8750_v8, 3  ;;  %v4907_v27 = vsel %vm4899_vm4, %v4886_v56, %v8770_v5 }
 0x412   : > { %v2676_v28 = vadd.f32 1.0, %v2675_v62  ;;  %v2683_v45 = vadd.f32 1.0, %v2682_v53  ;;  %v4194_v17 = vsub.s32 %v4190_v34, %v4193_v35  ;;  %v4908_v38 = vsel %vm4902_vm3, %v4895_v7, 920167782 }
 0x413   : > { %vm2692_vm7 = vcmp.eq.s32.totalorder %v8746_v13, 2  ;;  %v4909_v34 = vsel %vm4901_vm5, %v4892_v37, %v4908_v38  ;;  %v4916_v52 = vand.u32 65535, %v8776_v1  ;;  %v8794_v18 = vadd.f32 %v8544_v15, %v790_v61 }
 0x414   : > { %v2684_v58 = vmul.f32 %v2683_v45, %v2668_v41  ;;  %v2693_v19 = vxor.u32 2147483648, %v2676_v28  ;;  %vm4195_vm6 = vcmp.lt.s32.totalorder %v4194_v17, 0  ;;  %v4196_v31 = vsub.s32 0, %v4194_v17 }
 0x415   : > { %vm4900_vm8 = vcmp.lt.s32.totalorder %v8750_v8, 2  ;;  %v4911_v41 = vsel %vm4899_vm4, %v8770_v5, %v4892_v37  ;;  %v4912_v14 = vsel %vm4902_vm3, %v4898_v22, 1326507024  ;;  %v4186_v62 = vadd.s32 %v8734_v49, %v8730_v39 }
 0x416   : > { %v2690_v57 = vxor.u32 2147483648, %v2684_v58  ;;  %v4197_v4 = vsel %vm4195_vm6, %v4196_v31, %v4194_v17  ;;  %v2694_v44 = vsel %vm2692_vm7, %v2693_v19, %v2684_v58  ;;  %v4910_v63 = vsel %vm4900_vm8, %v4907_v27, %v4909_v34 }
 0x417   : > { %v4198_v24 = vclz %v4197_v4  ;;  %v4913_v23 = vsel %vm4901_vm5, %v4895_v7, %v4912_v14  ;;  %v4940_v48 = vand.u32 65535, %v4910_v63  ;;  %v4941_v11 = vshrl.u32 %v4910_v63, 16 }
 0x418   : > { %v2691_v36 = vsel %vm2689_vm15, %v2676_v28, %v2690_v57  ;;  %v4917_v35 = vshrl.u32 %v8776_v1, 16  ;;  %v4883_v61 = vshrl.u32 %v10440_v6, %v8748_v3  ;;  %v4914_v7 = vsel %vm4900_vm8, %v4911_v41, %v4913_v23 }
 0x419   : > { %v2695_v26 = vsel %vm2688_vm0, %v2691_v36, %v2694_v44  ;;  %v6018_v53 = vadd.s32 4294967294, %v4198_v24  ;;  %v3627_v28 = vand.u32 2147483647, %v8794_v18  ;;  %v4918_v13 = vand.u32 65535, %v4914_v7 }
 0x41a   : > { %v2696_v12 = vsel %vm2685_vm2, nan, %v2695_v26  ;;  %v4919_v45 = vshrl.u32 %v4914_v7, 16  ;;  %v4943_v22 = vmul.u32 %v4941_v11, %v4916_v52  ;;  %v4216_v49 = vsub.s32 4, %v8766_v40 }
 0x41b   : > { %5808 = vst [vmem:[%s6906_s5 + $0x58] sm:$0xff] %v2696_v12  ;;  %vm6019_vm9 = vcmp.lt.s32.totalorder %v6018_v53, 0  ;;  %v4944_v27 = vmul.u32 %v4940_v48, %v4917_v35  ;;  %v3630_v50 = vand.u32 2139095040, %v8794_v18  ;;  %v4903_v3 = vsel %vm4899_vm4, %v4883_v61, %v4886_v56 }
 0x41c   : > { %v4201_v39 = vsel %vm6019_vm9, 0, %v6018_v53  ;;  %v4904_v19 = vsel %vm4902_vm3, %v4892_v37, 2102212464  ;;  %vm4094_vm10 = vcmp.lt.s32.totalorder %v8547_v0, 0  ;;  %v4921_v31 = vmul.u32 %v4919_v45, %v4916_v52 }
 0x41d   : > { %v4202_v38 = vsub.s32 32, %v4201_v39  ;;  %v4206_v58 = vsub.s32 4294967266, %v4201_v39  ;;  %v4922_v34 = vmul.u32 %v4918_v13, %v4917_v35  ;;  %v4942_v57 = vmul.u32 %v4940_v48, %v4916_v52 }
 0x41e   : > { %v4946_v4 = vshll.u32 %v4943_v22, 16  ;;  %v4203_v41 = vshll.u32 %v4194_v17, %v4201_v39  ;;  %v4945_v63 = vmul.u32 %v4941_v11, %v4917_v35  ;;  %v4920_v14 = vmul.u32 %v4918_v13, %v4916_v52 }
 0x41f   : > { %v4204_v44 = vshrl.u32 %v4186_v62, %v4202_v38  ;;  %v4207_v24 = vadd.s32 127, %v4206_v58  ;;  %v4923_v36 = vmul.u32 %v4919_v45, %v4917_v35  ;;  %v4924_v23 = vshll.u32 %v4921_v31, 16 }
 0x420   : > { %v4948_v26 = vshll.u32 %v4944_v27, 16  ;;  %v4926_v56 = vshll.u32 %v4922_v34, 16  ;;  %vm4950_vm11 = vc.u32 %v4942_v57, %v4946_v4  ;;  %v4952_v7 = vadd.s32 %v4946_v4, %v4942_v57 }
 0x421   : > { %v4205_v53 = vor.u32 %v4204_v44, %v4203_v41  ;;  %v4208_v12 = vshll.u32 %v4207_v24, 23  ;;  %vm4928_vm13 = vc.u32 %v4920_v14, %v4924_v23  ;;  %v4930_v37 = vadd.s32 %v4924_v23, %v4920_v14 }
 0x422   : > { %v4951_v61 = vsel %vm4950_vm11, 1, %v6360_v29  ;;  %v4905_v17 = vsel %vm4901_vm5, %v8770_v5, %v4904_v19  ;;  %v4929_v48 = vsel %vm4928_vm13, 1, %v6360_v29  ;;  %vm4954_vm14 = vc.u32 %v4952_v7, %v4948_v26 }
 0x423   : > { %v4209_v33 = vor.u32 4788187, %v4208_v12  ;;  %v4953_v52 = vadd.s32 %v4951_v61, %v4945_v63  ;;  %v4212_v11 = vcvt.s32.f32 %v4205_v53  ;;  %v4931_v62 = vadd.s32 %v4929_v48, %v4923_v36 }
 0x424   : > { %vm4932_vm12 = vc.u32 %v4930_v37, %v4926_v56  ;;  %v4955_v45 = vsel %vm4954_vm14, 1, %v6360_v29  ;;  %v3631_v39 = vshrl.u32 %v3630_v50, 23  ;;  %v4925_v38 = vshrl.u32 %v4921_v31, 16 }
 0x425   : > { %v4210_v35 = vand.u32 2147483647, %v4209_v33  ;;  %v4933_v13 = vsel %vm4932_vm12, 1, %v6360_v29  ;;  %v4947_v57 = vshrl.u32 %v4943_v22, 16  ;;  %v4957_v4 = vadd.s32 %v4955_v45, %v4953_v52 }
 0x426   : > { %v4935_v58 = vadd.s32 %v4933_v13, %v4931_v62  ;;  %v4217_v5 = vsel %vm4094_vm10, %v4216_v49, %v8766_v40  ;;  %v6008_v19 = vadd.s32 4294967169, %v3631_v39  ;;  %v4927_v44 = vshrl.u32 %v4922_v34, 16 }
 0x427   : > { %v4213_v41 = vmul.f32 %v4212_v11, %v4210_v35  ;;  %v4949_v63 = vshrl.u32 %v4944_v27, 16  ;;  %v4958_v14 = vadd.s32 %v4957_v4, %v4947_v57  ;;  %v10441_v33 = vand.u32 2147483647, %v8547_v0 }
 0x428   : > { %v4936_v24 = vadd.s32 %v4935_v58, %v4925_v38  ;;  %v4906_v22 = vsel %vm4900_vm8, %v4903_v3, %v4905_v17  ;;  %v3637_v31 = vadd.s32 1, %v6008_v19  ;;  %v8848_v53 = vadd.s32 %v4952_v7, %v4948_v26  ;;  %v665_v26 = vpop.permute.xlu2 %664 }
 0x429   : > { %vm8840_vm15 = vcmp.le.f32.partialorder %v10441_v33, 0.7853982  ;;  %v4214_v50 = vxor.u32 2147483648, %v4213_v41  ;;  %v4959_v40 = vadd.s32 %v4958_v14, %v4949_v63  ;;  %v3634_v49 = vand.u32 8388607, %v3627_v28 }
 0x42a   : > { %v8846_v23 = vadd.s32 %v4936_v24, %v4927_v44  ;;  %v4219_v34 = vsel %vm8840_vm15, 0, %v4217_v5  ;;  %vm3638_vm0 = vcmp.gt.s32.totalorder %v3637_v31, 0  ;;  %v4960_v56 = vmul.u32 %v8776_v1, %v4906_v22 }
 0x42b   : > { %v4215_v27 = vsel %vm4094_vm10, %v4214_v50, %v4213_v41  ;;  %v4963_v3 = vadd.s32 1, %v4959_v40  ;;  %v3639_v37 = vsel %vm3638_vm0, %v3637_v31, 0  ;;  %v4236_v61 = vadd.s32 3, %v4219_v34 }
 0x42c   : > { %v4218_v8 = vsel %vm8840_vm15, %v8547_v0, %v4215_v27  ;;  %vm4962_vm2 = vc.u32 %v8846_v23, %v8848_v53  ;;  %v3635_v17 = vor.u32 8388608, %v3634_v49  ;;  %v3641_v48 = vand.u32 31, %v3639_v37 }
 0x42d   : > { %v4220_v12 = vmul.f32 %v4218_v8, %v4218_v8  ;;  %v4964_v7 = vsel %vm4962_vm2, %v4963_v3, %v4959_v40  ;;  %v759_v35 = vsel %vm320_vm1, %v8587_v32, %v665_v26  ;;  %v4237_v58 = vand.u32 3, %v4236_v61 }
 0x42e   : > { %v4965_v62 = vadd.s32 %v4964_v7, %v4960_v56  ;;  %v8865_v13 = vsub.s32 32, %v3641_v48  ;;  %v8867_v57 = vshll.u32 %v3635_v17, 8  ;;  %v792_v1 = vmul.f32 %v8519_v59, %v759_v35 }
 0x42f   : > { %v4221_v52 = vmul.f32 -0.001358992, %v4220_v12  ;;  %v4228_v11 = vmul.f32 -0.00019511016, %v4220_v12  ;;  %v8874_v44 = vshrl.u32 %v3639_v37, 5  ;;  %v3644_v36 = vshll.u32 %v10440_v6, %v3641_v48 }
 0x430   : > { %v4966_v38 = vadd.s32 536870912, %v4965_v62  ;;  %v3645_v19 = vshrl.u32 %v10409_v25, %v8865_v13  ;;  %v3648_v32 = vshrl.u32 %v10400_v55, %v8865_v13  ;;  %v3651_v24 = vshrl.u32 %v10399_v9, %v8865_v13 }
 0x431   : > { %v4222_v45 = vadd.f32 0.041655596, %v4221_v52  ;;  %v4229_v39 = vadd.f32 0.008332121, %v4228_v11  ;;  %v3654_v63 = vshrl.u32 %v10401_v30, %v8865_v13  ;;  %vm4239_vm4 = vcmp.eq.s32.totalorder %v4237_v58, 0 }
 0x432   : > { %v8870_v5 = vshrl.u32 %v4966_v38, 30  ;;  %v3647_v50 = vshll.u32 %v10409_v25, %v3641_v48  ;;  %v3650_v22 = vshll.u32 %v10400_v55, %v3641_v48  ;;  %v3653_v31 = vshll.u32 %v10399_v9, %v3641_v48 }
 0x433   : > { %v4223_v4 = vmul.f32 %v4222_v45, %v4220_v12  ;;  %v4230_v41 = vmul.f32 %v4229_v39, %v4220_v12  ;;  %v3657_v40 = vshrl.u32 %v10402_v16, %v8865_v13  ;;  %vm4238_vm3 = vcmp.lt.s32.totalorder %v4237_v58, 2 }
 0x434   : > { %v4968_v33 = vshll.u32 %v8870_v5, 30  ;;  %v3646_v3 = vor.u32 %v3645_v19, %v3644_v36  ;;  %vm4235_vm5 = vweird.f32 %v8547_v0  ;;  %v8890_v26 = vor.u32 %v3648_v32, %v3647_v50 }
 0x435   : > { %v4224_v14 = vadd.f32 -0.4999988, %v4223_v4  ;;  %v4231_v59 = vadd.f32 -0.16666654, %v4230_v41  ;;  %v3652_v56 = vor.u32 %v3651_v24, %v3650_v22  ;;  %v3655_v37 = vor.u32 %v3654_v63, %v3653_v31 }
 0x436   : > { %v4969_v34 = vsub.s32 %v4965_v62, %v4968_v33  ;;  %v3656_v61 = vshll.u32 %v10401_v30, %v3641_v48  ;;  %vm4242_vm7 = vcmp.eq.s32.totalorder %v4237_v58, 2  ;;  %vm3659_vm8 = vcmp.lt.s32.totalorder %v8874_v44, 1 }
 0x437   : > { %v4225_v49 = vmul.f32 %v4224_v14, %v4220_v12  ;;  %v4232_v27 = vmul.f32 %v4231_v59, %v4220_v12  ;;  %v8895_v12 = vadd.f32 %v8544_v15, %v792_v1  ;;  %vm3662_vm9 = vcmp.lt.s32.totalorder %v8874_v44, 4 }
 0x438   : > { %vm4970_vm6 = vcmp.lt.s32.totalorder %v4969_v34, 0  ;;  %v4971_v52 = vsub.s32 0, %v4969_v34  ;;  %v3658_v11 = vor.u32 %v3657_v40, %v3656_v61  ;;  %vm4869_vm10 = vcmp.lt.s32.totalorder %v8669_v21, 0 }
 0x439   : > { %v4226_v7 = vadd.f32 1.0, %v4225_v49  ;;  %v4233_v17 = vadd.f32 1.0, %v4232_v27  ;;  %vm3661_vm11 = vcmp.lt.s32.totalorder %v8874_v44, 3  ;;  %v3667_v48 = vsel %vm3659_vm8, %v3646_v3, %v8890_v26 }
 0x43a   : > { %v4972_v45 = vsel %vm4970_vm6, %v4971_v52, %v4969_v34  ;;  %v3668_v38 = vsel %vm3662_vm9, %v3655_v37, 920167782  ;;  %v4961_v15 = vadd.s32 %v8848_v53, %v8846_v23  ;;  %v3676_v1 = vand.u32 65535, %v8867_v57 }
 0x43b   : > { %v4234_v62 = vmul.f32 %v4233_v17, %v4218_v8  ;;  %v4243_v35 = vxor.u32 2147483648, %v4226_v7  ;;  %v4973_v39 = vclz %v4972_v45  ;;  %v3669_v8 = vsel %vm3661_vm11, %v3652_v56, %v3668_v38 }
 0x43c   : > { %v4991_v19 = vsub.s32 4, %v8870_v5  ;;  %vm3660_vm13 = vcmp.lt.s32.totalorder %v8874_v44, 2  ;;  %v3671_v32 = vsel %vm3659_vm8, %v8890_v26, %v3652_v56  ;;  %v3672_v53 = vsel %vm3662_vm9, %v3658_v11, 1326507024 }
 0x43d   : > { %v4240_v4 = vxor.u32 2147483648, %v4234_v62  ;;  %v6033_v41 = vadd.s32 4294967294, %v4973_v39  ;;  %v4244_v63 = vsel %vm4242_vm7, %v4243_v35, %v4234_v62  ;;  %v3670_v23 = vsel %vm3660_vm13, %v3667_v48, %v3669_v8 }
 0x43e   : > { %v3673_v59 = vsel %vm3661_vm11, %v3655_v37, %v3672_v53  ;;  %v3700_v33 = vand.u32 65535, %v3670_v23  ;;  %v3701_v31 = vshrl.u32 %v3670_v23, 16  ;;  %v3677_v27 = vshrl.u32 %v8867_v57, 16 }
 0x43f   : > { %v4241_v24 = vsel %vm4239_vm4, %v4226_v7, %v4240_v4  ;;  %vm6034_vm12 = vcmp.lt.s32.totalorder %v6033_v41, 0  ;;  %v3674_v22 = vsel %vm3660_vm13, %v3671_v32, %v3673_v59  ;;  %v3643_v7 = vshrl.u32 %v10440_v6, %v8865_v13 }
 0x440   : > { %v4245_v14 = vsel %vm4238_vm3, %v4241_v24, %v4244_v63  ;;  %v4976_v50 = vsel %vm6034_vm12, 0, %v6033_v41  ;;  %v3678_v58 = vand.u32 65535, %v3674_v22  ;;  %v3679_v37 = vshrl.u32 %v3674_v22, 16 }
 0x441   : > { %v4246_v36 = vsel %vm4235_vm5, nan, %v4245_v14  ;;  %v4977_v40 = vsub.s32 32, %v4976_v50  ;;  %v4981_v49 = vsub.s32 4294967266, %v4976_v50  ;;  %v4978_v61 = vshll.u32 %v4969_v34, %v4976_v50 }
 0x442   : > { %5818 = vst [vmem:[%s6906_s5 + $0xa8] sm:$0xff] %v4246_v36  ;;  %v3703_v17 = vmul.u32 %v3701_v31, %v3676_v1  ;;  %v3682_v11 = vmul.u32 %v3678_v58, %v3677_v27  ;;  %v3704_v62 = vmul.u32 %v3700_v33, %v3677_v27  ;;  %v4992_v35 = vsel %vm4869_vm10, %v4991_v19, %v8870_v5 }
 0x443   : > { %v4979_v52 = vshrl.u32 %v4961_v15, %v4977_v40  ;;  %v4982_v0 = vadd.s32 127, %v4981_v49  ;;  %v3663_v45 = vsel %vm3659_vm8, %v3643_v7, %v3646_v3  ;;  %v3681_v39 = vmul.u32 %v3679_v37, %v3676_v1 }
 0x444   : > { %v3706_v48 = vshll.u32 %v3703_v17, 16  ;;  %v3664_v13 = vsel %vm3662_vm9, %v3652_v56, 2102212464  ;;  %v3702_v4 = vmul.u32 %v3700_v33, %v3676_v1  ;;  %v3680_v8 = vmul.u32 %v3678_v58, %v3676_v1  ;;  %v8941_v56 = vpop.permute.xlu1 %514 }
 0x445   : > { %v4980_v38 = vor.u32 %v4979_v52, %v4978_v61  ;;  %v4983_v34 = vshll.u32 %v4982_v0, 23  ;;  %v3683_v15 = vmul.u32 %v3679_v37, %v3677_v27  ;;  %v3684_v41 = vshll.u32 %v3681_v39, 16  ;;  %v8977_v37 = vld [vmem:[%s10364_s3] ss:$0 sm:$0xff] }
 0x446   : > { %v3705_v32 = vmul.u32 %v3701_v31, %v3677_v27  ;;  %v3686_v63 = vshll.u32 %v3682_v11, 16  ;;  %v3708_v23 = vshll.u32 %v3704_v62, 16  ;;  %vm3710_vm14 = vc.u32 %v3702_v4, %v3706_v48 }
 0x447   : > { %v4984_v24 = vor.u32 4788187, %v4983_v34  ;;  %vm3688_vm15 = vc.u32 %v3680_v8, %v3684_v41  ;;  %v3690_v5 = vadd.s32 %v3684_v41, %v3680_v8  ;;  %v3711_v3 = vsel %vm3710_vm14, 1, %v6360_v29 }
 0x448   : > { %v3712_v19 = vadd.s32 %v3706_v48, %v3702_v4  ;;  %v4987_v14 = vcvt.s32.f32 %v4980_v38  ;;  %v3689_v59 = vsel %vm3688_vm15, 1, %v6360_v29  ;;  %v3713_v36 = vadd.s32 %v3711_v3, %v3705_v32 }
 0x449   : > { %v4985_v53 = vand.u32 2147483647, %v4984_v24  ;;  %v3665_v1 = vsel %vm3661_vm11, %v8890_v26, %v3664_v13  ;;  %v3691_v33 = vadd.s32 %v3689_v59, %v3683_v15  ;;  %vm3692_vm0 = vc.u32 %v3690_v5, %v3686_v63 }
 0x44a   : > { %vm3714_vm2 = vc.u32 %v3712_v19, %v3708_v23  ;;  %v3693_v22 = vsel %vm3692_vm0, 1, %v6360_v29  ;;  %v3940_v40 = vand.u32 2139095040, %v8895_v12  ;;  %v3685_v49 = vshrl.u32 %v3681_v39, 16 }
 0x44b   : > { %v4988_v50 = vmul.f32 %v4987_v14, %v4985_v53  ;;  %v3715_v31 = vsel %vm3714_vm2, 1, %v6360_v29  ;;  %v3695_v27 = vadd.s32 %v3693_v22, %v3691_v33  ;;  %v3707_v58 = vshrl.u32 %v3703_v17, 16  ;;  %v736_v14 = vpop.permute.xlu0 %735 }
 0x44c   : > { %v3717_v61 = vadd.s32 %v3715_v31, %v3713_v36  ;;  %v10444_v7 = vand.u32 2147483647, %v8669_v21  ;;  %v3937_v52 = vand.u32 2147483647, %v8895_v12  ;;  %v3941_v0 = vshrl.u32 %v3940_v40, 23 }
 0x44d   : > { %v4989_v26 = vxor.u32 2147483648, %v4988_v50  ;;  %v3687_v48 = vshrl.u32 %v3682_v11, 16  ;;  %v3696_v38 = vadd.s32 %v3695_v27, %v3685_v49  ;;  %v3709_v34 = vshrl.u32 %v3704_v62, 16 }
 0x44e   : > { %vm8951_vm4 = vcmp.le.f32.partialorder %v10444_v7, 0.7853982  ;;  %v3718_v13 = vadd.s32 %v3717_v61, %v3707_v58  ;;  %v3666_v4 = vsel %vm3660_vm13, %v3663_v45, %v3665_v1  ;;  %v6014_v8 = vadd.s32 4294967169, %v3941_v0  ;;  %v528_v45 = vpop.permute.xlu1 %527 }
 0x44f   : > { %v4990_v39 = vsel %vm4869_vm10, %v4989_v26, %v4988_v50  ;;  %v4994_v17 = vsel %vm8951_vm4, 0, %v4992_v35  ;;  %v3697_v41 = vadd.s32 %v3696_v38, %v3687_v48  ;;  %v3716_v32 = vadd.s32 %v3712_v19, %v3708_v23 }
 0x450   : > { %v4993_v15 = vsel %vm8951_vm4, %v8669_v21, %v4990_v39  ;;  %v3719_v11 = vadd.s32 %v3718_v13, %v3709_v34  ;;  %v3947_v62 = vadd.s32 1, %v6014_v8  ;;  %v5011_v63 = vadd.s32 3, %v4994_v17 }
 0x451   : > { %v4995_v24 = vmul.f32 %v4993_v15, %v4993_v15  ;;  %vm3722_vm3 = vc.u32 %v3697_v41, %v3716_v32  ;;  %v3944_v3 = vand.u32 8388607, %v3937_v52  ;;  %v3720_v44 = vmul.u32 %v8867_v57, %v3666_v4 }
 0x452   : > { %v3723_v5 = vadd.s32 1, %v3719_v11  ;;  %vm3948_vm5 = vcmp.gt.s32.totalorder %v3947_v62, 0  ;;  %v5012_v33 = vand.u32 3, %v5011_v63  ;;  %v770_v31 = vsel %vm320_vm1, %v528_v45, %v736_v14 }
 0x453   : > { %v4996_v35 = vmul.f32 -0.001358992, %v4995_v24  ;;  %v5003_v53 = vmul.f32 -0.00019511016, %v4995_v24  ;;  %v3949_v36 = vsel %vm3948_vm5, %v3947_v62, 0  ;;  %v3945_v50 = vor.u32 8388608, %v3944_v3 }
 0x454   : > { %v3724_v59 = vsel %vm3722_vm3, %v3723_v5, %v3719_v11  ;;  %v3951_v22 = vand.u32 31, %v3949_v36  ;;  %v803_v26 = vmul.f32 %v8977_v37, %v770_v31  ;;  %vm5014_vm6 = vcmp.eq.s32.totalorder %v5012_v33, 0 }
 0x455   : > { %v4997_v1 = vadd.f32 0.041655596, %v4996_v35  ;;  %v5004_v23 = vadd.f32 0.008332121, %v5003_v53  ;;  %v3725_v19 = vadd.s32 %v3724_v59, %v3720_v44  ;;  %vm5017_vm7 = vcmp.eq.s32.totalorder %v5012_v33, 2 }
 0x456   : > { %v8970_v58 = vsub.s32 32, %v3951_v22  ;;  %v8980_v0 = vshrl.u32 %v3949_v36, 5  ;;  %v8986_v34 = vshll.u32 %v3945_v50, 8  ;;  %vm5013_vm8 = vcmp.lt.s32.totalorder %v5012_v33, 2 }
 0x457   : > { %v4998_v40 = vmul.f32 %v4997_v1, %v4995_v24  ;;  %v5005_v49 = vmul.f32 %v5004_v23, %v4995_v24  ;;  %v3726_v27 = vadd.s32 536870912, %v3725_v19  ;;  %v3954_v4 = vshll.u32 %v10440_v6, %v3951_v22 }
 0x458   : > { %v3955_v48 = vshrl.u32 %v10409_v25, %v8970_v58  ;;  %v3958_v38 = vshrl.u32 %v10400_v55, %v8970_v58  ;;  %vm5010_vm9 = vweird.f32 %v8669_v21  ;;  %v3957_v8 = vshll.u32 %v10409_v25, %v3951_v22 }
 0x459   : > { %v4999_v57 = vadd.f32 -0.4999988, %v4998_v40  ;;  %v5006_v61 = vadd.f32 -0.16666654, %v5005_v49  ;;  %v8972_v7 = vshrl.u32 %v3726_v27, 30  ;;  %v3960_v11 = vshll.u32 %v10400_v55, %v3951_v22 }
 0x45a   : > { %v3963_v62 = vshll.u32 %v10399_v9, %v3951_v22  ;;  %v3964_v63 = vshrl.u32 %v10401_v30, %v8970_v58  ;;  %v3956_v53 = vor.u32 %v3955_v48, %v3954_v4  ;;  %v3959_v44 = vor.u32 %v3958_v38, %v3957_v8 }
 0x45b   : > { %v5000_v13 = vmul.f32 %v4999_v57, %v4995_v24  ;;  %v5007_v39 = vmul.f32 %v5006_v61, %v4995_v24  ;;  %v3728_v17 = vshll.u32 %v8972_v7, 30  ;;  %v3961_v24 = vshrl.u32 %v10399_v9, %v8970_v58 }
 0x45c   : > { %v3965_v45 = vor.u32 %v3964_v63, %v3963_v62  ;;  %v3967_v14 = vshrl.u32 %v10402_v16, %v8970_v58  ;;  %v3721_v23 = vadd.s32 %v3716_v32, %v3697_v41  ;;  %v3966_v50 = vshll.u32 %v10401_v30, %v3951_v22 }
 0x45d   : > { %v5001_v5 = vadd.f32 1.0, %v5000_v13  ;;  %v5008_v3 = vadd.f32 1.0, %v5007_v39  ;;  %v3729_v35 = vsub.s32 %v3725_v19, %v3728_v17  ;;  %v3986_v31 = vand.u32 65535, %v8986_v34  ;;  %v9005_v19 = vld [vmem:[%s10364_s3 + $0x1] ss:$0 sm:$0xff] }
 0x45e   : > { %v9008_v40 = vadd.f32 %v9005_v19, %v803_v26  ;;  %v3962_v57 = vor.u32 %v3961_v24, %v3960_v11  ;;  %vm3629_vm11 = vcmp.lt.s32.totalorder %v8794_v18, 0  ;;  %v3968_v32 = vor.u32 %v3967_v14, %v3966_v50 }
 0x45f   : > { %v5009_v59 = vmul.f32 %v5008_v3, %v4993_v15  ;;  %v5018_v36 = vxor.u32 2147483648, %v5001_v5  ;;  %vm3730_vm10 = vcmp.lt.s32.totalorder %v3729_v35, 0  ;;  %v3731_v1 = vsub.s32 0, %v3729_v35 }
 0x460   : > { %v3987_v15 = vshrl.u32 %v8986_v34, 16  ;;  %vm3969_vm13 = vcmp.lt.s32.totalorder %v8980_v0, 1  ;;  %vm3972_vm12 = vcmp.lt.s32.totalorder %v8980_v0, 4  ;;  %vm3971_vm14 = vcmp.lt.s32.totalorder %v8980_v0, 3 }
 0x461   : > { %v5015_v49 = vxor.u32 2147483648, %v5009_v59  ;;  %v3732_v27 = vsel %vm3730_vm10, %v3731_v1, %v3729_v35  ;;  %v5019_v61 = vsel %vm5017_vm7, %v5018_v36, %v5009_v59  ;;  %v3977_v26 = vsel %vm3969_vm13, %v3956_v53, %v3959_v44 }
 0x462   : > { %v3733_v41 = vclz %v3732_v27  ;;  %v3978_v48 = vsel %vm3972_vm12, %v3965_v45, 920167782  ;;  %v5645_v39 = vand.u32 2139095040, %v9008_v40  ;;  %v3751_v4 = vsub.s32 4, %v8972_v7 }
 0x463   : > { %v5016_v22 = vsel %vm5014_vm6, %v5001_v5, %v5015_v49  ;;  %vm3970_vm15 = vcmp.lt.s32.totalorder %v8980_v0, 2  ;;  %v3979_v8 = vsel %vm3971_vm14, %v3962_v57, %v3978_v48  ;;  %v3981_v11 = vsel %vm3969_vm13, %v3959_v44, %v3962_v57 }
 0x464   : > { %v5020_v38 = vsel %vm5013_vm8, %v5016_v22, %v5019_v61  ;;  %v6009_v13 = vadd.s32 4294967294, %v3733_v41  ;;  %v3980_v33 = vsel %vm3970_vm15, %v3977_v26, %v3979_v8  ;;  %v3982_v62 = vsel %vm3972_vm12, %v3968_v32, 1326507024 }
 0x465   : > { %v5021_v17 = vsel %vm5010_vm9, nan, %v5020_v38  ;;  %v3983_v63 = vsel %vm3971_vm14, %v3965_v45, %v3982_v62  ;;  %v4010_v5 = vand.u32 65535, %v3980_v33  ;;  %v4011_v3 = vshrl.u32 %v3980_v33, 16 }
 0x466   : > { %5823 = vst [vmem:[%s6906_s5 + $0xd0] sm:$0xff] %v5021_v17  ;;  %vm6010_vm0 = vcmp.lt.s32.totalorder %v6009_v13, 0  ;;  %v3953_v59 = vshrl.u32 %v10440_v6, %v8970_v58  ;;  %v3984_v36 = vsel %vm3970_vm15, %v3981_v11, %v3983_v63  ;;  %v3974_v1 = vsel %vm3972_vm12, %v3962_v57, 2102212464 }
 0x467   : > { %v3736_v21 = vsel %vm6010_vm0, 0, %v6009_v13  ;;  %v3988_v50 = vand.u32 65535, %v3984_v36  ;;  %v3989_v49 = vshrl.u32 %v3984_v36, 16  ;;  %v4013_v27 = vmul.u32 %v4011_v3, %v3986_v31 }
 0x468   : > { %v3737_v24 = vsub.s32 32, %v3736_v21  ;;  %v3741_v14 = vsub.s32 4294967266, %v3736_v21  ;;  %v3738_v41 = vshll.u32 %v3729_v35, %v3736_v21  ;;  %v4014_v45 = vmul.u32 %v4010_v5, %v3987_v15 }
 0x469   : > { %v3752_v61 = vsel %vm3629_vm11, %v3751_v4, %v8972_v7  ;;  %v3973_v58 = vsel %vm3969_vm13, %v3953_v59, %v3956_v53  ;;  %v3991_v26 = vmul.u32 %v3989_v49, %v3986_v31  ;;  %v3992_v48 = vmul.u32 %v3988_v50, %v3987_v15 }
 0x46a   : > { %v3739_v32 = vshrl.u32 %v3721_v23, %v3737_v24  ;;  %v3742_v22 = vadd.s32 127, %v3741_v14  ;;  %v3975_v57 = vsel %vm3971_vm14, %v3959_v44, %v3974_v1  ;;  %v4016_v17 = vshll.u32 %v4013_v27, 16 }
 0x46b   : > { %v3990_v8 = vmul.u32 %v3988_v50, %v3986_v31  ;;  %v3994_v35 = vshll.u32 %v3991_v26, 16  ;;  %v4012_v23 = vmul.u32 %v4010_v5, %v3986_v31  ;;  %v4015_v33 = vmul.u32 %v4011_v3, %v3987_v15 }
 0x46c   : > { %v3740_v38 = vor.u32 %v3739_v32, %v3738_v41  ;;  %v3743_v13 = vshll.u32 %v3742_v22, 23  ;;  %v3993_v62 = vmul.u32 %v3989_v49, %v3987_v15  ;;  %v3996_v21 = vshll.u32 %v3992_v48, 16 }
 0x46d   : > { %v4018_v63 = vshll.u32 %v4014_v45, 16  ;;  %vm3998_vm2 = vc.u32 %v3990_v8, %v3994_v35  ;;  %v4000_v7 = vadd.s32 %v3994_v35, %v3990_v8  ;;  %vm4020_vm4 = vc.u32 %v4012_v23, %v4016_v17 }
 0x46e   : > { %v3744_v11 = vor.u32 4788187, %v3743_v13  ;;  %v4022_v53 = vadd.s32 %v4016_v17, %v4012_v23  ;;  %v3747_v24 = vcvt.s32.f32 %v3740_v38  ;;  %v3999_v14 = vsel %vm3998_vm2, 1, %v6360_v29 }
 0x46f   : > { %v4021_v59 = vsel %vm4020_vm4, 1, %v6360_v29  ;;  %v4001_v44 = vadd.s32 %v3999_v14, %v3993_v62  ;;  %vm4002_vm3 = vc.u32 %v4000_v7, %v3996_v21  ;;  %v4017_v15 = vshrl.u32 %v4013_v27, 16 }
 0x470   : > { %v3745_v4 = vand.u32 2147483647, %v3744_v11  ;;  %v4023_v36 = vadd.s32 %v4021_v59, %v4015_v33  ;;  %vm4024_vm5 = vc.u32 %v4022_v53, %v4018_v63  ;;  %v4003_v5 = vsel %vm4002_vm3, 1, %v6360_v29 }
 0x471   : > { %v4025_v3 = vsel %vm4024_vm5, 1, %v6360_v29  ;;  %v3995_v1 = vshrl.u32 %v3991_v26, 16  ;;  %v4005_v50 = vadd.s32 %v4003_v5, %v4001_v44  ;;  %v5646_v41 = vshrl.u32 %v5645_v39, 23  ;;  %v645_v44 = vpop.permute.xlu1 %644 }
 0x472   : > { %v3748_v31 = vmul.f32 %v3747_v24, %v3745_v4  ;;  %v4027_v49 = vadd.s32 %v4025_v3, %v4023_v36  ;;  %vm9057_vm6 = vcmp.le.f32.partialorder %v3627_v28, 0.7853982  ;;  %v3997_v38 = vshrl.u32 %v3992_v48, 16 }
 0x473   : > { %v5642_v13 = vand.u32 2147483647, %v9008_v40  ;;  %v4006_v17 = vadd.s32 %v4005_v50, %v3995_v1  ;;  %v4019_v8 = vshrl.u32 %v4014_v45, 16  ;;  %v6047_v27 = vadd.s32 4294967169, %v5646_v41 }
 0x474   : > { %v3749_v22 = vxor.u32 2147483648, %v3748_v31  ;;  %v4028_v35 = vadd.s32 %v4027_v49, %v4017_v15  ;;  %v3754_v39 = vsel %vm9057_vm6, 0, %v3752_v61  ;;  %v3976_v28 = vsel %vm3970_vm15, %v3973_v58, %v3975_v57 }
 0x475   : > { %v9068_v23 = vadd.s32 %v4022_v53, %v4018_v63  ;;  %v9073_v33 = vadd.s32 %v4006_v17, %v3997_v38  ;;  %v5652_v11 = vadd.s32 1, %v6047_v27  ;;  %v3771_v21 = vadd.s32 3, %v3754_v39 }
 0x476   : > { %v3750_v26 = vsel %vm3629_vm11, %v3749_v22, %v3748_v31  ;;  %v4029_v45 = vadd.s32 %v4028_v35, %v4019_v8  ;;  %v4030_v58 = vmul.u32 %v8986_v34, %v3976_v28  ;;  %v5649_v53 = vand.u32 8388607, %v5642_v13 }
 0x477   : > { %v3753_v48 = vsel %vm9057_vm6, %v8794_v18, %v3750_v26  ;;  %vm4032_vm7 = vc.u32 %v9073_v33, %v9068_v23  ;;  %vm5653_vm8 = vcmp.gt.s32.totalorder %v5652_v11, 0  ;;  %v3772_v36 = vand.u32 3, %v3771_v21 }
 0x478   : > { %v3755_v62 = vmul.f32 %v3753_v48, %v3753_v48  ;;  %v4033_v7 = vadd.s32 1, %v4029_v45  ;;  %v5654_v57 = vsel %vm5653_vm8, %v5652_v11, 0  ;;  %v5650_v1 = vor.u32 8388608, %v5649_v53 }
 0x479   : > { %v5656_v4 = vand.u32 31, %v5654_v57  ;;  %v9082_v50 = vshrl.u32 %v5654_v57, 5  ;;  %v756_v34 = vsel %vm320_vm1, %v8567_v42, %v645_v44  ;;  %vm3774_vm9 = vcmp.eq.s32.totalorder %v3772_v36, 0 }
 0x47a   : > { %v3756_v61 = vmul.f32 -0.001358992, %v3755_v62  ;;  %v3763_v0 = vmul.f32 -0.00019511016, %v3755_v62  ;;  %v4034_v63 = vsel %vm4032_vm7, %v4033_v7, %v4029_v45  ;;  %vm3773_vm10 = vcmp.lt.s32.totalorder %v3772_v36, 2 }
 0x47b   : > { %v4035_v59 = vadd.s32 %v4034_v63, %v4030_v58  ;;  %v9080_v31 = vsub.s32 32, %v5656_v4  ;;  %v5659_v38 = vshll.u32 %v10440_v6, %v5656_v4  ;;  %v5662_v39 = vshll.u32 %v10409_v25, %v5656_v4 }
 0x47c   : > { %v3757_v24 = vadd.f32 0.041655596, %v3756_v61  ;;  %v3764_v14 = vadd.f32 0.008332121, %v3763_v0  ;;  %vm3770_vm11 = vweird.f32 %v8794_v18  ;;  %v5665_v28 = vshll.u32 %v10400_v55, %v5656_v4 }
 0x47d   : > { %v4036_v3 = vadd.s32 536870912, %v4035_v59  ;;  %v5660_v22 = vshrl.u32 %v10409_v25, %v9080_v31  ;;  %v5663_v17 = vshrl.u32 %v10400_v55, %v9080_v31  ;;  %v5666_v8 = vshrl.u32 %v10399_v9, %v9080_v31 }
 0x47e   : > { %v3758_v5 = vmul.f32 %v3757_v24, %v3755_v62  ;;  %v3765_v15 = vmul.f32 %v3764_v14, %v3755_v62  ;;  %v5669_v35 = vshrl.u32 %v10401_v30, %v9080_v31  ;;  %v5668_v45 = vshll.u32 %v10399_v9, %v5656_v4 }
 0x47f   : > { %v9087_v32 = vshrl.u32 %v4036_v3, 30  ;;  %v5671_v11 = vshll.u32 %v10401_v30, %v5656_v4  ;;  %v5672_v21 = vshrl.u32 %v10402_v16, %v9080_v31  ;;  %v9108_v58 = vor.u32 %v5663_v17, %v5662_v39 }
 0x480   : > { %v3759_v49 = vadd.f32 -0.4999988, %v3758_v5  ;;  %v3766_v41 = vadd.f32 -0.16666654, %v3765_v15  ;;  %v5667_v57 = vor.u32 %v5666_v8, %v5665_v28  ;;  %v5670_v63 = vor.u32 %v5669_v35, %v5668_v45 }
 0x481   : > { %v4038_v26 = vshll.u32 %v9087_v32, 30  ;;  %v5673_v53 = vor.u32 %v5672_v21, %v5671_v11  ;;  %vm3777_vm12 = vcmp.eq.s32.totalorder %v3772_v36, 2  ;;  %vm5674_vm14 = vcmp.lt.s32.totalorder %v9082_v50, 1 }
 0x482   : > { %v3760_v42 = vmul.f32 %v3759_v49, %v3755_v62  ;;  %v3767_v27 = vmul.f32 %v3766_v41, %v3755_v62  ;;  %v9106_v62 = vor.u32 %v5660_v22, %v5659_v38  ;;  %v9111_v4 = vshll.u32 %v5650_v1, 8 }
 0x483   : > { %v4039_v0 = vsub.s32 %v4035_v59, %v4038_v26  ;;  %v789_v5 = vmul.f32 %v8977_v37, %v756_v34  ;;  %vm5676_vm15 = vcmp.lt.s32.totalorder %v9082_v50, 3  ;;  %vm5677_vm0 = vcmp.lt.s32.totalorder %v9082_v50, 4 }
 0x484   : > { %v3761_v7 = vadd.f32 1.0, %v3760_v42  ;;  %v3768_v61 = vadd.f32 1.0, %v3767_v27  ;;  %v5683_v1 = vsel %vm5677_vm0, %v5670_v63, 920167782  ;;  %v5686_v22 = vsel %vm5674_vm14, %v9108_v58, %v5667_v57 }
 0x485   : > { %vm4040_vm13 = vcmp.lt.s32.totalorder %v4039_v0, 0  ;;  %v4041_v44 = vsub.s32 0, %v4039_v0  ;;  %v5684_v34 = vsel %vm5676_vm15, %v5667_v57, %v5683_v1  ;;  %v5687_v38 = vsel %vm5677_vm0, %v5673_v53, 1326507024 }
 0x486   : > { %v3769_v24 = vmul.f32 %v3768_v61, %v3753_v48  ;;  %v3778_v14 = vxor.u32 2147483648, %v3761_v7  ;;  %v5682_v48 = vsel %vm5674_vm14, %v9106_v62, %v9108_v58  ;;  %vm5675_vm2 = vcmp.lt.s32.totalorder %v9082_v50, 2 }
 0x487   : > { %v4042_v59 = vsel %vm4040_vm13, %v4041_v44, %v4039_v0  ;;  %v9133_v35 = vadd.f32 %v9005_v19, %v789_v5  ;;  %v5685_v27 = vsel %vm5675_vm2, %v5682_v48, %v5684_v34  ;;  %v5688_v26 = vsel %vm5676_vm15, %v5670_v63, %v5687_v38 }
 0x488   : > { %v3775_v15 = vxor.u32 2147483648, %v3769_v24  ;;  %v3779_v3 = vsel %vm3777_vm12, %v3778_v14, %v3769_v24  ;;  %v4043_v49 = vclz %v4042_v59  ;;  %v5691_v39 = vand.u32 65535, %v9111_v4 }
 0x489   : > { %v5689_v36 = vsel %vm5675_vm2, %v5686_v22, %v5688_v26  ;;  %v5715_v28 = vand.u32 65535, %v5685_v27  ;;  %v5716_v45 = vshrl.u32 %v5685_v27, 16  ;;  %v5692_v21 = vshrl.u32 %v9111_v4, 16 }
 0x48a   : > { %v3776_v41 = vsel %vm3774_vm9, %v3761_v7, %v3775_v15  ;;  %v6015_v8 = vadd.s32 4294967294, %v4043_v49  ;;  %v5693_v18 = vand.u32 65535, %v5689_v36  ;;  %v5694_v7 = vshrl.u32 %v5689_v36, 16 }
 0x48b   : > { %v3780_v17 = vsel %vm3773_vm10, %v3776_v41, %v3779_v3  ;;  %v4031_v61 = vadd.s32 %v9068_v23, %v9073_v33  ;;  %v3475_v63 = vand.u32 2139095040, %v9133_v35  ;;  %vm3939_vm3 = vcmp.lt.s32.totalorder %v8895_v12, 0 }
 0x48c   : > { %v3781_v42 = vsel %vm3770_vm11, nan, %v3780_v17  ;;  %vm6016_vm4 = vcmp.lt.s32.totalorder %v6015_v8, 0  ;;  %v5658_v44 = vshrl.u32 %v10440_v6, %v9080_v31  ;;  %v5696_v5 = vmul.u32 %v5694_v7, %v5691_v39 }
 0x48d   : > { %5815 = vst [vmem:[%s6906_s5 + $0x90] sm:$0xff] %v3781_v42  ;;  %v4046_v11 = vsel %vm6016_vm4, 0, %v6015_v8  ;;  %v5697_v15 = vmul.u32 %v5693_v18, %v5692_v21  ;;  %v5718_v49 = vmul.u32 %v5716_v45, %v5691_v39  ;;  %v5719_v48 = vmul.u32 %v5715_v28, %v5692_v21 }
 0x48e   : > { %v4047_v53 = vsub.s32 32, %v4046_v11  ;;  %v4051_v24 = vsub.s32 4294967266, %v4046_v11  ;;  %v4048_v14 = vshll.u32 %v4039_v0, %v4046_v11  ;;  %v4061_v1 = vsub.s32 4, %v9087_v32 }
 0x48f   : > { %v5679_v23 = vsel %vm5677_vm0, %v5667_v57, 2102212464  ;;  %v5695_v33 = vmul.u32 %v5693_v18, %v5691_v39  ;;  %v5699_v41 = vshll.u32 %v5696_v5, 16  ;;  %v5717_v38 = vmul.u32 %v5715_v28, %v5691_v39 }
 0x490   : > { %v4049_v59 = vshrl.u32 %v4031_v61, %v4047_v53  ;;  %v4052_v3 = vadd.s32 127, %v4051_v24  ;;  %v5721_v0 = vshll.u32 %v5718_v49, 16  ;;  %vm9157_vm5 = vcmp.le.f32.partialorder %v3937_v52, 0.7853982 }
 0x491   : > { %v5698_v17 = vmul.u32 %v5694_v7, %v5692_v21  ;;  %v5701_v8 = vshll.u32 %v5697_v15, 16  ;;  %vm5703_vm6 = vc.u32 %v5695_v33, %v5699_v41  ;;  %v5705_v42 = vadd.s32 %v5699_v41, %v5695_v33 }
 0x492   : > { %v4050_v34 = vor.u32 %v4049_v59, %v4048_v14  ;;  %v4053_v22 = vshll.u32 %v4052_v3, 23  ;;  %v5704_v26 = vsel %vm5703_vm6, 1, %v6360_v29  ;;  %v5720_v57 = vmul.u32 %v5716_v45, %v5692_v21 }
 0x493   : > { %v5723_v36 = vshll.u32 %v5719_v48, 16  ;;  %v5706_v11 = vadd.s32 %v5704_v26, %v5698_v17  ;;  %vm5707_vm7 = vc.u32 %v5705_v42, %v5701_v8  ;;  %vm5725_vm8 = vc.u32 %v5717_v38, %v5721_v0 }
 0x494   : > { %v4054_v27 = vor.u32 4788187, %v4053_v22  ;;  %v5727_v39 = vadd.s32 %v5721_v0, %v5717_v38  ;;  %v4057_v18 = vcvt.s32.f32 %v4050_v34  ;;  %v5708_v52 = vsel %vm5707_vm7, 1, %v6360_v29 }
 0x495   : > { %v5726_v61 = vsel %vm5725_vm8, 1, %v6360_v29  ;;  %v5700_v53 = vshrl.u32 %v5696_v5, 16  ;;  %v5710_v7 = vadd.s32 %v5708_v52, %v5706_v11  ;;  %v4062_v45 = vsel %vm3939_vm3, %v4061_v1, %v9087_v32 }
 0x496   : > { %v4055_v28 = vand.u32 2147483647, %v4054_v27  ;;  %v5728_v24 = vadd.s32 %v5726_v61, %v5720_v57  ;;  %vm5729_vm9 = vc.u32 %v5727_v39, %v5723_v36  ;;  %v3476_v59 = vshrl.u32 %v3475_v63, 23 }
 0x497   : > { %v5730_v21 = vsel %vm5729_vm9, 1, %v6360_v29  ;;  %v5702_v3 = vshrl.u32 %v5697_v15, 16  ;;  %v5711_v33 = vadd.s32 %v5710_v7, %v5700_v53  ;;  %v5722_v41 = vshrl.u32 %v5718_v49, 16 }
 0x498   : > { %v4058_v14 = vmul.f32 %v4057_v18, %v4055_v28  ;;  %v5732_v34 = vadd.s32 %v5730_v21, %v5728_v24  ;;  %v5678_v5 = vsel %vm5674_vm14, %v5658_v44, %v9106_v62  ;;  %v5680_v38 = vsel %vm5676_vm15, %v9108_v58, %v5679_v23  ;;  %v684_v28 = vpop.permute.xlu2 %683 }
 0x499   : > { %v6005_v0 = vadd.s32 4294967169, %v3476_v59  ;;  %v9174_v17 = vadd.s32 %v5711_v33, %v5702_v3  ;;  %v5724_v32 = vshrl.u32 %v5719_v48, 16  ;;  %v3472_v63 = vand.u32 2147483647, %v9133_v35 }
 0x49a   : > { %v4059_v22 = vxor.u32 2147483648, %v4058_v14  ;;  %v5733_v1 = vadd.s32 %v5732_v34, %v5722_v41  ;;  %v4064_v49 = vsel %vm9157_vm5, 0, %v4062_v45  ;;  %v9181_v8 = vadd.s32 %v5727_v39, %v5723_v36 }
 0x49b   : > { %v3482_v62 = vadd.s32 1, %v6005_v0  ;;  %v5681_v44 = vsel %vm5675_vm2, %v5678_v5, %v5680_v38  ;;  %v4081_v42 = vadd.s32 3, %v4064_v49  ;;  %v3479_v26 = vand.u32 8388607, %v3472_v63 }
 0x49c   : > { %v4060_v15 = vsel %vm3939_vm3, %v4059_v22, %v4058_v14  ;;  %v5734_v48 = vadd.s32 %v5733_v1, %v5724_v32  ;;  %vm5737_vm10 = vc.u32 %v9174_v17, %v9181_v8  ;;  %v5735_v31 = vmul.u32 %v9111_v4, %v5681_v44 }
 0x49d   : > { %v4063_v58 = vsel %vm9157_vm5, %v8895_v12, %v4060_v15  ;;  %vm3483_vm11 = vcmp.gt.s32.totalorder %v3482_v62, 0  ;;  %v4082_v7 = vand.u32 3, %v4081_v42  ;;  %v762_v24 = vsel %vm320_vm1, %v7997_v43, %v684_v28 }
 0x49e   : > { %v4065_v23 = vmul.f32 %v4063_v58, %v4063_v58  ;;  %v5738_v27 = vadd.s32 1, %v5734_v48  ;;  %v3484_v57 = vsel %vm3483_vm11, %v3482_v62, 0  ;;  %v3480_v59 = vor.u32 8388608, %v3479_v26 }
 0x49f   : > { %v3486_v39 = vand.u32 31, %v3484_v57  ;;  %v9198_v3 = vshrl.u32 %v3484_v57, 5  ;;  %vm4084_vm13 = vcmp.eq.s32.totalorder %v4082_v7, 0  ;;  %vm4083_vm12 = vcmp.lt.s32.totalorder %v4082_v7, 2 }
 0x4a0   : > { %v4066_v36 = vmul.f32 -0.001358992, %v4065_v23  ;;  %v4073_v11 = vmul.f32 -0.00019511016, %v4065_v23  ;;  %v5739_v50 = vsel %vm5737_vm10, %v5738_v27, %v5734_v48  ;;  %vm4080_vm14 = vweird.f32 %v8895_v12 }
 0x4a1   : > { %v5740_v61 = vadd.s32 %v5739_v50, %v5735_v31  ;;  %v9193_v53 = vsub.s32 32, %v3486_v39  ;;  %v3489_v43 = vshll.u32 %v10440_v6, %v3486_v39  ;;  %v3492_v38 = vshll.u32 %v10409_v25, %v3486_v39 }
 0x4a2   : > { %v4067_v18 = vadd.f32 0.041655596, %v4066_v36  ;;  %v4074_v52 = vadd.f32 0.008332121, %v4073_v11  ;;  %v3495_v0 = vshll.u32 %v10400_v55, %v3486_v39  ;;  %v3498_v1 = vshll.u32 %v10399_v9, %v3486_v39 }
 0x4a3   : > { %v5741_v21 = vadd.s32 536870912, %v5740_v61  ;;  %v3490_v4 = vshrl.u32 %v10409_v25, %v9193_v53  ;;  %v3493_v33 = vshrl.u32 %v10400_v55, %v9193_v53  ;;  %v3499_v41 = vshrl.u32 %v10401_v30, %v9193_v53 }
 0x4a4   : > { %v4068_v14 = vmul.f32 %v4067_v18, %v4065_v23  ;;  %v4075_v45 = vmul.f32 %v4074_v52, %v4065_v23  ;;  %v3496_v32 = vshrl.u32 %v10399_v9, %v9193_v53  ;;  %v3501_v44 = vshll.u32 %v10401_v30, %v3486_v39 }
 0x4a5   : > { %v9206_v5 = vshrl.u32 %v5741_v21, 30  ;;  %v9217_v48 = vor.u32 %v3490_v4, %v3489_v43  ;;  %v9219_v42 = vor.u32 %v3493_v33, %v3492_v38  ;;  %v3500_v27 = vor.u32 %v3499_v41, %v3498_v1 }
 0x4a6   : > { %v4069_v34 = vadd.f32 -0.4999988, %v4068_v14  ;;  %v4076_v22 = vadd.f32 -0.16666654, %v4075_v45  ;;  %v3502_v26 = vshrl.u32 %v10402_v16, %v9193_v53  ;;  %v9224_v31 = vor.u32 %v3496_v32, %v3495_v0 }
 0x4a7   : > { %v5743_v62 = vshll.u32 %v9206_v5, 30  ;;  %vm3504_vm15 = vcmp.lt.s32.totalorder %v9198_v3, 1  ;;  %vm3507_vm0 = vcmp.lt.s32.totalorder %v9198_v3, 4  ;;  %vm4087_vm4 = vcmp.eq.s32.totalorder %v4082_v7, 2 }
 0x4a8   : > { %v4070_v15 = vmul.f32 %v4069_v34, %v4065_v23  ;;  %v4077_v49 = vmul.f32 %v4076_v22, %v4065_v23  ;;  %v795_v23 = vmul.f32 %v8977_v37, %v762_v24  ;;  %v3503_v28 = vor.u32 %v3502_v26, %v3501_v44 }
 0x4a9   : > { %v5744_v11 = vsub.s32 %v5740_v61, %v5743_v62  ;;  %vm5644_vm3 = vcmp.lt.s32.totalorder %v9008_v40, 0  ;;  %v3512_v52 = vsel %vm3504_vm15, %v9217_v48, %v9219_v42  ;;  %v3513_v61 = vsel %vm3507_vm0, %v3500_v27, 920167782 }
 0x4aa   : > { %v4071_v57 = vadd.f32 1.0, %v4070_v15  ;;  %v4078_v36 = vadd.f32 1.0, %v4077_v49  ;;  %v9235_v24 = vshll.u32 %v3480_v59, 8  ;;  %vm3506_vm5 = vcmp.lt.s32.totalorder %v9198_v3, 3 }
 0x4ab   : > { %vm5745_vm2 = vcmp.lt.s32.totalorder %v5744_v11, 0  ;;  %v5746_v18 = vsub.s32 0, %v5744_v11  ;;  %vm3505_vm6 = vcmp.lt.s32.totalorder %v9198_v3, 2  ;;  %v3514_v33 = vsel %vm3506_vm5, %v9224_v31, %v3513_v61 }
 0x4ac   : > { %v4079_v39 = vmul.f32 %v4078_v36, %v4063_v58  ;;  %v4088_v50 = vxor.u32 2147483648, %v4071_v57  ;;  %v9239_v58 = vadd.f32 %v9005_v19, %v795_v23  ;;  %v3515_v59 = vsel %vm3505_vm6, %v3512_v52, %v3514_v33 }
 0x4ad   : > { %v5747_v45 = vsel %vm5745_vm2, %v5746_v18, %v5744_v11  ;;  %v3516_v34 = vsel %vm3504_vm15, %v9219_v42, %v9224_v31  ;;  %v3517_v22 = vsel %vm3507_vm0, %v3503_v28, 1326507024  ;;  %v5736_v38 = vadd.s32 %v9181_v8, %v9174_v17 }
 0x4ae   : > { %v4085_v14 = vxor.u32 2147483648, %v4079_v39  ;;  %v4089_v21 = vsel %vm4087_vm4, %v4088_v50, %v4079_v39  ;;  %v5748_v4 = vclz %v5747_v45  ;;  %v3521_v32 = vand.u32 65535, %v9235_v24 }
 0x4af   : > { %v5766_v15 = vsub.s32 4, %v9206_v5  ;;  %v3518_v49 = vsel %vm3506_vm5, %v3500_v27, %v3517_v22  ;;  %v3522_v62 = vshrl.u32 %v9235_v24, 16  ;;  %v3545_v44 = vand.u32 65535, %v3515_v59 }
 0x4b0   : > { %v4086_v41 = vsel %vm4084_vm13, %v4071_v57, %v4085_v14  ;;  %v6048_v0 = vadd.s32 4294967294, %v5748_v4  ;;  %v3519_v7 = vsel %vm3505_vm6, %v3516_v34, %v3518_v49  ;;  %v3546_v17 = vshrl.u32 %v3515_v59, 16 }
 0x4b1   : > { %v4090_v43 = vsel %vm4083_vm12, %v4086_v41, %v4089_v21  ;;  %v3523_v26 = vand.u32 65535, %v3519_v7  ;;  %v3524_v57 = vshrl.u32 %v3519_v7, 16  ;;  %v4402_v12 = vand.u32 2147483647, %v9239_v58 }
 0x4b2   : > { %v4091_v1 = vsel %vm4080_vm14, nan, %v4090_v43  ;;  %vm6049_vm7 = vcmp.lt.s32.totalorder %v6048_v0, 0  ;;  %v3548_v28 = vmul.u32 %v3546_v17, %v3521_v32  ;;  %v4405_v39 = vand.u32 2139095040, %v9239_v58 }
 0x4b3   : > { %5817 = vst [vmem:[%s6906_s5 + $0xa0] sm:$0xff] %v4091_v1  ;;  %v5751_v8 = vsel %vm6049_vm7, 0, %v6048_v0  ;;  %vm9271_vm8 = vcmp.le.f32.partialorder %v5642_v13, 0.7853982  ;;  %v5767_v50 = vsel %vm5644_vm3, %v5766_v15, %v9206_v5  ;;  %v3488_v18 = vshrl.u32 %v10440_v6, %v9193_v53 }
 0x4b4   : > { %v5752_v36 = vsub.s32 32, %v5751_v8  ;;  %v5756_v23 = vsub.s32 4294967266, %v5751_v8  ;;  %v3526_v52 = vmul.u32 %v3524_v57, %v3521_v32  ;;  %v3527_v61 = vmul.u32 %v3523_v26, %v3522_v62 }
 0x4b5   : > { %v5753_v14 = vshll.u32 %v5744_v11, %v5751_v8  ;;  %v3549_v4 = vmul.u32 %v3545_v44, %v3522_v62  ;;  %v3525_v33 = vmul.u32 %v3523_v26, %v3521_v32  ;;  %v3528_v41 = vmul.u32 %v3524_v57, %v3522_v62 }
 0x4b6   : > { %v5754_v45 = vshrl.u32 %v5736_v38, %v5752_v36  ;;  %v5757_v21 = vadd.s32 127, %v5756_v23  ;;  %v3529_v59 = vshll.u32 %v3526_v52, 16  ;;  %v3547_v13 = vmul.u32 %v3545_v44, %v3521_v32 }
 0x4b7   : > { %v3550_v43 = vmul.u32 %v3546_v17, %v3522_v62  ;;  %v3551_v0 = vshll.u32 %v3548_v28, 16  ;;  %v3531_v1 = vshll.u32 %v3527_v61, 16  ;;  %v3553_v15 = vshll.u32 %v3549_v4, 16 }
 0x4b8   : > { %v5755_v34 = vor.u32 %v5754_v45, %v5753_v14  ;;  %v5758_v22 = vshll.u32 %v5757_v21, 23  ;;  %vm3533_vm9 = vc.u32 %v3525_v33, %v3529_v59  ;;  %v3535_v5 = vadd.s32 %v3529_v59, %v3525_v33 }
 0x4b9   : > { %v3534_v7 = vsel %vm3533_vm9, 1, %v6360_v29  ;;  %vm3555_vm10 = vc.u32 %v3547_v13, %v3551_v0  ;;  %v3557_v8 = vadd.s32 %v3551_v0, %v3547_v13  ;;  %v4406_v62 = vshrl.u32 %v4405_v39, 23 }
 0x4ba   : > { %v5759_v49 = vor.u32 4788187, %v5758_v22  ;;  %v5762_v53 = vcvt.s32.f32 %v5755_v34  ;;  %v3536_v11 = vadd.s32 %v3534_v7, %v3528_v41  ;;  %vm3537_vm11 = vc.u32 %v3535_v5, %v3531_v1 }
 0x4bb   : > { %v3556_v38 = vsel %vm3555_vm10, 1, %v6360_v29  ;;  %v3538_v32 = vsel %vm3537_vm11, 1, %v6360_v29  ;;  %v3509_v17 = vsel %vm3507_vm0, %v9224_v31, 2102212464  ;;  %v3530_v57 = vshrl.u32 %v3526_v52, 16 }
 0x4bc   : > { %v5760_v26 = vand.u32 2147483647, %v5759_v49  ;;  %v3558_v44 = vadd.s32 %v3556_v38, %v3550_v43  ;;  %v3540_v36 = vadd.s32 %v3538_v32, %v3536_v11  ;;  %vm3559_vm13 = vc.u32 %v3557_v8, %v3553_v15  ;;  %v658_v11 = vpop.permute.xlu1 %657 }
 0x4bd   : > { %v5769_v14 = vsel %vm9271_vm8, 0, %v5767_v50  ;;  %v3560_v45 = vsel %vm3559_vm13, 1, %v6360_v29  ;;  %v6023_v21 = vadd.s32 4294967169, %v4406_v62  ;;  %v3532_v33 = vshrl.u32 %v3527_v61, 16 }
 0x4be   : > { %v5763_v23 = vmul.f32 %v5762_v53, %v5760_v26  ;;  %v3541_v41 = vadd.s32 %v3540_v36, %v3530_v57  ;;  %v3552_v59 = vshrl.u32 %v3548_v28, 16  ;;  %v3562_v13 = vadd.s32 %v3560_v45, %v3558_v44 }
 0x4bf   : > { %v3508_v39 = vsel %vm3504_vm15, %v3488_v18, %v9217_v48  ;;  %v3510_v31 = vsel %vm3506_vm5, %v9219_v42, %v3509_v17  ;;  %v4412_v52 = vadd.s32 1, %v6023_v21  ;;  %v3554_v50 = vshrl.u32 %v3549_v4, 16 }
 0x4c0   : > { %v5764_v34 = vxor.u32 2147483648, %v5763_v23  ;;  %v9295_v22 = vadd.s32 %v3541_v41, %v3532_v33  ;;  %v3563_v43 = vadd.s32 %v3562_v13, %v3552_v59  ;;  %v9299_v0 = vadd.s32 %v3557_v8, %v3553_v15 }
 0x4c1   : > { %vm4413_vm12 = vcmp.gt.s32.totalorder %v4412_v52, 0  ;;  %v5786_v48 = vadd.s32 3, %v5769_v14  ;;  %v3511_v18 = vsel %vm3505_vm6, %v3508_v39, %v3510_v31  ;;  %v4409_v4 = vand.u32 8388607, %v4402_v12 }
 0x4c2   : > { %v5765_v61 = vsel %vm5644_vm3, %v5764_v34, %v5763_v23  ;;  %v3564_v42 = vadd.s32 %v3563_v43, %v3554_v50  ;;  %vm3567_vm14 = vc.u32 %v9295_v22, %v9299_v0  ;;  %v4414_v5 = vsel %vm4413_vm12, %v4412_v52, 0 }
 0x4c3   : > { %v5768_v28 = vsel %vm9271_vm8, %v9008_v40, %v5765_v61  ;;  %v4416_v49 = vand.u32 31, %v4414_v5  ;;  %v3565_v27 = vmul.u32 %v9235_v24, %v3511_v18  ;;  %v9311_v38 = vand.u32 3, %v5786_v48 }
 0x4c4   : > { %v5770_v1 = vmul.f32 %v5768_v28, %v5768_v28  ;;  %v3568_v15 = vadd.s32 1, %v3564_v42  ;;  %v4410_v62 = vor.u32 8388608, %v4409_v4  ;;  %v9315_v17 = vshrl.u32 %v4414_v5, 5 }
 0x4c5   : > { %v9313_v8 = vsub.s32 32, %v4416_v49  ;;  %v758_v24 = vsel %vm320_vm1, %v8453_v10, %v658_v11  ;;  %v4419_v21 = vshll.u32 %v10440_v6, %v4416_v49  ;;  %v4422_v33 = vshll.u32 %v10409_v25, %v4416_v49 }
 0x4c6   : > { %v5771_v53 = vmul.f32 -0.001358992, %v5770_v1  ;;  %v5778_v7 = vmul.f32 -0.00019511016, %v5770_v1  ;;  %v3569_v3 = vsel %vm3567_vm14, %v3568_v15, %v3564_v42  ;;  %v4428_v59 = vshll.u32 %v10399_v9, %v4416_v49 }
 0x4c7   : > { %v3570_v44 = vadd.s32 %v3569_v3, %v3565_v27  ;;  %v4420_v57 = vshrl.u32 %v10409_v25, %v9313_v8  ;;  %v4423_v36 = vshrl.u32 %v10400_v55, %v9313_v8  ;;  %v4426_v41 = vshrl.u32 %v10399_v9, %v9313_v8 }
 0x4c8   : > { %v5772_v26 = vadd.f32 0.041655596, %v5771_v53  ;;  %v5779_v32 = vadd.f32 0.008332121, %v5778_v7  ;;  %v4429_v13 = vshrl.u32 %v10401_v30, %v9313_v8  ;;  %v4425_v10 = vshll.u32 %v10400_v55, %v4416_v49 }
 0x4c9   : > { %v3571_v45 = vadd.s32 536870912, %v3570_v44  ;;  %vm5789_vm15 = vcmp.eq.s32.totalorder %v9311_v38, 0  ;;  %v4421_v52 = vor.u32 %v4420_v57, %v4419_v21  ;;  %v9335_v50 = vor.u32 %v4423_v36, %v4422_v33 }
 0x4ca   : > { %v5773_v23 = vmul.f32 %v5772_v26, %v5770_v1  ;;  %v5780_v14 = vmul.f32 %v5779_v32, %v5770_v1  ;;  %v4430_v43 = vor.u32 %v4429_v13, %v4428_v59  ;;  %v4432_v61 = vshrl.u32 %v10402_v16, %v9313_v8 }
 0x4cb   : > { %v9331_v31 = vshrl.u32 %v3571_v45, 30  ;;  %vm5788_vm0 = vcmp.lt.s32.totalorder %v9311_v38, 2  ;;  %v9341_v4 = vshll.u32 %v4410_v62, 8  ;;  %vm5785_vm2 = vweird.f32 %v9008_v40 }
 0x4cc   : > { %v5774_v34 = vadd.f32 -0.4999988, %v5773_v23  ;;  %v5781_v39 = vadd.f32 -0.16666654, %v5780_v14  ;;  %v4427_v5 = vor.u32 %v4426_v41, %v4425_v10  ;;  %v4431_v15 = vshll.u32 %v10401_v30, %v4416_v49 }
 0x4cd   : > { %v3573_v42 = vshll.u32 %v9331_v31, 30  ;;  %vm4434_vm4 = vcmp.lt.s32.totalorder %v9315_v17, 1  ;;  %v791_v53 = vmul.f32 %v8977_v37, %v758_v24  ;;  %vm4437_vm3 = vcmp.lt.s32.totalorder %v9315_v17, 4 }
 0x4ce   : > { %v5775_v48 = vmul.f32 %v5774_v34, %v5770_v1  ;;  %v5782_v18 = vmul.f32 %v5781_v39, %v5770_v1  ;;  %v4433_v1 = vor.u32 %v4432_v61, %v4431_v15  ;;  %vm4436_vm5 = vcmp.lt.s32.totalorder %v9315_v17, 3 }
 0x4cf   : > { %v3574_v11 = vsub.s32 %v3570_v44, %v3573_v42  ;;  %v4442_v3 = vsel %vm4434_vm4, %v4421_v52, %v9335_v50  ;;  %v4443_v26 = vsel %vm4437_vm3, %v4430_v43, 920167782  ;;  %vm5792_vm7 = vcmp.eq.s32.totalorder %v9311_v38, 2 }
 0x4d0   : > { %v5776_v7 = vadd.f32 1.0, %v5775_v48  ;;  %v5783_v27 = vadd.f32 1.0, %v5782_v18  ;;  %v4444_v37 = vsel %vm4436_vm5, %v4427_v5, %v4443_v26  ;;  %v4451_v44 = vand.u32 65535, %v9341_v4 }
 0x4d1   : > { %vm3575_vm6 = vcmp.lt.s32.totalorder %v3574_v11, 0  ;;  %v3576_v62 = vsub.s32 0, %v3574_v11  ;;  %v9359_v57 = vadd.f32 %v9005_v19, %v791_v53  ;;  %vm4435_vm8 = vcmp.lt.s32.totalorder %v9315_v17, 2 }
 0x4d2   : > { %v5784_v49 = vmul.f32 %v5783_v27, %v5768_v28  ;;  %v5793_v32 = vxor.u32 2147483648, %v5776_v7  ;;  %v4446_v28 = vsel %vm4434_vm4, %v9335_v50, %v4427_v5  ;;  %v4445_v45 = vsel %vm4435_vm8, %v4442_v3, %v4444_v37 }
 0x4d3   : > { %v3577_v24 = vsel %vm3575_vm6, %v3576_v62, %v3574_v11  ;;  %v4447_v21 = vsel %vm4437_vm3, %v4433_v1, 1326507024  ;;  %v4475_v41 = vand.u32 65535, %v4445_v45  ;;  %v4476_v59 = vshrl.u32 %v4445_v45, 16 }
 0x4d4   : > { %v5790_v36 = vxor.u32 2147483648, %v5784_v49  ;;  %v5794_v23 = vsel %vm5792_vm7, %v5793_v32, %v5784_v49  ;;  %v3578_v14 = vclz %v3577_v24  ;;  %v4448_v33 = vsel %vm4436_vm5, %v4430_v43, %v4447_v21 }
 0x4d5   : > { %v3566_v34 = vadd.s32 %v9299_v0, %v9295_v22  ;;  %v4452_v10 = vshrl.u32 %v9341_v4, 16  ;;  %v4418_v48 = vshrl.u32 %v10440_v6, %v9313_v8  ;;  %v4449_v43 = vsel %vm4435_vm8, %v4446_v28, %v4448_v33 }
 0x4d6   : > { %v5791_v19 = vsel %vm5789_vm15, %v5776_v7, %v5790_v36  ;;  %v6006_v39 = vadd.s32 4294967294, %v3578_v14  ;;  %v3782_v18 = vand.u32 2147483647, %v9359_v57  ;;  %v4453_v38 = vand.u32 65535, %v4449_v43 }
 0x4d7   : > { %v5795_v13 = vsel %vm5788_vm0, %v5791_v19, %v5794_v23  ;;  %v4454_v42 = vshrl.u32 %v4449_v43, 16  ;;  %v4478_v15 = vmul.u32 %v4476_v59, %v4451_v44  ;;  %v3596_v0 = vsub.s32 4, %v9331_v31 }
 0x4d8   : > { %v5796_v61 = vsel %vm5785_vm2, nan, %v5795_v13  ;;  %vm6007_vm9 = vcmp.lt.s32.totalorder %v6006_v39, 0  ;;  %v4479_v53 = vmul.u32 %v4475_v41, %v4452_v10  ;;  %v3785_v40 = vand.u32 2139095040, %v9359_v57 }
 0x4d9   : > { %5828 = vst [vmem:[%s6906_s5 + $0xf8] sm:$0xff] %v5796_v61  ;;  %v3581_v22 = vsel %vm6007_vm9, 0, %v6006_v39  ;;  %v4438_v8 = vsel %vm4434_vm4, %v4418_v48, %v4421_v52  ;;  %v4439_v1 = vsel %vm4437_vm3, %v4427_v5, 2102212464  ;;  %vm3474_vm10 = vcmp.lt.s32.totalorder %v9133_v35, 0 }
 0x4da   : > { %v3582_v7 = vsub.s32 32, %v3581_v22  ;;  %v3586_v27 = vsub.s32 4294967266, %v3581_v22  ;;  %v4456_v3 = vmul.u32 %v4454_v42, %v4451_v44  ;;  %v4457_v26 = vmul.u32 %v4453_v38, %v4452_v10 }
 0x4db   : > { %v4477_v49 = vmul.u32 %v4475_v41, %v4451_v44  ;;  %v4481_v32 = vshll.u32 %v4478_v15, 16  ;;  %v3583_v62 = vshll.u32 %v3574_v11, %v3581_v22  ;;  %v4480_v24 = vmul.u32 %v4476_v59, %v4452_v10 }
 0x4dc   : > { %v3584_v37 = vshrl.u32 %v3566_v34, %v3582_v7  ;;  %v3587_v36 = vadd.s32 127, %v3586_v27  ;;  %v4455_v28 = vmul.u32 %v4453_v38, %v4451_v44  ;;  %v4458_v23 = vmul.u32 %v4454_v42, %v4452_v10 }
 0x4dd   : > { %v4459_v14 = vshll.u32 %v4456_v3, 16  ;;  %v4483_v45 = vshll.u32 %v4479_v53, 16  ;;  %v4461_v52 = vshll.u32 %v4457_v26, 16  ;;  %vm4485_vm11 = vc.u32 %v4477_v49, %v4481_v32 }
 0x4de   : > { %v3585_v21 = vor.u32 %v3584_v37, %v3583_v62  ;;  %v3588_v19 = vshll.u32 %v3587_v36, 23  ;;  %v4486_v33 = vsel %vm4485_vm11, 1, %v6360_v29  ;;  %v4487_v13 = vadd.s32 %v4481_v32, %v4477_v49 }
 0x4df   : > { %vm4463_vm13 = vc.u32 %v4455_v28, %v4459_v14  ;;  %v4465_v5 = vadd.s32 %v4459_v14, %v4455_v28  ;;  %v4440_v11 = vsel %vm4436_vm5, %v9335_v50, %v4439_v1  ;;  %v4488_v44 = vadd.s32 %v4486_v33, %v4480_v24 }
 0x4e0   : > { %v3589_v39 = vor.u32 4788187, %v3588_v19  ;;  %v4464_v41 = vsel %vm4463_vm13, 1, %v6360_v29  ;;  %v3592_v59 = vcvt.s32.f32 %v3585_v21  ;;  %vm4489_vm14 = vc.u32 %v4487_v13, %v4483_v45 }
 0x4e1   : > { %v4466_v34 = vadd.s32 %v4464_v41, %v4458_v23  ;;  %vm4467_vm12 = vc.u32 %v4465_v5, %v4461_v52  ;;  %v4490_v48 = vsel %vm4489_vm14, 1, %v6360_v29  ;;  %v3786_v43 = vshrl.u32 %v3785_v40, 23 }
 0x4e2   : > { %v3590_v10 = vand.u32 2147483647, %v3589_v39  ;;  %v4468_v61 = vsel %vm4467_vm12, 1, %v6360_v29  ;;  %v4460_v38 = vshrl.u32 %v4456_v3, 16  ;;  %v4482_v22 = vshrl.u32 %v4478_v15, 16 }
 0x4e3   : > { %v4470_v42 = vadd.s32 %v4468_v61, %v4466_v34  ;;  %v4492_v7 = vadd.s32 %v4490_v48, %v4488_v44  ;;  %v3597_v50 = vsel %vm3474_vm10, %v3596_v0, %v9331_v31  ;;  %v6011_v1 = vadd.s32 4294967169, %v3786_v43  ;;  %v9439_v61 = vld [vmem:[%s10364_s3] ss:$0 sm:$0xff] }
 0x4e4   : > { %v3593_v27 = vmul.f32 %v3592_v59, %v3590_v10  ;;  %v4462_v49 = vshrl.u32 %v4457_v26, 16  ;;  %v4484_v62 = vshrl.u32 %v4479_v53, 16  ;;  %vm9405_vm15 = vcmp.le.f32.partialorder %v3472_v63, 0.7853982  ;;  %v697_v26 = vpop.permute.xlu2 %696 }
 0x4e5   : > { %v4471_v32 = vadd.s32 %v4470_v42, %v4460_v38  ;;  %v4493_v37 = vadd.s32 %v4492_v7, %v4482_v22  ;;  %v4441_v15 = vsel %vm4435_vm8, %v4438_v8, %v4440_v11  ;;  %v3792_v3 = vadd.s32 1, %v6011_v1 }
 0x4e6   : > { %v3594_v40 = vxor.u32 2147483648, %v3593_v27  ;;  %v9413_v28 = vadd.s32 %v4487_v13, %v4483_v45  ;;  %v3789_v0 = vand.u32 8388607, %v3782_v18  ;;  %v3599_v63 = vsel %vm9405_vm15, 0, %v3597_v50 }
 0x4e7   : > { %v9411_v24 = vadd.s32 %v4471_v32, %v4462_v49  ;;  %v4494_v31 = vadd.s32 %v4493_v37, %v4484_v62  ;;  %vm3793_vm0 = vcmp.gt.s32.totalorder %v3792_v3, 0  ;;  %v4495_v14 = vmul.u32 %v9341_v4, %v4441_v15 }
 0x4e8   : > { %v3595_v53 = vsel %vm3474_vm10, %v3594_v40, %v3593_v27  ;;  %v3794_v45 = vsel %vm3793_vm0, %v3792_v3, 0  ;;  %v3616_v21 = vadd.s32 3, %v3599_v63  ;;  %v3790_v52 = vor.u32 8388608, %v3789_v0 }
 0x4e9   : > { %v3598_v17 = vsel %vm9405_vm15, %v9133_v35, %v3595_v53  ;;  %vm4497_vm2 = vc.u32 %v9411_v24, %v9413_v28  ;;  %v4498_v8 = vadd.s32 1, %v4494_v31  ;;  %v3796_v5 = vand.u32 31, %v3794_v45 }
 0x4ea   : > { %v3600_v23 = vmul.f32 %v3598_v17, %v3598_v17  ;;  %v764_v11 = vsel %vm320_vm1, %v8653_v47, %v697_v26  ;;  %v9432_v10 = vand.u32 3, %v3616_v21  ;;  %v9434_v4 = vshll.u32 %v3790_v52, 8  ;;  %v9476_v52 = vld [vmem:[%s10364_s3 + $0x1] ss:$0 sm:$0xff] }
 0x4eb   : > { %v4499_v19 = vsel %vm4497_vm2, %v4498_v8, %v4494_v31  ;;  %v9430_v41 = vsub.s32 32, %v3796_v5  ;;  %v797_v48 = vmul.f32 %v9439_v61, %v764_v11  ;;  %v9446_v22 = vshrl.u32 %v3794_v45, 5 }
 0x4ec   : > { %v3601_v33 = vmul.f32 -0.001358992, %v3600_v23  ;;  %v3608_v13 = vmul.f32 -0.00019511016, %v3600_v23  ;;  %v4500_v39 = vadd.s32 %v4499_v19, %v4495_v14  ;;  %v3799_v62 = vshll.u32 %v10440_v6, %v3796_v5 }
 0x4ed   : > { %v3800_v47 = vshrl.u32 %v10409_v25, %v9430_v41  ;;  %v3803_v7 = vshrl.u32 %v10400_v55, %v9430_v41  ;;  %v3806_v27 = vshrl.u32 %v10399_v9, %v9430_v41  ;;  %v3809_v50 = vshrl.u32 %v10401_v30, %v9430_v41 }
 0x4ee   : > { %v3602_v44 = vadd.f32 0.041655596, %v3601_v33  ;;  %v3609_v59 = vadd.f32 0.008332121, %v3608_v13  ;;  %v4501_v34 = vadd.s32 536870912, %v4500_v39  ;;  %vm3619_vm4 = vcmp.eq.s32.totalorder %v9432_v10, 0 }
 0x4ef   : > { %v3802_v37 = vshll.u32 %v10409_v25, %v3796_v5  ;;  %v3805_v36 = vshll.u32 %v10400_v55, %v3796_v5  ;;  %v3808_v40 = vshll.u32 %v10399_v9, %v3796_v5  ;;  %v3812_v15 = vshrl.u32 %v10402_v16, %v9430_v41 }
 0x4f0   : > { %v3603_v43 = vmul.f32 %v3602_v44, %v3600_v23  ;;  %v3610_v38 = vmul.f32 %v3609_v59, %v3600_v23  ;;  %v9442_v42 = vshrl.u32 %v4501_v34, 30  ;;  %vm3618_vm3 = vcmp.lt.s32.totalorder %v9432_v10, 2 }
 0x4f1   : > { %v3801_v53 = vor.u32 %v3800_v47, %v3799_v62  ;;  %vm3615_vm5 = vweird.f32 %v9133_v35  ;;  %v9466_v63 = vor.u32 %v3803_v7, %v3802_v37  ;;  %v3807_v8 = vor.u32 %v3806_v27, %v3805_v36 }
 0x4f2   : > { %v3604_v1 = vadd.f32 -0.4999988, %v3603_v43  ;;  %v3611_v49 = vadd.f32 -0.16666654, %v3610_v38  ;;  %v4503_v32 = vshll.u32 %v9442_v42, 30  ;;  %v3810_v26 = vor.u32 %v3809_v50, %v3808_v40 }
 0x4f3   : > { %v3811_v14 = vshll.u32 %v10401_v30, %v3796_v5  ;;  %vm3622_vm7 = vcmp.eq.s32.totalorder %v9432_v10, 2  ;;  %vm3814_vm8 = vcmp.lt.s32.totalorder %v9446_v22, 1  ;;  %v9479_v33 = vadd.f32 %v9476_v52, %v797_v48 }
 0x4f4   : > { %v3605_v3 = vmul.f32 %v3604_v1, %v3600_v23  ;;  %v3612_v31 = vmul.f32 %v3611_v49, %v3600_v23  ;;  %v9463_v0 = vsub.s32 %v4500_v39, %v4503_v32  ;;  %vm3817_vm9 = vcmp.lt.s32.totalorder %v9446_v22, 4 }
 0x4f5   : > { %v3813_v23 = vor.u32 %v3812_v15, %v3811_v14  ;;  %vm4404_vm10 = vcmp.lt.s32.totalorder %v9239_v58, 0  ;;  %vm3816_vm11 = vcmp.lt.s32.totalorder %v9446_v22, 3  ;;  %v3822_v44 = vsel %vm3814_vm8, %v3801_v53, %v9466_v63 }
 0x4f6   : > { %v3606_v45 = vadd.f32 1.0, %v3605_v3  ;;  %v3613_v21 = vadd.f32 1.0, %v3612_v31  ;;  %vm4505_vm6 = vcmp.lt.s32.totalorder %v9463_v0, 0  ;;  %v4506_v19 = vsub.s32 0, %v9463_v0 }
 0x4f7   : > { %v3823_v59 = vsel %vm3817_vm9, %v3810_v26, 920167782  ;;  %v3831_v43 = vand.u32 65535, %v9434_v4  ;;  %v4526_v47 = vsub.s32 4, %v9442_v42  ;;  %vm3815_vm13 = vcmp.lt.s32.totalorder %v9446_v22, 2 }
 0x4f8   : > { %v3614_v5 = vmul.f32 %v3613_v21, %v3598_v17  ;;  %v3623_v13 = vxor.u32 2147483648, %v3606_v45  ;;  %v4507_v39 = vsel %vm4505_vm6, %v4506_v19, %v9463_v0  ;;  %v4496_v17 = vadd.s32 %v9413_v28, %v9411_v24 }
 0x4f9   : > { %v4508_v11 = vclz %v4507_v39  ;;  %v3824_v48 = vsel %vm3816_vm11, %v3807_v8, %v3823_v59  ;;  %v3826_v7 = vsel %vm3814_vm8, %v9466_v63, %v3807_v8  ;;  %v3827_v50 = vsel %vm3817_vm9, %v3813_v23, 1326507024 }
 0x4fa   : > { %v3620_v34 = vxor.u32 2147483648, %v3614_v5  ;;  %v3624_v24 = vsel %vm3622_vm7, %v3623_v13, %v3614_v5  ;;  %v3825_v28 = vsel %vm3815_vm13, %v3822_v44, %v3824_v48  ;;  %v3828_v49 = vsel %vm3816_vm11, %v3810_v26, %v3827_v50 }
 0x4fb   : > { %v6024_v38 = vadd.s32 4294967294, %v4508_v11  ;;  %v3855_v32 = vand.u32 65535, %v3825_v28  ;;  %v3829_v36 = vsel %vm3815_vm13, %v3826_v7, %v3828_v49  ;;  %v3856_v40 = vshrl.u32 %v3825_v28, 16 }
 0x4fc   : > { %v3621_v27 = vsel %vm3619_vm4, %v3606_v45, %v3620_v34  ;;  %v3832_v31 = vshrl.u32 %v9434_v4, 16  ;;  %v3833_v10 = vand.u32 65535, %v3829_v36  ;;  %v3798_v26 = vshrl.u32 %v10440_v6, %v9430_v41 }
 0x4fd   : > { %v3625_v1 = vsel %vm3618_vm3, %v3621_v27, %v3624_v24  ;;  %vm6025_vm12 = vcmp.lt.s32.totalorder %v6024_v38, 0  ;;  %v3834_v45 = vshrl.u32 %v3829_v36, 16  ;;  %v3858_v21 = vmul.u32 %v3856_v40, %v3831_v43 }
 0x4fe   : > { %v3626_v62 = vsel %vm3615_vm5, nan, %v3625_v1  ;;  %v4511_v37 = vsel %vm6025_vm12, 0, %v6024_v38  ;;  %v3837_v23 = vmul.u32 %v3833_v10, %v3832_v31  ;;  %v3859_v5 = vmul.u32 %v3855_v32, %v3832_v31 }
 0x4ff   : > { %5814 = vst [vmem:[%s6906_s5 + $0x88] sm:$0xff] %v3626_v62  ;;  %v4512_v15 = vsub.s32 32, %v4511_v37  ;;  %v4516_v3 = vsub.s32 4294967266, %v4511_v37  ;;  %v4513_v14 = vshll.u32 %v9463_v0, %v4511_v37  ;;  %v4527_v13 = vsel %vm4404_vm10, %v4526_v47, %v9442_v42 }
 0x500   : > { %v3818_v39 = vsel %vm3814_vm8, %v3798_v26, %v3801_v53  ;;  %v3836_v11 = vmul.u32 %v3834_v45, %v3831_v43  ;;  %v3861_v44 = vshll.u32 %v3858_v21, 16  ;;  %v3819_v41 = vsel %vm3817_vm9, %v3807_v8, 2102212464 }
 0x501   : > { %v4514_v35 = vshrl.u32 %v4496_v17, %v4512_v15  ;;  %v4517_v19 = vadd.s32 127, %v4516_v3  ;;  %v3857_v34 = vmul.u32 %v3855_v32, %v3831_v43  ;;  %v3835_v48 = vmul.u32 %v3833_v10, %v3831_v43 }
 0x502   : > { %v3838_v17 = vmul.u32 %v3834_v45, %v3832_v31  ;;  %v3839_v38 = vshll.u32 %v3836_v11, 16  ;;  %v3860_v7 = vmul.u32 %v3856_v40, %v3832_v31  ;;  %v3841_v24 = vshll.u32 %v3837_v23, 16 }
 0x503   : > { %v4515_v59 = vor.u32 %v4514_v35, %v4513_v14  ;;  %v4518_v0 = vshll.u32 %v4517_v19, 23  ;;  %v3863_v28 = vshll.u32 %v3859_v5, 16  ;;  %vm3865_vm14 = vc.u32 %v3857_v34, %v3861_v44 }
 0x504   : > { %vm3843_vm15 = vc.u32 %v3835_v48, %v3839_v38  ;;  %v3845_v42 = vadd.s32 %v3839_v38, %v3835_v48  ;;  %v3866_v53 = vsel %vm3865_vm14, 1, %v6360_v29  ;;  %v3867_v47 = vadd.s32 %v3861_v44, %v3857_v34 }
 0x505   : > { %v4519_v27 = vor.u32 4788187, %v4518_v0  ;;  %v4522_v1 = vcvt.s32.f32 %v4515_v59  ;;  %v3844_v49 = vsel %vm3843_vm15, 1, %v6360_v29  ;;  %v3868_v62 = vadd.s32 %v3866_v53, %v3860_v7 }
 0x506   : > { %v3820_v8 = vsel %vm3816_vm11, %v9466_v63, %v3819_v41  ;;  %v3846_v43 = vadd.s32 %v3844_v49, %v3838_v17  ;;  %vm3847_vm0 = vc.u32 %v3845_v42, %v3841_v24  ;;  %vm3869_vm2 = vc.u32 %v3867_v47, %v3863_v28 }
 0x507   : > { %v4520_v50 = vand.u32 2147483647, %v4519_v27  ;;  %v3848_v37 = vsel %vm3847_vm0, 1, %v6360_v29  ;;  %v3870_v36 = vsel %vm3869_vm2, 1, %v6360_v29  ;;  %v4715_v40 = vand.u32 2139095040, %v9479_v33 }
 0x508   : > { %v3840_v15 = vshrl.u32 %v3836_v11, 16  ;;  %v3850_v3 = vadd.s32 %v3848_v37, %v3846_v43  ;;  %v3862_v31 = vshrl.u32 %v3858_v21, 16  ;;  %v3872_v10 = vadd.s32 %v3870_v36, %v3868_v62 }
 0x509   : > { %v4523_v32 = vmul.f32 %v4522_v1, %v4520_v50  ;;  %vm9538_vm4 = vcmp.le.f32.partialorder %v4402_v12, 0.7853982  ;;  %v4712_v26 = vand.u32 2147483647, %v9479_v33  ;;  %v4716_v45 = vshrl.u32 %v4715_v40, 23 }
 0x50a   : > { %v3842_v35 = vshrl.u32 %v3837_v23, 16  ;;  %v3851_v19 = vadd.s32 %v3850_v3, %v3840_v15  ;;  %v3864_v44 = vshrl.u32 %v3859_v5, 16  ;;  %v3873_v59 = vadd.s32 %v3872_v10, %v3862_v31 }
 0x50b   : > { %v4524_v63 = vxor.u32 2147483648, %v4523_v32  ;;  %v4529_v21 = vsel %vm9538_vm4, 0, %v4527_v13  ;;  %v3821_v12 = vsel %vm3815_vm13, %v3818_v39, %v3820_v8  ;;  %v6029_v0 = vadd.s32 4294967169, %v4716_v45  ;;  %v678_v39 = vpop.permute.xlu1 %677 }
 0x50c   : > { %v3852_v34 = vadd.s32 %v3851_v19, %v3842_v35  ;;  %v3871_v48 = vadd.s32 %v3867_v47, %v3863_v28  ;;  %v3874_v23 = vadd.s32 %v3873_v59, %v3864_v44  ;;  %v4546_v38 = vadd.s32 3, %v4529_v21 }
 0x50d   : > { %v4525_v11 = vsel %vm4404_vm10, %v4524_v63, %v4523_v32  ;;  %v4722_v5 = vadd.s32 1, %v6029_v0  ;;  %v4719_v27 = vand.u32 8388607, %v4712_v26  ;;  %v3875_v22 = vmul.u32 %v9434_v4, %v3821_v12 }
 0x50e   : > { %v4528_v41 = vsel %vm9538_vm4, %v9239_v58, %v4525_v11  ;;  %vm3877_vm3 = vc.u32 %v3852_v34, %v3871_v48  ;;  %v3878_v7 = vadd.s32 1, %v3874_v23  ;;  %v4547_v47 = vand.u32 3, %v4546_v38 }
 0x50f   : > { %v4530_v17 = vmul.f32 %v4528_v41, %v4528_v41  ;;  %vm4723_vm5 = vcmp.gt.s32.totalorder %v4722_v5, 0  ;;  %v4720_v49 = vor.u32 8388608, %v4719_v27  ;;  %v761_v8 = vsel %vm320_vm1, %v8616_v51, %v678_v39 }
 0x510   : > { %v3879_v42 = vsel %vm3877_vm3, %v3878_v7, %v3874_v23  ;;  %v4724_v53 = vsel %vm4723_vm5, %v4722_v5, 0  ;;  %v794_v3 = vmul.f32 %v9439_v61, %v761_v8  ;;  %vm4549_vm6 = vcmp.eq.s32.totalorder %v4547_v47, 0 }
 0x511   : > { %v4531_v13 = vmul.f32 -0.001358992, %v4530_v17  ;;  %v4538_v24 = vmul.f32 -0.00019511016, %v4530_v17  ;;  %v3880_v28 = vadd.s32 %v3879_v42, %v3875_v22  ;;  %v4726_v62 = vand.u32 31, %v4724_v53 }
 0x512   : > { %vm4552_vm7 = vcmp.eq.s32.totalorder %v4547_v47, 2  ;;  %v9563_v31 = vshrl.u32 %v4724_v53, 5  ;;  %v9569_v14 = vshll.u32 %v4720_v49, 8  ;;  %vm4548_vm8 = vcmp.lt.s32.totalorder %v4547_v47, 2 }
 0x513   : > { %v4532_v50 = vadd.f32 0.041655596, %v4531_v13  ;;  %v4539_v1 = vadd.f32 0.008332121, %v4538_v24  ;;  %v3881_v37 = vadd.s32 536870912, %v3880_v28  ;;  %v9558_v36 = vsub.s32 32, %v4726_v62 }
 0x514   : > { %v4729_v19 = vshll.u32 %v10440_v6, %v4726_v62  ;;  %vm4545_vm9 = vweird.f32 %v9239_v58  ;;  %v4732_v44 = vshll.u32 %v10409_v25, %v4726_v62  ;;  %v4735_v59 = vshll.u32 %v10400_v55, %v4726_v62 }
 0x515   : > { %v4533_v43 = vmul.f32 %v4532_v50, %v4530_v17  ;;  %v4540_v32 = vmul.f32 %v4539_v1, %v4530_v17  ;;  %v9560_v15 = vshrl.u32 %v3881_v37, 30  ;;  %v4730_v10 = vshrl.u32 %v10409_v25, %v9558_v36 }
 0x516   : > { %v4733_v51 = vshrl.u32 %v10400_v55, %v9558_v36  ;;  %v4738_v11 = vshll.u32 %v10399_v9, %v4726_v62  ;;  %v4739_v21 = vshrl.u32 %v10401_v30, %v9558_v36  ;;  %v4742_v27 = vshrl.u32 %v10402_v16, %v9558_v36 }
 0x517   : > { %v4534_v4 = vadd.f32 -0.4999988, %v4533_v43  ;;  %v4541_v40 = vadd.f32 -0.16666654, %v4540_v32  ;;  %v3883_v35 = vshll.u32 %v9560_v15, 30  ;;  %v4731_v5 = vor.u32 %v4730_v10, %v4729_v19 }
 0x518   : > { %v4734_v38 = vor.u32 %v4733_v51, %v4732_v44  ;;  %v4740_v7 = vor.u32 %v4739_v21, %v4738_v11  ;;  %v3876_v39 = vadd.s32 %v3871_v48, %v3852_v34  ;;  %v4741_v42 = vshll.u32 %v10401_v30, %v4726_v62 }
 0x519   : > { %v4535_v63 = vmul.f32 %v4534_v4, %v4530_v17  ;;  %v4542_v45 = vmul.f32 %v4541_v40, %v4530_v17  ;;  %v3884_v23 = vsub.s32 %v3880_v28, %v3883_v35  ;;  %v4736_v17 = vshrl.u32 %v10399_v9, %v9558_v36 }
 0x51a   : > { %v4761_v53 = vand.u32 65535, %v9569_v14  ;;  %v9586_v50 = vadd.f32 %v9476_v52, %v794_v3  ;;  %v4762_v8 = vshrl.u32 %v9569_v14, 16  ;;  %vm3784_vm11 = vcmp.lt.s32.totalorder %v9359_v57, 0 }
 0x51b   : > { %v4536_v12 = vadd.f32 1.0, %v4535_v63  ;;  %v4543_v0 = vadd.f32 1.0, %v4542_v45  ;;  %vm3885_vm10 = vcmp.lt.s32.totalorder %v3884_v23, 0  ;;  %v3886_v22 = vsub.s32 0, %v3884_v23 }
 0x51c   : > { %v4737_v49 = vor.u32 %v4736_v17, %v4735_v59  ;;  %vm4744_vm13 = vcmp.lt.s32.totalorder %v9563_v31, 1  ;;  %vm4747_vm12 = vcmp.lt.s32.totalorder %v9563_v31, 4  ;;  %vm4746_vm14 = vcmp.lt.s32.totalorder %v9563_v31, 3 }
 0x51d   : > { %v4544_v13 = vmul.f32 %v4543_v0, %v4528_v41  ;;  %v4553_v24 = vxor.u32 2147483648, %v4536_v12  ;;  %v3887_v28 = vsel %vm3885_vm10, %v3886_v22, %v3884_v23  ;;  %v4743_v41 = vor.u32 %v4742_v27, %v4741_v42 }
 0x51e   : > { %v3888_v43 = vclz %v3887_v28  ;;  %v4752_v62 = vsel %vm4744_vm13, %v4731_v5, %v4734_v38  ;;  %v4753_v32 = vsel %vm4747_vm12, %v4740_v7, 920167782  ;;  %v4250_v40 = vand.u32 2139095040, %v9586_v50 }
 0x51f   : > { %v4550_v1 = vxor.u32 2147483648, %v4544_v13  ;;  %v4554_v48 = vsel %vm4552_vm7, %v4553_v24, %v4544_v13  ;;  %v3906_v10 = vsub.s32 4, %v9560_v15  ;;  %vm4745_vm15 = vcmp.lt.s32.totalorder %v9563_v31, 2 }
 0x520   : > { %v6012_v4 = vadd.s32 4294967294, %v3888_v43  ;;  %v4754_v51 = vsel %vm4746_vm14, %v4737_v49, %v4753_v32  ;;  %v4756_v63 = vsel %vm4744_vm13, %v4734_v38, %v4737_v49  ;;  %v4757_v45 = vsel %vm4747_vm12, %v4743_v41, 1326507024 }
 0x521   : > { %v4551_v34 = vsel %vm4549_vm6, %v4536_v12, %v4550_v1  ;;  %v4755_v47 = vsel %vm4745_vm15, %v4752_v62, %v4754_v51  ;;  %v4758_v35 = vsel %vm4746_vm14, %v4740_v7, %v4757_v45  ;;  %v4728_v21 = vshrl.u32 %v10440_v6, %v9558_v36 }
 0x522   : > { %v4555_v37 = vsel %vm4548_vm8, %v4551_v34, %v4554_v48  ;;  %vm6013_vm0 = vcmp.lt.s32.totalorder %v6012_v4, 0  ;;  %v4785_v19 = vand.u32 65535, %v4755_v47  ;;  %v4786_v44 = vshrl.u32 %v4755_v47, 16 }
 0x523   : > { %v4556_v3 = vsel %vm4545_vm9, nan, %v4555_v37  ;;  %v3891_v58 = vsel %vm6013_vm0, 0, %v6012_v4  ;;  %v4759_v12 = vsel %vm4745_vm15, %v4756_v63, %v4758_v35  ;;  %v4749_v0 = vsel %vm4747_vm12, %v4737_v49, 2102212464 }
 0x524   : > { %5820 = vst [vmem:[%s6906_s5 + $0xb8] sm:$0xff] %v4556_v3  ;;  %v3892_v59 = vsub.s32 32, %v3891_v58  ;;  %v3896_v11 = vsub.s32 4294967266, %v3891_v58  ;;  %v4763_v17 = vand.u32 65535, %v4759_v12  ;;  %v4764_v27 = vshrl.u32 %v4759_v12, 16 }
 0x525   : > { %v4788_v13 = vmul.u32 %v4786_v44, %v4761_v53  ;;  %v3893_v24 = vshll.u32 %v3884_v23, %v3891_v58  ;;  %v4789_v7 = vmul.u32 %v4785_v19, %v4762_v8  ;;  %v3907_v1 = vsel %vm3784_vm11, %v3906_v10, %v9560_v15 }
 0x526   : > { %v3894_v22 = vshrl.u32 %v3876_v39, %v3892_v59  ;;  %v3897_v42 = vadd.s32 127, %v3896_v11  ;;  %v4748_v36 = vsel %vm4744_vm13, %v4728_v21, %v4731_v5  ;;  %v4766_v28 = vmul.u32 %v4764_v27, %v4761_v53 }
 0x527   : > { %v4767_v43 = vmul.u32 %v4763_v17, %v4762_v8  ;;  %v4750_v49 = vsel %vm4746_vm14, %v4734_v38, %v4749_v0  ;;  %v4791_v48 = vshll.u32 %v4788_v13, 16  ;;  %v4765_v62 = vmul.u32 %v4763_v17, %v4761_v53 }
 0x528   : > { %v3895_v41 = vor.u32 %v3894_v22, %v3893_v24  ;;  %v3898_v34 = vshll.u32 %v3897_v42, 23  ;;  %v4769_v23 = vshll.u32 %v4766_v28, 16  ;;  %v4787_v39 = vmul.u32 %v4785_v19, %v4761_v53 }
 0x529   : > { %v4790_v32 = vmul.u32 %v4786_v44, %v4762_v8  ;;  %v4768_v4 = vmul.u32 %v4764_v27, %v4762_v8  ;;  %v4771_v3 = vshll.u32 %v4767_v43, 16  ;;  %v4793_v51 = vshll.u32 %v4789_v7, 16 }
 0x52a   : > { %v3899_v37 = vor.u32 4788187, %v3898_v34  ;;  %vm4773_vm2 = vc.u32 %v4765_v62, %v4769_v23  ;;  %v4775_v15 = vadd.s32 %v4769_v23, %v4765_v62  ;;  %vm4795_vm4 = vc.u32 %v4787_v39, %v4791_v48 }
 0x52b   : > { %v4797_v5 = vadd.s32 %v4791_v48, %v4787_v39  ;;  %v3902_v47 = vcvt.s32.f32 %v3895_v41  ;;  %v4774_v63 = vsel %vm4773_vm2, 1, %v6360_v29  ;;  %v4796_v45 = vsel %vm4795_vm4, 1, %v6360_v29 }
 0x52c   : > { %v3900_v10 = vand.u32 2147483647, %v3899_v37  ;;  %v4776_v38 = vadd.s32 %v4774_v63, %v4768_v4  ;;  %vm4777_vm3 = vc.u32 %v4775_v15, %v4771_v3  ;;  %v4798_v58 = vadd.s32 %v4796_v45, %v4790_v32 }
 0x52d   : > { %vm4799_vm5 = vc.u32 %v4797_v5, %v4793_v51  ;;  %v4778_v35 = vsel %vm4777_vm3, 1, %v6360_v29  ;;  %v4792_v8 = vshrl.u32 %v4788_v13, 16  ;;  %v4770_v44 = vshrl.u32 %v4766_v28, 16 }
 0x52e   : > { %v3903_v53 = vmul.f32 %v3902_v47, %v3900_v10  ;;  %v4800_v19 = vsel %vm4799_vm5, 1, %v6360_v29  ;;  %v4780_v59 = vadd.s32 %v4778_v35, %v4776_v38  ;;  %v4251_v21 = vshrl.u32 %v4250_v40, 23 }
 0x52f   : > { %v4802_v11 = vadd.s32 %v4800_v19, %v4798_v58  ;;  %vm9635_vm6 = vcmp.le.f32.partialorder %v3782_v18, 0.7853982  ;;  %v4772_v17 = vshrl.u32 %v4767_v43, 16  ;;  %v4247_v27 = vand.u32 2147483647, %v9586_v50 }
 0x530   : > { %v3904_v0 = vxor.u32 2147483648, %v3903_v53  ;;  %v4781_v24 = vadd.s32 %v4780_v59, %v4770_v44  ;;  %v4794_v22 = vshrl.u32 %v4789_v7, 16  ;;  %v6020_v13 = vadd.s32 4294967169, %v4251_v21 }
 0x531   : > { %v4803_v42 = vadd.s32 %v4802_v11, %v4792_v8  ;;  %v3909_v40 = vsel %vm9635_vm6, 0, %v3907_v1  ;;  %v4751_v18 = vsel %vm4745_vm15, %v4748_v36, %v4750_v49  ;;  %v9646_v41 = vadd.s32 %v4797_v5, %v4793_v51  ;;  %v717_v5 = vpop.permute.xlu2 %716 }
 0x532   : > { %v3905_v28 = vsel %vm3784_vm11, %v3904_v0, %v3903_v53  ;;  %v9651_v34 = vadd.s32 %v4781_v24, %v4772_v17  ;;  %v4257_v48 = vadd.s32 1, %v6020_v13  ;;  %v3926_v23 = vadd.s32 3, %v3909_v40 }
 0x533   : > { %v3908_v43 = vsel %vm9635_vm6, %v9359_v57, %v3905_v28  ;;  %v4804_v7 = vadd.s32 %v4803_v42, %v4794_v22  ;;  %v4805_v36 = vmul.u32 %v9569_v14, %v4751_v18  ;;  %v4254_v37 = vand.u32 8388607, %v4247_v27 }
 0x534   : > { %v3910_v62 = vmul.f32 %v3908_v43, %v3908_v43  ;;  %vm4807_vm7 = vc.u32 %v9651_v34, %v9646_v41  ;;  %vm4258_vm8 = vcmp.gt.s32.totalorder %v4257_v48, 0  ;;  %v3927_v10 = vand.u32 3, %v3926_v23 }
 0x535   : > { %v4808_v39 = vadd.s32 1, %v4804_v7  ;;  %v4259_v49 = vsel %vm4258_vm8, %v4257_v48, 0  ;;  %v4255_v58 = vor.u32 8388608, %v4254_v37  ;;  %v767_v14 = vsel %vm320_vm1, %v8032_v2, %v717_v5 }
 0x536   : > { %v3911_v1 = vmul.f32 -0.001358992, %v3910_v62  ;;  %v3918_v31 = vmul.f32 -0.00019511016, %v3910_v62  ;;  %v4261_v4 = vand.u32 31, %v4259_v49  ;;  %v9660_v53 = vshrl.u32 %v4259_v49, 5 }
 0x537   : > { %v4809_v32 = vsel %vm4807_vm7, %v4808_v39, %v4804_v7  ;;  %vm3929_vm9 = vcmp.eq.s32.totalorder %v3927_v10, 0  ;;  %vm3928_vm10 = vcmp.lt.s32.totalorder %v3927_v10, 2  ;;  %vm3925_vm11 = vweird.f32 %v9359_v57 }
 0x538   : > { %v3912_v3 = vadd.f32 0.041655596, %v3911_v1  ;;  %v3919_v51 = vadd.f32 0.008332121, %v3918_v31  ;;  %v4810_v15 = vadd.s32 %v4809_v32, %v4805_v36  ;;  %v9658_v47 = vsub.s32 32, %v4261_v4 }
 0x539   : > { %v4264_v59 = vshll.u32 %v10440_v6, %v4261_v4  ;;  %v4267_v24 = vshll.u32 %v10409_v25, %v4261_v4  ;;  %v4270_v22 = vshll.u32 %v10400_v55, %v4261_v4  ;;  %v4273_v42 = vshll.u32 %v10399_v9, %v4261_v4 }
 0x53a   : > { %v3913_v63 = vmul.f32 %v3912_v3, %v3910_v62  ;;  %v3920_v45 = vmul.f32 %v3919_v51, %v3910_v62  ;;  %v4811_v38 = vadd.s32 536870912, %v4810_v15  ;;  %v4265_v44 = vshrl.u32 %v10409_v25, %v9658_v47 }
 0x53b   : > { %v4268_v11 = vshrl.u32 %v10400_v55, %v9658_v47  ;;  %v4271_v21 = vshrl.u32 %v10399_v9, %v9658_v47  ;;  %v4274_v12 = vshrl.u32 %v10401_v30, %v9658_v47  ;;  %v4276_v13 = vshll.u32 %v10401_v30, %v4261_v4 }
 0x53c   : > { %v3914_v35 = vadd.f32 -0.4999988, %v3913_v63  ;;  %v3921_v8 = vadd.f32 -0.16666654, %v3920_v45  ;;  %v9665_v19 = vshrl.u32 %v4811_v38, 30  ;;  %v4277_v28 = vshrl.u32 %v10402_v16, %v9658_v47 }
 0x53d   : > { %v9684_v48 = vor.u32 %v4265_v44, %v4264_v59  ;;  %v4272_v23 = vor.u32 %v4271_v21, %v4270_v22  ;;  %v4275_v39 = vor.u32 %v4274_v12, %v4273_v42  ;;  %vm3932_vm12 = vcmp.eq.s32.totalorder %v3927_v10, 2 }
 0x53e   : > { %v3915_v2 = vmul.f32 %v3914_v35, %v3910_v62  ;;  %v3922_v0 = vmul.f32 %v3921_v8, %v3910_v62  ;;  %v4813_v17 = vshll.u32 %v9665_v19, 30  ;;  %v9686_v62 = vor.u32 %v4268_v11, %v4267_v24 }
 0x53f   : > { %v4278_v1 = vor.u32 %v4277_v28, %v4276_v13  ;;  %vm4279_vm14 = vcmp.lt.s32.totalorder %v9660_v53, 1  ;;  %v9689_v32 = vshll.u32 %v4255_v58, 8  ;;  %v800_v37 = vmul.f32 %v9439_v61, %v767_v14 }
 0x540   : > { %v3916_v40 = vadd.f32 1.0, %v3915_v2  ;;  %v3923_v18 = vadd.f32 1.0, %v3922_v0  ;;  %v4814_v7 = vsub.s32 %v4810_v15, %v4813_v17  ;;  %vm4281_vm15 = vcmp.lt.s32.totalorder %v9660_v53, 3 }
 0x541   : > { %vm4282_vm0 = vcmp.lt.s32.totalorder %v9660_v53, 4  ;;  %v4291_v38 = vsel %vm4279_vm14, %v9686_v62, %v4272_v23  ;;  %vm4280_vm2 = vcmp.lt.s32.totalorder %v9660_v53, 2  ;;  %v9711_v8 = vadd.f32 %v9476_v52, %v800_v37 }
 0x542   : > { %v3924_v31 = vmul.f32 %v3923_v18, %v3908_v43  ;;  %v3933_v36 = vxor.u32 2147483648, %v3916_v40  ;;  %vm4815_vm13 = vcmp.lt.s32.totalorder %v4814_v7, 0  ;;  %v4816_v49 = vsub.s32 0, %v4814_v7 }
 0x543   : > { %v4287_v43 = vsel %vm4279_vm14, %v9684_v48, %v9686_v62  ;;  %v4288_v5 = vsel %vm4282_vm0, %v4275_v39, 920167782  ;;  %v4292_v58 = vsel %vm4282_vm0, %v4278_v1, 1326507024  ;;  %v4296_v21 = vand.u32 65535, %v9689_v32 }
 0x544   : > { %v3930_v4 = vxor.u32 2147483648, %v3924_v31  ;;  %v4817_v3 = vsel %vm4815_vm13, %v4816_v49, %v4814_v7  ;;  %v3934_v51 = vsel %vm3932_vm12, %v3933_v36, %v3924_v31  ;;  %v4289_v45 = vsel %vm4281_vm15, %v4272_v23, %v4288_v5 }
 0x545   : > { %v4818_v15 = vclz %v4817_v3  ;;  %v4290_v59 = vsel %vm4280_vm2, %v4287_v43, %v4289_v45  ;;  %v4293_v11 = vsel %vm4281_vm15, %v4275_v39, %v4292_v58  ;;  %v4297_v17 = vshrl.u32 %v9689_v32, 16 }
 0x546   : > { %v3931_v63 = vsel %vm3929_vm9, %v3916_v40, %v3930_v4  ;;  %v4294_v10 = vsel %vm4280_vm2, %v4291_v38, %v4293_v11  ;;  %v4320_v12 = vand.u32 65535, %v4290_v59  ;;  %v4321_v2 = vshrl.u32 %v4290_v59, 16 }
 0x547   : > { %v3935_v14 = vsel %vm3928_vm10, %v3931_v63, %v3934_v51  ;;  %v6030_v35 = vadd.s32 4294967294, %v4818_v15  ;;  %v4298_v57 = vand.u32 65535, %v4294_v10  ;;  %v4299_v24 = vshrl.u32 %v4294_v10, 16 }
 0x548   : > { %v3936_v44 = vsel %vm3925_vm11, nan, %v3935_v14  ;;  %v4806_v22 = vadd.s32 %v9646_v41, %v9651_v34  ;;  %v5180_v28 = vand.u32 2139095040, %v9711_v8  ;;  %vm4714_vm3 = vcmp.lt.s32.totalorder %v9479_v33, 0 }
 0x549   : > { %5816 = vst [vmem:[%s6906_s5 + $0x98] sm:$0xff] %v3936_v44  ;;  %vm6031_vm4 = vcmp.lt.s32.totalorder %v6030_v35, 0  ;;  %v4263_v18 = vshrl.u32 %v10440_v6, %v9658_v47  ;;  %v4301_v39 = vmul.u32 %v4299_v24, %v4296_v21  ;;  %v4302_v1 = vmul.u32 %v4298_v57, %v4297_v17 }
 0x54a   : > { %v4821_v0 = vsel %vm6031_vm4, 0, %v6030_v35  ;;  %v4323_v49 = vmul.u32 %v4321_v2, %v4296_v21  ;;  %v4324_v37 = vmul.u32 %v4320_v12, %v4297_v17  ;;  %v4836_v4 = vsub.s32 4, %v9665_v19 }
 0x54b   : > { %v4822_v42 = vsub.s32 32, %v4821_v0  ;;  %v4826_v13 = vsub.s32 4294967266, %v4821_v0  ;;  %v4823_v40 = vshll.u32 %v4814_v7, %v4821_v0  ;;  %v4284_v41 = vsel %vm4282_vm0, %v4272_v23, 2102212464 }
 0x54c   : > { %v4300_v34 = vmul.u32 %v4298_v57, %v4296_v21  ;;  %v4304_v3 = vshll.u32 %v4301_v39, 16  ;;  %v4322_v43 = vmul.u32 %v4320_v12, %v4296_v21  ;;  %v4326_v7 = vshll.u32 %v4323_v49, 16 }
 0x54d   : > { %v4824_v31 = vshrl.u32 %v4806_v22, %v4822_v42  ;;  %v4827_v36 = vadd.s32 127, %v4826_v13  ;;  %vm9735_vm5 = vcmp.le.f32.partialorder %v4712_v26, 0.7853982  ;;  %v4303_v5 = vmul.u32 %v4299_v24, %v4297_v17 }
 0x54e   : > { %v4306_v63 = vshll.u32 %v4302_v1, 16  ;;  %vm4308_vm6 = vc.u32 %v4300_v34, %v4304_v3  ;;  %v4310_v45 = vadd.s32 %v4304_v3, %v4300_v34  ;;  %v4325_v23 = vmul.u32 %v4321_v2, %v4297_v17 }
 0x54f   : > { %v4825_v51 = vor.u32 %v4824_v31, %v4823_v40  ;;  %v4828_v15 = vshll.u32 %v4827_v36, 23  ;;  %v4309_v58 = vsel %vm4308_vm6, 1, %v6360_v29  ;;  %v4328_v14 = vshll.u32 %v4324_v37, 16 }
 0x550   : > { %v4311_v35 = vadd.s32 %v4309_v58, %v4303_v5  ;;  %vm4312_vm7 = vc.u32 %v4310_v45, %v4306_v63  ;;  %vm4330_vm8 = vc.u32 %v4322_v43, %v4326_v7  ;;  %v4332_v44 = vadd.s32 %v4326_v7, %v4322_v43  ;;  %v691_v58 = vpop.permute.xlu1 %690 }
 0x551   : > { %v4829_v38 = vor.u32 4788187, %v4828_v15  ;;  %v4832_v11 = vcvt.s32.f32 %v4825_v51  ;;  %v4313_v26 = vsel %vm4312_vm7, 1, %v6360_v29  ;;  %v4331_v21 = vsel %vm4330_vm8, 1, %v6360_v29 }
 0x552   : > { %v4305_v10 = vshrl.u32 %v4301_v39, 16  ;;  %v4315_v12 = vadd.s32 %v4313_v26, %v4311_v35  ;;  %v4333_v0 = vadd.s32 %v4331_v21, %v4325_v23  ;;  %vm4334_vm9 = vc.u32 %v4332_v44, %v4328_v14 }
 0x553   : > { %v4830_v59 = vand.u32 2147483647, %v4829_v38  ;;  %v4837_v2 = vsel %vm4714_vm3, %v4836_v4, %v9665_v19  ;;  %v4335_v17 = vsel %vm4334_vm9, 1, %v6360_v29  ;;  %v5181_v24 = vshrl.u32 %v5180_v28, 23 }
 0x554   : > { %v4307_v22 = vshrl.u32 %v4302_v1, 16  ;;  %v4316_v42 = vadd.s32 %v4315_v12, %v4305_v10  ;;  %v4327_v13 = vshrl.u32 %v4323_v49, 16  ;;  %v4337_v40 = vadd.s32 %v4335_v17, %v4333_v0 }
 0x555   : > { %v4833_v57 = vmul.f32 %v4832_v11, %v4830_v59  ;;  %v4283_v39 = vsel %vm4279_vm14, %v4263_v18, %v9684_v48  ;;  %v4285_v36 = vsel %vm4281_vm15, %v9686_v62, %v4284_v41  ;;  %v6038_v34 = vadd.s32 4294967169, %v5181_v24 }
 0x556   : > { %v9752_v3 = vadd.s32 %v4316_v42, %v4307_v22  ;;  %v4329_v19 = vshrl.u32 %v4324_v37, 16  ;;  %v4338_v4 = vadd.s32 %v4337_v40, %v4327_v13  ;;  %v5177_v28 = vand.u32 2147483647, %v9711_v8 }
 0x557   : > { %v4834_v31 = vxor.u32 2147483648, %v4833_v57  ;;  %v4839_v49 = vsel %vm9735_vm5, 0, %v4837_v2  ;;  %v9759_v51 = vadd.s32 %v4332_v44, %v4328_v14  ;;  %v5187_v48 = vadd.s32 1, %v6038_v34 }
 0x558   : > { %v4286_v18 = vsel %vm4280_vm2, %v4283_v39, %v4285_v36  ;;  %v4339_v37 = vadd.s32 %v4338_v4, %v4329_v19  ;;  %v4856_v15 = vadd.s32 3, %v4839_v49  ;;  %v5184_v7 = vand.u32 8388607, %v5177_v28 }
 0x559   : > { %v4835_v1 = vsel %vm4714_vm3, %v4834_v31, %v4833_v57  ;;  %vm4342_vm10 = vc.u32 %v9752_v3, %v9759_v51  ;;  %vm5188_vm11 = vcmp.gt.s32.totalorder %v5187_v48, 0  ;;  %v4340_v47 = vmul.u32 %v9689_v32, %v4286_v18 }
 0x55a   : > { %v4838_v62 = vsel %vm9735_vm5, %v9479_v33, %v4835_v1  ;;  %v4343_v43 = vadd.s32 1, %v4339_v37  ;;  %v5189_v5 = vsel %vm5188_vm11, %v5187_v48, 0  ;;  %v4857_v59 = vand.u32 3, %v4856_v15 }
 0x55b   : > { %v4840_v41 = vmul.f32 %v4838_v62, %v4838_v62  ;;  %v5191_v38 = vand.u32 31, %v5189_v5  ;;  %v763_v11 = vsel %vm320_vm1, %v8581_v60, %v691_v58  ;;  %v5185_v12 = vor.u32 8388608, %v5184_v7 }
 0x55c   : > { %v4344_v53 = vsel %vm4342_vm10, %v4343_v43, %v4339_v37  ;;  %v9776_v0 = vshrl.u32 %v5189_v5, 5  ;;  %vm4859_vm13 = vcmp.eq.s32.totalorder %v4857_v59, 0  ;;  %vm4858_vm12 = vcmp.lt.s32.totalorder %v4857_v59, 2 }
 0x55d   : > { %v4841_v63 = vmul.f32 -0.001358992, %v4840_v41  ;;  %v4848_v45 = vmul.f32 -0.00019511016, %v4840_v41  ;;  %v4345_v35 = vadd.s32 %v4344_v53, %v4340_v47  ;;  %v9771_v44 = vsub.s32 32, %v5191_v38 }
 0x55e   : > { %v5194_v60 = vshll.u32 %v10440_v6, %v5191_v38  ;;  %v5197_v42 = vshll.u32 %v10409_v25, %v5191_v38  ;;  %v5200_v13 = vshll.u32 %v10400_v55, %v5191_v38  ;;  %v5203_v31 = vshll.u32 %v10399_v9, %v5191_v38 }
 0x55f   : > { %v4842_v23 = vadd.f32 0.041655596, %v4841_v63  ;;  %v4849_v14 = vadd.f32 0.008332121, %v4848_v45  ;;  %v4346_v10 = vadd.s32 536870912, %v4345_v35  ;;  %v5195_v32 = vshrl.u32 %v10409_v25, %v9771_v44 }
 0x560   : > { %v5198_v57 = vshrl.u32 %v10400_v55, %v9771_v44  ;;  %v5204_v2 = vshrl.u32 %v10401_v30, %v9771_v44  ;;  %v5201_v40 = vshrl.u32 %v10399_v9, %v9771_v44  ;;  %v5206_v19 = vshll.u32 %v10401_v30, %v5191_v38 }
 0x561   : > { %v4843_v26 = vmul.f32 %v4842_v23, %v4840_v41  ;;  %v4850_v21 = vmul.f32 %v4849_v14, %v4840_v41  ;;  %v9784_v22 = vshrl.u32 %v4346_v10, 30  ;;  %vm4855_vm14 = vweird.f32 %v9479_v33 }
 0x562   : > { %v9795_v4 = vor.u32 %v5195_v32, %v5194_v60  ;;  %v9797_v1 = vor.u32 %v5198_v57, %v5197_v42  ;;  %v5205_v49 = vor.u32 %v5204_v2, %v5203_v31  ;;  %v5207_v48 = vshrl.u32 %v10402_v16, %v9771_v44 }
 0x563   : > { %v4844_v17 = vadd.f32 -0.4999988, %v4843_v26  ;;  %v4851_v24 = vadd.f32 -0.16666654, %v4850_v21  ;;  %v4348_v34 = vshll.u32 %v9784_v22, 30  ;;  %v9802_v43 = vor.u32 %v5201_v40, %v5200_v13 }
 0x564   : > { %v5208_v7 = vor.u32 %v5207_v48, %v5206_v19  ;;  %vm5209_vm15 = vcmp.lt.s32.totalorder %v9776_v0, 1  ;;  %vm5212_vm0 = vcmp.lt.s32.totalorder %v9776_v0, 4  ;;  %vm4862_vm4 = vcmp.eq.s32.totalorder %v4857_v59, 2 }
 0x565   : > { %v4845_v39 = vmul.f32 %v4844_v17, %v4840_v41  ;;  %v4852_v36 = vmul.f32 %v4851_v24, %v4840_v41  ;;  %v4349_v15 = vsub.s32 %v4345_v35, %v4348_v34  ;;  %v796_v41 = vmul.f32 %v9439_v61, %v763_v11 }
 0x566   : > { %vm4249_vm3 = vcmp.lt.s32.totalorder %v9586_v50, 0  ;;  %v5217_v47 = vsel %vm5209_vm15, %v9795_v4, %v9797_v1  ;;  %v5218_v61 = vsel %vm5212_vm0, %v5205_v49, 920167782  ;;  %v9813_v38 = vshll.u32 %v5185_v12, 8 }
 0x567   : > { %v4846_v18 = vadd.f32 1.0, %v4845_v39  ;;  %v4853_v37 = vadd.f32 1.0, %v4852_v36  ;;  %vm4350_vm2 = vcmp.lt.s32.totalorder %v4349_v15, 0  ;;  %v4351_v45 = vsub.s32 0, %v4349_v15 }
 0x568   : > { %vm5211_vm5 = vcmp.lt.s32.totalorder %v9776_v0, 3  ;;  %vm5210_vm6 = vcmp.lt.s32.totalorder %v9776_v0, 2  ;;  %v5222_v21 = vsel %vm5212_vm0, %v5208_v7, 1326507024  ;;  %v4341_v12 = vadd.s32 %v9759_v51, %v9752_v3 }
 0x569   : > { %v4854_v5 = vmul.f32 %v4853_v37, %v4838_v62  ;;  %v4863_v63 = vxor.u32 2147483648, %v4846_v18  ;;  %v4352_v53 = vsel %vm4350_vm2, %v4351_v45, %v4349_v15  ;;  %v9817_v62 = vadd.f32 %v9476_v52, %v796_v41 }
 0x56a   : > { %v4353_v14 = vclz %v4352_v53  ;;  %v5219_v35 = vsel %vm5211_vm5, %v9802_v43, %v5218_v61  ;;  %v5221_v52 = vsel %vm5209_vm15, %v9797_v1, %v9802_v43  ;;  %v5226_v57 = vand.u32 65535, %v9813_v38 }
 0x56b   : > { %v4860_v58 = vxor.u32 2147483648, %v4854_v5  ;;  %v4864_v23 = vsel %vm4862_vm4, %v4863_v63, %v4854_v5  ;;  %v5220_v26 = vsel %vm5210_vm6, %v5217_v47, %v5219_v35  ;;  %v4371_v17 = vsub.s32 4, %v9784_v22 }
 0x56c   : > { %v6021_v32 = vadd.s32 4294967294, %v4353_v14  ;;  %v5223_v24 = vsel %vm5211_vm5, %v5205_v49, %v5222_v21  ;;  %v5227_v60 = vshrl.u32 %v9813_v38, 16  ;;  %v5250_v42 = vand.u32 65535, %v5220_v26 }
 0x56d   : > { %v4861_v11 = vsel %vm4859_vm13, %v4846_v18, %v4860_v58  ;;  %v5224_v59 = vsel %vm5210_vm6, %v5221_v52, %v5223_v24  ;;  %v5251_v3 = vshrl.u32 %v5220_v26, 16  ;;  %v4557_v33 = vand.u32 2147483647, %v9817_v62 }
 0x56e   : > { %v4865_v10 = vsel %vm4858_vm12, %v4861_v11, %v4864_v23  ;;  %vm6022_vm7 = vcmp.lt.s32.totalorder %v6021_v32, 0  ;;  %v5228_v13 = vand.u32 65535, %v5224_v59  ;;  %v5229_v40 = vshrl.u32 %v5224_v59, 16 }
 0x56f   : > { %v4866_v2 = vsel %vm4855_vm14, nan, %v4865_v10  ;;  %v4356_v51 = vsel %vm6022_vm7, 0, %v6021_v32  ;;  %v5253_v36 = vmul.u32 %v5251_v3, %v5226_v57  ;;  %v4560_v34 = vand.u32 2139095040, %v9817_v62 }
 0x570   : > { %5822 = vst [vmem:[%s6906_s5 + $0xc8] sm:$0xff] %v4866_v2  ;;  %v4357_v31 = vsub.s32 32, %v4356_v51  ;;  %v4361_v39 = vsub.s32 4294967266, %v4356_v51  ;;  %vm9849_vm8 = vcmp.le.f32.partialorder %v4247_v27, 0.7853982  ;;  %v4372_v49 = vsel %vm4249_vm3, %v4371_v17, %v9784_v22 }
 0x571   : > { %v5193_v48 = vshrl.u32 %v10440_v6, %v9771_v44  ;;  %v5231_v18 = vmul.u32 %v5229_v40, %v5226_v57  ;;  %v5232_v37 = vmul.u32 %v5228_v13, %v5227_v60  ;;  %v4358_v41 = vshll.u32 %v4349_v15, %v4356_v51 }
 0x572   : > { %v4359_v7 = vshrl.u32 %v4341_v12, %v4357_v31  ;;  %v4362_v5 = vadd.s32 127, %v4361_v39  ;;  %v5254_v63 = vmul.u32 %v5250_v42, %v5227_v60  ;;  %v5230_v45 = vmul.u32 %v5228_v13, %v5226_v57 }
 0x573   : > { %v5233_v47 = vmul.u32 %v5229_v40, %v5227_v60  ;;  %v5234_v61 = vshll.u32 %v5231_v18, 16  ;;  %v5252_v27 = vmul.u32 %v5250_v42, %v5226_v57  ;;  %v5255_v23 = vmul.u32 %v5251_v3, %v5227_v60 }
 0x574   : > { %v4360_v58 = vor.u32 %v4359_v7, %v4358_v41  ;;  %v4363_v53 = vshll.u32 %v4362_v5, 23  ;;  %v5256_v14 = vshll.u32 %v5253_v36, 16  ;;  %v5236_v35 = vshll.u32 %v5232_v37, 16 }
 0x575   : > { %vm5238_vm9 = vc.u32 %v5230_v45, %v5234_v61  ;;  %v5240_v22 = vadd.s32 %v5234_v61, %v5230_v45  ;;  %v5258_v11 = vshll.u32 %v5254_v63, 16  ;;  %v4561_v2 = vshrl.u32 %v4560_v34, 23 }
 0x576   : > { %v4364_v26 = vor.u32 4788187, %v4363_v53  ;;  %v4367_v44 = vcvt.s32.f32 %v4360_v58  ;;  %v5239_v52 = vsel %vm5238_vm9, 1, %v6360_v29  ;;  %vm5260_vm10 = vc.u32 %v5252_v27, %v5256_v14 }
 0x577   : > { %v5241_v15 = vadd.s32 %v5239_v52, %v5233_v47  ;;  %vm5242_vm11 = vc.u32 %v5240_v22, %v5236_v35  ;;  %v5261_v21 = vsel %vm5260_vm10, 1, %v6360_v29  ;;  %v5262_v10 = vadd.s32 %v5256_v14, %v5252_v27  ;;  %v730_v14 = vpop.permute.xlu2 %729 }
 0x578   : > { %v4365_v12 = vand.u32 2147483647, %v4364_v26  ;;  %v5243_v32 = vsel %vm5242_vm11, 1, %v6360_v29  ;;  %v5263_v57 = vadd.s32 %v5261_v21, %v5255_v23  ;;  %v5214_v17 = vsel %vm5212_vm0, %v9802_v43, 2102212464 }
 0x579   : > { %v5235_v24 = vshrl.u32 %v5231_v18, 16  ;;  %v5245_v60 = vadd.s32 %v5243_v32, %v5241_v15  ;;  %vm5264_vm13 = vc.u32 %v5262_v10, %v5258_v11  ;;  %v4374_v42 = vsel %vm9849_vm8, 0, %v4372_v49 }
 0x57a   : > { %v4368_v59 = vmul.f32 %v4367_v44, %v4365_v12  ;;  %v5265_v3 = vsel %vm5264_vm13, 1, %v6360_v29  ;;  %v6026_v51 = vadd.s32 4294967169, %v4561_v2  ;;  %v5237_v13 = vshrl.u32 %v5232_v37, 16 }
 0x57b   : > { %v5246_v40 = vadd.s32 %v5245_v60, %v5235_v24  ;;  %v5257_v31 = vshrl.u32 %v5253_v36, 16  ;;  %v5267_v39 = vadd.s32 %v5265_v3, %v5263_v57  ;;  %v5213_v34 = vsel %vm5209_vm15, %v5193_v48, %v9795_v4 }
 0x57c   : > { %v4369_v41 = vxor.u32 2147483648, %v4368_v59  ;;  %v5215_v43 = vsel %vm5211_vm5, %v9797_v1, %v5214_v17  ;;  %v4567_v18 = vadd.s32 1, %v6026_v51  ;;  %v5259_v49 = vshrl.u32 %v5254_v63, 16 }
 0x57d   : > { %v9873_v7 = vadd.s32 %v5246_v40, %v5237_v13  ;;  %v5268_v5 = vadd.s32 %v5267_v39, %v5257_v31  ;;  %v9877_v45 = vadd.s32 %v5262_v10, %v5258_v11  ;;  %v4391_v4 = vadd.s32 3, %v4374_v42 }
 0x57e   : > { %v4370_v37 = vsel %vm4249_vm3, %v4369_v41, %v4368_v59  ;;  %vm4568_vm12 = vcmp.gt.s32.totalorder %v4567_v18, 0  ;;  %v5216_v48 = vsel %vm5210_vm6, %v5213_v34, %v5215_v43  ;;  %v4564_v63 = vand.u32 8388607, %v4557_v33 }
 0x57f   : > { %v4373_v36 = vsel %vm9849_vm8, %v9586_v50, %v4370_v37  ;;  %v5269_v1 = vadd.s32 %v5268_v5, %v5259_v49  ;;  %vm5272_vm14 = vc.u32 %v9873_v7, %v9877_v45  ;;  %v4569_v61 = vsel %vm4568_vm12, %v4567_v18, 0  ;;  %v9929_v37 = vld [vmem:[%s10364_s3] ss:$0 sm:$0xff] }
 0x580   : > { %v4375_v47 = vmul.f32 %v4373_v36, %v4373_v36  ;;  %v4571_v58 = vand.u32 31, %v4569_v61  ;;  %v5270_v19 = vmul.u32 %v9813_v38, %v5216_v48  ;;  %v9889_v35 = vand.u32 3, %v4391_v4 }
 0x581   : > { %v5273_v27 = vadd.s32 1, %v5269_v1  ;;  %v4565_v52 = vor.u32 8388608, %v4564_v63  ;;  %v9893_v15 = vshrl.u32 %v4569_v61, 5  ;;  %v769_v38 = vsel %vm320_vm1, %v8716_v54, %v730_v14 }
 0x582   : > { %v4376_v53 = vmul.f32 -0.001358992, %v4375_v47  ;;  %v4383_v23 = vmul.f32 -0.00019511016, %v4375_v47  ;;  %v9891_v22 = vsub.s32 32, %v4571_v58  ;;  %v4574_v2 = vshll.u32 %v10440_v6, %v4571_v58 }
 0x583   : > { %v5274_v0 = vsel %vm5272_vm14, %v5273_v27, %v5269_v1  ;;  %v4577_v17 = vshll.u32 %v10409_v25, %v4571_v58  ;;  %v4583_v60 = vshll.u32 %v10399_v9, %v4571_v58  ;;  %v4580_v54 = vshll.u32 %v10400_v55, %v4571_v58 }
 0x584   : > { %v4377_v11 = vadd.f32 0.041655596, %v4376_v53  ;;  %v4384_v26 = vadd.f32 0.008332121, %v4383_v23  ;;  %v5275_v44 = vadd.s32 %v5274_v0, %v5270_v19  ;;  %v4575_v21 = vshrl.u32 %v10409_v25, %v9891_v22  ;;  %v9947_v0 = vld [vmem:[%s10364_s3 + $0x1] ss:$0 sm:$0xff] }
 0x585   : > { %v4578_v10 = vshrl.u32 %v10400_v55, %v9891_v22  ;;  %v4581_v24 = vshrl.u32 %v10399_v9, %v9891_v22  ;;  %v4584_v59 = vshrl.u32 %v10401_v30, %v9891_v22  ;;  %vm4394_vm15 = vcmp.eq.s32.totalorder %v9889_v35, 0 }
 0x586   : > { %v4378_v12 = vmul.f32 %v4377_v11, %v4375_v47  ;;  %v4385_v32 = vmul.f32 %v4384_v26, %v4375_v47  ;;  %v5276_v57 = vadd.s32 536870912, %v5275_v44  ;;  %v9913_v13 = vor.u32 %v4575_v21, %v4574_v2 }
 0x587   : > { %v9915_v40 = vor.u32 %v4578_v10, %v4577_v17  ;;  %v4585_v31 = vor.u32 %v4584_v59, %v4583_v60  ;;  %v4587_v39 = vshrl.u32 %v10402_v16, %v9891_v22  ;;  %vm4393_vm0 = vcmp.lt.s32.totalorder %v9889_v35, 2 }
 0x588   : > { %v4379_v42 = vadd.f32 -0.4999988, %v4378_v12  ;;  %v4386_v3 = vadd.f32 -0.16666654, %v4385_v32  ;;  %v9909_v51 = vshrl.u32 %v5276_v57, 30  ;;  %v9921_v18 = vshll.u32 %v4565_v52, 8 }
 0x589   : > { %vm4390_vm2 = vweird.f32 %v9586_v50  ;;  %v4582_v49 = vor.u32 %v4581_v24, %v4580_v54  ;;  %v4586_v5 = vshll.u32 %v10401_v30, %v4571_v58  ;;  %vm4589_vm4 = vcmp.lt.s32.totalorder %v9893_v15, 1 }
 0x58a   : > { %v4380_v41 = vmul.f32 %v4379_v42, %v4375_v47  ;;  %v4387_v34 = vmul.f32 %v4386_v3, %v4375_v47  ;;  %v5278_v43 = vshll.u32 %v9909_v51, 30  ;;  %v802_v4 = vmul.f32 %v9929_v37, %v769_v38 }
 0x58b   : > { %vm4592_vm3 = vcmp.lt.s32.totalorder %v9893_v15, 4  ;;  %v4588_v63 = vor.u32 %v4587_v39, %v4586_v5  ;;  %vm4591_vm5 = vcmp.lt.s32.totalorder %v9893_v15, 3  ;;  %v4597_v61 = vsel %vm4589_vm4, %v9913_v13, %v9915_v40 }
 0x58c   : > { %v4381_v48 = vadd.f32 1.0, %v4380_v41  ;;  %v4388_v1 = vadd.f32 1.0, %v4387_v34  ;;  %v5279_v47 = vsub.s32 %v5275_v44, %v5278_v43  ;;  %v4598_v27 = vsel %vm4592_vm3, %v4585_v31, 920167782 }
 0x58d   : > { %vm4397_vm7 = vcmp.eq.s32.totalorder %v9889_v35, 2  ;;  %v4599_v19 = vsel %vm4591_vm5, %v4582_v49, %v4598_v27  ;;  %v4606_v14 = vand.u32 65535, %v9921_v18  ;;  %v9950_v11 = vadd.f32 %v9947_v0, %v802_v4 }
 0x58e   : > { %v4389_v58 = vmul.f32 %v4388_v1, %v4373_v36  ;;  %v4398_v53 = vxor.u32 2147483648, %v4381_v48  ;;  %vm5280_vm6 = vcmp.lt.s32.totalorder %v5279_v47, 0  ;;  %v5281_v23 = vsub.s32 0, %v5279_v47 }
 0x58f   : > { %vm4590_vm8 = vcmp.lt.s32.totalorder %v9893_v15, 2  ;;  %v4601_v44 = vsel %vm4589_vm4, %v9915_v40, %v4582_v49  ;;  %v4602_v38 = vsel %vm4592_vm3, %v4588_v63, 1326507024  ;;  %v5271_v24 = vadd.s32 %v9877_v45, %v9873_v7 }
 0x590   : > { %v4395_v26 = vxor.u32 2147483648, %v4389_v58  ;;  %v5282_v36 = vsel %vm5280_vm6, %v5281_v23, %v5279_v47  ;;  %v4399_v52 = vsel %vm4397_vm7, %v4398_v53, %v4389_v58  ;;  %v4600_v10 = vsel %vm4590_vm8, %v4597_v61, %v4599_v19 }
 0x591   : > { %v5283_v21 = vclz %v5282_v36  ;;  %v4603_v32 = vsel %vm4591_vm5, %v4585_v31, %v4602_v38  ;;  %v4630_v57 = vand.u32 65535, %v4600_v10  ;;  %v4631_v2 = vshrl.u32 %v4600_v10, 16 }
 0x592   : > { %v4396_v12 = vsel %vm4394_vm15, %v4381_v48, %v4395_v26  ;;  %v4607_v59 = vshrl.u32 %v9921_v18, 16  ;;  %v4573_v3 = vshrl.u32 %v10440_v6, %v9891_v22  ;;  %v4604_v54 = vsel %vm4590_vm8, %v4601_v44, %v4603_v32 }
 0x593   : > { %v4400_v17 = vsel %vm4393_vm0, %v4396_v12, %v4399_v52  ;;  %v6039_v60 = vadd.s32 4294967294, %v5283_v21  ;;  %v5487_v31 = vand.u32 2147483647, %v9950_v11  ;;  %v4608_v35 = vand.u32 65535, %v4604_v54 }
 0x594   : > { %v4401_v42 = vsel %vm4390_vm2, nan, %v4400_v17  ;;  %v4609_v39 = vshrl.u32 %v4604_v54, 16  ;;  %v4633_v41 = vmul.u32 %v4631_v2, %v4606_v14  ;;  %v5301_v45 = vsub.s32 4, %v9909_v51 }
 0x595   : > { %5819 = vst [vmem:[%s6906_s5 + $0xb0] sm:$0xff] %v4401_v42  ;;  %vm6040_vm9 = vcmp.lt.s32.totalorder %v6039_v60, 0  ;;  %v4634_v34 = vmul.u32 %v4630_v57, %v4607_v59  ;;  %v5490_v50 = vand.u32 2139095040, %v9950_v11  ;;  %v4593_v22 = vsel %vm4589_vm4, %v4573_v3, %v9913_v13 }
 0x596   : > { %v5286_v7 = vsel %vm6040_vm9, 0, %v6039_v60  ;;  %v4594_v4 = vsel %vm4592_vm3, %v4582_v49, 2102212464  ;;  %vm5179_vm10 = vcmp.lt.s32.totalorder %v9711_v8, 0  ;;  %v4611_v48 = vmul.u32 %v4609_v39, %v4606_v14 }
 0x597   : > { %v5287_v43 = vsub.s32 32, %v5286_v7  ;;  %v5291_v5 = vsub.s32 4294967266, %v5286_v7  ;;  %v4612_v1 = vmul.u32 %v4608_v35, %v4607_v59  ;;  %v4632_v63 = vmul.u32 %v4630_v57, %v4606_v14 }
 0x598   : > { %v4636_v61 = vshll.u32 %v4633_v41, 16  ;;  %v5288_v27 = vshll.u32 %v5279_v47, %v5286_v7  ;;  %v4635_v23 = vmul.u32 %v4631_v2, %v4607_v59  ;;  %v4610_v19 = vmul.u32 %v4608_v35, %v4606_v14 }
 0x599   : > { %v5289_v58 = vshrl.u32 %v5271_v24, %v5287_v43  ;;  %v5292_v53 = vadd.s32 127, %v5291_v5  ;;  %v4613_v26 = vmul.u32 %v4609_v39, %v4607_v59  ;;  %v4614_v36 = vshll.u32 %v4611_v48, 16 }
 0x59a   : > { %v4638_v44 = vshll.u32 %v4634_v34, 16  ;;  %v4616_v13 = vshll.u32 %v4612_v1, 16  ;;  %vm4640_vm11 = vc.u32 %v4632_v63, %v4636_v61  ;;  %v4642_v38 = vadd.s32 %v4636_v61, %v4632_v63 }
 0x59b   : > { %v5290_v52 = vor.u32 %v5289_v58, %v5288_v27  ;;  %v5293_v21 = vshll.u32 %v5292_v53, 23  ;;  %vm4618_vm13 = vc.u32 %v4610_v19, %v4614_v36  ;;  %v4620_v49 = vadd.s32 %v4614_v36, %v4610_v19 }
 0x59c   : > { %v4641_v10 = vsel %vm4640_vm11, 1, %v6360_v29  ;;  %v4595_v47 = vsel %vm4591_vm5, %v9915_v40, %v4594_v4  ;;  %v4619_v32 = vsel %vm4618_vm13, 1, %v6360_v29  ;;  %vm4644_vm14 = vc.u32 %v4642_v38, %v4638_v44 }
 0x59d   : > { %v5294_v12 = vor.u32 4788187, %v5293_v21  ;;  %v4643_v14 = vadd.s32 %v4641_v10, %v4635_v23  ;;  %v5297_v57 = vcvt.s32.f32 %v5290_v52  ;;  %v4621_v2 = vadd.s32 %v4619_v32, %v4613_v26 }
 0x59e   : > { %vm4622_vm12 = vc.u32 %v4620_v49, %v4616_v13  ;;  %v4645_v60 = vsel %vm4644_vm14, 1, %v6360_v29  ;;  %v5491_v59 = vshrl.u32 %v5490_v50, 23  ;;  %v4615_v42 = vshrl.u32 %v4611_v48, 16 }
 0x59f   : > { %v5295_v17 = vand.u32 2147483647, %v5294_v12  ;;  %v4623_v24 = vsel %vm4622_vm12, 1, %v6360_v29  ;;  %v4637_v54 = vshrl.u32 %v4633_v41, 16  ;;  %v4647_v35 = vadd.s32 %v4645_v60, %v4643_v14 }
 0x5a0   : > { %v4625_v3 = vadd.s32 %v4623_v24, %v4621_v2  ;;  %v5302_v40 = vsel %vm5179_vm10, %v5301_v45, %v9909_v51  ;;  %v6044_v7 = vadd.s32 4294967169, %v5491_v59  ;;  %v4617_v43 = vshrl.u32 %v4612_v1, 16  ;;  %v710_v1 = vpop.permute.xlu1 %709 }
 0x5a1   : > { %v5298_v39 = vmul.f32 %v5297_v57, %v5295_v17  ;;  %v4639_v4 = vshrl.u32 %v4634_v34, 16  ;;  %v4648_v63 = vadd.s32 %v4647_v35, %v4637_v54  ;;  %vm9997_vm15 = vcmp.le.f32.partialorder %v5177_v28, 0.7853982 }
 0x5a2   : > { %v4626_v5 = vadd.s32 %v4625_v3, %v4615_v42  ;;  %v4596_v41 = vsel %vm4590_vm8, %v4593_v22, %v4595_v47  ;;  %v5497_v48 = vadd.s32 1, %v6044_v7  ;;  %v10005_v58 = vadd.s32 %v4642_v38, %v4638_v44 }
 0x5a3   : > { %v5299_v50 = vxor.u32 2147483648, %v5298_v39  ;;  %v4649_v51 = vadd.s32 %v4648_v63, %v4639_v4  ;;  %v5494_v45 = vand.u32 8388607, %v5487_v31  ;;  %v5304_v28 = vsel %vm9997_vm15, 0, %v5302_v40 }
 0x5a4   : > { %v10003_v27 = vadd.s32 %v4626_v5, %v4617_v43  ;;  %vm5498_vm0 = vcmp.gt.s32.totalorder %v5497_v48, 0  ;;  %v4650_v23 = vmul.u32 %v9921_v18, %v4596_v41  ;;  %v5321_v26 = vadd.s32 3, %v5304_v28 }
 0x5a5   : > { %v5300_v34 = vsel %vm5179_vm10, %v5299_v50, %v5298_v39  ;;  %v4653_v22 = vadd.s32 1, %v4649_v51  ;;  %v5499_v19 = vsel %vm5498_vm0, %v5497_v48, 0  ;;  %v5495_v44 = vor.u32 8388608, %v5494_v45 }
 0x5a6   : > { %v5303_v15 = vsel %vm9997_vm15, %v9711_v8, %v5300_v34  ;;  %vm4652_vm2 = vc.u32 %v10003_v27, %v10005_v58  ;;  %v5501_v52 = vand.u32 31, %v5499_v19  ;;  %v766_v10 = vsel %vm320_vm1, %v8698_v20, %v710_v1 }
 0x5a7   : > { %v5305_v53 = vmul.f32 %v5303_v15, %v5303_v15  ;;  %v4654_v36 = vsel %vm4652_vm2, %v4653_v22, %v4649_v51  ;;  %v5322_v14 = vand.u32 3, %v5321_v26  ;;  %v10024_v57 = vshll.u32 %v5495_v44, 8 }
 0x5a8   : > { %v4655_v49 = vadd.s32 %v4654_v36, %v4650_v23  ;;  %v10022_v38 = vsub.s32 32, %v5501_v52  ;;  %v799_v18 = vmul.f32 %v9929_v37, %v766_v10  ;;  %v10031_v59 = vshrl.u32 %v5499_v19, 5 }
 0x5a9   : > { %v5306_v21 = vmul.f32 -0.001358992, %v5305_v53  ;;  %v5313_v13 = vmul.f32 -0.00019511016, %v5305_v53  ;;  %v5504_v40 = vshll.u32 %v10440_v6, %v5501_v52  ;;  %vm5324_vm4 = vcmp.eq.s32.totalorder %v5322_v14, 0 }
 0x5aa   : > { %v4656_v32 = vadd.s32 536870912, %v4655_v49  ;;  %v5505_v60 = vshrl.u32 %v10409_v25, %v10022_v38  ;;  %v5508_v20 = vshrl.u32 %v10400_v55, %v10022_v38  ;;  %v5511_v42 = vshrl.u32 %v10399_v9, %v10022_v38 }
 0x5ab   : > { %v5307_v12 = vadd.f32 0.041655596, %v5306_v21  ;;  %v5314_v47 = vadd.f32 0.008332121, %v5313_v13  ;;  %v5514_v3 = vshrl.u32 %v10401_v30, %v10022_v38  ;;  %v5507_v7 = vshll.u32 %v10409_v25, %v5501_v52 }
 0x5ac   : > { %v10027_v24 = vshrl.u32 %v4656_v32, 30  ;;  %v5510_v43 = vshll.u32 %v10400_v55, %v5501_v52  ;;  %v5513_v5 = vshll.u32 %v10399_v9, %v5501_v52  ;;  %v5517_v4 = vshrl.u32 %v10402_v16, %v10022_v38 }
 0x5ad   : > { %v5308_v2 = vmul.f32 %v5307_v12, %v5305_v53  ;;  %v5315_v17 = vmul.f32 %v5314_v47, %v5305_v53  ;;  %vm5323_vm3 = vcmp.lt.s32.totalorder %v5322_v14, 2  ;;  %v5506_v41 = vor.u32 %v5505_v60, %v5504_v40 }
 0x5ae   : > { %v4658_v39 = vshll.u32 %v10027_v24, 30  ;;  %vm5320_vm5 = vweird.f32 %v9711_v8  ;;  %v10047_v48 = vor.u32 %v5508_v20, %v5507_v7  ;;  %v5512_v51 = vor.u32 %v5511_v42, %v5510_v43 }
 0x5af   : > { %v5309_v54 = vadd.f32 -0.4999988, %v5308_v2  ;;  %v5316_v35 = vadd.f32 -0.16666654, %v5315_v17  ;;  %v5515_v45 = vor.u32 %v5514_v3, %v5513_v5  ;;  %v5516_v34 = vshll.u32 %v10401_v30, %v5501_v52 }
 0x5b0   : > { %v4659_v50 = vsub.s32 %v4655_v49, %v4658_v39  ;;  %vm5327_vm7 = vcmp.eq.s32.totalorder %v5322_v14, 2  ;;  %vm5519_vm8 = vcmp.lt.s32.totalorder %v10031_v59, 1  ;;  %vm5522_vm9 = vcmp.lt.s32.totalorder %v10031_v59, 4 }
 0x5b1   : > { %v5310_v63 = vmul.f32 %v5309_v54, %v5305_v53  ;;  %v5317_v61 = vmul.f32 %v5316_v35, %v5305_v53  ;;  %v5518_v23 = vor.u32 %v5517_v4, %v5516_v34  ;;  %v10052_v53 = vadd.f32 %v9947_v0, %v799_v18 }
 0x5b2   : > { %vm4660_vm6 = vcmp.lt.s32.totalorder %v4659_v50, 0  ;;  %v4661_v1 = vsub.s32 0, %v4659_v50  ;;  %vm4559_vm10 = vcmp.lt.s32.totalorder %v9817_v62, 0  ;;  %vm5521_vm11 = vcmp.lt.s32.totalorder %v10031_v59, 3 }
 0x5b3   : > { %v5311_v28 = vadd.f32 1.0, %v5310_v63  ;;  %v5318_v22 = vadd.f32 1.0, %v5317_v61  ;;  %v5527_v52 = vsel %vm5519_vm8, %v5506_v41, %v10047_v48  ;;  %v5528_v21 = vsel %vm5522_vm9, %v5515_v45, 920167782 }
 0x5b4   : > { %v4662_v36 = vsel %vm4660_vm6, %v4661_v1, %v4659_v50  ;;  %v5529_v49 = vsel %vm5521_vm11, %v5512_v51, %v5528_v21  ;;  %v5536_v10 = vand.u32 65535, %v10024_v57  ;;  %v4681_v47 = vsub.s32 4, %v10027_v24 }
 0x5b5   : > { %v5319_v19 = vmul.f32 %v5318_v22, %v5303_v15  ;;  %v5328_v26 = vxor.u32 2147483648, %v5311_v28  ;;  %v4663_v44 = vclz %v4662_v36  ;;  %v4651_v15 = vadd.s32 %v10005_v58, %v10003_v27 }
 0x5b6   : > { %vm5520_vm13 = vcmp.lt.s32.totalorder %v10031_v59, 2  ;;  %v5531_v32 = vsel %vm5519_vm8, %v10047_v48, %v5512_v51  ;;  %v5532_v58 = vsel %vm5522_vm9, %v5518_v23, 1326507024  ;;  %v5537_v7 = vshrl.u32 %v10024_v57, 16 }
 0x5b7   : > { %v5325_v13 = vxor.u32 2147483648, %v5319_v19  ;;  %v6027_v12 = vadd.s32 4294967294, %v4663_v44  ;;  %v5329_v2 = vsel %vm5327_vm7, %v5328_v26, %v5319_v19  ;;  %v5530_v27 = vsel %vm5520_vm13, %v5527_v52, %v5529_v49 }
 0x5b8   : > { %v5533_v60 = vsel %vm5521_vm11, %v5515_v45, %v5532_v58  ;;  %v5560_v20 = vand.u32 65535, %v5530_v27  ;;  %v5561_v35 = vshrl.u32 %v5530_v27, 16  ;;  %v5503_v5 = vshrl.u32 %v10440_v6, %v10022_v38 }
 0x5b9   : > { %v5326_v18 = vsel %vm5324_vm4, %v5311_v28, %v5325_v13  ;;  %vm6028_vm12 = vcmp.lt.s32.totalorder %v6027_v12, 0  ;;  %v5534_v54 = vsel %vm5520_vm13, %v5531_v32, %v5533_v60  ;;  %v4682_v28 = vsel %vm4559_vm10, %v4681_v47, %v10027_v24 }
 0x5ba   : > { %v5330_v17 = vsel %vm5323_vm3, %v5326_v18, %v5329_v2  ;;  %v4666_v3 = vsel %vm6028_vm12, 0, %v6027_v12  ;;  %v5538_v14 = vand.u32 65535, %v5534_v54  ;;  %v5539_v4 = vshrl.u32 %v5534_v54, 16 }
 0x5bb   : > { %v5331_v42 = vsel %vm5320_vm5, nan, %v5330_v17  ;;  %v4667_v39 = vsub.s32 32, %v4666_v3  ;;  %v4671_v40 = vsub.s32 4294967266, %v4666_v3  ;;  %v4668_v43 = vshll.u32 %v4659_v50, %v4666_v3 }
 0x5bc   : > { %5825 = vst [vmem:[%s6906_s5 + $0xe0] sm:$0xff] %v5331_v42  ;;  %v5563_v63 = vmul.u32 %v5561_v35, %v5536_v10  ;;  %v5542_v45 = vmul.u32 %v5538_v14, %v5537_v7  ;;  %v5564_v34 = vmul.u32 %v5560_v20, %v5537_v7  ;;  %v5523_v22 = vsel %vm5519_vm8, %v5503_v5, %v5506_v41 }
 0x5bd   : > { %v4669_v61 = vshrl.u32 %v4651_v15, %v4667_v39  ;;  %v4672_v8 = vadd.s32 127, %v4671_v40  ;;  %v5541_v1 = vmul.u32 %v5539_v4, %v5536_v10  ;;  %v5524_v38 = vsel %vm5522_vm9, %v5512_v51, 2102212464 }
 0x5be   : > { %v5566_v23 = vshll.u32 %v5563_v63, 16  ;;  %v5562_v26 = vmul.u32 %v5560_v20, %v5536_v10  ;;  %v5540_v36 = vmul.u32 %v5538_v14, %v5536_v10  ;;  %v5543_v44 = vmul.u32 %v5539_v4, %v5537_v7 }
 0x5bf   : > { %v4670_v19 = vor.u32 %v4669_v61, %v4668_v43  ;;  %v4673_v50 = vshll.u32 %v4672_v8, 23  ;;  %v5544_v52 = vshll.u32 %v5541_v1, 16  ;;  %v5565_v21 = vmul.u32 %v5561_v35, %v5537_v7 }
 0x5c0   : > { %v5546_v15 = vshll.u32 %v5542_v45, 16  ;;  %v5568_v49 = vshll.u32 %v5564_v34, 16  ;;  %vm5570_vm14 = vc.u32 %v5562_v26, %v5566_v23  ;;  %v5572_v12 = vadd.s32 %v5566_v23, %v5562_v26 }
 0x5c1   : > { %v4674_v13 = vor.u32 4788187, %v4673_v50  ;;  %vm5548_vm15 = vc.u32 %v5540_v36, %v5544_v52  ;;  %v5550_v24 = vadd.s32 %v5544_v52, %v5540_v36  ;;  %v5571_v41 = vsel %vm5570_vm14, 1, %v6360_v29 }
 0x5c2   : > { %v4677_v32 = vcvt.s32.f32 %v4670_v19  ;;  %v5549_v18 = vsel %vm5548_vm15, 1, %v6360_v29  ;;  %v5573_v2 = vadd.s32 %v5571_v41, %v5565_v21  ;;  %v5525_v51 = vsel %vm5521_vm11, %v10047_v48, %v5524_v38 }
 0x5c3   : > { %v4675_v47 = vand.u32 2147483647, %v4674_v13  ;;  %v5551_v10 = vadd.s32 %v5549_v18, %v5543_v44  ;;  %vm5552_vm0 = vc.u32 %v5550_v24, %v5546_v15  ;;  %vm5574_vm2 = vc.u32 %v5572_v12, %v5568_v49 }
 0x5c4   : > { %v5553_v58 = vsel %vm5552_vm0, 1, %v6360_v29  ;;  %v5575_v17 = vsel %vm5574_vm2, 1, %v6360_v29  ;;  %v5025_v60 = vand.u32 2139095040, %v10052_v53  ;;  %v5545_v20 = vshrl.u32 %v5541_v1, 16 }
 0x5c5   : > { %v4678_v27 = vmul.f32 %v4677_v32, %v4675_v47  ;;  %v5555_v42 = vadd.s32 %v5553_v58, %v5551_v10  ;;  %v5567_v3 = vshrl.u32 %v5563_v63, 16  ;;  %v5577_v54 = vadd.s32 %v5575_v17, %v5573_v2 }
 0x5c6   : > { %vm10106_vm4 = vcmp.le.f32.partialorder %v4557_v33, 0.7853982  ;;  %v5022_v39 = vand.u32 2147483647, %v10052_v53  ;;  %v5026_v40 = vshrl.u32 %v5025_v60, 23  ;;  %v5547_v7 = vshrl.u32 %v5542_v45, 16 }
 0x5c7   : > { %v4679_v48 = vxor.u32 2147483648, %v4678_v27  ;;  %v5556_v14 = vadd.s32 %v5555_v42, %v5545_v20  ;;  %v5569_v43 = vshrl.u32 %v5564_v34, 16  ;;  %v5578_v5 = vadd.s32 %v5577_v54, %v5567_v3 }
 0x5c8   : > { %v4684_v63 = vsel %vm10106_vm4, 0, %v4682_v28  ;;  %v5526_v33 = vsel %vm5520_vm13, %v5523_v22, %v5525_v51  ;;  %v6035_v61 = vadd.s32 4294967169, %v5026_v40  ;;  %v5576_v23 = vadd.s32 %v5572_v12, %v5568_v49  ;;  %v723_v22 = vpop.permute.xlu1 %722 }
 0x5c9   : > { %v4680_v4 = vsel %vm4559_vm10, %v4679_v48, %v4678_v27  ;;  %v5557_v1 = vadd.s32 %v5556_v14, %v5547_v7  ;;  %v5579_v45 = vadd.s32 %v5578_v5, %v5569_v43  ;;  %v4701_v50 = vadd.s32 3, %v4684_v63 }
 0x5ca   : > { %v4683_v8 = vsel %vm10106_vm4, %v9817_v62, %v4680_v4  ;;  %v5032_v34 = vadd.s32 1, %v6035_v61  ;;  %v5029_v26 = vand.u32 8388607, %v5022_v39  ;;  %v5580_v59 = vmul.u32 %v10024_v57, %v5526_v33 }
 0x5cb   : > { %v4685_v19 = vmul.f32 %v4683_v8, %v4683_v8  ;;  %vm5582_vm3 = vc.u32 %v5557_v1, %v5576_v23  ;;  %v5583_v38 = vadd.s32 1, %v5579_v45  ;;  %v4702_v49 = vand.u32 3, %v4701_v50 }
 0x5cc   : > { %vm5033_vm5 = vcmp.gt.s32.totalorder %v5032_v34, 0  ;;  %v5030_v24 = vor.u32 8388608, %v5029_v26  ;;  %v768_v12 = vsel %vm320_vm1, %v8941_v56, %v723_v22  ;;  %vm4700_vm8 = vweird.f32 %v9817_v62 }
 0x5cd   : > { %v4686_v28 = vmul.f32 -0.001358992, %v4685_v19  ;;  %v4693_v36 = vmul.f32 -0.00019511016, %v4685_v19  ;;  %v5584_v44 = vsel %vm5582_vm3, %v5583_v38, %v5579_v45  ;;  %v5034_v52 = vsel %vm5033_vm5, %v5032_v34, 0 }
 0x5ce   : > { %v5585_v15 = vadd.s32 %v5584_v44, %v5580_v59  ;;  %v5036_v41 = vand.u32 31, %v5034_v52  ;;  %v801_v27 = vmul.f32 %v9929_v37, %v768_v12  ;;  %vm4704_vm6 = vcmp.eq.s32.totalorder %v4702_v49, 0 }
 0x5cf   : > { %v4687_v21 = vadd.f32 0.041655596, %v4686_v28  ;;  %v4694_v13 = vadd.f32 0.008332121, %v4693_v36  ;;  %vm4707_vm7 = vcmp.eq.s32.totalorder %v4702_v49, 2  ;;  %v10131_v58 = vshrl.u32 %v5034_v52, 5 }
 0x5d0   : > { %v5586_v18 = vadd.s32 536870912, %v5585_v15  ;;  %v10126_v2 = vsub.s32 32, %v5036_v41  ;;  %v10137_v56 = vshll.u32 %v5030_v24, 8  ;;  %vm4703_vm1 = vcmp.lt.s32.totalorder %v4702_v49, 2 }
 0x5d1   : > { %v4688_v47 = vmul.f32 %v4687_v21, %v4685_v19  ;;  %v4695_v32 = vmul.f32 %v4694_v13, %v4685_v19  ;;  %v5039_v3 = vshll.u32 %v10440_v6, %v5036_v41  ;;  %v5042_v37 = vshll.u32 %v10409_v25, %v5036_v41 }
 0x5d2   : > { %v10128_v10 = vshrl.u32 %v5586_v18, 30  ;;  %v5040_v17 = vshrl.u32 %v10409_v25, %v10126_v2  ;;  %v5043_v46 = vshrl.u32 %v10400_v55, %v10126_v2  ;;  %v5045_v54 = vshll.u32 %v10400_v55, %v5036_v41 }
 0x5d3   : > { %v4689_v57 = vadd.f32 -0.4999988, %v4688_v47  ;;  %v4696_v51 = vadd.f32 -0.16666654, %v4695_v32  ;;  %v5048_v35 = vshll.u32 %v10399_v9, %v5036_v41  ;;  %v5049_v48 = vshrl.u32 %v10401_v30, %v10126_v2 }
 0x5d4   : > { %v5588_v42 = vshll.u32 %v10128_v10, 30  ;;  %v5046_v43 = vshrl.u32 %v10399_v9, %v10126_v2  ;;  %v5041_v5 = vor.u32 %v5040_v17, %v5039_v3  ;;  %v5044_v4 = vor.u32 %v5043_v46, %v5042_v37 }
 0x5d5   : > { %v4690_v60 = vmul.f32 %v4689_v57, %v4685_v19  ;;  %v4697_v20 = vmul.f32 %v4696_v51, %v4685_v19  ;;  %v5050_v63 = vor.u32 %v5049_v48, %v5048_v35  ;;  %v5052_v33 = vshrl.u32 %v10402_v16, %v10126_v2 }
 0x5d6   : > { %v5589_v14 = vsub.s32 %v5585_v15, %v5588_v42  ;;  %v5581_v34 = vadd.s32 %v5576_v23, %v5557_v1  ;;  %v5051_v50 = vshll.u32 %v10401_v30, %v5036_v41  ;;  %v5071_v38 = vand.u32 65535, %v10137_v56 }
 0x5d7   : > { %v4691_v40 = vadd.f32 1.0, %v4690_v60  ;;  %v4698_v7 = vadd.f32 1.0, %v4697_v20  ;;  %v10154_v26 = vadd.f32 %v9947_v0, %v801_v27  ;;  %v5047_v59 = vor.u32 %v5046_v43, %v5045_v54 }
 0x5d8   : > { %vm5590_vm9 = vcmp.lt.s32.totalorder %v5589_v14, 0  ;;  %v5591_v19 = vsub.s32 0, %v5589_v14  ;;  %v5072_v22 = vshrl.u32 %v10137_v56, 16  ;;  %vm5489_vm10 = vcmp.lt.s32.totalorder %v9950_v11, 0 }
 0x5d9   : > { %v4699_v61 = vmul.f32 %v4698_v7, %v4683_v8  ;;  %v4708_v45 = vxor.u32 2147483648, %v4691_v40  ;;  %v5053_v8 = vor.u32 %v5052_v33, %v5051_v50  ;;  %vm5054_vm11 = vcmp.lt.s32.totalorder %v10131_v58, 1 }
 0x5da   : > { %v5592_v36 = vsel %vm5590_vm9, %v5591_v19, %v5589_v14  ;;  %vm5057_vm13 = vcmp.lt.s32.totalorder %v10131_v58, 4  ;;  %v5062_v0 = vsel %vm5054_vm11, %v5041_v5, %v5044_v4  ;;  %vm5056_vm12 = vcmp.lt.s32.totalorder %v10131_v58, 3 }
 0x5db   : > { %v4705_v28 = vxor.u32 2147483648, %v4699_v61  ;;  %v5593_v44 = vclz %v5592_v36  ;;  %v4709_v23 = vsel %vm4707_vm7, %v4708_v45, %v4699_v61  ;;  %v5063_v52 = vsel %vm5057_vm13, %v5050_v63, 920167782 }
 0x5dc   : > { %v5335_v15 = vand.u32 2139095040, %v10154_v26  ;;  %v5611_v41 = vsub.s32 4, %v10128_v10  ;;  %vm5055_vm14 = vcmp.lt.s32.totalorder %v10131_v58, 2  ;;  %v5064_v12 = vsel %vm5056_vm12, %v5047_v59, %v5063_v52 }
 0x5dd   : > { %v4706_v1 = vsel %vm4704_vm6, %v4691_v40, %v4705_v28  ;;  %v6045_v13 = vadd.s32 4294967294, %v5593_v44  ;;  %v5065_v49 = vsel %vm5055_vm14, %v5062_v0, %v5064_v12  ;;  %v5066_v47 = vsel %vm5054_vm11, %v5044_v4, %v5047_v59 }
 0x5de   : > { %v4710_v21 = vsel %vm4703_vm1, %v4706_v1, %v4709_v23  ;;  %v5067_v32 = vsel %vm5057_vm13, %v5053_v8, 1326507024  ;;  %v5095_v57 = vand.u32 65535, %v5065_v49  ;;  %v5096_v51 = vshrl.u32 %v5065_v49, 16 }
 0x5df   : > { %v4711_v24 = vsel %vm4700_vm8, nan, %v4710_v21  ;;  %vm6046_vm15 = vcmp.lt.s32.totalorder %v6045_v13, 0  ;;  %v5068_v18 = vsel %vm5056_vm12, %v5050_v63, %v5067_v32  ;;  %v5038_v46 = vshrl.u32 %v10440_v6, %v10126_v2 }
 0x5e0   : > { %5821 = vst [vmem:[%s6906_s5 + $0xc0] sm:$0xff] %v4711_v24  ;;  %v5596_v62 = vsel %vm6046_vm15, 0, %v6045_v13  ;;  %v5069_v60 = vsel %vm5055_vm14, %v5066_v47, %v5068_v18  ;;  %v5059_v20 = vsel %vm5057_vm13, %v5047_v59, 2102212464  ;;  %v5098_v37 = vmul.u32 %v5096_v51, %v5071_v38 }
 0x5e1   : > { %v5597_v27 = vsub.s32 32, %v5596_v62  ;;  %v5601_v17 = vsub.s32 4294967266, %v5596_v62  ;;  %v5073_v42 = vand.u32 65535, %v5069_v60  ;;  %v5074_v3 = vshrl.u32 %v5069_v60, 16 }
 0x5e2   : > { %v5598_v54 = vshll.u32 %v5589_v14, %v5596_v62  ;;  %v5099_v40 = vmul.u32 %v5095_v57, %v5072_v22  ;;  %v5612_v7 = vsel %vm5489_vm10, %v5611_v41, %v10128_v10  ;;  %v5058_v2 = vsel %vm5054_vm11, %v5038_v46, %v5041_v5 }
 0x5e3   : > { %v5599_v35 = vshrl.u32 %v5581_v34, %v5597_v27  ;;  %v5602_v48 = vadd.s32 127, %v5601_v17  ;;  %v5076_v43 = vmul.u32 %v5074_v3, %v5071_v38  ;;  %v5077_v63 = vmul.u32 %v5073_v42, %v5072_v22 }
 0x5e4   : > { %v5060_v45 = vsel %vm5056_vm12, %v5044_v4, %v5059_v20  ;;  %v5101_v19 = vshll.u32 %v5098_v37, 16  ;;  %v5075_v50 = vmul.u32 %v5073_v42, %v5071_v38  ;;  %v5097_v34 = vmul.u32 %v5095_v57, %v5071_v38 }
 0x5e5   : > { %v5600_v33 = vor.u32 %v5599_v35, %v5598_v54  ;;  %v5603_v61 = vshll.u32 %v5602_v48, 23  ;;  %v5079_v14 = vshll.u32 %v5076_v43, 16  ;;  %v5100_v28 = vmul.u32 %v5096_v51, %v5072_v22 }
 0x5e6   : > { %v5078_v59 = vmul.u32 %v5074_v3, %v5072_v22  ;;  %v5081_v44 = vshll.u32 %v5077_v63, 16  ;;  %v5103_v8 = vshll.u32 %v5099_v40, 16  ;;  %vm5105_vm2 = vc.u32 %v5097_v34, %v5101_v19 }
 0x5e7   : > { %v5604_v36 = vor.u32 4788187, %v5603_v61  ;;  %vm5083_vm0 = vc.u32 %v5075_v50, %v5079_v14  ;;  %v5085_v10 = vadd.s32 %v5079_v14, %v5075_v50  ;;  %v5107_v5 = vadd.s32 %v5101_v19, %v5097_v34 }
 0x5e8   : > { %v5607_v23 = vcvt.s32.f32 %v5600_v33  ;;  %v5084_v0 = vsel %vm5083_vm0, 1, %v6360_v29  ;;  %v5106_v52 = vsel %vm5105_vm2, 1, %v6360_v29  ;;  %v5102_v22 = vshrl.u32 %v5098_v37, 16 }
 0x5e9   : > { %v5605_v1 = vand.u32 2147483647, %v5604_v36  ;;  %v5086_v4 = vadd.s32 %v5084_v0, %v5078_v59  ;;  %vm5087_vm4 = vc.u32 %v5085_v10, %v5081_v44  ;;  %v5108_v21 = vadd.s32 %v5106_v52, %v5100_v28 }
 0x5ea   : > { %vm5109_vm3 = vc.u32 %v5107_v5, %v5103_v8  ;;  %v5088_v13 = vsel %vm5087_vm4, 1, %v6360_v29  ;;  %v5080_v41 = vshrl.u32 %v5076_v43, 16  ;;  %v5336_v47 = vshrl.u32 %v5335_v15, 23 }
 0x5eb   : > { %v5608_v38 = vmul.f32 %v5607_v23, %v5605_v1  ;;  %v5110_v24 = vsel %vm5109_vm3, 1, %v6360_v29  ;;  %v5090_v12 = vadd.s32 %v5088_v13, %v5086_v4  ;;  %vm10203_vm5 = vcmp.le.f32.partialorder %v5487_v31, 0.7853982 }
 0x5ec   : > { %v5112_v49 = vadd.s32 %v5110_v24, %v5108_v21  ;;  %v5082_v18 = vshrl.u32 %v5077_v63, 16  ;;  %v5332_v57 = vand.u32 2147483647, %v10154_v26  ;;  %v5104_v27 = vshrl.u32 %v5099_v40, 16 }
 0x5ed   : > { %v5609_v62 = vxor.u32 2147483648, %v5608_v38  ;;  %v5091_v51 = vadd.s32 %v5090_v12, %v5080_v41  ;;  %v6041_v46 = vadd.s32 4294967169, %v5336_v47  ;;  %v5614_v15 = vsel %vm10203_vm5, 0, %v5612_v7 }
 0x5ee   : > { %v5113_v17 = vadd.s32 %v5112_v49, %v5102_v22  ;;  %v5061_v31 = vsel %vm5055_vm14, %v5058_v2, %v5060_v45  ;;  %v10214_v20 = vadd.s32 %v5107_v5, %v5103_v8  ;;  %v5631_v48 = vadd.s32 3, %v5614_v15 }
 0x5ef   : > { %v5610_v60 = vsel %vm5489_vm10, %v5609_v62, %v5608_v38  ;;  %v10219_v3 = vadd.s32 %v5091_v51, %v5082_v18  ;;  %v5342_v54 = vadd.s32 1, %v6041_v46  ;;  %v5115_v2 = vmul.u32 %v10137_v56, %v5061_v31 }
 0x5f0   : > { %v5613_v42 = vsel %vm10203_vm5, %v9950_v11, %v5610_v60  ;;  %v5114_v37 = vadd.s32 %v5113_v17, %v5104_v27  ;;  %v5339_v33 = vand.u32 8388607, %v5332_v57  ;;  %v5632_v36 = vand.u32 3, %v5631_v48 }
 0x5f1   : > { %v5615_v35 = vmul.f32 %v5613_v42, %v5613_v42  ;;  %vm5117_vm6 = vc.u32 %v10219_v3, %v10214_v20  ;;  %vm5343_vm7 = vcmp.gt.s32.totalorder %v5342_v54, 0  ;;  %vm5630_vm14 = vweird.f32 %v9950_v11 }
 0x5f2   : > { %v5118_v40 = vadd.s32 1, %v5114_v37  ;;  %v5344_v43 = vsel %vm5343_vm7, %v5342_v54, 0  ;;  %v5340_v44 = vor.u32 8388608, %v5339_v33  ;;  %vm5633_vm1 = vcmp.lt.s32.totalorder %v5632_v36, 2 }
 0x5f3   : > { %v5616_v7 = vmul.f32 -0.001358992, %v5615_v35  ;;  %v5623_v58 = vmul.f32 -0.00019511016, %v5615_v35  ;;  %v5346_v61 = vand.u32 31, %v5344_v43  ;;  %v10228_v8 = vshrl.u32 %v5344_v43, 5 }
 0x5f4   : > { %v5119_v63 = vsel %vm5117_vm6, %v5118_v40, %v5114_v37  ;;  %vm5634_vm9 = vcmp.eq.s32.totalorder %v5632_v36, 0  ;;  %vm5637_vm10 = vcmp.eq.s32.totalorder %v5632_v36, 2  ;;  %v5116_v36 = vadd.s32 %v10214_v20, %v10219_v3 }
 0x5f5   : > { %v5617_v45 = vadd.f32 0.041655596, %v5616_v7  ;;  %v5624_v19 = vadd.f32 0.008332121, %v5623_v58  ;;  %v5120_v50 = vadd.s32 %v5119_v63, %v5115_v2  ;;  %v10226_v14 = vsub.s32 32, %v5346_v61 }
 0x5f6   : > { %v5349_v23 = vshll.u32 %v10440_v6, %v5346_v61  ;;  %v5352_v22 = vshll.u32 %v10409_v25, %v5346_v61  ;;  %v5355_v24 = vshll.u32 %v10400_v55, %v5346_v61  ;;  %v5358_v41 = vshll.u32 %v10399_v9, %v5346_v61 }
 0x5f7   : > { %v5618_v34 = vmul.f32 %v5617_v45, %v5615_v35  ;;  %v5625_v28 = vmul.f32 %v5624_v19, %v5615_v35  ;;  %v5121_v59 = vadd.s32 536870912, %v5120_v50  ;;  %v5350_v1 = vshrl.u32 %v10409_v25, %v10226_v14 }
 0x5f8   : > { %v5353_v0 = vshrl.u32 %v10400_v55, %v10226_v14  ;;  %v5356_v52 = vshrl.u32 %v10399_v9, %v10226_v14  ;;  %v5359_v4 = vshrl.u32 %v10401_v30, %v10226_v14  ;;  %v5361_v12 = vshll.u32 %v10401_v30, %v5346_v61 }
 0x5f9   : > { %v5619_v10 = vadd.f32 -0.4999988, %v5618_v34  ;;  %v5626_v56 = vadd.f32 -0.16666654, %v5625_v28  ;;  %v10230_v5 = vshrl.u32 %v5121_v59, 30  ;;  %v5362_v49 = vshrl.u32 %v10402_v16, %v10226_v14 }
 0x5fa   : > { %v10248_v18 = vor.u32 %v5350_v1, %v5349_v23  ;;  %v10250_v51 = vor.u32 %v5353_v0, %v5352_v22  ;;  %v5357_v27 = vor.u32 %v5356_v52, %v5355_v24  ;;  %v5360_v17 = vor.u32 %v5359_v4, %v5358_v41 }
 0x5fb   : > { %v5620_v21 = vmul.f32 %v5619_v10, %v5615_v35  ;;  %v5627_v38 = vmul.f32 %v5626_v56, %v5615_v35  ;;  %v5123_v13 = vshll.u32 %v10230_v5, 30  ;;  %v5363_v46 = vor.u32 %v5362_v49, %v5361_v12 }
 0x5fc   : > { %vm5364_vm11 = vcmp.lt.s32.totalorder %v10228_v8, 1  ;;  %v10253_v9 = vshll.u32 %v5340_v44, 8  ;;  %vm5366_vm13 = vcmp.lt.s32.totalorder %v10228_v8, 3  ;;  %vm5367_vm12 = vcmp.lt.s32.totalorder %v10228_v8, 4 }
 0x5fd   : > { %v5621_v47 = vadd.f32 1.0, %v5620_v21  ;;  %v5628_v32 = vadd.f32 1.0, %v5627_v38  ;;  %v5124_v62 = vsub.s32 %v5120_v50, %v5123_v13  ;;  %v5373_v37 = vsel %vm5367_vm12, %v5360_v17, 920167782 }
 0x5fe   : > { %v5374_v35 = vsel %vm5366_vm13, %v5357_v27, %v5373_v37  ;;  %v5376_v48 = vsel %vm5364_vm11, %v10250_v51, %v5357_v27  ;;  %v5377_v40 = vsel %vm5367_vm12, %v5363_v46, 1326507024  ;;  %vm5365_vm15 = vcmp.lt.s32.totalorder %v10228_v8, 2 }
 0x5ff   : > { %v5629_v25 = vmul.f32 %v5628_v32, %v5613_v42  ;;  %v5638_v60 = vxor.u32 2147483648, %v5621_v47  ;;  %vm5125_vm8 = vcmp.lt.s32.totalorder %v5124_v62, 0  ;;  %v5126_v55 = vsub.s32 0, %v5124_v62 }
 0x600   : > { %v5372_v42 = vsel %vm5364_vm11, %v10248_v18, %v10250_v51  ;;  %v5378_v63 = vsel %vm5366_vm13, %v5360_v17, %v5377_v40  ;;  %v5381_v33 = vand.u32 65535, %v10253_v9  ;;  %v5382_v50 = vshrl.u32 %v10253_v9, 16 }
 0x601   : > { %v5635_v30 = vxor.u32 2147483648, %v5629_v25  ;;  %v5127_v16 = vsel %vm5125_vm8, %v5126_v55, %v5124_v62  ;;  %v5639_v15 = vsel %vm5637_vm10, %v5638_v60, %v5629_v25  ;;  %v5375_v43 = vsel %vm5365_vm15, %v5372_v42, %v5374_v35 }
 0x602   : > { %v5128_v31 = vclz %v5127_v16  ;;  %v5379_v61 = vsel %vm5365_vm15, %v5376_v48, %v5378_v63  ;;  %v5405_v11 = vand.u32 65535, %v5375_v43  ;;  %v5406_v45 = vshrl.u32 %v5375_v43, 16 }
 0x603   : > { %v5636_v54 = vsel %vm5634_vm9, %v5621_v47, %v5635_v30  ;;  %v5383_v34 = vand.u32 65535, %v5379_v61  ;;  %v5384_v28 = vshrl.u32 %v5379_v61, 16  ;;  %v5369_v21 = vsel %vm5367_vm12, %v5357_v27, 2102212464 }
 0x604   : > { %v5640_v7 = vsel %vm5633_vm1, %v5636_v54, %v5639_v15  ;;  %v6036_v58 = vadd.s32 4294967294, %v5128_v31  ;;  %v5408_v52 = vmul.u32 %v5406_v45, %v5381_v33  ;;  %v5409_v4 = vmul.u32 %v5405_v11, %v5382_v50 }
 0x605   : > { %v5641_v2 = vsel %vm5630_vm14, nan, %v5640_v7  ;;  %v5386_v56 = vmul.u32 %v5384_v28, %v5381_v33  ;;  %v5387_v1 = vmul.u32 %v5383_v34, %v5382_v50  ;;  %v5385_v38 = vmul.u32 %v5383_v34, %v5381_v33 }
 0x606   : > { %5827 = vst [vmem:[%s6906_s5 + $0xf0] sm:$0xff] %v5641_v2  ;;  %vm6037_vm0 = vcmp.lt.s32.totalorder %v6036_v58, 0  ;;  %v5407_v41 = vmul.u32 %v5405_v11, %v5381_v33  ;;  %v5411_v12 = vshll.u32 %v5408_v52, 16  ;;  %v5388_v49 = vmul.u32 %v5384_v28, %v5382_v50 }
 0x607   : > { %v5131_v19 = vsel %vm6037_vm0, 0, %v6036_v58  ;;  %v5389_v13 = vshll.u32 %v5386_v56, 16  ;;  %v5391_v20 = vshll.u32 %v5387_v1, 16  ;;  %v5413_v17 = vshll.u32 %v5409_v4, 16 }
 0x608   : > { %v5132_v59 = vsub.s32 32, %v5131_v19  ;;  %v5136_v44 = vsub.s32 4294967266, %v5131_v19  ;;  %v5133_v10 = vshll.u32 %v5124_v62, %v5131_v19  ;;  %v5410_v62 = vmul.u32 %v5406_v45, %v5382_v50 }
 0x609   : > { %vm5393_vm2 = vc.u32 %v5385_v38, %v5389_v13  ;;  %v5395_v3 = vadd.s32 %v5389_v13, %v5385_v38  ;;  %vm5415_vm3 = vc.u32 %v5407_v41, %v5411_v12  ;;  %v5417_v25 = vadd.s32 %v5411_v12, %v5407_v41 }
 0x60a   : > { %v5134_v23 = vshrl.u32 %v5116_v36, %v5132_v59  ;;  %v5137_v0 = vadd.s32 127, %v5136_v44  ;;  %v5394_v32 = vsel %vm5393_vm2, 1, %v6360_v29  ;;  %v5416_v30 = vsel %vm5415_vm3, 1, %v6360_v29 }
 0x60b   : > { %v5396_v46 = vadd.s32 %v5394_v32, %v5388_v49  ;;  %vm5397_vm4 = vc.u32 %v5395_v3, %v5391_v20  ;;  %v5390_v16 = vshrl.u32 %v5386_v56, 16  ;;  %v5418_v31 = vadd.s32 %v5416_v30, %v5410_v62 }
 0x60c   : > { %v5135_v22 = vor.u32 %v5134_v23, %v5133_v10  ;;  %v5138_v24 = vshll.u32 %v5137_v0, 23  ;;  %v5398_v55 = vsel %vm5397_vm4, 1, %v6360_v29  ;;  %vm5419_vm5 = vc.u32 %v5417_v25, %v5413_v17 }
 0x60d   : > { %v5400_v15 = vadd.s32 %v5398_v55, %v5396_v46  ;;  %v5348_v37 = vshrl.u32 %v10440_v6, %v10226_v14  ;;  %v5420_v54 = vsel %vm5419_vm5, 1, %v6360_v29  ;;  %v5392_v35 = vshrl.u32 %v5387_v1, 16 }
 0x60e   : > { %v5139_v47 = vor.u32 4788187, %v5138_v24  ;;  %v5142_v60 = vcvt.s32.f32 %v5135_v22  ;;  %v5412_v40 = vshrl.u32 %v5408_v52, 16  ;;  %v5422_v7 = vadd.s32 %v5420_v54, %v5418_v31 }
 0x60f   : > { %v5401_v48 = vadd.s32 %v5400_v15, %v5390_v16  ;;  %v5368_v2 = vsel %vm5364_vm11, %v5348_v37, %v10248_v18  ;;  %v5370_v43 = vsel %vm5366_vm13, %v10250_v51, %v5369_v21  ;;  %vm5024_vm6 = vcmp.lt.s32.totalorder %v10052_v53, 0 }
 0x610   : > { %v5140_v27 = vand.u32 2147483647, %v5139_v47  ;;  %v5414_v33 = vshrl.u32 %v5409_v4, 16  ;;  %v5423_v6 = vadd.s32 %v5422_v7, %v5412_v40  ;;  %vm10301_vm7 = vcmp.le.f32.partialorder %v5022_v39, 0.7853982 }
 0x611   : > { %v5402_v63 = vadd.s32 %v5401_v48, %v5392_v35  ;;  %v5421_v61 = vadd.s32 %v5417_v25, %v5413_v17  ;;  %v5146_v18 = vsub.s32 4, %v10230_v5  ;;  %v5371_v11 = vsel %vm5365_vm15, %v5368_v2, %v5370_v43 }
 0x612   : > { %v5143_v42 = vmul.f32 %v5142_v60, %v5140_v27  ;;  %v5424_v45 = vadd.s32 %v5423_v6, %v5414_v33  ;;  %v5425_v28 = vmul.u32 %v10253_v9, %v5371_v11  ;;  %vm5165_vm13 = vweird.f32 %v10052_v53 }
 0x613   : > { %vm5427_vm1 = vc.u32 %v5402_v63, %v5421_v61  ;;  %v5147_v36 = vsel %vm5024_vm6, %v5146_v18, %v10230_v5  ;;  %v5426_v30 = vadd.s32 %v5421_v61, %v5402_v63  ;;  %vm5334_vm14 = vcmp.lt.s32.totalorder %v10154_v26, 0 }
 0x614   : > { %v5144_v58 = vxor.u32 2147483648, %v5143_v42  ;;  %v5428_v39 = vadd.s32 1, %v5424_v45  ;;  %v5149_v8 = vsel %vm10301_vm7, 0, %v5147_v36  ;;  %vm5333_vm15 = vcmp.le.f32.partialorder %v5332_v57, 0.7853982 }
 0x615   : > { %v5166_v38 = vadd.s32 3, %v5149_v8  ;;  %vm5475_vm3 = vweird.f32 %v10154_v26 }
 0x616   : > { %v5145_v14 = vsel %vm5024_vm6, %v5144_v58, %v5143_v42  ;;  %v5429_v59 = vsel %vm5427_vm1, %v5428_v39, %v5424_v45 }
 0x617   : > { %v5148_v51 = vsel %vm10301_vm7, %v10052_v53, %v5145_v14  ;;  %v5430_v56 = vadd.s32 %v5429_v59, %v5425_v28  ;;  %v5167_v12 = vand.u32 3, %v5166_v38 }
 0x618   : > { %v5150_v19 = vmul.f32 %v5148_v51, %v5148_v51 }
 0x619   : > { %v5431_v0 = vadd.s32 536870912, %v5430_v56  ;;  %vm5169_vm9 = vcmp.eq.s32.totalorder %v5167_v12, 0  ;;  %vm5172_vm10 = vcmp.eq.s32.totalorder %v5167_v12, 2  ;;  %vm5168_vm11 = vcmp.lt.s32.totalorder %v5167_v12, 2 }
 0x61a   : > { %v5151_v50 = vmul.f32 -0.001358992, %v5150_v19  ;;  %v5158_v34 = vmul.f32 -0.00019511016, %v5150_v19 }
 0x61b   : > { %v5432_v21 = vshrl.u32 %v5431_v0, 30 }
 0x61c   : > { %v5152_v44 = vadd.f32 0.041655596, %v5151_v50  ;;  %v5159_v10 = vadd.f32 0.008332121, %v5158_v34 }
 0x61d   : > { %v5433_v22 = vshll.u32 %v5432_v21, 30  ;;  %v5456_v43 = vsub.s32 4, %v5432_v21 }
 0x61e   : > { %v5153_v1 = vmul.f32 %v5152_v44, %v5150_v19  ;;  %v5160_v23 = vmul.f32 %v5159_v10, %v5150_v19 }
 0x61f   : > { %v5434_v5 = vsub.s32 %v5430_v56, %v5433_v22  ;;  %v5457_v14 = vsel %vm5334_vm14, %v5456_v43, %v5432_v21 }
 0x620   : > { %v5154_v52 = vadd.f32 -0.4999988, %v5153_v1  ;;  %v5161_v4 = vadd.f32 -0.16666654, %v5160_v23 }
 0x621   : > { %vm5435_vm8 = vcmp.lt.s32.totalorder %v5434_v5, 0  ;;  %v5436_v3 = vsub.s32 0, %v5434_v5 }
 0x622   : > { %v5155_v13 = vmul.f32 %v5154_v52, %v5150_v19  ;;  %v5162_v9 = vmul.f32 %v5161_v4, %v5150_v19 }
 0x623   : > { %v5437_v32 = vsel %vm5435_vm8, %v5436_v3, %v5434_v5 }
 0x624   : > { %v5156_v24 = vadd.f32 1.0, %v5155_v13  ;;  %v5163_v41 = vadd.f32 1.0, %v5162_v9  ;;  %v5438_v62 = vclz %v5437_v32 }
 0x626   : > { %v5164_v49 = vmul.f32 %v5163_v41, %v5148_v51  ;;  %v5173_v20 = vxor.u32 2147483648, %v5156_v24  ;;  %v6042_v27 = vadd.s32 4294967294, %v5438_v62  ;;  %v5459_v51 = vsel %vm5333_vm15, 0, %v5457_v14 }
 0x627   : > { %v5476_v50 = vadd.s32 3, %v5459_v51 }
 0x628   : > { %v5170_v47 = vxor.u32 2147483648, %v5164_v49  ;;  %v5174_v46 = vsel %vm5172_vm10, %v5173_v20, %v5164_v49  ;;  %vm6043_vm12 = vcmp.lt.s32.totalorder %v6042_v27, 0 }
 0x629   : > { %v5441_v55 = vsel %vm6043_vm12, 0, %v6042_v27  ;;  %v5477_v59 = vand.u32 3, %v5476_v50 }
 0x62a   : > { %v5171_v17 = vsel %vm5169_vm9, %v5156_v24, %v5170_v47  ;;  %v5442_v16 = vsub.s32 32, %v5441_v55  ;;  %v5446_v15 = vsub.s32 4294967266, %v5441_v55  ;;  %v5443_v31 = vshll.u32 %v5434_v5, %v5441_v55 }
 0x62b   : > { %v5175_v25 = vsel %vm5168_vm11, %v5171_v17, %v5174_v46  ;;  %vm5479_vm0 = vcmp.eq.s32.totalorder %v5477_v59, 0  ;;  %vm5482_vm2 = vcmp.eq.s32.totalorder %v5477_v59, 2  ;;  %vm5478_vm4 = vcmp.lt.s32.totalorder %v5477_v59, 2 }
 0x62c   : > { %v5176_v60 = vsel %vm5165_vm13, nan, %v5175_v25  ;;  %v5444_v42 = vshrl.u32 %v5426_v30, %v5442_v16  ;;  %v5447_v37 = vadd.s32 127, %v5446_v15 }
 0x62d   : > { %5824 = vst [vmem:[%s6906_s5 + $0xd8] sm:$0xff] %v5176_v60 }
 0x62e   : > { %v5445_v54 = vor.u32 %v5444_v42, %v5443_v31  ;;  %v5448_v35 = vshll.u32 %v5447_v37, 23 }
 0x630   : > { %v5449_v48 = vor.u32 4788187, %v5448_v35  ;;  %v5452_v7 = vcvt.s32.f32 %v5445_v54 }
 0x632   : > { %v5450_v40 = vand.u32 2147483647, %v5449_v48 }
 0x634   : > { %v5453_v58 = vmul.f32 %v5452_v7, %v5450_v40 }
 0x636   : > { %v5454_v2 = vxor.u32 2147483648, %v5453_v58 }
 0x638   : > { %v5455_v53 = vsel %vm5334_vm14, %v5454_v2, %v5453_v58 }
 0x639   : > { %v5458_v63 = vsel %vm5333_vm15, %v10154_v26, %v5455_v53 }
 0x63a   : > { %v5460_v33 = vmul.f32 %v5458_v63, %v5458_v63 }
 0x63c   : > { %v5461_v6 = vmul.f32 -0.001358992, %v5460_v33  ;;  %v5468_v29 = vmul.f32 -0.00019511016, %v5460_v33 }
 0x63e   : > { %v5462_v61 = vadd.f32 0.041655596, %v5461_v6  ;;  %v5469_v18 = vadd.f32 0.008332121, %v5468_v29 }
 0x640   : > { %v5463_v11 = vmul.f32 %v5462_v61, %v5460_v33  ;;  %v5470_v45 = vmul.f32 %v5469_v18, %v5460_v33 }
 0x642   : > { %v5464_v19 = vadd.f32 -0.4999988, %v5463_v11  ;;  %v5471_v39 = vadd.f32 -0.16666654, %v5470_v45 }
 0x644   : > { %v5465_v57 = vmul.f32 %v5464_v19, %v5460_v33  ;;  %v5472_v34 = vmul.f32 %v5471_v39, %v5460_v33 }
 0x646   : > { %v5466_v28 = vadd.f32 1.0, %v5465_v57  ;;  %v5473_v36 = vadd.f32 1.0, %v5472_v34 }
 0x648   : > { %v5474_v44 = vmul.f32 %v5473_v36, %v5458_v63  ;;  %v5483_v10 = vxor.u32 2147483648, %v5466_v28 }
 0x64a   : > { %v5480_v56 = vxor.u32 2147483648, %v5474_v44  ;;  %v5484_v1 = vsel %vm5482_vm2, %v5483_v10, %v5474_v44 }
 0x64c   : > { %v5481_v8 = vsel %vm5479_vm0, %v5466_v28, %v5480_v56 }
 0x64d   : > { %v5485_v23 = vsel %vm5478_vm4, %v5481_v8, %v5484_v1 }
 0x64e   : > { %v5486_v0 = vsel %vm5475_vm3, nan, %v5485_v23 }
 0x64f   : > { %5826 = vst [vmem:[%s6906_s5 + $0xe8] sm:$0xff] %v5486_v0 }
 0x650   : > { %6305 = shalt.err (!%p6302_p10)
}
 0x651   : > { %s6361_s20 = smov 128   ;;  %s6362_s5 = smov 8  }
 0x652   : > { %6071 = dma.vmem_to_hbm [thread:$0]  (%p6460_p3), %s5843_s24, 4096, %s5845_s23, %s5830_s19, %s6361_s20, %s6361_s20, %s6362_s5  }
 0x653 PF: > { %s5859_s26 = sand.u32 1, %s6336_s15   ;;  %p10471_p12 = scmp.ge.s32.totalorder %s6348_s18, 2 }
 0x654   : > { %s5860_s6 = scalar_lea.sflag [#allocation4], %s5859_s26 }
 0x655   : > { %p6085_p13 = pnand %p10471_p12, %p6423_p6 }
 0x657   : > { %p6086_p0 = pneg %p6085_p13 }
 0x659   : > { %6331 = dma.done.wait (%p6086_p0), %s5860_s6, 4096  }
 0x65a   : > { %6333 = vsyncadd (%p6086_p0), %s5860_s6, 4294963200  ;;  %p18_p5 = scmp.ge.s32.totalorder %s6450_s10, 4   ;;  %s10472_s15 = smov %s6340_s16 }
 0x65b   : > { %s10473_s16 = smov %s6344_s17  ;;  %s10474_s17 = smov %s6466_s14 }
 0x65c   : > { %s10475_s18 = smov %s6450_s10  ;;  %20 = sbr.rel (!%p18_p5) target bundleno = 6 (0x6), region = 89 }
 0x661   :  { %5866 = vsyncpa [#allocation3], 1 }
 0x662   :  { %5868 = vsyncpa [#allocation3 + $0x1], 1 }
 0x663   :  { %5869 = vsyncpa [#allocation6], 1 }
 0x664   :  { %5870 = vsyncpa [#allocation4], 1 }
 0x665   :  { %5872 = vsyncpa [#allocation4 + $0x1], 1 }

</bundles_post_ra>
